<compile_context>
chip_gen: v5e
topology: v5e:2x2
jax: 0.10.0
libtpu: 0.0.40
codegen_flags: <defaults>
</compile_context>

<pallas_src>
import jax
import jax.numpy as jnp
import numpy as np
from jax.experimental import pallas as pl
from jax.experimental.pallas import tpu as pltpu

# ---- hyperparameters (module globals in the PyTorch code) ----
POOL_K = 2          # pool_kernel
SMOOTH_K = 3        # smooth_kernel
SMOOTH_PAD = 1      # smooth_padding
KK = POOL_K * POOL_K
CONV_CH = 64
assert 2 * SMOOTH_PAD == SMOOTH_K - 1


# =====================  fused conv stack kernel  =====================

def _make_conv_kernel(H, W, C):
    HW = H * W

    def kernel(xp_ref, w1_ref, b1_ref, w2_ref, b2_ref, out_ref, h1p_ref):
        # ---- conv1: Cin=1, K=9 -> VPU shifted broadcast-FMAs (MXU would be ~idle at K=9) ----
        h1 = jnp.zeros((H, W, C), jnp.float32)
        for t in range(9):
            dy, dx = t // 3, t % 3
            xp_t = xp_ref[0, dy:dy + H, dx:dx + W, :]          # (H, W, 1)
            h1 = h1 + xp_t * w1_ref[t]                         # (H,W,1) * (1,C) -> (H,W,C)
        h1 = jnp.maximum(h1 + b1_ref[...], 0.0)

        # ---- zero-padded h1 kept in VMEM scratch (no HBM im2col / h1 round trip) ----
        h1p_ref[...] = jnp.zeros((H + 2, W + 2, C), jnp.float32)
        h1p_ref[1:1 + H, 1:1 + W, :] = h1

        # ---- conv2: fold im2col into 9 shifted bf16 MXU matmuls, f32 accumulation ----
        acc = jnp.zeros((HW, C), jnp.float32)
        for t in range(9):
            dy, dx = t // 3, t % 3
            a_t = h1p_ref[dy:dy + H, dx:dx + W, :].reshape(HW, C).astype(jnp.bfloat16)
            acc = acc + jnp.dot(a_t, w2_ref[t], preferred_element_type=jnp.float32)
        out_ref[0] = jnp.maximum(acc + b2_ref[...], 0.0)

    return kernel


def conv_stack(x_pad, w1r, b1r, w2r, b2r, H, W):
    """x_pad: (B, H+2, W+2, 1) f32  ->  h2: (B, H*W, C) f32."""
    B = x_pad.shape[0]
    C = CONV_CH
    return pl.pallas_call(
        _make_conv_kernel(H, W, C),
        out_shape=jax.ShapeDtypeStruct((B, H * W, C), jnp.float32),
        grid=(B,),
        in_specs=[
            pl.BlockSpec((1, H + 2, W + 2, 1), lambda b: (b, 0, 0, 0)),
            pl.BlockSpec((9, 1, C), lambda b: (0, 0, 0)),
            pl.BlockSpec((1, C), lambda b: (0, 0)),
            pl.BlockSpec((9, C, C), lambda b: (0, 0, 0)),
            pl.BlockSpec((1, C), lambda b: (0, 0)),
        ],
        out_specs=pl.BlockSpec((1, H * W, C), lambda b: (b, 0, 0)),
        scratch_shapes=[pltpu.VMEM((H + 2, W + 2, C), jnp.float32)],
        compiler_params=pltpu.CompilerParams(dimension_semantics=("parallel",)),
    )(x_pad, w1r, b1r, w2r, b2r)


# =====================  fused regularized-pooling kernel  =====================

def _make_pool_kernel(Hp, Wp, C):
    p = SMOOTH_PAD
    half = (POOL_K - 1) / 2.0
    Hpp, Wpp = Hp + 2 * p, Wp + 2 * p

    def kernel(win_ref, out_ref, dyp_ref, dxp_ref):
        taps = [win_ref[0, k] for k in range(KK)]              # each (Hp, Wp, C)

        # max-pool over the window
        mx = taps[0]
        for t in taps[1:]:
            mx = jnp.maximum(mx, t)

        # argmax displacement ("first max wins") + "dontcare" (all-zero window -> 0)
        dyv = jnp.zeros((Hp, Wp, C), jnp.float32)
        dxv = jnp.zeros((Hp, Wp, C), jnp.float32)
        for k in range(KK - 1, -1, -1):
            ky, kx = k // POOL_K, k % POOL_K
            hit = taps[k] == mx
            dyv = jnp.where(hit, float(ky) - half, dyv)
            dxv = jnp.where(hit, float(kx) - half, dxv)
        valid = mx > 0.0
        dyv = jnp.where(valid, dyv, 0.0)
        dxv = jnp.where(valid, dxv, 0.0)

        # zero-padded displacement maps in VMEM scratch (fused; no HBM round trip / XLA pads)
        dyp_ref[...] = jnp.zeros((Hpp, Wpp, C), jnp.float32)
        dxp_ref[...] = jnp.zeros((Hpp, Wpp, C), jnp.float32)
        dyp_ref[p:p + Hp, p:p + Wp, :] = dyv
        dxp_ref[p:p + Hp, p:p + Wp, :] = dxv

        # separable 3x3 box smoothing: W pass then H pass
        ty = dyp_ref[:, 0:Wp, :]
        tx = dxp_ref[:, 0:Wp, :]
        for a in range(1, SMOOTH_K):
            ty = ty + dyp_ref[:, a:a + Wp, :]
            tx = tx + dxp_ref[:, a:a + Wp, :]
        sy = ty[0:Hp]
        sx = tx[0:Hp]
        for a in range(1, SMOOTH_K):
            sy = sy + ty[a:a + Hp]
            sx = sx + tx[a:a + Hp]

        inv = 1.0 / float(SMOOTH_K * SMOOTH_K)
        # TODO(synk): round-half-up here; torch.round (half-to-even) could differ on exact .5 ties.
        offy = jnp.clip(jnp.floor(sy * inv + half + 0.5), 0.0, float(POOL_K - 1))
        offx = jnp.clip(jnp.floor(sx * inv + half + 0.5), 0.0, float(POOL_K - 1))

        # re-select the pooled value at the regularized offset (one-hot select, no gather)
        out = jnp.zeros((Hp, Wp, C), jnp.float32)
        for k in range(KK):
            ky, kx = k // POOL_K, k % POOL_K
            out = out + jnp.where((offy == float(ky)) & (offx == float(kx)), taps[k], 0.0)
        out_ref[0] = out

    return kernel


def regularized_pool(win):
    """win: (B, KK, Hp, Wp, C) f32  ->  pooled: (B, Hp, Wp, C) f32."""
    B, KKd, Hp, Wp, C = win.shape
    assert KKd == KK
    return pl.pallas_call(
        _make_pool_kernel(Hp, Wp, C),
        out_shape=jax.ShapeDtypeStruct((B, Hp, Wp, C), jnp.float32),
        grid=(B,),
        in_specs=[pl.BlockSpec((1, KK, Hp, Wp, C), lambda b: (b, 0, 0, 0, 0))],
        out_specs=pl.BlockSpec((1, Hp, Wp, C), lambda b: (b, 0, 0, 0)),
        scratch_shapes=[
            pltpu.VMEM((Hp + 2 * SMOOTH_PAD, Wp + 2 * SMOOTH_PAD, C), jnp.float32),
            pltpu.VMEM((Hp + 2 * SMOOTH_PAD, Wp + 2 * SMOOTH_PAD, C), jnp.float32),
        ],
        compiler_params=pltpu.CompilerParams(dimension_semantics=("parallel",)),
    )(win)


# =====================  forward (JAX glue, layout plumbing only)  =====================

def forward(x_nchw, w1, b1, w2, b2):
    B, Cin, H, W = x_nchw.shape
    assert Cin == 1
    assert H % POOL_K == 0 and W % POOL_K == 0, "pooling path assumes H,W multiples of pool_kernel"
    C = CONV_CH
    Hp, Wp = H // POOL_K, W // POOL_K

    # NCHW -> zero-padded NHWC single-channel input for the fused conv kernel
    x_nhwc = jnp.transpose(x_nchw, (0, 2, 3, 1))
    x_pad = jnp.pad(x_nhwc, ((0, 0), (1, 1), (1, 1), (0, 0)))

    # per-tap weight slabs, tap index t = dy*3 + dx; conv2 weights in bf16 (MXU-native)
    w1r = jnp.transpose(w1, (2, 3, 1, 0)).reshape(9, 1, C).astype(jnp.float32)
    w2r = jnp.transpose(w2, (2, 3, 1, 0)).reshape(9, C, C).astype(jnp.bfloat16)
    b1r = b1.reshape(1, C).astype(jnp.float32)
    b2r = b2.reshape(1, C).astype(jnp.float32)

    h2 = conv_stack(x_pad, w1r, b1r, w2r, b2r, H, W).reshape(B, H, W, C)

    # pooling window taps (B, KK, Hp, Wp, C), kk = ky*POOL_K + kx; channel stays the lane dim
    win = jnp.transpose(h2.reshape(B, Hp, POOL_K, Wp, POOL_K, C),
                        (0, 2, 4, 1, 3, 5)).reshape(B, KK, Hp, Wp, C)

    pooled = regularized_pool(win)                              # (B, Hp, Wp, C)
    # Fold(kernel_size=(1,1)) == layout back to (B, C, output_width, output_width)
    return jnp.transpose(pooled, (0, 3, 1, 2)), h2


# =====================  pure-JAX references (for validation)  =====================

def ref_conv(x_nchw, w1, b1, w2, b2):
    dn = ("NCHW", "OIHW", "NCHW")
    h = jax.lax.conv_general_dilated(x_nchw, w1, (1, 1), "SAME", dimension_numbers=dn,
                                     precision=jax.lax.Precision.HIGHEST)
    h = jnp.maximum(h + b1[None, :, None, None], 0.0)
    # mirror the kernel's bf16 quantization of the conv2 operands (f32 accumulation)
    h = jax.lax.conv_general_dilated(h.astype(jnp.bfloat16), w2.astype(jnp.bfloat16),
                                     (1, 1), "SAME", dimension_numbers=dn,
                                     preferred_element_type=jnp.float32)
    return jnp.maximum(h + b2[None, :, None, None], 0.0)


def ref_postpool(h2_bhwc):
    B, H, W, C = h2_bhwc.shape
    Hp, Wp = H // POOL_K, W // POOL_K
    win = jnp.transpose(h2_bhwc.reshape(B, Hp, POOL_K, Wp, POOL_K, C),
                        (0, 2, 4, 1, 3, 5)).reshape(B, KK, Hp, Wp, C)
    mx = jnp.max(win, axis=1)
    am = jnp.argmax(win, axis=1)
    half = (POOL_K - 1) / 2.0
    valid = mx > 0.0
    dy = jnp.where(valid, (am // POOL_K).astype(jnp.float32) - half, 0.0)
    dx = jnp.where(valid, (am % POOL_K).astype(jnp.float32) - half, 0.0)
    p = SMOOTH_PAD
    dy_p = jnp.pad(dy, ((0, 0), (p, p), (p, p), (0, 0)))
    dx_p = jnp.pad(dx, ((0, 0), (p, p), (p, p), (0, 0)))
    sy = sum(dy_p[:, a:a + Hp, b:b + Wp, :] for a in range(SMOOTH_K) for b in range(SMOOTH_K))
    sx = sum(dx_p[:, a:a + Hp, b:b + Wp, :] for a in range(SMOOTH_K) for b in range(SMOOTH_K))
    inv = 1.0 / float(SMOOTH_K * SMOOTH_K)
    offy = jnp.clip(jnp.floor(sy * inv + half + 0.5), 0, POOL_K - 1).astype(jnp.int32)
    offx = jnp.clip(jnp.floor(sx * inv + half + 0.5), 0, POOL_K - 1).astype(jnp.int32)
    idx = offy * POOL_K + offx
    sel = jnp.take_along_axis(win, idx[:, None], axis=1)[:, 0]
    return jnp.transpose(sel, (0, 3, 1, 2))


# =====================  main  =====================

if __name__ == "__main__":
    key = jax.random.PRNGKey(0)
    k1, k2, k3, k4, k5 = jax.random.split(key, 5)

    # deterministic synthetic parameters (shapes from the module's __init__)
    w1 = jax.random.normal(k1, (CONV_CH, 1, 3, 3), jnp.float32) * (1.0 / 3.0)
    b1 = jax.random.normal(k2, (CONV_CH,), jnp.float32) * 0.1
    w2 = jax.random.normal(k3, (CONV_CH, CONV_CH, 3, 3), jnp.float32) * (1.0 / np.sqrt(9.0 * CONV_CH))
    b2 = jax.random.normal(k4, (CONV_CH,), jnp.float32) * 0.1

    x = jax.random.normal(k5, (2, 1, 16, 16), jnp.float32)   # NCHW, 1 input channel

    out, h2 = jax.jit(forward)(x, w1, b1, w2, b2)
    out = jax.block_until_ready(out)

    assert out.shape == (2, CONV_CH, 16 // POOL_K, 16 // POOL_K)

    # validate conv stack (tolerance covers bf16 operands + accumulation-order differences)
    h2_nchw = jnp.transpose(h2, (0, 3, 1, 2))
    np.testing.assert_allclose(np.asarray(h2_nchw), np.asarray(ref_conv(x, w1, b1, w2, b2)),
                               rtol=2e-2, atol=2e-2)
    # validate pooling/regularization path exactly (same activations in)
    np.testing.assert_allclose(np.asarray(out), np.asarray(ref_postpool(h2)), atol=1e-6)

    print("KERNEL_OK")
</pallas_src>

<mosaic_0001>
module attributes {stable_mosaic.version = 11 : i64} {
  func.func @kernel(%arg0: i32, %arg1: memref<1x4x8x8x64xf32, #tpu.memory_space<vmem>>, %arg2: memref<1x8x8x64xf32, #tpu.memory_space<vmem>>, %arg3: memref<10x10x64xf32, #tpu.memory_space<vmem>>, %arg4: memref<10x10x64xf32, #tpu.memory_space<vmem>>) attributes {dimension_semantics = [#tpu.dimension_semantics<parallel>], iteration_bounds = array<i64: 2>, scalar_prefetch = 0 : i64, scratch_operands = 2 : i64, tpu.core_type = #tpu.core_type<tc>, window_params = [{transform_indices = @transform_0, window_bounds = array<i64: 1, 4, 8, 8, 64>}, {transform_indices = @transform_1, window_bounds = array<i64: 1, 8, 8, 64>}]} {
    %c0 = arith.constant 0 : index
    %c0_0 = arith.constant 0 : index
    %c0_1 = arith.constant 0 : index
    %c0_2 = arith.constant 0 : index
    %c0_3 = arith.constant 0 : index
    %0 = vector.load %arg1[%c0, %c0_0, %c0_1, %c0_2, %c0_3] : memref<1x4x8x8x64xf32, #tpu.memory_space<vmem>>, vector<1x1x8x8x64xf32>
    %1 = vector.shape_cast %0 : vector<1x1x8x8x64xf32> to vector<8x8x64xf32>
    %c0_4 = arith.constant 0 : index
    %c1 = arith.constant 1 : index
    %c0_5 = arith.constant 0 : index
    %c0_6 = arith.constant 0 : index
    %c0_7 = arith.constant 0 : index
    %2 = vector.load %arg1[%c0_4, %c1, %c0_5, %c0_6, %c0_7] : memref<1x4x8x8x64xf32, #tpu.memory_space<vmem>>, vector<1x1x8x8x64xf32>
    %3 = vector.shape_cast %2 : vector<1x1x8x8x64xf32> to vector<8x8x64xf32>
    %c0_8 = arith.constant 0 : index
    %c2 = arith.constant 2 : index
    %c0_9 = arith.constant 0 : index
    %c0_10 = arith.constant 0 : index
    %c0_11 = arith.constant 0 : index
    %4 = vector.load %arg1[%c0_8, %c2, %c0_9, %c0_10, %c0_11] : memref<1x4x8x8x64xf32, #tpu.memory_space<vmem>>, vector<1x1x8x8x64xf32>
    %5 = vector.shape_cast %4 : vector<1x1x8x8x64xf32> to vector<8x8x64xf32>
    %c0_12 = arith.constant 0 : index
    %c3 = arith.constant 3 : index
    %c0_13 = arith.constant 0 : index
    %c0_14 = arith.constant 0 : index
    %c0_15 = arith.constant 0 : index
    %6 = vector.load %arg1[%c0_12, %c3, %c0_13, %c0_14, %c0_15] : memref<1x4x8x8x64xf32, #tpu.memory_space<vmem>>, vector<1x1x8x8x64xf32>
    %7 = vector.shape_cast %6 : vector<1x1x8x8x64xf32> to vector<8x8x64xf32>
    %8 = arith.maximumf %1, %3 : vector<8x8x64xf32>
    %9 = arith.maximumf %8, %5 : vector<8x8x64xf32>
    %10 = arith.maximumf %9, %7 : vector<8x8x64xf32>
    %cst = arith.constant 0.000000e+00 : f32
    %11 = vector.broadcast %cst : f32 to vector<8x8x64xf32>
    %cst_16 = arith.constant 0.000000e+00 : f32
    %12 = vector.broadcast %cst_16 : f32 to vector<8x8x64xf32>
    %13 = arith.cmpf oeq, %7, %10 : vector<8x8x64xf32>
    %cst_17 = arith.constant 5.000000e-01 : f32
    %14 = vector.broadcast %cst_17 : f32 to vector<8x8x64xf32>
    %15 = arith.select %13, %14, %11 : vector<8x8x64xi1>, vector<8x8x64xf32>
    %cst_18 = arith.constant 5.000000e-01 : f32
    %16 = vector.broadcast %cst_18 : f32 to vector<8x8x64xf32>
    %17 = arith.select %13, %16, %12 : vector<8x8x64xi1>, vector<8x8x64xf32>
    %18 = arith.cmpf oeq, %5, %10 : vector<8x8x64xf32>
    %cst_19 = arith.constant 5.000000e-01 : f32
    %19 = vector.broadcast %cst_19 : f32 to vector<8x8x64xf32>
    %20 = arith.select %18, %19, %15 : vector<8x8x64xi1>, vector<8x8x64xf32>
    %cst_20 = arith.constant -5.000000e-01 : f32
    %21 = vector.broadcast %cst_20 : f32 to vector<8x8x64xf32>
    %22 = arith.select %18, %21, %17 : vector<8x8x64xi1>, vector<8x8x64xf32>
    %23 = arith.cmpf oeq, %3, %10 : vector<8x8x64xf32>
    %cst_21 = arith.constant -5.000000e-01 : f32
    %24 = vector.broadcast %cst_21 : f32 to vector<8x8x64xf32>
    %25 = arith.select %23, %24, %20 : vector<8x8x64xi1>, vector<8x8x64xf32>
    %cst_22 = arith.constant 5.000000e-01 : f32
    %26 = vector.broadcast %cst_22 : f32 to vector<8x8x64xf32>
    %27 = arith.select %23, %26, %22 : vector<8x8x64xi1>, vector<8x8x64xf32>
    %28 = arith.cmpf oeq, %1, %10 : vector<8x8x64xf32>
    %cst_23 = arith.constant -5.000000e-01 : f32
    %29 = vector.broadcast %cst_23 : f32 to vector<8x8x64xf32>
    %30 = arith.select %28, %29, %25 : vector<8x8x64xi1>, vector<8x8x64xf32>
    %cst_24 = arith.constant -5.000000e-01 : f32
    %31 = vector.broadcast %cst_24 : f32 to vector<8x8x64xf32>
    %32 = arith.select %28, %31, %27 : vector<8x8x64xi1>, vector<8x8x64xf32>
    %cst_25 = arith.constant 0.000000e+00 : f32
    %33 = vector.broadcast %cst_25 : f32 to vector<8x8x64xf32>
    %34 = arith.cmpf ogt, %10, %33 : vector<8x8x64xf32>
    %cst_26 = arith.constant 0.000000e+00 : f32
    %35 = vector.broadcast %cst_26 : f32 to vector<8x8x64xf32>
    %36 = arith.select %34, %30, %35 : vector<8x8x64xi1>, vector<8x8x64xf32>
    %cst_27 = arith.constant 0.000000e+00 : f32
    %37 = vector.broadcast %cst_27 : f32 to vector<8x8x64xf32>
    %38 = arith.select %34, %32, %37 : vector<8x8x64xi1>, vector<8x8x64xf32>
    %cst_28 = arith.constant 0.000000e+00 : f32
    %39 = vector.broadcast %cst_28 : f32 to vector<10x10x64xf32>
    %c0_29 = arith.constant 0 : index
    %c0_30 = arith.constant 0 : index
    %c0_31 = arith.constant 0 : index
    %40 = vector.load %arg3[%c0_29, %c0_30, %c0_31] : memref<10x10x64xf32, #tpu.memory_space<vmem>>, vector<10x10x64xf32>
    tpu.vector_store %arg3[%c0_29, %c0_30, %c0_31], %39 {strides = array<i32>} : memref<10x10x64xf32, #tpu.memory_space<vmem>>, vector<10x10x64xf32>,
    %cst_32 = arith.constant 0.000000e+00 : f32
    %41 = vector.broadcast %cst_32 : f32 to vector<10x10x64xf32>
    %c0_33 = arith.constant 0 : index
    %c0_34 = arith.constant 0 : index
    %c0_35 = arith.constant 0 : index
    %42 = vector.load %arg4[%c0_33, %c0_34, %c0_35] : memref<10x10x64xf32, #tpu.memory_space<vmem>>, vector<10x10x64xf32>
    tpu.vector_store %arg4[%c0_33, %c0_34, %c0_35], %41 {strides = array<i32>} : memref<10x10x64xf32, #tpu.memory_space<vmem>>, vector<10x10x64xf32>,
    %c1_36 = arith.constant 1 : index
    %c1_37 = arith.constant 1 : index
    %c0_38 = arith.constant 0 : index
    %43 = vector.load %arg3[%c1_36, %c1_37, %c0_38] : memref<10x10x64xf32, #tpu.memory_space<vmem>>, vector<8x8x64xf32>
    tpu.vector_store %arg3[%c1_36, %c1_37, %c0_38], %36 {strides = array<i32>} : memref<10x10x64xf32, #tpu.memory_space<vmem>>, vector<8x8x64xf32>,
    %c1_39 = arith.constant 1 : index
    %c1_40 = arith.constant 1 : index
    %c0_41 = arith.constant 0 : index
    %44 = vector.load %arg4[%c1_39, %c1_40, %c0_41] : memref<10x10x64xf32, #tpu.memory_space<vmem>>, vector<8x8x64xf32>
    tpu.vector_store %arg4[%c1_39, %c1_40, %c0_41], %38 {strides = array<i32>} : memref<10x10x64xf32, #tpu.memory_space<vmem>>, vector<8x8x64xf32>,
    %c0_42 = arith.constant 0 : index
    %c0_43 = arith.constant 0 : index
    %c0_44 = arith.constant 0 : index
    %45 = vector.load %arg3[%c0_42, %c0_43, %c0_44] : memref<10x10x64xf32, #tpu.memory_space<vmem>>, vector<10x8x64xf32>
    %c0_45 = arith.constant 0 : index
    %c0_46 = arith.constant 0 : index
    %c0_47 = arith.constant 0 : index
    %46 = vector.load %arg4[%c0_45, %c0_46, %c0_47] : memref<10x10x64xf32, #tpu.memory_space<vmem>>, vector<10x8x64xf32>
    %c0_48 = arith.constant 0 : index
    %c1_49 = arith.constant 1 : index
    %c0_50 = arith.constant 0 : index
    %47 = vector.load %arg3[%c0_48, %c1_49, %c0_50] : memref<10x10x64xf32, #tpu.memory_space<vmem>>, vector<10x8x64xf32>
    %48 = arith.addf %45, %47 : vector<10x8x64xf32>
    %c0_51 = arith.constant 0 : index
    %c1_52 = arith.constant 1 : index
    %c0_53 = arith.constant 0 : index
    %49 = vector.load %arg4[%c0_51, %c1_52, %c0_53] : memref<10x10x64xf32, #tpu.memory_space<vmem>>, vector<10x8x64xf32>
    %50 = arith.addf %46, %49 : vector<10x8x64xf32>
    %c0_54 = arith.constant 0 : index
    %c2_55 = arith.constant 2 : index
    %c0_56 = arith.constant 0 : index
    %51 = vector.load %arg3[%c0_54, %c2_55, %c0_56] : memref<10x10x64xf32, #tpu.memory_space<vmem>>, vector<10x8x64xf32>
    %52 = arith.addf %48, %51 : vector<10x8x64xf32>
    %c0_57 = arith.constant 0 : index
    %c2_58 = arith.constant 2 : index
    %c0_59 = arith.constant 0 : index
    %53 = vector.load %arg4[%c0_57, %c2_58, %c0_59] : memref<10x10x64xf32, #tpu.memory_space<vmem>>, vector<10x8x64xf32>
    %54 = arith.addf %50, %53 : vector<10x8x64xf32>
    %55 = vector.extract_strided_slice %52 {offsets = [0, 0, 0], sizes = [8, 8, 64], strides = [1, 1, 1]} : vector<10x8x64xf32> to vector<8x8x64xf32>
    %56 = vector.extract_strided_slice %54 {offsets = [0, 0, 0], sizes = [8, 8, 64], strides = [1, 1, 1]} : vector<10x8x64xf32> to vector<8x8x64xf32>
    %57 = vector.extract_strided_slice %52 {offsets = [1, 0, 0], sizes = [8, 8, 64], strides = [1, 1, 1]} : vector<10x8x64xf32> to vector<8x8x64xf32>
    %58 = arith.addf %55, %57 : vector<8x8x64xf32>
    %59 = vector.extract_strided_slice %54 {offsets = [1, 0, 0], sizes = [8, 8, 64], strides = [1, 1, 1]} : vector<10x8x64xf32> to vector<8x8x64xf32>
    %60 = arith.addf %56, %59 : vector<8x8x64xf32>
    %61 = vector.extract_strided_slice %52 {offsets = [2, 0, 0], sizes = [8, 8, 64], strides = [1, 1, 1]} : vector<10x8x64xf32> to vector<8x8x64xf32>
    %62 = arith.addf %58, %61 : vector<8x8x64xf32>
    %63 = vector.extract_strided_slice %54 {offsets = [2, 0, 0], sizes = [8, 8, 64], strides = [1, 1, 1]} : vector<10x8x64xf32> to vector<8x8x64xf32>
    %64 = arith.addf %60, %63 : vector<8x8x64xf32>
    %cst_60 = arith.constant 0.111111112 : f32
    %65 = vector.broadcast %cst_60 : f32 to vector<8x8x64xf32>
    %66 = arith.mulf %62, %65 : vector<8x8x64xf32>
    %cst_61 = arith.constant 5.000000e-01 : f32
    %67 = vector.broadcast %cst_61 : f32 to vector<8x8x64xf32>
    %68 = arith.addf %66, %67 : vector<8x8x64xf32>
    %cst_62 = arith.constant 5.000000e-01 : f32
    %69 = vector.broadcast %cst_62 : f32 to vector<8x8x64xf32>
    %70 = arith.addf %68, %69 : vector<8x8x64xf32>
    %71 = math.floor %70 : vector<8x8x64xf32>
    %cst_63 = arith.constant 0.000000e+00 : f32
    %cst_64 = arith.constant 1.000000e+00 : f32
    %72 = vector.broadcast %cst_63 : f32 to vector<8x8x64xf32>
    %73 = arith.maximumf %72, %71 : vector<8x8x64xf32>
    %74 = vector.broadcast %cst_64 : f32 to vector<8x8x64xf32>
    %75 = arith.minimumf %74, %73 : vector<8x8x64xf32>
    %cst_65 = arith.constant 0.111111112 : f32
    %76 = vector.broadcast %cst_65 : f32 to vector<8x8x64xf32>
    %77 = arith.mulf %64, %76 : vector<8x8x64xf32>
    %cst_66 = arith.constant 5.000000e-01 : f32
    %78 = vector.broadcast %cst_66 : f32 to vector<8x8x64xf32>
    %79 = arith.addf %77, %78 : vector<8x8x64xf32>
    %cst_67 = arith.constant 5.000000e-01 : f32
    %80 = vector.broadcast %cst_67 : f32 to vector<8x8x64xf32>
    %81 = arith.addf %79, %80 : vector<8x8x64xf32>
    %82 = math.floor %81 : vector<8x8x64xf32>
    %cst_68 = arith.constant 0.000000e+00 : f32
    %cst_69 = arith.constant 1.000000e+00 : f32
    %83 = vector.broadcast %cst_68 : f32 to vector<8x8x64xf32>
    %84 = arith.maximumf %83, %82 : vector<8x8x64xf32>
    %85 = vector.broadcast %cst_69 : f32 to vector<8x8x64xf32>
    %86 = arith.minimumf %85, %84 : vector<8x8x64xf32>
    %cst_70 = arith.constant 0.000000e+00 : f32
    %87 = vector.broadcast %cst_70 : f32 to vector<8x8x64xf32>
    %cst_71 = arith.constant 0.000000e+00 : f32
    %88 = vector.broadcast %cst_71 : f32 to vector<8x8x64xf32>
    %89 = arith.cmpf oeq, %75, %88 : vector<8x8x64xf32>
    %cst_72 = arith.constant 0.000000e+00 : f32
    %90 = vector.broadcast %cst_72 : f32 to vector<8x8x64xf32>
    %91 = arith.cmpf oeq, %86, %90 : vector<8x8x64xf32>
    %92 = arith.andi %89, %91 : vector<8x8x64xi1>
    %cst_73 = arith.constant 0.000000e+00 : f32
    %93 = vector.broadcast %cst_73 : f32 to vector<8x8x64xf32>
    %94 = arith.select %92, %1, %93 : vector<8x8x64xi1>, vector<8x8x64xf32>
    %95 = arith.addf %87, %94 : vector<8x8x64xf32>
    %cst_74 = arith.constant 0.000000e+00 : f32
    %96 = vector.broadcast %cst_74 : f32 to vector<8x8x64xf32>
    %97 = arith.cmpf oeq, %75, %96 : vector<8x8x64xf32>
    %cst_75 = arith.constant 1.000000e+00 : f32
    %98 = vector.broadcast %cst_75 : f32 to vector<8x8x64xf32>
    %99 = arith.cmpf oeq, %86, %98 : vector<8x8x64xf32>
    %100 = arith.andi %97, %99 : vector<8x8x64xi1>
    %cst_76 = arith.constant 0.000000e+00 : f32
    %101 = vector.broadcast %cst_76 : f32 to vector<8x8x64xf32>
    %102 = arith.select %100, %3, %101 : vector<8x8x64xi1>, vector<8x8x64xf32>
    %103 = arith.addf %95, %102 : vector<8x8x64xf32>
    %cst_77 = arith.constant 1.000000e+00 : f32
    %104 = vector.broadcast %cst_77 : f32 to vector<8x8x64xf32>
    %105 = arith.cmpf oeq, %75, %104 : vector<8x8x64xf32>
    %cst_78 = arith.constant 0.000000e+00 : f32
    %106 = vector.broadcast %cst_78 : f32 to vector<8x8x64xf32>
    %107 = arith.cmpf oeq, %86, %106 : vector<8x8x64xf32>
    %108 = arith.andi %105, %107 : vector<8x8x64xi1>
    %cst_79 = arith.constant 0.000000e+00 : f32
    %109 = vector.broadcast %cst_79 : f32 to vector<8x8x64xf32>
    %110 = arith.select %108, %5, %109 : vector<8x8x64xi1>, vector<8x8x64xf32>
    %111 = arith.addf %103, %110 : vector<8x8x64xf32>
    %cst_80 = arith.constant 1.000000e+00 : f32
    %112 = vector.broadcast %cst_80 : f32 to vector<8x8x64xf32>
    %113 = arith.cmpf oeq, %75, %112 : vector<8x8x64xf32>
    %cst_81 = arith.constant 1.000000e+00 : f32
    %114 = vector.broadcast %cst_81 : f32 to vector<8x8x64xf32>
    %115 = arith.cmpf oeq, %86, %114 : vector<8x8x64xf32>
    %116 = arith.andi %113, %115 : vector<8x8x64xi1>
    %cst_82 = arith.constant 0.000000e+00 : f32
    %117 = vector.broadcast %cst_82 : f32 to vector<8x8x64xf32>
    %118 = arith.select %116, %7, %117 : vector<8x8x64xi1>, vector<8x8x64xf32>
    %119 = arith.addf %111, %118 : vector<8x8x64xf32>
    %c0_83 = arith.constant 0 : index
    %c0_84 = arith.constant 0 : index
    %c0_85 = arith.constant 0 : index
    %c0_86 = arith.constant 0 : index
    %120 = vector.load %arg2[%c0_83, %c0_84, %c0_85, %c0_86] : memref<1x8x8x64xf32, #tpu.memory_space<vmem>>, vector<1x8x8x64xf32>
    %121 = vector.shape_cast %120 : vector<1x8x8x64xf32> to vector<8x8x64xf32>
    %122 = vector.shape_cast %119 : vector<8x8x64xf32> to vector<1x8x8x64xf32>
    tpu.vector_store %arg2[%c0_83, %c0_84, %c0_85, %c0_86], %122 {strides = array<i32>} : memref<1x8x8x64xf32, #tpu.memory_space<vmem>>, vector<1x8x8x64xf32>,
    return
  }
  func.func @transform_0(%arg0: i32) -> (i32, i32, i32, i32, i32) {
    %c0_i32 = arith.constant 0 : i32
    %c0_i32_0 = arith.constant 0 : i32
    %c0_i32_1 = arith.constant 0 : i32
    %c0_i32_2 = arith.constant 0 : i32
    %c0_i32_3 = arith.constant 0 : i32
    return %arg0, %c0_i32, %c0_i32_0, %c0_i32_1, %c0_i32_2 : i32, i32, i32, i32, i32
  }
  func.func @transform_1(%arg0: i32) -> (i32, i32, i32, i32) {
    %c0_i32 = arith.constant 0 : i32
    %c0_i32_0 = arith.constant 0 : i32
    %c0_i32_1 = arith.constant 0 : i32
    %c0_i32_2 = arith.constant 0 : i32
    return %arg0, %c0_i32, %c0_i32_0, %c0_i32_1 : i32, i32, i32, i32
  }
}

module attributes {stable_mosaic.version = 11 : i64} {
  func.func @kernel(%arg0: i32, %arg1: memref<1x18x18x1xf32, #tpu.memory_space<vmem>>, %arg2: memref<9x1x64xf32, #tpu.memory_space<vmem>>, %arg3: memref<1x64xf32, #tpu.memory_space<vmem>>, %arg4: memref<9x64x64xbf16, #tpu.memory_space<vmem>>, %arg5: memref<1x64xf32, #tpu.memory_space<vmem>>, %arg6: memref<1x256x64xf32, #tpu.memory_space<vmem>>, %arg7: memref<18x18x64xf32, #tpu.memory_space<vmem>>) attributes {dimension_semantics = [#tpu.dimension_semantics<parallel>], iteration_bounds = array<i64: 2>, scalar_prefetch = 0 : i64, scratch_operands = 1 : i64, tpu.core_type = #tpu.core_type<tc>, window_params = [{transform_indices = @transform_0, window_bounds = array<i64: 1, 18, 18, 1>}, {pipeline_mode = #tpu.pipeline_mode<synchronous>, transform_indices = @transform_1, window_bounds = array<i64: 9, 1, 64>}, {pipeline_mode = #tpu.pipeline_mode<synchronous>, transform_indices = @transform_2, window_bounds = array<i64: 1, 64>}, {pipeline_mode = #tpu.pipeline_mode<synchronous>, transform_indices = @transform_3, window_bounds = array<i64: 9, 64, 64>}, {pipeline_mode = #tpu.pipeline_mode<synchronous>, transform_indices = @transform_4, window_bounds = array<i64: 1, 64>}, {transform_indices = @transform_5, window_bounds = array<i64: 1, 256, 64>}]} {
    %cst = arith.constant 0.000000e+00 : f32
    %0 = vector.broadcast %cst : f32 to vector<16x16x64xf32>
    %c0 = arith.constant 0 : index
    %c0_0 = arith.constant 0 : index
    %c0_1 = arith.constant 0 : index
    %c0_2 = arith.constant 0 : index
    %1 = vector.load %arg1[%c0, %c0_0, %c0_1, %c0_2] : memref<1x18x18x1xf32, #tpu.memory_space<vmem>>, vector<1x16x16x1xf32>
    %2 = vector.shape_cast %1 : vector<1x16x16x1xf32> to vector<16x16x1xf32>
    %c0_3 = arith.constant 0 : index
    %c0_4 = arith.constant 0 : index
    %c0_5 = arith.constant 0 : index
    %3 = vector.load %arg2[%c0_3, %c0_4, %c0_5] : memref<9x1x64xf32, #tpu.memory_space<vmem>>, vector<1x1x64xf32>
    %4 = vector.shape_cast %3 : vector<1x1x64xf32> to vector<1x64xf32>
    %5 = vector.shape_cast %4 : vector<1x64xf32> to vector<1x1x64xf32>
    %6 = vector.broadcast %2 : vector<16x16x1xf32> to vector<16x16x64xf32>
    %7 = vector.broadcast %5 : vector<1x1x64xf32> to vector<16x16x64xf32>
    %8 = arith.mulf %6, %7 : vector<16x16x64xf32>
    %9 = arith.addf %0, %8 : vector<16x16x64xf32>
    %c0_6 = arith.constant 0 : index
    %c0_7 = arith.constant 0 : index
    %c1 = arith.constant 1 : index
    %c0_8 = arith.constant 0 : index
    %10 = vector.load %arg1[%c0_6, %c0_7, %c1, %c0_8] : memref<1x18x18x1xf32, #tpu.memory_space<vmem>>, vector<1x16x16x1xf32>
    %11 = vector.shape_cast %10 : vector<1x16x16x1xf32> to vector<16x16x1xf32>
    %c1_9 = arith.constant 1 : index
    %c0_10 = arith.constant 0 : index
    %c0_11 = arith.constant 0 : index
    %12 = vector.load %arg2[%c1_9, %c0_10, %c0_11] : memref<9x1x64xf32, #tpu.memory_space<vmem>>, vector<1x1x64xf32>
    %13 = vector.shape_cast %12 : vector<1x1x64xf32> to vector<1x64xf32>
    %14 = vector.shape_cast %13 : vector<1x64xf32> to vector<1x1x64xf32>
    %15 = vector.broadcast %11 : vector<16x16x1xf32> to vector<16x16x64xf32>
    %16 = vector.broadcast %14 : vector<1x1x64xf32> to vector<16x16x64xf32>
    %17 = arith.mulf %15, %16 : vector<16x16x64xf32>
    %18 = arith.addf %9, %17 : vector<16x16x64xf32>
    %c0_12 = arith.constant 0 : index
    %c0_13 = arith.constant 0 : index
    %c2 = arith.constant 2 : index
    %c0_14 = arith.constant 0 : index
    %19 = vector.load %arg1[%c0_12, %c0_13, %c2, %c0_14] : memref<1x18x18x1xf32, #tpu.memory_space<vmem>>, vector<1x16x16x1xf32>
    %20 = vector.shape_cast %19 : vector<1x16x16x1xf32> to vector<16x16x1xf32>
    %c2_15 = arith.constant 2 : index
    %c0_16 = arith.constant 0 : index
    %c0_17 = arith.constant 0 : index
    %21 = vector.load %arg2[%c2_15, %c0_16, %c0_17] : memref<9x1x64xf32, #tpu.memory_space<vmem>>, vector<1x1x64xf32>
    %22 = vector.shape_cast %21 : vector<1x1x64xf32> to vector<1x64xf32>
    %23 = vector.shape_cast %22 : vector<1x64xf32> to vector<1x1x64xf32>
    %24 = vector.broadcast %20 : vector<16x16x1xf32> to vector<16x16x64xf32>
    %25 = vector.broadcast %23 : vector<1x1x64xf32> to vector<16x16x64xf32>
    %26 = arith.mulf %24, %25 : vector<16x16x64xf32>
    %27 = arith.addf %18, %26 : vector<16x16x64xf32>
    %c0_18 = arith.constant 0 : index
    %c1_19 = arith.constant 1 : index
    %c0_20 = arith.constant 0 : index
    %c0_21 = arith.constant 0 : index
    %28 = vector.load %arg1[%c0_18, %c1_19, %c0_20, %c0_21] : memref<1x18x18x1xf32, #tpu.memory_space<vmem>>, vector<1x16x16x1xf32>
    %29 = vector.shape_cast %28 : vector<1x16x16x1xf32> to vector<16x16x1xf32>
    %c3 = arith.constant 3 : index
    %c0_22 = arith.constant 0 : index
    %c0_23 = arith.constant 0 : index
    %30 = vector.load %arg2[%c3, %c0_22, %c0_23] : memref<9x1x64xf32, #tpu.memory_space<vmem>>, vector<1x1x64xf32>
    %31 = vector.shape_cast %30 : vector<1x1x64xf32> to vector<1x64xf32>
    %32 = vector.shape_cast %31 : vector<1x64xf32> to vector<1x1x64xf32>
    %33 = vector.broadcast %29 : vector<16x16x1xf32> to vector<16x16x64xf32>
    %34 = vector.broadcast %32 : vector<1x1x64xf32> to vector<16x16x64xf32>
    %35 = arith.mulf %33, %34 : vector<16x16x64xf32>
    %36 = arith.addf %27, %35 : vector<16x16x64xf32>
    %c0_24 = arith.constant 0 : index
    %c1_25 = arith.constant 1 : index
    %c1_26 = arith.constant 1 : index
    %c0_27 = arith.constant 0 : index
    %37 = vector.load %arg1[%c0_24, %c1_25, %c1_26, %c0_27] : memref<1x18x18x1xf32, #tpu.memory_space<vmem>>, vector<1x16x16x1xf32>
    %38 = vector.shape_cast %37 : vector<1x16x16x1xf32> to vector<16x16x1xf32>
    %c4 = arith.constant 4 : index
    %c0_28 = arith.constant 0 : index
    %c0_29 = arith.constant 0 : index
    %39 = vector.load %arg2[%c4, %c0_28, %c0_29] : memref<9x1x64xf32, #tpu.memory_space<vmem>>, vector<1x1x64xf32>
    %40 = vector.shape_cast %39 : vector<1x1x64xf32> to vector<1x64xf32>
    %41 = vector.shape_cast %40 : vector<1x64xf32> to vector<1x1x64xf32>
    %42 = vector.broadcast %38 : vector<16x16x1xf32> to vector<16x16x64xf32>
    %43 = vector.broadcast %41 : vector<1x1x64xf32> to vector<16x16x64xf32>
    %44 = arith.mulf %42, %43 : vector<16x16x64xf32>
    %45 = arith.addf %36, %44 : vector<16x16x64xf32>
    %c0_30 = arith.constant 0 : index
    %c1_31 = arith.constant 1 : index
    %c2_32 = arith.constant 2 : index
    %c0_33 = arith.constant 0 : index
    %46 = vector.load %arg1[%c0_30, %c1_31, %c2_32, %c0_33] : memref<1x18x18x1xf32, #tpu.memory_space<vmem>>, vector<1x16x16x1xf32>
    %47 = vector.shape_cast %46 : vector<1x16x16x1xf32> to vector<16x16x1xf32>
    %c5 = arith.constant 5 : index
    %c0_34 = arith.constant 0 : index
    %c0_35 = arith.constant 0 : index
    %48 = vector.load %arg2[%c5, %c0_34, %c0_35] : memref<9x1x64xf32, #tpu.memory_space<vmem>>, vector<1x1x64xf32>
    %49 = vector.shape_cast %48 : vector<1x1x64xf32> to vector<1x64xf32>
    %50 = vector.shape_cast %49 : vector<1x64xf32> to vector<1x1x64xf32>
    %51 = vector.broadcast %47 : vector<16x16x1xf32> to vector<16x16x64xf32>
    %52 = vector.broadcast %50 : vector<1x1x64xf32> to vector<16x16x64xf32>
    %53 = arith.mulf %51, %52 : vector<16x16x64xf32>
    %54 = arith.addf %45, %53 : vector<16x16x64xf32>
    %c0_36 = arith.constant 0 : index
    %c2_37 = arith.constant 2 : index
    %c0_38 = arith.constant 0 : index
    %c0_39 = arith.constant 0 : index
    %55 = vector.load %arg1[%c0_36, %c2_37, %c0_38, %c0_39] : memref<1x18x18x1xf32, #tpu.memory_space<vmem>>, vector<1x16x16x1xf32>
    %56 = vector.shape_cast %55 : vector<1x16x16x1xf32> to vector<16x16x1xf32>
    %c6 = arith.constant 6 : index
    %c0_40 = arith.constant 0 : index
    %c0_41 = arith.constant 0 : index
    %57 = vector.load %arg2[%c6, %c0_40, %c0_41] : memref<9x1x64xf32, #tpu.memory_space<vmem>>, vector<1x1x64xf32>
    %58 = vector.shape_cast %57 : vector<1x1x64xf32> to vector<1x64xf32>
    %59 = vector.shape_cast %58 : vector<1x64xf32> to vector<1x1x64xf32>
    %60 = vector.broadcast %56 : vector<16x16x1xf32> to vector<16x16x64xf32>
    %61 = vector.broadcast %59 : vector<1x1x64xf32> to vector<16x16x64xf32>
    %62 = arith.mulf %60, %61 : vector<16x16x64xf32>
    %63 = arith.addf %54, %62 : vector<16x16x64xf32>
    %c0_42 = arith.constant 0 : index
    %c2_43 = arith.constant 2 : index
    %c1_44 = arith.constant 1 : index
    %c0_45 = arith.constant 0 : index
    %64 = vector.load %arg1[%c0_42, %c2_43, %c1_44, %c0_45] : memref<1x18x18x1xf32, #tpu.memory_space<vmem>>, vector<1x16x16x1xf32>
    %65 = vector.shape_cast %64 : vector<1x16x16x1xf32> to vector<16x16x1xf32>
    %c7 = arith.constant 7 : index
    %c0_46 = arith.constant 0 : index
    %c0_47 = arith.constant 0 : index
    %66 = vector.load %arg2[%c7, %c0_46, %c0_47] : memref<9x1x64xf32, #tpu.memory_space<vmem>>, vector<1x1x64xf32>
    %67 = vector.shape_cast %66 : vector<1x1x64xf32> to vector<1x64xf32>
    %68 = vector.shape_cast %67 : vector<1x64xf32> to vector<1x1x64xf32>
    %69 = vector.broadcast %65 : vector<16x16x1xf32> to vector<16x16x64xf32>
    %70 = vector.broadcast %68 : vector<1x1x64xf32> to vector<16x16x64xf32>
    %71 = arith.mulf %69, %70 : vector<16x16x64xf32>
    %72 = arith.addf %63, %71 : vector<16x16x64xf32>
    %c0_48 = arith.constant 0 : index
    %c2_49 = arith.constant 2 : index
    %c2_50 = arith.constant 2 : index
    %c0_51 = arith.constant 0 : index
    %73 = vector.load %arg1[%c0_48, %c2_49, %c2_50, %c0_51] : memref<1x18x18x1xf32, #tpu.memory_space<vmem>>, vector<1x16x16x1xf32>
    %74 = vector.shape_cast %73 : vector<1x16x16x1xf32> to vector<16x16x1xf32>
    %c8 = arith.constant 8 : index
    %c0_52 = arith.constant 0 : index
    %c0_53 = arith.constant 0 : index
    %75 = vector.load %arg2[%c8, %c0_52, %c0_53] : memref<9x1x64xf32, #tpu.memory_space<vmem>>, vector<1x1x64xf32>
    %76 = vector.shape_cast %75 : vector<1x1x64xf32> to vector<1x64xf32>
    %77 = vector.shape_cast %76 : vector<1x64xf32> to vector<1x1x64xf32>
    %78 = vector.broadcast %74 : vector<16x16x1xf32> to vector<16x16x64xf32>
    %79 = vector.broadcast %77 : vector<1x1x64xf32> to vector<16x16x64xf32>
    %80 = arith.mulf %78, %79 : vector<16x16x64xf32>
    %81 = arith.addf %72, %80 : vector<16x16x64xf32>
    %c0_54 = arith.constant 0 : index
    %c0_55 = arith.constant 0 : index
    %82 = vector.load %arg3[%c0_54, %c0_55] : memref<1x64xf32, #tpu.memory_space<vmem>>, vector<1x64xf32>
    %83 = vector.shape_cast %82 : vector<1x64xf32> to vector<1x1x64xf32>
    %84 = vector.broadcast %83 : vector<1x1x64xf32> to vector<16x16x64xf32>
    %85 = arith.addf %81, %84 : vector<16x16x64xf32>
    %cst_56 = arith.constant 0.000000e+00 : f32
    %86 = vector.broadcast %cst_56 : f32 to vector<16x16x64xf32>
    %87 = arith.maximumf %85, %86 : vector<16x16x64xf32>
    %cst_57 = arith.constant 0.000000e+00 : f32
    %88 = vector.broadcast %cst_57 : f32 to vector<18x18x64xf32>
    %c0_58 = arith.constant 0 : index
    %c0_59 = arith.constant 0 : index
    %c0_60 = arith.constant 0 : index
    %89 = vector.load %arg7[%c0_58, %c0_59, %c0_60] : memref<18x18x64xf32, #tpu.memory_space<vmem>>, vector<18x18x64xf32>
    tpu.vector_store %arg7[%c0_58, %c0_59, %c0_60], %88 {strides = array<i32>} : memref<18x18x64xf32, #tpu.memory_space<vmem>>, vector<18x18x64xf32>,
    %c1_61 = arith.constant 1 : index
    %c1_62 = arith.constant 1 : index
    %c0_63 = arith.constant 0 : index
    %90 = vector.load %arg7[%c1_61, %c1_62, %c0_63] : memref<18x18x64xf32, #tpu.memory_space<vmem>>, vector<16x16x64xf32>
    tpu.vector_store %arg7[%c1_61, %c1_62, %c0_63], %87 {strides = array<i32>} : memref<18x18x64xf32, #tpu.memory_space<vmem>>, vector<16x16x64xf32>,
    %cst_64 = arith.constant 0.000000e+00 : f32
    %91 = vector.broadcast %cst_64 : f32 to vector<256x64xf32>
    %c0_65 = arith.constant 0 : index
    %c0_66 = arith.constant 0 : index
    %c0_67 = arith.constant 0 : index
    %92 = vector.load %arg7[%c0_65, %c0_66, %c0_67] : memref<18x18x64xf32, #tpu.memory_space<vmem>>, vector<16x16x64xf32>
    %93 = vector.shape_cast %92 : vector<16x16x64xf32> to vector<256x64xf32>
    %94 = arith.truncf %93 : vector<256x64xf32> to vector<256x64xbf16>
    %c0_68 = arith.constant 0 : index
    %c0_69 = arith.constant 0 : index
    %c0_70 = arith.constant 0 : index
    %95 = vector.load %arg4[%c0_68, %c0_69, %c0_70] : memref<9x64x64xbf16, #tpu.memory_space<vmem>>, vector<1x64x64xbf16>
    %96 = vector.shape_cast %95 : vector<1x64x64xbf16> to vector<64x64xbf16>
    %cst_71 = arith.constant dense<0.000000e+00> : vector<256x64xf32>
    %97 = tpu.matmul %94, %96, %cst_71 {dimension_numbers = #tpu.dot_dimension_numbers<[1], [0], [0], [1], [0, 0, 1, 1], [], []>} : vector<256x64xbf16>, vector<64x64xbf16>, vector<256x64xf32> -> vector<256x64xf32>
    %98 = arith.addf %91, %97 : vector<256x64xf32>
    %c0_72 = arith.constant 0 : index
    %c1_73 = arith.constant 1 : index
    %c0_74 = arith.constant 0 : index
    %99 = vector.load %arg7[%c0_72, %c1_73, %c0_74] : memref<18x18x64xf32, #tpu.memory_space<vmem>>, vector<16x16x64xf32>
    %100 = vector.shape_cast %99 : vector<16x16x64xf32> to vector<256x64xf32>
    %101 = arith.truncf %100 : vector<256x64xf32> to vector<256x64xbf16>
    %c1_75 = arith.constant 1 : index
    %c0_76 = arith.constant 0 : index
    %c0_77 = arith.constant 0 : index
    %102 = vector.load %arg4[%c1_75, %c0_76, %c0_77] : memref<9x64x64xbf16, #tpu.memory_space<vmem>>, vector<1x64x64xbf16>
    %103 = vector.shape_cast %102 : vector<1x64x64xbf16> to vector<64x64xbf16>
    %cst_78 = arith.constant dense<0.000000e+00> : vector<256x64xf32>
    %104 = tpu.matmul %101, %103, %cst_78 {dimension_numbers = #tpu.dot_dimension_numbers<[1], [0], [0], [1], [0, 0, 1, 1], [], []>} : vector<256x64xbf16>, vector<64x64xbf16>, vector<256x64xf32> -> vector<256x64xf32>
    %105 = arith.addf %98, %104 : vector<256x64xf32>
    %c0_79 = arith.constant 0 : index
    %c2_80 = arith.constant 2 : index
    %c0_81 = arith.constant 0 : index
    %106 = vector.load %arg7[%c0_79, %c2_80, %c0_81] : memref<18x18x64xf32, #tpu.memory_space<vmem>>, vector<16x16x64xf32>
    %107 = vector.shape_cast %106 : vector<16x16x64xf32> to vector<256x64xf32>
    %108 = arith.truncf %107 : vector<256x64xf32> to vector<256x64xbf16>
    %c2_82 = arith.constant 2 : index
    %c0_83 = arith.constant 0 : index
    %c0_84 = arith.constant 0 : index
    %109 = vector.load %arg4[%c2_82, %c0_83, %c0_84] : memref<9x64x64xbf16, #tpu.memory_space<vmem>>, vector<1x64x64xbf16>
    %110 = vector.shape_cast %109 : vector<1x64x64xbf16> to vector<64x64xbf16>
    %cst_85 = arith.constant dense<0.000000e+00> : vector<256x64xf32>
    %111 = tpu.matmul %108, %110, %cst_85 {dimension_numbers = #tpu.dot_dimension_numbers<[1], [0], [0], [1], [0, 0, 1, 1], [], []>} : vector<256x64xbf16>, vector<64x64xbf16>, vector<256x64xf32> -> vector<256x64xf32>
    %112 = arith.addf %105, %111 : vector<256x64xf32>
    %c1_86 = arith.constant 1 : index
    %c0_87 = arith.constant 0 : index
    %c0_88 = arith.constant 0 : index
    %113 = vector.load %arg7[%c1_86, %c0_87, %c0_88] : memref<18x18x64xf32, #tpu.memory_space<vmem>>, vector<16x16x64xf32>
    %114 = vector.shape_cast %113 : vector<16x16x64xf32> to vector<256x64xf32>
    %115 = arith.truncf %114 : vector<256x64xf32> to vector<256x64xbf16>
    %c3_89 = arith.constant 3 : index
    %c0_90 = arith.constant 0 : index
    %c0_91 = arith.constant 0 : index
    %116 = vector.load %arg4[%c3_89, %c0_90, %c0_91] : memref<9x64x64xbf16, #tpu.memory_space<vmem>>, vector<1x64x64xbf16>
    %117 = vector.shape_cast %116 : vector<1x64x64xbf16> to vector<64x64xbf16>
    %cst_92 = arith.constant dense<0.000000e+00> : vector<256x64xf32>
    %118 = tpu.matmul %115, %117, %cst_92 {dimension_numbers = #tpu.dot_dimension_numbers<[1], [0], [0], [1], [0, 0, 1, 1], [], []>} : vector<256x64xbf16>, vector<64x64xbf16>, vector<256x64xf32> -> vector<256x64xf32>
    %119 = arith.addf %112, %118 : vector<256x64xf32>
    %c1_93 = arith.constant 1 : index
    %c1_94 = arith.constant 1 : index
    %c0_95 = arith.constant 0 : index
    %120 = vector.load %arg7[%c1_93, %c1_94, %c0_95] : memref<18x18x64xf32, #tpu.memory_space<vmem>>, vector<16x16x64xf32>
    %121 = vector.shape_cast %120 : vector<16x16x64xf32> to vector<256x64xf32>
    %122 = arith.truncf %121 : vector<256x64xf32> to vector<256x64xbf16>
    %c4_96 = arith.constant 4 : index
    %c0_97 = arith.constant 0 : index
    %c0_98 = arith.constant 0 : index
    %123 = vector.load %arg4[%c4_96, %c0_97, %c0_98] : memref<9x64x64xbf16, #tpu.memory_space<vmem>>, vector<1x64x64xbf16>
    %124 = vector.shape_cast %123 : vector<1x64x64xbf16> to vector<64x64xbf16>
    %cst_99 = arith.constant dense<0.000000e+00> : vector<256x64xf32>
    %125 = tpu.matmul %122, %124, %cst_99 {dimension_numbers = #tpu.dot_dimension_numbers<[1], [0], [0], [1], [0, 0, 1, 1], [], []>} : vector<256x64xbf16>, vector<64x64xbf16>, vector<256x64xf32> -> vector<256x64xf32>
    %126 = arith.addf %119, %125 : vector<256x64xf32>
    %c1_100 = arith.constant 1 : index
    %c2_101 = arith.constant 2 : index
    %c0_102 = arith.constant 0 : index
    %127 = vector.load %arg7[%c1_100, %c2_101, %c0_102] : memref<18x18x64xf32, #tpu.memory_space<vmem>>, vector<16x16x64xf32>
    %128 = vector.shape_cast %127 : vector<16x16x64xf32> to vector<256x64xf32>
    %129 = arith.truncf %128 : vector<256x64xf32> to vector<256x64xbf16>
    %c5_103 = arith.constant 5 : index
    %c0_104 = arith.constant 0 : index
    %c0_105 = arith.constant 0 : index
    %130 = vector.load %arg4[%c5_103, %c0_104, %c0_105] : memref<9x64x64xbf16, #tpu.memory_space<vmem>>, vector<1x64x64xbf16>
    %131 = vector.shape_cast %130 : vector<1x64x64xbf16> to vector<64x64xbf16>
    %cst_106 = arith.constant dense<0.000000e+00> : vector<256x64xf32>
    %132 = tpu.matmul %129, %131, %cst_106 {dimension_numbers = #tpu.dot_dimension_numbers<[1], [0], [0], [1], [0, 0, 1, 1], [], []>} : vector<256x64xbf16>, vector<64x64xbf16>, vector<256x64xf32> -> vector<256x64xf32>
    %133 = arith.addf %126, %132 : vector<256x64xf32>
    %c2_107 = arith.constant 2 : index
    %c0_108 = arith.constant 0 : index
    %c0_109 = arith.constant 0 : index
    %134 = vector.load %arg7[%c2_107, %c0_108, %c0_109] : memref<18x18x64xf32, #tpu.memory_space<vmem>>, vector<16x16x64xf32>
    %135 = vector.shape_cast %134 : vector<16x16x64xf32> to vector<256x64xf32>
    %136 = arith.truncf %135 : vector<256x64xf32> to vector<256x64xbf16>
    %c6_110 = arith.constant 6 : index
    %c0_111 = arith.constant 0 : index
    %c0_112 = arith.constant 0 : index
    %137 = vector.load %arg4[%c6_110, %c0_111, %c0_112] : memref<9x64x64xbf16, #tpu.memory_space<vmem>>, vector<1x64x64xbf16>
    %138 = vector.shape_cast %137 : vector<1x64x64xbf16> to vector<64x64xbf16>
    %cst_113 = arith.constant dense<0.000000e+00> : vector<256x64xf32>
    %139 = tpu.matmul %136, %138, %cst_113 {dimension_numbers = #tpu.dot_dimension_numbers<[1], [0], [0], [1], [0, 0, 1, 1], [], []>} : vector<256x64xbf16>, vector<64x64xbf16>, vector<256x64xf32> -> vector<256x64xf32>
    %140 = arith.addf %133, %139 : vector<256x64xf32>
    %c2_114 = arith.constant 2 : index
    %c1_115 = arith.constant 1 : index
    %c0_116 = arith.constant 0 : index
    %141 = vector.load %arg7[%c2_114, %c1_115, %c0_116] : memref<18x18x64xf32, #tpu.memory_space<vmem>>, vector<16x16x64xf32>
    %142 = vector.shape_cast %141 : vector<16x16x64xf32> to vector<256x64xf32>
    %143 = arith.truncf %142 : vector<256x64xf32> to vector<256x64xbf16>
    %c7_117 = arith.constant 7 : index
    %c0_118 = arith.constant 0 : index
    %c0_119 = arith.constant 0 : index
    %144 = vector.load %arg4[%c7_117, %c0_118, %c0_119] : memref<9x64x64xbf16, #tpu.memory_space<vmem>>, vector<1x64x64xbf16>
    %145 = vector.shape_cast %144 : vector<1x64x64xbf16> to vector<64x64xbf16>
    %cst_120 = arith.constant dense<0.000000e+00> : vector<256x64xf32>
    %146 = tpu.matmul %143, %145, %cst_120 {dimension_numbers = #tpu.dot_dimension_numbers<[1], [0], [0], [1], [0, 0, 1, 1], [], []>} : vector<256x64xbf16>, vector<64x64xbf16>, vector<256x64xf32> -> vector<256x64xf32>
    %147 = arith.addf %140, %146 : vector<256x64xf32>
    %c2_121 = arith.constant 2 : index
    %c2_122 = arith.constant 2 : index
    %c0_123 = arith.constant 0 : index
    %148 = vector.load %arg7[%c2_121, %c2_122, %c0_123] : memref<18x18x64xf32, #tpu.memory_space<vmem>>, vector<16x16x64xf32>
    %149 = vector.shape_cast %148 : vector<16x16x64xf32> to vector<256x64xf32>
    %150 = arith.truncf %149 : vector<256x64xf32> to vector<256x64xbf16>
    %c8_124 = arith.constant 8 : index
    %c0_125 = arith.constant 0 : index
    %c0_126 = arith.constant 0 : index
    %151 = vector.load %arg4[%c8_124, %c0_125, %c0_126] : memref<9x64x64xbf16, #tpu.memory_space<vmem>>, vector<1x64x64xbf16>
    %152 = vector.shape_cast %151 : vector<1x64x64xbf16> to vector<64x64xbf16>
    %cst_127 = arith.constant dense<0.000000e+00> : vector<256x64xf32>
    %153 = tpu.matmul %150, %152, %cst_127 {dimension_numbers = #tpu.dot_dimension_numbers<[1], [0], [0], [1], [0, 0, 1, 1], [], []>} : vector<256x64xbf16>, vector<64x64xbf16>, vector<256x64xf32> -> vector<256x64xf32>
    %154 = arith.addf %147, %153 : vector<256x64xf32>
    %c0_128 = arith.constant 0 : index
    %c0_129 = arith.constant 0 : index
    %155 = vector.load %arg5[%c0_128, %c0_129] : memref<1x64xf32, #tpu.memory_space<vmem>>, vector<1x64xf32>
    %156 = vector.broadcast %155 : vector<1x64xf32> to vector<256x64xf32>
    %157 = arith.addf %154, %156 : vector<256x64xf32>
    %cst_130 = arith.constant 0.000000e+00 : f32
    %158 = vector.broadcast %cst_130 : f32 to vector<256x64xf32>
    %159 = arith.maximumf %157, %158 : vector<256x64xf32>
    %c0_131 = arith.constant 0 : index
    %c0_132 = arith.constant 0 : index
    %c0_133 = arith.constant 0 : index
    %160 = vector.load %arg6[%c0_131, %c0_132, %c0_133] : memref<1x256x64xf32, #tpu.memory_space<vmem>>, vector<1x256x64xf32>
    %161 = vector.shape_cast %160 : vector<1x256x64xf32> to vector<256x64xf32>
    %162 = vector.shape_cast %159 : vector<256x64xf32> to vector<1x256x64xf32>
    tpu.vector_store %arg6[%c0_131, %c0_132, %c0_133], %162 {strides = array<i32>} : memref<1x256x64xf32, #tpu.memory_space<vmem>>, vector<1x256x64xf32>,
    return
  }
  func.func @transform_0(%arg0: i32) -> (i32, i32, i32, i32) {
    %c0_i32 = arith.constant 0 : i32
    %c0_i32_0 = arith.constant 0 : i32
    %c0_i32_1 = arith.constant 0 : i32
    %c0_i32_2 = arith.constant 0 : i32
    return %arg0, %c0_i32, %c0_i32_0, %c0_i32_1 : i32, i32, i32, i32
  }
  func.func @transform_1(%arg0: i32) -> (i32, i32, i32) {
    %c0_i32 = arith.constant 0 : i32
    %c0_i32_0 = arith.constant 0 : i32
    %c0_i32_1 = arith.constant 0 : i32
    %c0_i32_2 = arith.constant 0 : i32
    return %c0_i32, %c0_i32_0, %c0_i32_1 : i32, i32, i32
  }
  func.func @transform_2(%arg0: i32) -> (i32, i32) {
    %c0_i32 = arith.constant 0 : i32
    %c0_i32_0 = arith.constant 0 : i32
    %c0_i32_1 = arith.constant 0 : i32
    return %c0_i32, %c0_i32_0 : i32, i32
  }
  func.func @transform_3(%arg0: i32) -> (i32, i32, i32) {
    %c0_i32 = arith.constant 0 : i32
    %c0_i32_0 = arith.constant 0 : i32
    %c0_i32_1 = arith.constant 0 : i32
    %c0_i32_2 = arith.constant 0 : i32
    return %c0_i32, %c0_i32_0, %c0_i32_1 : i32, i32, i32
  }
  func.func @transform_4(%arg0: i32) -> (i32, i32) {
    %c0_i32 = arith.constant 0 : i32
    %c0_i32_0 = arith.constant 0 : i32
    %c0_i32_1 = arith.constant 0 : i32
    return %c0_i32, %c0_i32_0 : i32, i32
  }
  func.func @transform_5(%arg0: i32) -> (i32, i32, i32) {
    %c0_i32 = arith.constant 0 : i32
    %c0_i32_0 = arith.constant 0 : i32
    %c0_i32_1 = arith.constant 0 : i32
    return %arg0, %c0_i32, %c0_i32_0 : i32, i32, i32
  }
}

</mosaic_0001>

<bundles_post_ra>
// kernel: forward.3
= control target key start
LH: loop header
LB: loop body
LE: loop exit
PB: predicated region body
PF: predicated region fallthrough
CT: control target
= control target key end

     0   :  { %6 = vsyncpa [#allocation5], 0  ;;  %s1887_s0 = inlined_call_operand.vmem [shape: f32[2,4,8,8,64], index: 0, kind: input, shape index: {}]   ;;  %s1888_s1 = inlined_call_operand.hbm [shape: f32[2,8,8,64], index: 1, kind: output, shape index: {}]  }
   0x1   :  { %8 = vsyncpa [#allocation5 + $0x1], 0  ;;  %s945_s6 = smov 0   ;;  %s947_s7 = smov 0  }
   0x2   :  { %s949_s8 = smov 0   ;;  %s951_s9 = smov 0  }
   0x3 LB: > { %s966_s10 = sadd.s32 4294967295, %s930_s9   ;;  %s788_s11 = sadd.s32 4294967294, %s930_s9   ;;  %s930_s9 = sphi %s951_s9, %s1994_s9   ;;  %s926_s8 = sphi %s949_s8, %s1993_s8   ;;  %s922_s7 = sphi %s947_s7, %s1992_s7   ;;  %s918_s6 = sphi %s945_s6, %s1991_s6  }
   0x4   : > { %s970_s12 = sadd.s32 1, %s930_s9   ;;  %s47_s13 = sadd.s32 1, %s926_s8 }
   0x5   : > { %s44_s14 = ssub.s32 %s930_s9, %s970_s12  ;;  %p57_p0 = scmp.ne.s32.totalorder %s926_s8, %s922_s7 }
   0x6   : > { %p45_p1 = scmp.eq.s32.totalorder %s44_s14, 0  ;;  %p58_p2 = scmp.eq.s32.totalorder %s966_s10, 1 }
   0x7   : > { %p63_p3 = scmp.ne.s32.totalorder %s922_s7, %s918_s6  ;;  %p64_p4 = scmp.eq.s32.totalorder %s788_s11, 1 }
   0x8   : > { %s981_s15 = scalar_select %p45_p1, %s926_s8, %s47_s13  }
   0x9   : > { %p983_p5 = por %p58_p2, %p57_p0  ;;  %p987_p6 = por %p64_p4, %p63_p3 }
   0xa   : > { %p791_p7 = scmp.ge.s32.totalorder %s930_s9, 1  ;;  %p90_p8 = scmp.lt.s32.totalorder %s930_s9, 3 }
   0xc   : > { %p91_p9 = pnand %p791_p7, %p90_p8 }
   0xe   : > { %94 = sbr.rel (%p91_p9) target bundleno = 159 (0x9f), region = 24 }
  0x13   : > { %vm286_vm0 = vcmask 523264   ;;  %p110_p10 = scmp.lt.s32.totalorder %s966_s10, 1  ;;  %v932_v0 = vmov 0.0   ;;  %vm288_vm5 = vcmask 517120   ;;  %s107_s23 = sand.u32 1, %s922_s7  }
  0x14   : > { %287 = vst.msk [vmem:[#allocation2] sm:$0xff] %vm286_vm0, %v932_v0  ;;  %s1625_s24 = sshll.u32 %s107_s23, 6  ;;  %s825_s26 = sshll.u32 %s966_s10, 6 }
  0x15   : > { %290 = vst.msk [vmem:[#allocation2 + $0x10] sm:$0xff] %vm286_vm0, %v932_v0  ;;  %s111_s18 = scalar_select %p110_p10, %s966_s10, 1 }
  0x16   : > { %292 = vst.msk [vmem:[#allocation2 + $0x20] sm:$0xff] %vm286_vm0, %v932_v0  ;;  %s1676_s25 = scalar_lea.vmem [#allocation4], %s1625_s24  ;;  %s722_s29 = scalar_lea.hbm %s1888_s1, %s825_s26 }
  0x17   : > { %294 = vst.msk [vmem:[#allocation2 + $0x30] sm:$0xff] %vm286_vm0, %v932_v0  ;;  %s824_s19 = sshll.u32 %s111_s18, 8  ;;  %s723_s30 = sshll.u32 %s1676_s25, 4  ;;  %s724_s30 = int_to_ptr.vmem [resolvable:$true] %s723_s30 }
  0x18   : > { %296 = vst.msk [vmem:[#allocation2 + $0x40] sm:$0xff] %vm286_vm0, %v932_v0  ;;  %s1008_s22 = scalar_lea.vmem %s1887_s0, %s824_s19  ;;  %s725_s2 = sshll.u32 %s722_s29, 4  ;;  %s726_s2 = int_to_ptr.hbm [resolvable:$true] %s725_s2 }
  0x19   : > { %298 = vst.msk [vmem:[#allocation2 + $0x50] sm:$0xff] %vm286_vm0, %v932_v0  ;;  %v1013_v1 = vld [vmem:[%s1008_s22] sm:$0xff]  ;;  %v1026_v5 = vld [vmem:[%s1008_s22 + $0x8] sm:$0xff]  ;;  %v1042_v10 = vld [vmem:[%s1008_s22 + $0x10] sm:$0xff]  ;;  %s711_s3 = scalar_lea.sflag [#allocation5], %s107_s23  ;;  %s882_s4 = sshra.s32 %s726_s2, 4  ;;  %s883_s4 = int_to_ptr.hbm [resolvable:$true] %s882_s4 }
  0x1a   : > { %v1016_v2 = vld [vmem:[%s1008_s22 + $0x40] sm:$0xff]  ;;  %300 = vst.msk [vmem:[#allocation2 + $0x60] sm:$0xff] %vm286_vm0, %v932_v0  ;;  %v1029_v6 = vld [vmem:[%s1008_s22 + $0x48] sm:$0xff]  ;;  %v1051_v13 = vld [vmem:[%s1008_s22 + $0x50] sm:$0xff]  ;;  %s884_s5 = scalar_lea.hbm %s883_s4, 64  ;;  %s888_s13 = scalar_lea.hbm %s1888_s1, 128 }
  0x1b   : > { %v1019_v3 = vld [vmem:[%s1008_s22 + $0x80] sm:$0xff]  ;;  %v150_v4 = vmax.f32 %v1013_v1, %v1016_v2  ;;  %302 = vst.msk [vmem:[#allocation2 + $0x70] sm:$0xff] %vm286_vm0, %v932_v0  ;;  %v1037_v8 = vld [vmem:[%s1008_s22 + $0x88] sm:$0xff]  ;;  %v151_v9 = vmax.f32 %v1026_v5, %v1029_v6  ;;  %v1057_v15 = vld [vmem:[%s1008_s22 + $0x90] sm:$0xff]  ;;  %v152_v16 = vmax.f32 %v1042_v10, %v1051_v13  ;;  %p885_p11 = scmp.ne.s32.totalorder %s883_s4, %s884_s5  ;;  %p889_p0 = scmp.lt.s32.totalorder %s883_s4, %s1888_s1 }
  0x1c   : > { %v1034_v7 = vld [vmem:[%s1008_s22 + $0xc0] sm:$0xff]  ;;  %304 = vst.msk [vmem:[#allocation2 + $0x80] sm:$0xff] %vm286_vm0, %v932_v0  ;;  %v1048_v12 = vld [vmem:[%s1008_s22 + $0xc8] sm:$0xff]  ;;  %v1062_v17 = vld [vmem:[%s1008_s22 + $0x18] sm:$0xff]  ;;  %p890_p1 = scmp.lt.s32.totalorder %s888_s13, %s884_s5 }
  0x1d   : > { %v158_v11 = vmax.f32 %v150_v4, %v1019_v3  ;;  %306 = vst.msk [vmem:[#allocation2 + $0x90] sm:$0xff] %vm286_vm0, %v932_v0  ;;  %v159_v14 = vmax.f32 %v151_v9, %v1037_v8  ;;  %v1065_v18 = vld [vmem:[%s1008_s22 + $0x58] sm:$0xff]  ;;  %v1073_v20 = vld [vmem:[%s1008_s22 + $0x20] sm:$0xff]  ;;  %v160_v23 = vmax.f32 %v152_v16, %v1057_v15  ;;  %v1097_v26 = vld [vmem:[%s1008_s22 + $0xd0] sm:$0xff]  ;;  %p886_p12 = pnand %p885_p11, %p983_p5 }
  0x1e   : > { %308 = vst.msk [vmem:[#allocation3] sm:$0xff] %vm286_vm0, %v932_v0  ;;  %v1076_v21 = vld [vmem:[%s1008_s22 + $0x60] sm:$0xff]  ;;  %v153_v24 = vmax.f32 %v1062_v17, %v1065_v18  ;;  %v1100_v27 = vld [vmem:[%s1008_s22 + $0x98] sm:$0xff]  ;;  %v1135_v36 = vld [vmem:[%s1008_s22 + $0x28] sm:$0xff]  ;;  %p891_p2 = por %p890_p1, %p889_p0 }
  0x1f   : > { %v1070_v19 = vmax.f32 %v158_v11, %v1034_v7  ;;  %310 = vst.msk [vmem:[#allocation3 + $0x10] sm:$0xff] %vm286_vm0, %v932_v0  ;;  %v1081_v22 = vmax.f32 %v159_v14, %v1048_v12  ;;  %v154_v25 = vmax.f32 %v1073_v20, %v1076_v21  ;;  %v1103_v28 = vld [vmem:[%s1008_s22 + $0xa0] sm:$0xff]  ;;  %v1122_v31 = vmax.f32 %v160_v23, %v1097_v26  ;;  %v1125_v32 = vld [vmem:[%s1008_s22 + $0xd8] sm:$0xff]  ;;  %v1152_v39 = vld [vmem:[%s1008_s22 + $0x68] sm:$0xff]  ;;  %p887_p13 = pneg %p886_p12 }
  0x20   : > { %312 = vst.msk [vmem:[#allocation3 + $0x20] sm:$0xff] %vm286_vm0, %v932_v0  ;;  %v161_v33 = vmax.f32 %v153_v24, %v1100_v27  ;;  %v1129_v34 = vld [vmem:[%s1008_s22 + $0xe0] sm:$0xff]  ;;  %v1155_v40 = vld [vmem:[%s1008_s22 + $0x30] sm:$0xff]  ;;  %v1169_v44 = vld [vmem:[%s1008_s22 + $0x38] sm:$0xff]  ;;  %v155_v48 = vmax.f32 %v1135_v36, %v1152_v39 }
  0x21   : > { %vm174_vm1 = vcmp.eq.f32.partialorder %v1034_v7, %v1070_v19  ;;  %314 = vst.msk [vmem:[#allocation3 + $0x30] sm:$0xff] %vm286_vm0, %v932_v0  ;;  %vm175_vm2 = vcmp.eq.f32.partialorder %v1048_v12, %v1081_v22  ;;  %vm190_vm3 = vcmp.eq.f32.partialorder %v1019_v3, %v1070_v19  ;;  %vm191_vm4 = vcmp.eq.f32.partialorder %v1037_v8, %v1081_v22  ;;  %v1158_v41 = vld [vmem:[%s1008_s22 + $0x70] sm:$0xff]  ;;  %v1172_v45 = vld [vmem:[%s1008_s22 + $0x78] sm:$0xff]  ;;  %v1199_v50 = vld [vmem:[%s1008_s22 + $0xa8] sm:$0xff]  ;;  %p892_p3 = pnand %p891_p2, %p887_p13 }
  0x22   : > { %316 = vst.msk [vmem:[#allocation3 + $0x40] sm:$0xff] %vm286_vm0, %v932_v0  ;;  %v1110_v29 = vsel %vm174_vm1, 0.5, %v932_v0  ;;  %v1115_v30 = vsel %vm175_vm2, 0.5, %v932_v0  ;;  %v162_v35 = vmax.f32 %v154_v25, %v1103_v28  ;;  %vm214_vm6 = vcmp.eq.f32.partialorder %v1016_v2, %v1070_v19  ;;  %v1202_v51 = vld [vmem:[%s1008_s22 + $0xb0] sm:$0xff]  ;;  %v1217_v54 = vld [vmem:[%s1008_s22 + $0xe8] sm:$0xff]  ;;  %v1220_v55 = vld [vmem:[%s1008_s22 + $0xb8] sm:$0xff] }
  0x23   : > { %318 = vst.msk [vmem:[#allocation3 + $0x50] sm:$0xff] %vm286_vm0, %v932_v0  ;;  %v198_v37 = vsel %vm190_vm3, 0.5, %v1110_v29  ;;  %v199_v38 = vsel %vm191_vm4, 0.5, %v1115_v30  ;;  %vm1898_vm7 = vcmp.eq.f32.partialorder %v1029_v6, %v1081_v22  ;;  %v1163_v42 = vmax.f32 %v161_v33, %v1125_v32  ;;  %v1234_v58 = vld [vmem:[%s1008_s22 + $0xf0] sm:$0xff]  ;;  %v1249_v62 = vld [vmem:[%s1008_s22 + $0xf8] sm:$0xff] }
  0x24   : > { %320 = vst.msk [vmem:[#allocation3 + $0x60] sm:$0xff] %vm286_vm0, %v932_v0  ;;  %v1166_v43 = vmax.f32 %v162_v35, %v1129_v34  ;;  %vm1892_vm8 = vcmp.eq.f32.partialorder %v1013_v1, %v1070_v19  ;;  %vm1891_vm9 = vcmp.eq.f32.partialorder %v1026_v5, %v1081_v22  ;;  %vm176_vm10 = vcmp.eq.f32.partialorder %v1097_v26, %v1122_v31 }
  0x25   : > { %322 = vst.msk [vmem:[#allocation3 + $0x70] sm:$0xff] %vm286_vm0, %v932_v0  ;;  %v222_v46 = vsel %vm214_vm6, -0.5, %v198_v37  ;;  %v223_v47 = vsel %vm1898_vm7, -0.5, %v199_v38  ;;  %v156_v49 = vmax.f32 %v1155_v40, %v1158_v41  ;;  %vm177_vm11 = vcmp.eq.f32.partialorder %v1125_v32, %v1163_v42 }
  0x26   : > { %324 = vst.msk [vmem:[#allocation3 + $0x80] sm:$0xff] %vm286_vm0, %v932_v0  ;;  %v157_v52 = vmax.f32 %v1169_v44, %v1172_v45  ;;  %vm1890_vm12 = vcmp.gt.f32.partialorder %v1070_v19, 0.0  ;;  %v1210_v53 = vsel %vm176_vm10, 0.5, %v932_v0  ;;  %vm192_vm13 = vcmp.eq.f32.partialorder %v1057_v15, %v1122_v31 }
  0x27   : > { %326 = vst.msk [vmem:[#allocation3 + $0x90] sm:$0xff] %vm286_vm0, %v932_v0  ;;  %vm178_vm14 = vcmp.eq.f32.partialorder %v1129_v34, %v1166_v43  ;;  %v246_v56 = vsel %vm1892_vm8, -0.5, %v222_v46  ;;  %v247_v57 = vsel %vm1891_vm9, -0.5, %v223_v47  ;;  %vm1889_vm15 = vcmp.gt.f32.partialorder %v1081_v22, 0.0 }
  0x28   : > { %1911 = vst [vmem:[#allocation7_spill] sm:$0xff] %v1169_v44  ;;  %vm1893_vm1 = vcmp.eq.f32.partialorder %v1051_v13, %v1122_v31  ;;  %v1242_v59 = vsel %vm177_vm11, 0.5, %v932_v0  ;;  %vm193_vm2 = vcmp.eq.f32.partialorder %v1100_v27, %v1163_v42  ;;  %v163_v60 = vmax.f32 %v155_v48, %v1199_v50 }
  0x29   : > { %1912 = vst [vmem:[#allocation8_spill] sm:$0xff] %v1172_v45  ;;  %v164_v61 = vmax.f32 %v156_v49, %v1202_v51  ;;  %v200_v63 = vsel %vm192_vm13, 0.5, %v1210_v53  ;;  %v1261_v4 = vsel %vm178_vm14, 0.5, %v932_v0  ;;  %vm1894_vm10 = vcmp.eq.f32.partialorder %v1103_v28, %v1166_v43 }
  0x2a   : > { %289 = vst.msk [vmem:[#allocation2 + $0x8] sm:$0x3] %vm288_vm5, %v932_v0  ;;  %v165_v9 = vmax.f32 %v157_v52, %v1220_v55  ;;  %v1270_v11 = vsel %vm1890_vm12, %v246_v56, 0.0  ;;  %v1274_v14 = vsel %vm1889_vm15, %v247_v57, 0.0  ;;  %v1277_v16 = vmax.f32 %v163_v60, %v1217_v54 }
  0x2b   : > { %291 = vst.msk [vmem:[#allocation2 + $0x18] sm:$0x3] %vm288_vm5, %v932_v0  ;;  %v1280_v23 = vmax.f32 %v164_v61, %v1234_v58  ;;  %vm1896_vm11 = vcmp.eq.f32.partialorder %v1042_v10, %v1122_v31  ;;  %v201_v24 = vsel %vm193_vm2, 0.5, %v1242_v59  ;;  %vm1895_vm14 = vcmp.eq.f32.partialorder %v1065_v18, %v1163_v42 }
  0x2c   : > { %293 = vst.msk [vmem:[#allocation2 + $0x28] sm:$0x3] %vm288_vm5, %v932_v0  ;;  %v1293_v25 = vmax.f32 %v165_v9, %v1249_v62  ;;  %v224_v33 = vsel %vm1893_vm1, -0.5, %v200_v63  ;;  %v202_v35 = vsel %vm1894_vm10, 0.5, %v1261_v4  ;;  %vm1897_vm15 = vcmp.eq.f32.partialorder %v1076_v21, %v1166_v43 }
  0x2d   : > { %295 = vst.msk [vmem:[#allocation2 + $0x38] sm:$0x3] %vm288_vm5, %v932_v0  ;;  %vm179_vm12 = vcmp.eq.f32.partialorder %v1217_v54, %v1277_v16  ;;  %vm1900_vm9 = vcmp.gt.f32.partialorder %v1122_v31, 0.0  ;;  %vm1899_vm8 = vcmp.eq.f32.partialorder %v1199_v50, %v1277_v16  ;;  %vm180_vm1 = vcmp.eq.f32.partialorder %v1234_v58, %v1280_v23 }
  0x2e   : > { %1913 = vst [vmem:[#allocation9_spill] sm:$0xff] %v1220_v55  ;;  %v187_v37 = vsel %vm179_vm12, 0.5, %v932_v0  ;;  %v225_v38 = vsel %vm1895_vm14, -0.5, %v201_v24  ;;  %vm1901_vm10 = vcmp.eq.f32.partialorder %v1062_v17, %v1163_v42  ;;  %v188_v46 = vsel %vm180_vm1, 0.5, %v932_v0 }
  0x2f   : > { %297 = vst.msk [vmem:[#allocation2 + $0x48] sm:$0x3] %vm288_vm5, %v932_v0  ;;  %vm196_vm12 = vcmp.eq.f32.partialorder %v1202_v51, %v1280_v23  ;;  %v248_v47 = vsel %vm1896_vm11, -0.5, %v224_v33  ;;  %v226_v48 = vsel %vm1897_vm15, -0.5, %v202_v35  ;;  %vm242_vm14 = vcmp.eq.f32.partialorder %v1073_v20, %v1166_v43 }
  0x30   : > { %299 = vst.msk [vmem:[#allocation2 + $0x58] sm:$0x3] %vm288_vm5, %v932_v0  ;;  %vm181_vm1 = vcmp.eq.f32.partialorder %v1249_v62, %v1293_v25  ;;  %v203_v49 = vsel %vm1899_vm8, 0.5, %v187_v37  ;;  %vm219_vm11 = vcmp.eq.f32.partialorder %v1152_v39, %v1277_v16  ;;  %vm197_vm15 = vcmp.eq.f32.partialorder %v1220_v55, %v1293_v25 }
  0x31   : > { %1914 = vst [vmem:[#allocation10_spill] sm:$0xff] %v1249_v62  ;;  %v189_v52 = vsel %vm181_vm1, 0.5, %v932_v0  ;;  %v249_v56 = vsel %vm1901_vm10, -0.5, %v225_v38  ;;  %vm1902_vm7 = vcmp.gt.f32.partialorder %v1163_v42, 0.0  ;;  %v204_v57 = vsel %vm196_vm12, 0.5, %v188_v46 }
  0x32   : > { %301 = vst.msk [vmem:[#allocation2 + $0x68] sm:$0x3] %vm288_vm5, %v932_v0  ;;  %vm220_vm8 = vcmp.eq.f32.partialorder %v1158_v41, %v1280_v23  ;;  %v272_v60 = vsel %vm1900_vm9, %v248_v47, 0.0  ;;  %v205_v61 = vsel %vm197_vm15, 0.5, %v189_v52  ;;  %vm221_vm1 = vcmp.eq.f32.partialorder %v1172_v45, %v1293_v25 }
  0x33   : > { %303 = vst.msk [vmem:[#allocation2 + $0x78] sm:$0x3] %vm288_vm5, %v932_v0  ;;  %v206_v63 = vsel %vm190_vm3, -0.5, %v1110_v29  ;;  %v250_v9 = vsel %vm242_vm14, -0.5, %v226_v48  ;;  %vm1903_vm9 = vcmp.gt.f32.partialorder %v1166_v43, 0.0  ;;  %v227_v24 = vsel %vm219_vm11, -0.5, %v203_v49 }
  0x34   : > { %305 = vst.msk [vmem:[#allocation2 + $0x88] sm:$0x3] %vm288_vm5, %v932_v0  ;;  %vm243_vm10 = vcmp.eq.f32.partialorder %v1135_v36, %v1277_v16  ;;  %v273_v29 = vsel %vm1902_vm7, %v249_v56, 0.0  ;;  %v228_v33 = vsel %vm220_vm8, -0.5, %v204_v57  ;;  %vm244_vm3 = vcmp.eq.f32.partialorder %v1155_v40, %v1280_v23 }
  0x35   : > { %307 = vst.msk [vmem:[#allocation2 + $0x98] sm:$0x3] %vm288_vm5, %v932_v0  ;;  %v207_v35 = vsel %vm191_vm4, -0.5, %v1115_v30  ;;  %v229_v38 = vsel %vm221_vm1, -0.5, %v205_v61  ;;  %vm1904_vm7 = vcmp.eq.f32.partialorder %v1169_v44, %v1293_v25  ;;  %v230_v47 = vsel %vm214_vm6, 0.5, %v206_v63 }
  0x36   : > { %309 = vst.msk [vmem:[#allocation3 + $0x8] sm:$0x3] %vm288_vm5, %v932_v0  ;;  %v208_v48 = vsel %vm192_vm13, -0.5, %v1210_v53  ;;  %v274_v30 = vsel %vm1903_vm9, %v250_v9, 0.0  ;;  %v251_v49 = vsel %vm243_vm10, -0.5, %v227_v24  ;;  %vm267_vm4 = vcmp.gt.f32.partialorder %v1277_v16, 0.0 }
  0x37   : > { %311 = vst.msk [vmem:[#allocation3 + $0x18] sm:$0x3] %vm288_vm5, %v932_v0  ;;  %v209_v56 = vsel %vm193_vm2, -0.5, %v1242_v59  ;;  %vm1915_vm6 = vcmp.eq.f32.partialorder %v1029_v6, %v1081_v22  ;;  %vm1916_vm13 = vcmp.eq.f32.partialorder %v1103_v28, %v1166_v43  ;;  %v253_v59 = vsel %vm1904_vm7, -0.5, %v229_v38  ;;  %v346_v24 = vld [vmem:[#allocation2] sm:$0xff] }
  0x38   : > { %313 = vst.msk [vmem:[#allocation3 + $0x28] sm:$0x3] %vm288_vm5, %v932_v0  ;;  %v231_v53 = vsel %vm1915_vm6, 0.5, %v207_v35  ;;  %v210_v57 = vsel %vm1916_vm13, -0.5, %v1261_v4  ;;  %vm269_vm2 = vcmp.gt.f32.partialorder %v1293_v25, 0.0  ;;  %vm1917_vm9 = vcmp.eq.f32.partialorder %v1051_v13, %v1122_v31  ;;  %v366_v38 = vld [vmem:[#allocation2 + $0x1] sm:$0xff] }
  0x39   : > { %315 = vst.msk [vmem:[#allocation3 + $0x38] sm:$0x3] %vm288_vm5, %v932_v0  ;;  %vm1918_vm6 = vcmp.eq.f32.partialorder %v1199_v50, %v1277_v16  ;;  %v275_v4 = vsel %vm267_vm4, %v251_v49, 0.0  ;;  %vm1919_vm13 = vcmp.eq.f32.partialorder %v1013_v1, %v1070_v19  ;;  %vm1920_vm7 = vcmp.eq.f32.partialorder %v1065_v18, %v1163_v42 }
  0x3a   : > { %317 = vst.msk [vmem:[#allocation3 + $0x48] sm:$0x3] %vm288_vm5, %v932_v0  ;;  %v211_v61 = vsel %vm1918_vm6, -0.5, %v187_v37  ;;  %v233_v63 = vsel %vm1920_vm7, 0.5, %v209_v56  ;;  %v212_v9 = vsel %vm196_vm12, -0.5, %v188_v46  ;;  %vm1922_vm6 = vcmp.eq.f32.partialorder %v1076_v21, %v1166_v43 }
  0x3b   : > { %319 = vst.msk [vmem:[#allocation3 + $0x58] sm:$0x3] %vm288_vm5, %v932_v0  ;;  %v213_v35 = vsel %vm197_vm15, -0.5, %v189_v52  ;;  %v277_v46 = vsel %vm269_vm2, %v253_v59, 0.0  ;;  %vm1923_vm7 = vcmp.eq.f32.partialorder %v1042_v10, %v1122_v31  ;;  %vm1924_vm12 = vcmp.gt.f32.partialorder %v1070_v19, 0.0 }
  0x3c   : > { %321 = vst.msk [vmem:[#allocation3 + $0x68] sm:$0x3] %vm288_vm5, %v932_v0  ;;  %vm1925_vm15 = vcmp.eq.f32.partialorder %v1062_v17, %v1163_v42  ;;  %v237_v19 = vsel %vm221_vm1, 0.5, %v213_v35 }
  0x3d   : > { %323 = vst.msk [vmem:[#allocation3 + $0x78] sm:$0x3] %vm288_vm5, %v932_v0  ;;  %v257_v52 = vsel %vm1925_vm15, -0.5, %v233_v63 }
  0x3e   : > { %325 = vst.msk [vmem:[#allocation3 + $0x88] sm:$0x3] %vm288_vm5, %v932_v0 }
  0x3f   : > { %327 = vst.msk [vmem:[#allocation3 + $0x98] sm:$0x3] %vm288_vm5, %v932_v0  ;;  %v252_v0 = vsel %vm244_vm3, -0.5, %v228_v33  ;;  %vm268_vm5 = vcmp.gt.f32.partialorder %v1280_v23, 0.0  ;;  %v234_v33 = vsel %vm1922_vm6, 0.5, %v210_v57 }
  0x40   : > { %329 = vst.msk [vmem:[#allocation2 + $0x11] sm:$0xff] %vm286_vm0, %v1270_v11  ;;  %v232_v11 = vsel %vm1917_vm9, 0.5, %v208_v48  ;;  %v276_v37 = vsel %vm268_vm5, %v252_v0, 0.0  ;;  %vm1921_vm9 = vcmp.eq.f32.partialorder %v1026_v5, %v1081_v22  ;;  %v258_v56 = vsel %vm242_vm14, -0.5, %v234_v33  ;;  %v356_v0 = vld [vmem:[#allocation3] sm:$0xff] }
  0x41   : > { %330 = vst.msk [vmem:[#allocation2 + $0x21] sm:$0xff] %vm286_vm0, %v1274_v14  ;;  %v254_v14 = vsel %vm1919_vm13, -0.5, %v230_v47  ;;  %v235_v47 = vsel %vm219_vm11, 0.5, %v211_v61  ;;  %vm1926_vm13 = vcmp.gt.f32.partialorder %v1081_v22, 0.0  ;;  %vm1927_vm11 = vcmp.gt.f32.partialorder %v1122_v31, 0.0  ;;  %v406_v61 = vld [vmem:[#allocation2 + $0x2] sm:$0xff] }
  0x42   : > { %331 = vst.msk [vmem:[#allocation2 + $0x31] sm:$0xff] %vm286_vm0, %v272_v60  ;;  %v255_v60 = vsel %vm1921_vm9, -0.5, %v231_v53  ;;  %v278_v48 = vsel %vm1924_vm12, %v254_v14, 0.0  ;;  %v376_v53 = vadd.f32 %v366_v38, %v346_v24  ;;  %v259_v22 = vsel %vm243_vm10, -0.5, %v235_v47  ;;  %v386_v24 = vld [vmem:[#allocation3 + $0x1] sm:$0xff] }
  0x43   : > { %332 = vst.msk [vmem:[#allocation2 + $0x41] sm:$0xff] %vm286_vm0, %v273_v29  ;;  %v256_v29 = vsel %vm1923_vm7, -0.5, %v232_v11  ;;  %v279_v49 = vsel %vm1926_vm13, %v255_v60, 0.0  ;;  %vm1929_vm10 = vcmp.gt.f32.partialorder %v1166_v43, 0.0  ;;  %vm1930_vm14 = vcmp.eq.f32.partialorder %v1169_v44, %v1293_v25 }
  0x44   : > { %333 = vst.msk [vmem:[#allocation2 + $0x51] sm:$0xff] %vm286_vm0, %v274_v30  ;;  %v236_v30 = vsel %vm220_vm8, 0.5, %v212_v9  ;;  %v280_v57 = vsel %vm1927_vm11, %v256_v29, 0.0  ;;  %vm1928_vm8 = vcmp.gt.f32.partialorder %v1163_v42, 0.0  ;;  %v261_v60 = vsel %vm1930_vm14, -0.5, %v237_v19 }
  0x45   : > { %334 = vst.msk [vmem:[#allocation2 + $0x61] sm:$0xff] %vm286_vm0, %v275_v4  ;;  %v281_v4 = vsel %vm1928_vm8, %v257_v52, 0.0  ;;  %v260_v14 = vsel %vm244_vm3, -0.5, %v236_v30  ;;  %v416_v47 = vadd.f32 %v406_v61, %v376_v53  ;;  %v426_v52 = vld [vmem:[#allocation3 + $0x2] sm:$0xff]  ;;  %v396_v19 = vadd.f32 %v386_v24, %v356_v0 }
  0x46   : > { %335 = vst.msk [vmem:[#allocation2 + $0x71] sm:$0xff] %vm286_vm0, %v276_v37  ;;  %v282_v37 = vsel %vm1929_vm10, %v258_v56, 0.0  ;;  %v284_v56 = vsel %vm268_vm5, %v260_v14, 0.0  ;;  %v285_v16 = vsel %vm269_vm2, %v261_v60, 0.0 }
  0x47   : > { %336 = vst.msk [vmem:[#allocation2 + $0x81] sm:$0xff] %vm286_vm0, %v277_v46  ;;  %v347_v59 = vld [vmem:[#allocation2 + $0x10] sm:$0xff]  ;;  %v283_v46 = vsel %vm267_vm4, %v259_v22, 0.0 }
  0x48   : > { %v367_v11 = vld [vmem:[#allocation2 + $0x11] sm:$0xff]  ;;  %338 = vst.msk [vmem:[#allocation3 + $0x11] sm:$0xff] %vm286_vm0, %v278_v48  ;;  %v348_v63 = vld [vmem:[#allocation2 + $0x20] sm:$0xff] }
  0x49   : > { %v368_v9 = vld [vmem:[#allocation2 + $0x21] sm:$0xff]  ;;  %v377_v31 = vadd.f32 %v367_v11, %v347_v59  ;;  %339 = vst.msk [vmem:[#allocation3 + $0x21] sm:$0xff] %vm286_vm0, %v279_v49  ;;  %v407_v42 = vld [vmem:[#allocation2 + $0x12] sm:$0xff] }
  0x4a   : > { %v378_v33 = vadd.f32 %v368_v9, %v348_v63  ;;  %v349_v35 = vld [vmem:[#allocation2 + $0x30] sm:$0xff]  ;;  %340 = vst.msk [vmem:[#allocation3 + $0x31] sm:$0xff] %vm286_vm0, %v280_v57  ;;  %v408_v29 = vld [vmem:[#allocation2 + $0x22] sm:$0xff] }
  0x4b   : > { %v369_v38 = vld [vmem:[#allocation2 + $0x31] sm:$0xff]  ;;  %v417_v48 = vadd.f32 %v407_v42, %v377_v31  ;;  %v350_v43 = vld [vmem:[#allocation2 + $0x40] sm:$0xff]  ;;  %341 = vst.msk [vmem:[#allocation3 + $0x41] sm:$0xff] %vm286_vm0, %v281_v4 }
  0x4c   : > { %v379_v30 = vadd.f32 %v369_v38, %v349_v35  ;;  %v370_v49 = vld [vmem:[#allocation2 + $0x41] sm:$0xff]  ;;  %v418_v59 = vadd.f32 %v408_v29, %v378_v33  ;;  %v409_v11 = vld [vmem:[#allocation2 + $0x32] sm:$0xff]  ;;  %342 = vst.msk [vmem:[#allocation3 + $0x51] sm:$0xff] %vm286_vm0, %v282_v37  ;;  %v436_v29 = vadd.f32 %v426_v52, %v396_v19 }
  0x4d   : > { %v380_v63 = vadd.f32 %v370_v49, %v350_v43  ;;  %v351_v57 = vld [vmem:[#allocation2 + $0x50] sm:$0xff]  ;;  %v446_v53 = vadd.f32 %v417_v48, %v416_v47  ;;  %v410_v61 = vld [vmem:[#allocation2 + $0x42] sm:$0xff]  ;;  %343 = vst.msk [vmem:[#allocation3 + $0x61] sm:$0xff] %vm286_vm0, %v283_v46 }
  0x4e   : > { %v371_v9 = vld [vmem:[#allocation2 + $0x51] sm:$0xff]  ;;  %v419_v22 = vadd.f32 %v409_v11, %v379_v30  ;;  %v352_v42 = vld [vmem:[#allocation2 + $0x60] sm:$0xff]  ;;  %v447_v23 = vadd.f32 %v418_v59, %v417_v48  ;;  %344 = vst.msk [vmem:[#allocation3 + $0x71] sm:$0xff] %vm286_vm0, %v284_v56 }
  0x4f   : > { %v381_v31 = vadd.f32 %v371_v9, %v351_v57  ;;  %v372_v4 = vld [vmem:[#allocation2 + $0x61] sm:$0xff]  ;;  %v1526_v0 = vadd.f32 %v410_v61, %v380_v63  ;;  %v353_v24 = vld [vmem:[#allocation2 + $0x70] sm:$0xff]  ;;  %v462_v37 = vadd.f32 %v446_v53, %v418_v59  ;;  %345 = vst.msk [vmem:[#allocation3 + $0x81] sm:$0xff] %vm286_vm0, %v285_v16 }
  0x50   : > { %v382_v14 = vadd.f32 %v372_v4, %v352_v42  ;;  %v373_v33 = vld [vmem:[#allocation2 + $0x71] sm:$0xff]  ;;  %v448_v35 = vadd.f32 %v419_v22, %v418_v59  ;;  %v463_v47 = vadd.f32 %v447_v23, %v419_v22  ;;  %v358_v48 = vld [vmem:[#allocation3 + $0x20] sm:$0xff] }
  0x51   : > { %v411_v25 = vld [vmem:[#allocation2 + $0x52] sm:$0xff]  ;;  %v449_v46 = vadd.f32 %v1526_v0, %v419_v22  ;;  %v388_v43 = vld [vmem:[#allocation3 + $0x21] sm:$0xff]  ;;  %v478_v11 = vmul.f32 0.11111111, %v462_v37  ;;  %v1534_v57 = vadd.f32 %v373_v33, %v353_v24 }
  0x52   : > { %v357_v60 = vld [vmem:[#allocation3 + $0x10] sm:$0xff]  ;;  %v1530_v30 = vadd.f32 %v411_v25, %v381_v31  ;;  %v464_v63 = vadd.f32 %v448_v35, %v1526_v0  ;;  %v412_v56 = vld [vmem:[#allocation2 + $0x62] sm:$0xff]  ;;  %v398_v59 = vadd.f32 %v388_v43, %v358_v48  ;;  %v479_v61 = vmul.f32 0.11111111, %v463_v47 }
  0x53   : > { %v387_v38 = vld [vmem:[#allocation3 + $0x11] sm:$0xff]  ;;  %v1537_v19 = vadd.f32 %v412_v56, %v382_v14  ;;  %v428_v31 = vld [vmem:[#allocation3 + $0x22] sm:$0xff]  ;;  %v486_v42 = vadd.f32 0.5, %v478_v11 }
  0x54   : > { %v397_v49 = vadd.f32 %v387_v38, %v357_v60  ;;  %v427_v9 = vld [vmem:[#allocation3 + $0x12] sm:$0xff]  ;;  %v465_v52 = vadd.f32 %v449_v46, %v1530_v30  ;;  %v360_v23 = vld [vmem:[#allocation3 + $0x40] sm:$0xff]  ;;  %v480_v25 = vmul.f32 0.11111111, %v464_v63  ;;  %v438_v35 = vadd.f32 %v428_v31, %v398_v59 }
  0x55   : > { %v359_v16 = vld [vmem:[#allocation3 + $0x30] sm:$0xff]  ;;  %v390_v37 = vld [vmem:[#allocation3 + $0x41] sm:$0xff]  ;;  %v487_v24 = vadd.f32 0.5, %v479_v61  ;;  %v494_v47 = vadd.f32 0.5, %v486_v42 }
  0x56   : > { %v389_v53 = vld [vmem:[#allocation3 + $0x31] sm:$0xff]  ;;  %v437_v22 = vadd.f32 %v427_v9, %v397_v49  ;;  %v400_v33 = vadd.f32 %v390_v37, %v360_v23  ;;  %v481_v43 = vmul.f32 0.11111111, %v465_v52  ;;  %v430_v46 = vld [vmem:[#allocation3 + $0x42] sm:$0xff]  ;;  %v488_v14 = vadd.f32 0.5, %v480_v25 }
  0x57   : > { %v399_v4 = vadd.f32 %v389_v53, %v359_v16  ;;  %v429_v60 = vld [vmem:[#allocation3 + $0x32] sm:$0xff]  ;;  %v495_v45 = vadd.f32 0.5, %v487_v24  ;;  %v502_v16 = vfloor.f32 %v494_v47 }
  0x58   : > { %v361_v38 = vld [vmem:[#allocation3 + $0x50] sm:$0xff]  ;;  %v454_v62 = vadd.f32 %v437_v22, %v436_v29  ;;  %v455_v56 = vadd.f32 %v438_v35, %v437_v22  ;;  %v440_v49 = vadd.f32 %v430_v46, %v400_v33  ;;  %v496_v63 = vadd.f32 0.5, %v488_v14  ;;  %v354_v33 = vld [vmem:[#allocation2 + $0x80] sm:$0xff] }
  0x59   : > { %v391_v48 = vld [vmem:[#allocation3 + $0x51] sm:$0xff]  ;;  %v439_v55 = vadd.f32 %v429_v60, %v399_v4  ;;  %v503_v61 = vfloor.f32 %v495_v45  ;;  %v510_v52 = vmax.f32 %v502_v16, 0.0  ;;  %v489_v24 = vadd.f32 0.5, %v481_v43  ;;  %v392_v16 = vld [vmem:[#allocation3 + $0x61] sm:$0xff] }
  0x5a   : > { %v401_v11 = vadd.f32 %v391_v48, %v361_v38  ;;  %v470_v9 = vadd.f32 %v454_v62, %v438_v35  ;;  %v431_v59 = vld [vmem:[#allocation3 + $0x52] sm:$0xff]  ;;  %v504_v4 = vfloor.f32 %v496_v63  ;;  %v374_v62 = vld [vmem:[#allocation2 + $0x81] sm:$0xff] }
  0x5b   : > { %v456_v53 = vadd.f32 %v439_v55, %v438_v35  ;;  %v471_v31 = vadd.f32 %v455_v56, %v439_v55  ;;  %v457_v37 = vadd.f32 %v440_v49, %v439_v55  ;;  %v511_v60 = vmax.f32 %v503_v61, 0.0  ;;  %v413_v55 = vld [vmem:[#allocation2 + $0x72] sm:$0xff] }
  0x5c   : > { %v1539_v23 = vadd.f32 %v431_v59, %v401_v11  ;;  %v526_v29 = vmul.f32 0.11111111, %v470_v9  ;;  %v518_v38 = vmin.f32 %v510_v52, 1.0  ;;  %v512_v48 = vmax.f32 %v504_v4, 0.0  ;;  %v362_v9 = vld [vmem:[#allocation3 + $0x60] sm:$0xff] }
  0x5d   : > { %v472_v42 = vadd.f32 %v456_v53, %v440_v49  ;;  %v527_v25 = vmul.f32 0.11111111, %v471_v31  ;;  %v519_v46 = vmin.f32 %v511_v60, 1.0  ;;  %v497_v14 = vadd.f32 0.5, %v489_v24  ;;  %v393_v24 = vld [vmem:[#allocation3 + $0x71] sm:$0xff]  ;;  %v434_v59 = vld [vmem:[#allocation3 + $0x82] sm:$0xff] }
  0x5e   : > { %v473_v22 = vadd.f32 %v457_v37, %v1539_v23  ;;  %v534_v35 = vadd.f32 0.5, %v526_v29  ;;  %v450_v53 = vadd.f32 %v1530_v30, %v1526_v0  ;;  %v1545_v63 = vadd.f32 %v413_v55, %v1534_v57 }
  0x5f   : > { %v528_v47 = vmul.f32 0.11111111, %v472_v42  ;;  %v535_v45 = vadd.f32 0.5, %v527_v25  ;;  %v1547_v43 = vadd.f32 %v374_v62, %v354_v33  ;;  %vm1549_vm1 = vcmp.eq.f32.partialorder %v518_v38, 0.0 }
  0x60   : > { %v529_v56 = vmul.f32 0.11111111, %v473_v22  ;;  %v542_v11 = vadd.f32 0.5, %v534_v35  ;;  %vm1553_vm3 = vcmp.eq.f32.partialorder %v518_v38, 1.0  ;;  %vm1557_vm4 = vcmp.eq.f32.partialorder %v519_v46, 0.0  ;;  %v363_v22 = vld [vmem:[#allocation3 + $0x70] sm:$0xff] }
  0x61   : > { %v543_v61 = vadd.f32 0.5, %v535_v45  ;;  %v536_v37 = vadd.f32 0.5, %v528_v47  ;;  %v520_v0 = vmin.f32 %v512_v48, 1.0  ;;  %v505_v57 = vfloor.f32 %v497_v14  ;;  %v432_v35 = vld [vmem:[#allocation3 + $0x62] sm:$0xff] }
  0x62   : > { %v550_v52 = vfloor.f32 %v542_v11  ;;  %v537_v60 = vadd.f32 0.5, %v529_v56  ;;  %v402_v25 = vadd.f32 %v392_v16, %v362_v9  ;;  %vm1561_vm5 = vcmp.eq.f32.partialorder %v519_v46, 1.0 }
  0x63   : > { %v551_v42 = vfloor.f32 %v543_v61  ;;  %v544_v4 = vadd.f32 0.5, %v536_v37  ;;  %v513_v38 = vmax.f32 %v505_v57, 0.0  ;;  %v458_v47 = vadd.f32 %v1539_v23, %v440_v49 }
  0x64   : > { %v558_v33 = vmax.f32 %v550_v52, 0.0  ;;  %v466_v45 = vadd.f32 %v450_v53, %v1537_v19  ;;  %v545_v14 = vadd.f32 0.5, %v537_v60  ;;  %v1567_v11 = vadd.f32 %v432_v35, %v402_v25 }
  0x65   : > { %v559_v55 = vmax.f32 %v551_v42, 0.0  ;;  %v552_v48 = vfloor.f32 %v544_v4  ;;  %v521_v9 = vmin.f32 %v513_v38, 1.0  ;;  %v403_v61 = vadd.f32 %v393_v24, %v363_v22  ;;  %v433_v22 = vld [vmem:[#allocation3 + $0x72] sm:$0xff] }
  0x66   : > { %v566_v56 = vmin.f32 %v558_v33, 1.0  ;;  %v482_v16 = vmul.f32 0.11111111, %v466_v45  ;;  %v553_v52 = vfloor.f32 %v545_v14  ;;  %v474_v57 = vadd.f32 %v458_v47, %v1567_v11 }
  0x67   : > { %v567_v46 = vmin.f32 %v559_v55, 1.0  ;;  %v560_v37 = vmax.f32 %v552_v48, 0.0  ;;  %vm1578_vm6 = vcmp.eq.f32.partialorder %v520_v0, 0.0  ;;  %vm1582_vm7 = vcmp.eq.f32.partialorder %v520_v0, 1.0 }
  0x68   : > { %vm1570_vm2 = vcmp.eq.f32.partialorder %v566_v56, 0.0  ;;  %vm1574_vm9 = vcmp.eq.f32.partialorder %v566_v56, 1.0  ;;  %v561_v0 = vmax.f32 %v553_v52, 0.0  ;;  %vm1604_vm8 = vcmp.eq.f32.partialorder %v521_v9, 0.0 }
  0x69   : > { %vm590_vm12 = vmand %vm1549_vm1, %vm1570_vm2  ;;  %vm1591_vm15 = vcmp.eq.f32.partialorder %v567_v46, 0.0  ;;  %vm1595_vm13 = vcmp.eq.f32.partialorder %v567_v46, 1.0  ;;  %v568_v25 = vmin.f32 %v560_v37, 1.0  ;;  %v490_v38 = vadd.f32 0.5, %v482_v16  ;;  %v364_v16 = vld [vmem:[#allocation3 + $0x80] sm:$0xff] }
  0x6a   : > { %v598_v24 = vsel %vm590_vm12, %v1013_v1, 0.0  ;;  %vm622_vm11 = vmand %vm1549_vm1, %vm1574_vm9  ;;  %v530_v35 = vmul.f32 0.11111111, %v474_v57  ;;  %v1608_v47 = vadd.f32 %v433_v22, %v403_v61  ;;  %v569_v55 = vmin.f32 %v561_v0, 1.0  ;;  %v394_v61 = vld [vmem:[#allocation3 + $0x81] sm:$0xff] }
  0x6b   : > { %v630_v45 = vsel %vm622_vm11, %v1016_v2, 0.0  ;;  %vm654_vm10 = vmand %vm1553_vm3, %vm1570_vm2  ;;  %vm1615_vm14 = vcmp.eq.f32.partialorder %v568_v25, 0.0  ;;  %vm1619_vm1 = vcmp.eq.f32.partialorder %v568_v25, 1.0  ;;  %vm1632_vm12 = vcmp.eq.f32.partialorder %v521_v9, 1.0 }
  0x6c   : > { %v638_v48 = vadd.f32 %v630_v45, %v598_v24  ;;  %v662_v2 = vsel %vm654_vm10, %v1019_v3, 0.0  ;;  %vm678_vm2 = vmand %vm1553_vm3, %vm1574_vm9  ;;  %v498_v14 = vadd.f32 0.5, %v490_v38  ;;  %v538_v56 = vadd.f32 0.5, %v530_v35  ;;  %v414_v35 = vld [vmem:[#allocation2 + $0x82] sm:$0xff] }
  0x6d   : > { %v686_v46 = vsel %vm678_vm2, %v1034_v7, 0.0  ;;  %vm591_vm11 = vmand %vm1557_vm4, %vm1591_vm15  ;;  %vm1641_vm10 = vcmp.eq.f32.partialorder %v569_v55, 0.0  ;;  %vm1645_vm3 = vcmp.eq.f32.partialorder %v569_v55, 1.0  ;;  %v451_v9 = vadd.f32 %v1537_v19, %v1530_v30 }
  0x6e   : > { %v670_v37 = vadd.f32 %v662_v2, %v638_v48  ;;  %v599_v52 = vsel %vm591_vm11, %v1026_v5, 0.0  ;;  %vm623_vm9 = vmand %vm1557_vm4, %vm1595_vm13  ;;  %v506_v7 = vfloor.f32 %v498_v14  ;;  %v546_v57 = vadd.f32 0.5, %v538_v56 }
  0x6f   : > { %v631_v49 = vsel %vm623_vm9, %v1029_v6, 0.0  ;;  %vm655_vm2 = vmand %vm1561_vm5, %vm1591_vm15  ;;  %v459_v30 = vadd.f32 %v1567_v11, %v1539_v23  ;;  %v467_v5 = vadd.f32 %v451_v9, %v1545_v63  ;;  %v404_v25 = vadd.f32 %v394_v61, %v364_v16 }
  0x70   : > { %v694_v0 = vadd.f32 %v686_v46, %v670_v37  ;;  %v639_v22 = vadd.f32 %v631_v49, %v599_v52  ;;  %v663_v29 = vsel %vm655_vm2, %v1037_v8, 0.0  ;;  %vm679_vm4 = vmand %vm1561_vm5, %vm1595_vm13  ;;  %v514_v6 = vmax.f32 %v506_v7, 0.0  ;;  %v355_v37 = vld [vmem:[#allocation2 + $0x90] sm:$0xff] }
  0x71   : > { %v687_v4 = vsel %vm679_vm4, %v1048_v12, 0.0  ;;  %vm592_vm15 = vmand %vm1578_vm6, %vm1615_vm14  ;;  %v554_v23 = vfloor.f32 %v546_v57  ;;  %v475_v24 = vadd.f32 %v459_v30, %v1608_v47  ;;  %v483_v38 = vmul.f32 0.11111111, %v467_v5  ;;  %v375_v52 = vld [vmem:[#allocation2 + $0x91] sm:$0xff] }
  0x72   : > { %702 = vst.msk [vmem:[%s1676_s25] sm:$0xff] %vm286_vm0, %v694_v0  ;;  %v671_v8 = vadd.f32 %v663_v29, %v639_v22  ;;  %v600_v62 = vsel %vm592_vm15, %v1042_v10, 0.0  ;;  %vm624_vm5 = vmand %vm1578_vm6, %vm1619_vm1  ;;  %v522_v12 = vmin.f32 %v514_v6, 1.0  ;;  %v1686_v60 = vadd.f32 %v414_v35, %v1547_v43  ;;  %v395_v29 = vld [vmem:[#allocation3 + $0x91] sm:$0xff] }
  0x73   : > { %v632_v45 = vsel %vm624_vm5, %v1051_v13, 0.0  ;;  %vm656_vm13 = vmand %vm1582_vm7, %vm1615_vm14  ;;  %v562_v55 = vmax.f32 %v554_v23, 0.0  ;;  %v491_v48 = vadd.f32 0.5, %v483_v38  ;;  %v531_v10 = vmul.f32 0.11111111, %v475_v24  ;;  %v415_v24 = vld [vmem:[#allocation2 + $0x92] sm:$0xff] }
  0x74   : > { %v695_v2 = vadd.f32 %v687_v4, %v671_v8  ;;  %v640_v14 = vadd.f32 %v632_v45, %v600_v62  ;;  %v664_v53 = vsel %vm656_vm13, %v1057_v15, 0.0  ;;  %vm680_vm6 = vmand %vm1582_vm7, %vm1619_vm1  ;;  %vm1698_vm11 = vcmp.eq.f32.partialorder %v522_v12, 0.0  ;;  %v1990_v8 = vld [vmem:[#allocation10_spill] sm:$0xff] }
  0x75   : > { %v688_v43 = vsel %vm680_vm6, %v1097_v26, 0.0  ;;  %vm593_vm14 = vmand %vm1604_vm8, %vm1641_vm10  ;;  %v570_v1 = vmin.f32 %v562_v55, 1.0  ;;  %vm1707_vm9 = vcmp.eq.f32.partialorder %v522_v12, 1.0  ;;  %v499_v15 = vadd.f32 0.5, %v491_v48  ;;  %v435_v48 = vld [vmem:[#allocation3 + $0x92] sm:$0xff] }
  0x76   : > { %703 = vst.msk [vmem:[%s1676_s25 + $0x8] sm:$0xff] %vm286_vm0, %v695_v2  ;;  %v672_v42 = vadd.f32 %v664_v53, %v640_v14  ;;  %v601_v16 = vsel %vm593_vm14, %v1062_v17, 0.0  ;;  %vm625_vm7 = vmand %vm1604_vm8, %vm1645_vm3  ;;  %v539_v26 = vadd.f32 0.5, %v531_v10  ;;  %v444_v61 = vadd.f32 %v434_v59, %v404_v25 }
  0x77   : > { %v633_v46 = vsel %vm625_vm7, %v1065_v18, 0.0  ;;  %vm657_vm1 = vmand %vm1632_vm12, %vm1641_vm10  ;;  %vm1723_vm2 = vcmp.eq.f32.partialorder %v570_v1, 0.0  ;;  %vm1727_vm4 = vcmp.eq.f32.partialorder %v570_v1, 1.0  ;;  %v507_v33 = vfloor.f32 %v499_v15 }
  0x78   : > { %v696_v7 = vadd.f32 %v688_v43, %v672_v42  ;;  %v641_v57 = vadd.f32 %v633_v46, %v601_v16  ;;  %v665_v18 = vsel %vm657_vm1, %v1100_v27, 0.0  ;;  %vm681_vm8 = vmand %vm1632_vm12, %vm1645_vm3  ;;  %v547_v3 = vadd.f32 0.5, %v539_v26 }
  0x79   : > { %v689_v49 = vsel %vm681_vm8, %v1125_v32, 0.0  ;;  %vm594_vm10 = vmand %vm1698_vm11, %vm1723_vm2  ;;  %v515_v30 = vmax.f32 %v507_v33, 0.0  ;;  %v452_v5 = vadd.f32 %v1545_v63, %v1537_v19  ;;  %v460_v27 = vadd.f32 %v1608_v47, %v1567_v11 }
  0x7a   : > { %704 = vst.msk [vmem:[%s1676_s25 + $0x10] sm:$0xff] %vm286_vm0, %v696_v7  ;;  %v673_v31 = vadd.f32 %v665_v18, %v641_v57  ;;  %v602_v44 = vsel %vm594_vm10, %v1073_v20, 0.0  ;;  %vm626_vm12 = vmand %vm1698_vm11, %vm1727_vm4  ;;  %v555_v32 = vfloor.f32 %v547_v3  ;;  %v385_v25 = vadd.f32 %v375_v52, %v355_v37  ;;  %v365_v20 = vld [vmem:[#allocation3 + $0x90] sm:$0xff] }
  0x7b   : > { %v634_v0 = vsel %vm626_vm12, %v1076_v21, 0.0  ;;  %vm658_vm3 = vmand %vm1707_vm9, %vm1723_vm2  ;;  %v523_v19 = vmin.f32 %v515_v30, 1.0  ;;  %v468_v11 = vadd.f32 %v452_v5, %v1686_v60  ;;  %v476_v22 = vadd.f32 %v460_v27, %v444_v61 }
  0x7c   : > { %v697_v6 = vadd.f32 %v689_v49, %v673_v31  ;;  %v642_v4 = vadd.f32 %v634_v0, %v602_v44  ;;  %v666_v23 = vsel %vm658_vm3, %v1103_v28, 0.0  ;;  %vm682_vm15 = vmand %vm1707_vm9, %vm1727_vm4  ;;  %v563_v21 = vmax.f32 %v555_v32, 0.0 }
  0x7d   : > { %v690_v38 = vsel %vm682_vm15, %v1129_v34, 0.0  ;;  %vm1764_vm5 = vcmp.eq.f32.partialorder %v523_v19, 0.0  ;;  %vm1768_vm13 = vcmp.eq.f32.partialorder %v523_v19, 1.0  ;;  %v484_v62 = vmul.f32 0.11111111, %v468_v11 }
  0x7e   : > { %705 = vst.msk [vmem:[%s1676_s25 + $0x18] sm:$0xff] %vm286_vm0, %v697_v6  ;;  %v674_v28 = vadd.f32 %v666_v23, %v642_v4  ;;  %v571_v12 = vmin.f32 %v563_v21, 1.0  ;;  %v532_v45 = vmul.f32 0.11111111, %v476_v22  ;;  %v405_v55 = vadd.f32 %v395_v29, %v365_v20  ;;  %v1987_v4 = vld [vmem:[#allocation7_spill] sm:$0xff] }
  0x7f   : > { %v492_v10 = vadd.f32 0.5, %v484_v62  ;;  %v425_v2 = vadd.f32 %v415_v24, %v385_v25  ;;  %v453_v34 = vadd.f32 %v1686_v60, %v1545_v63  ;;  %v461_v14 = vadd.f32 %v444_v61, %v1608_v47  ;;  %v1989_v24 = vld [vmem:[#allocation9_spill] sm:$0xff] }
  0x80   : > { %v698_v53 = vadd.f32 %v690_v38, %v674_v28  ;;  %vm1777_vm6 = vcmp.eq.f32.partialorder %v571_v12, 0.0  ;;  %vm1781_vm11 = vcmp.eq.f32.partialorder %v571_v12, 1.0  ;;  %v540_v1 = vadd.f32 0.5, %v532_v45 }
  0x81   : > { %vm595_vm14 = vmand %vm1764_vm5, %vm1777_vm6  ;;  %v500_v56 = vadd.f32 0.5, %v492_v10  ;;  %v445_v15 = vadd.f32 %v435_v48, %v405_v55  ;;  %v469_v63 = vadd.f32 %v453_v34, %v425_v2 }
  0x82   : > { %706 = vst.msk [vmem:[%s1676_s25 + $0x20] sm:$0xff] %vm286_vm0, %v698_v53  ;;  %v603_v47 = vsel %vm595_vm14, %v1135_v36, 0.0  ;;  %vm627_vm9 = vmand %vm1764_vm5, %vm1781_vm11  ;;  %v548_v60 = vadd.f32 0.5, %v540_v1 }
  0x83   : > { %v635_v59 = vsel %vm627_vm9, %v1152_v39, 0.0  ;;  %vm659_vm7 = vmand %vm1768_vm13, %vm1777_vm6  ;;  %v508_v42 = vfloor.f32 %v500_v56  ;;  %v477_v16 = vadd.f32 %v461_v14, %v445_v15  ;;  %v485_v26 = vmul.f32 0.11111111, %v469_v63 }
  0x84   : > { %v643_v61 = vadd.f32 %v635_v59, %v603_v47  ;;  %vm683_vm1 = vmand %vm1768_vm13, %vm1781_vm11  ;;  %v556_v36 = vfloor.f32 %v548_v60  ;;  %v667_v46 = vsel %vm659_vm7, %v1199_v50, 0.0 }
  0x85   : > { %v516_v9 = vmax.f32 %v508_v42, 0.0  ;;  %v493_v39 = vadd.f32 0.5, %v485_v26  ;;  %v533_v17 = vmul.f32 0.11111111, %v477_v16  ;;  %v691_v52 = vsel %vm683_vm1, %v1217_v54, 0.0 }
  0x86   : > { %v675_v33 = vadd.f32 %v667_v46, %v643_v61  ;;  %v564_v37 = vmax.f32 %v556_v36, 0.0 }
  0x87   : > { %v524_v7 = vmin.f32 %v516_v9, 1.0  ;;  %v501_v57 = vadd.f32 0.5, %v493_v39  ;;  %v541_v18 = vadd.f32 0.5, %v533_v17 }
  0x88   : > { %v699_v3 = vadd.f32 %v691_v52, %v675_v33  ;;  %v572_v49 = vmin.f32 %v564_v37, 1.0 }
  0x89   : > { %vm580_vm2 = vcmp.eq.f32.partialorder %v524_v7, 0.0  ;;  %v509_v30 = vfloor.f32 %v501_v57  ;;  %v549_v5 = vadd.f32 0.5, %v541_v18  ;;  %vm1813_vm10 = vcmp.eq.f32.partialorder %v524_v7, 1.0 }
  0x8a   : > { %707 = vst.msk [vmem:[%s1676_s25 + $0x28] sm:$0xff] %vm286_vm0, %v699_v3  ;;  %vm588_vm4 = vcmp.eq.f32.partialorder %v572_v49, 0.0  ;;  %vm1809_vm8 = vcmp.eq.f32.partialorder %v572_v49, 1.0 }
  0x8b   : > { %vm596_vm12 = vmand %vm580_vm2, %vm588_vm4  ;;  %v517_v54 = vmax.f32 %v509_v30, 0.0  ;;  %v557_v31 = vfloor.f32 %v549_v5 }
  0x8c   : > { %v604_v44 = vsel %vm596_vm12, %v1155_v40, 0.0  ;;  %vm628_vm3 = vmand %vm580_vm2, %vm1809_vm8 }
  0x8d   : > { %v636_v32 = vsel %vm628_vm3, %v1158_v41, 0.0  ;;  %vm660_vm15 = vmand %vm1813_vm10, %vm588_vm4  ;;  %v525_v25 = vmin.f32 %v517_v54, 1.0  ;;  %v565_v0 = vmax.f32 %v557_v31, 0.0 }
  0x8e   : > { %v644_v19 = vadd.f32 %v636_v32, %v604_v44  ;;  %vm684_vm5 = vmand %vm1813_vm10, %vm1809_vm8  ;;  %v668_v11 = vsel %vm660_vm15, %v1202_v51, 0.0 }
  0x8f   : > { %v573_v40 = vmin.f32 %v565_v0, 1.0  ;;  %vm581_vm13 = vcmp.eq.f32.partialorder %v525_v25, 0.0  ;;  %v692_v41 = vsel %vm684_vm5, %v1234_v58, 0.0  ;;  %vm1834_vm14 = vcmp.eq.f32.partialorder %v525_v25, 1.0  ;;  %v1988_v58 = vld [vmem:[#allocation8_spill] sm:$0xff] }
  0x90   : > { %v676_v22 = vadd.f32 %v668_v11, %v644_v19 }
  0x91   : > { %vm589_vm6 = vcmp.eq.f32.partialorder %v573_v40, 0.0  ;;  %vm1830_vm11 = vcmp.eq.f32.partialorder %v573_v40, 1.0 }
  0x92   : > { %v700_v6 = vadd.f32 %v692_v41, %v676_v22  ;;  %vm597_vm9 = vmand %vm581_vm13, %vm589_vm6 }
  0x93   : > { %v605_v51 = vsel %vm597_vm9, %v1987_v4, 0.0  ;;  %vm629_vm7 = vmand %vm581_vm13, %vm1830_vm11 }
  0x94   : > { %708 = vst.msk [vmem:[%s1676_s25 + $0x30] sm:$0xff] %vm286_vm0, %v700_v6  ;;  %v637_v23 = vsel %vm629_vm7, %v1988_v58, 0.0  ;;  %vm661_vm1 = vmand %vm1834_vm14, %vm589_vm6 }
  0x95   : > { %v645_v21 = vadd.f32 %v637_v23, %v605_v51  ;;  %vm685_vm2 = vmand %vm1834_vm14, %vm1830_vm11  ;;  %v669_v38 = vsel %vm661_vm1, %v1989_v24, 0.0 }
  0x96   : > { %v693_v62 = vsel %vm685_vm2, %v1990_v8, 0.0 }
  0x97   : > { %v677_v35 = vadd.f32 %v669_v38, %v645_v21 }
  0x99   : > { %v701_v28 = vadd.f32 %v693_v62, %v677_v35 }
  0x9b   : > { %709 = vst.msk [vmem:[%s1676_s25 + $0x38] sm:$0xff] %vm286_vm0, %v701_v28 }
  0x9c   : > { %895 = shalt.err (!%p892_p3)
}
  0x9d   : > { %s933_s19 = smov 128   ;;  %s934_s20 = smov 8  }
  0x9e   : > { %826 = dma.vmem_to_hbm [thread:$0]  (%p983_p5), %s724_s30, 1024, %s726_s2, %s711_s3, %s933_s19, %s933_s19, %s934_s20  }
  0x9f PF: > { %p832_p4 = scmp.ge.s32.totalorder %s930_s9, 2  ;;  %s740_s21 = sand.u32 1, %s918_s6  }
  0xa0   : > { %s741_s22 = scalar_lea.sflag [#allocation5], %s740_s21 }
  0xa1   : > { %p829_p7 = pnand %p832_p4, %p987_p6 }
  0xa3   : > { %p830_p8 = pneg %p829_p7 }
  0xa5   : > { %913 = dma.done.wait (%p830_p8), %s741_s22, 1024  }
  0xa6   : > { %915 = vsyncadd (%p830_p8), %s741_s22, 4294966272  ;;  %p11_p9 = scmp.ge.s32.totalorder %s970_s12, 4   ;;  %s1991_s6 = smov %s922_s7 }
  0xa7   : > { %s1992_s7 = smov %s926_s8  ;;  %s1993_s8 = smov %s981_s15 }
  0xa8   : > { %s1994_s9 = smov %s970_s12  ;;  %13 = sbr.rel (!%p11_p9) target bundleno = 3 (0x3), region = 64 }
  0xad   :  { %747 = vsyncpa [#allocation5], 1 }
  0xae   :  { %749 = vsyncpa [#allocation5 + $0x1], 1 }

// kernel: forward.2
= control target key start
LH: loop header
LB: loop body
LE: loop exit
PB: predicated region body
PF: predicated region fallthrough
CT: control target
= control target key end

     0   :  { %s5770_s18 = smov 0   ;;  %s8255_s0 = inlined_call_operand.vmem [shape: f32[2,18,18,1], index: 0, kind: input, shape index: {}]   ;;  %s8256_s1 = inlined_call_operand.vmem [shape: f32[9,1,64], index: 1, kind: input, shape index: {}]   ;;  %s8257_s2 = inlined_call_operand.vmem [shape: f32[1,64], index: 2, kind: input, shape index: {}]   ;;  %s8258_s3 = inlined_call_operand.vmem [shape: bf16[9,64,64], index: 3, kind: input, shape index: {}]   ;;  %s8259_s4 = inlined_call_operand.vmem [shape: f32[1,64], index: 4, kind: input, shape index: {}]   ;;  %s8260_s5 = inlined_call_operand.vmem [shape: f32[2,256,64], index: 5, kind: output, shape index: {}]  }
   0x1 LB: > { %s5074_s19 = sadd.s32 4294967295, %s5736_s18   ;;  %p5078_p0 = scmp.ge.s32.totalorder %s5736_s18, 1  ;;  %s5736_s18 = sphi %s5770_s18, %s15_s18  }
   0x2   : > { %p187_p1 = scmp.lt.s32.totalorder %s5736_s18, 3 }
   0x4   : > { %p188_p2 = pnand %p5078_p0, %p187_p1 }
   0x6   : > { %191 = sbr.rel (%p188_p2) target bundleno = 1549 (0x60d), region = 40 }
   0xb   : > { %p215_p3 = scmp.lt.s32.totalorder %s5074_s19, 1  ;;  %v5738_v0 = vmov 0   ;;  %vm2644_vm0 = vcmask 523264   ;;  %vm2647_vm1 = vcmask 517120  }
   0xc   : > { %5698 = vset.pattern.permute.xlu2 %v5738_v0  ;;  %5697 = vset.pattern.permute.xlu1 %v5738_v0 }
   0xd   : > { %5696 = vset.pattern.permute.xlu0 %v5738_v0  ;;  %s8616_s19 = smov (!%p215_p3, %s5074_s19), 1 }
   0xe   : > { %s5685_s20 = smul.u32 432, %s8616_s19  ;;  %s5636_s21 = sshll.u32 %s8616_s19, 8 }
   0xf   : > { %s8094_s25 = scalar_lea.vmem %s8260_s5, %s5636_s21 }
  0x10   : > { %s5784_s23 = scalar_lea.vmem %s8255_s0, %s5685_s20 }
  0x11   : > { %v5787_v1 = vld [vmem:[%s5784_s23 + $0x30] sm:$0xff]  ;;  %v5790_v2 = vld [vmem:[%s5784_s23 + $0x18] sm:$0xff]  ;;  %v226_v3 = vld [vmem:[%s5784_s23] sm:$0xff] }
  0x12   : > { %281 = vperm.xlu2 %5698, %v5787_v1   ;;  %271 = vperm.xlu1 %5697, %v5790_v2   ;;  %v5796_v4 = vld [vmem:[%s5784_s23 + $0x38] sm:$0xff]  ;;  %v5799_v5 = vld [vmem:[%s5784_s23 + $0x20] sm:$0xff]  ;;  %v227_v6 = vld [vmem:[%s5784_s23 + $0x8] sm:$0xff] }
  0x13   : > { %261 = vperm.xlu0 %5696, %v226_v3   ;;  %v5805_v7 = vld [vmem:[%s5784_s23 + $0x60] sm:$0xff]  ;;  %v5808_v8 = vld [vmem:[%s5784_s23 + $0x50] sm:$0xff]  ;;  %v5811_v9 = vld [vmem:[%s5784_s23 + $0x48] sm:$0xff] }
  0x14   : > { %v5817_v10 = vld [vmem:[%s5784_s23 + $0x80] sm:$0xff]  ;;  %v5820_v11 = vld [vmem:[%s5784_s23 + $0x78] sm:$0xff]  ;;  %v5823_v12 = vld [vmem:[%s5784_s23 + $0x68] sm:$0xff] }
  0x15   : > { %v5829_v13 = vld [vmem:[%s5784_s23 + $0xa8] sm:$0xff]  ;;  %v5832_v14 = vld [vmem:[%s5784_s23 + $0x98] sm:$0xff]  ;;  %v5835_v15 = vld [vmem:[%s5784_s23 + $0x90] sm:$0xff] }
  0x16   : > { %v5841_v16 = vld [vmem:[%s5784_s23 + $0xc8] sm:$0xff]  ;;  %v5844_v17 = vld [vmem:[%s5784_s23 + $0xc0] sm:$0xff]  ;;  %v5847_v18 = vld [vmem:[%s5784_s23 + $0xb0] sm:$0xff] }
  0x17   : > { %v5853_v19 = vld [vmem:[%s5784_s23 + $0xf0] sm:$0xff]  ;;  %v5856_v20 = vld [vmem:[%s5784_s23 + $0xe0] sm:$0xff]  ;;  %v5859_v21 = vld [vmem:[%s5784_s23 + $0xd8] sm:$0xff] }
  0x18   : > { %v5865_v22 = vld [vmem:[%s5784_s23 + $0x110] sm:$0xff]  ;;  %v5868_v23 = vld [vmem:[%s5784_s23 + $0x108] sm:$0xff]  ;;  %v5871_v24 = vld [vmem:[%s5784_s23 + $0xf8] sm:$0xff] }
  0x19   : > { %v5877_v25 = vld [vmem:[%s5784_s23 + $0x138] sm:$0xff]  ;;  %v5880_v26 = vld [vmem:[%s5784_s23 + $0x128] sm:$0xff]  ;;  %v5883_v27 = vld [vmem:[%s5784_s23 + $0x120] sm:$0xff] }
  0x1a   : > { %286 = vperm.xlu2 %5698, %v5796_v4   ;;  %276 = vperm.xlu1 %5697, %v5799_v5   ;;  %v5889_v28 = vld [vmem:[%s5784_s23 + $0x158] sm:$0xff]  ;;  %v5892_v29 = vld [vmem:[%s5784_s23 + $0x150] sm:$0xff]  ;;  %v5895_v30 = vld [vmem:[%s5784_s23 + $0x140] sm:$0xff] }
  0x1b   : > { %266 = vperm.xlu0 %5696, %v227_v6   ;;  %v486_v31 = vld [vmem:[%s5784_s23 + $0x1] sm:$0xff]  ;;  %v5902_v32 = vld [vmem:[%s5784_s23 + $0x170] sm:$0xff]  ;;  %v5913_v35 = vld [vmem:[%s5784_s23 + $0x19] sm:$0xff] }
  0x1c   : > { %v5905_v33 = vld [vmem:[%s5784_s23 + $0x168] sm:$0xff]  ;;  %v5924_v39 = vld [vmem:[%s5784_s23 + $0x39] sm:$0xff]  ;;  %v5927_v40 = vld [vmem:[%s5784_s23 + $0x31] sm:$0xff] }
  0x1d   : > { %v5910_v34 = vld [vmem:[%s5784_s23 + $0x21] sm:$0xff]  ;;  %v487_v36 = vld [vmem:[%s5784_s23 + $0x9] sm:$0xff]  ;;  %v5941_v44 = vld [vmem:[%s5784_s23 + $0x51] sm:$0xff] }
  0x1e   : > { %v5921_v38 = vld [vmem:[%s5784_s23 + $0x49] sm:$0xff]  ;;  %v5938_v43 = vld [vmem:[%s5784_s23 + $0x61] sm:$0xff]  ;;  %v5949_v46 = vld [vmem:[%s5784_s23 + $0x91] sm:$0xff] }
  0x1f   : > { %v5935_v42 = vld [vmem:[%s5784_s23 + $0x69] sm:$0xff]  ;;  %v5952_v47 = vld [vmem:[%s5784_s23 + $0x81] sm:$0xff]  ;;  %v5955_v48 = vld [vmem:[%s5784_s23 + $0x79] sm:$0xff] }
  0x20   : > { %v5967_v52 = vld [vmem:[%s5784_s23 + $0xb1] sm:$0xff]  ;;  %v5970_v53 = vld [vmem:[%s5784_s23 + $0xa9] sm:$0xff]  ;;  %v5973_v54 = vld [vmem:[%s5784_s23 + $0x99] sm:$0xff] }
  0x21   : > { %v5985_v58 = vld [vmem:[%s5784_s23 + $0xd9] sm:$0xff]  ;;  %v5988_v59 = vld [vmem:[%s5784_s23 + $0xc9] sm:$0xff]  ;;  %v5991_v60 = vld [vmem:[%s5784_s23 + $0xc1] sm:$0xff] }
  0x22   : > { %301 = vperm.xlu2 %5698, %v5805_v7   ;;  %296 = vperm.xlu1 %5697, %v5808_v8   ;;  %v6003_v0 = vld [vmem:[%s5784_s23 + $0xf9] sm:$0xff]  ;;  %v6006_v3 = vld [vmem:[%s5784_s23 + $0xf1] sm:$0xff]  ;;  %v6009_v6 = vld [vmem:[%s5784_s23 + $0xe1] sm:$0xff] }
  0x23   : > { %291 = vperm.xlu0 %5696, %v5811_v9  }
  0x2a   : > { %316 = vperm.xlu2 %5698, %v5817_v10   ;;  %311 = vperm.xlu1 %5697, %v5820_v11  }
  0x2b   : > { %306 = vperm.xlu0 %5696, %v5823_v12  }
  0x32   : > { %331 = vperm.xlu2 %5698, %v5829_v13   ;;  %326 = vperm.xlu1 %5697, %v5832_v14  }
  0x33   : > { %321 = vperm.xlu0 %5696, %v5835_v15  }
  0x3a   : > { %346 = vperm.xlu2 %5698, %v5841_v16   ;;  %341 = vperm.xlu1 %5697, %v5844_v17  }
  0x3b   : > { %336 = vperm.xlu0 %5696, %v5847_v18  }
  0x42   : > { %361 = vperm.xlu2 %5698, %v5853_v19   ;;  %356 = vperm.xlu1 %5697, %v5856_v20  }
  0x43   : > { %351 = vperm.xlu0 %5696, %v5859_v21  }
  0x4a   : > { %376 = vperm.xlu2 %5698, %v5865_v22   ;;  %371 = vperm.xlu1 %5697, %v5868_v23  }
  0x4b   : > { %366 = vperm.xlu0 %5696, %v5871_v24  }
  0x52   : > { %391 = vperm.xlu2 %5698, %v5877_v25   ;;  %386 = vperm.xlu1 %5697, %v5880_v26  }
  0x53   : > { %381 = vperm.xlu0 %5696, %v5883_v27  }
  0x5a   : > { %406 = vperm.xlu2 %5698, %v5889_v28   ;;  %401 = vperm.xlu1 %5697, %v5892_v29  }
  0x5b   : > { %396 = vperm.xlu0 %5696, %v5895_v30  }
  0x62   : > { %522 = vperm.xlu2 %5698, %v486_v31   ;;  %416 = vperm.xlu1 %5697, %v5902_v32  }
  0x63   : > { %411 = vperm.xlu0 %5696, %v5905_v33  }
  0x6a   : > { %537 = vperm.xlu2 %5698, %v5910_v34   ;;  %532 = vperm.xlu1 %5697, %v5913_v35  }
  0x6b   : > { %527 = vperm.xlu0 %5696, %v487_v36  }
  0x6c   : > { %v5918_v37 = vpop.permute.xlu2 %281 }
  0x6d   : > { %8282 = vst [vmem:[#allocation3_spill] sm:$0xff] %v5918_v37  ;;  %v6021_v37 = vld [vmem:[%s5784_s23 + $0x121] sm:$0xff] }
  0x6e   : > { %8297 = vst [vmem:[#allocation18_spill] sm:$0xff] %v6021_v37 }
  0x72   : > { %552 = vperm.xlu2 %5698, %v5921_v38   ;;  %547 = vperm.xlu1 %5697, %v5924_v39  }
  0x73   : > { %542 = vperm.xlu0 %5696, %v5927_v40  }
  0x74   : > { %v5932_v41 = vpop.permute.xlu2 %286 }
  0x75   : > { %8283 = vst [vmem:[#allocation4_spill] sm:$0xff] %v5932_v41 }
  0x7a   : > { %567 = vperm.xlu2 %5698, %v5935_v42   ;;  %562 = vperm.xlu1 %5697, %v5938_v43  }
  0x7b   : > { %557 = vperm.xlu0 %5696, %v5941_v44  }
  0x7c   : > { %v5946_v45 = vpop.permute.xlu2 %301 }
  0x7d   : > { %8284 = vst [vmem:[#allocation5_spill] sm:$0xff] %v5946_v45  ;;  %v6045_v45 = vld [vmem:[%s5784_s23 + $0x129] sm:$0xff] }
  0x7e   : > { %8302 = vst [vmem:[#allocation23_spill] sm:$0xff] %v6045_v45 }
  0x82   : > { %582 = vperm.xlu2 %5698, %v5949_v46   ;;  %577 = vperm.xlu1 %5697, %v5952_v47  }
  0x83   : > { %572 = vperm.xlu0 %5696, %v5955_v48  }
  0x84   : > { %v5960_v49 = vpop.permute.xlu2 %316  ;;  %v5962_v50 = vpop.permute.xlu1 %271 }
  0x85   : > { %8285 = vst [vmem:[#allocation6_spill] sm:$0xff] %v5960_v49  ;;  %v5964_v51 = vpop.permute.xlu0 %261 }
  0x86   : > { %8286 = vst [vmem:[#allocation7_spill] sm:$0xff] %v5962_v50  ;;  %v6027_v50 = vld [vmem:[%s5784_s23 + $0x109] sm:$0xff] }
  0x87   : > { %8287 = vst [vmem:[#allocation8_spill] sm:$0xff] %v5964_v51  ;;  %v6042_v51 = vld [vmem:[%s5784_s23 + $0x139] sm:$0xff] }
  0x8a   : > { %597 = vperm.xlu2 %5698, %v5967_v52   ;;  %592 = vperm.xlu1 %5697, %v5970_v53  }
  0x8b   : > { %587 = vperm.xlu0 %5696, %v5973_v54  }
  0x8c   : > { %v5978_v55 = vpop.permute.xlu2 %331  ;;  %v5980_v56 = vpop.permute.xlu1 %276 }
  0x8d   : > { %8288 = vst [vmem:[#allocation9_spill] sm:$0xff] %v5978_v55  ;;  %v5982_v57 = vpop.permute.xlu0 %266  ;;  %v748_v55 = vld [vmem:[%s5784_s23 + $0xa] sm:$0xff] }
  0x8e   : > { %8289 = vst [vmem:[#allocation10_spill] sm:$0xff] %v5980_v56  ;;  %v6024_v56 = vld [vmem:[%s5784_s23 + $0x111] sm:$0xff] }
  0x8f   : > { %8290 = vst [vmem:[#allocation11_spill] sm:$0xff] %v5982_v57  ;;  %v6039_v57 = vld [vmem:[%s5784_s23 + $0x141] sm:$0xff] }
  0x90   : > { %8301 = vst [vmem:[#allocation22_spill] sm:$0xff] %v6039_v57 }
  0x92   : > { %612 = vperm.xlu2 %5698, %v5985_v58   ;;  %607 = vperm.xlu1 %5697, %v5988_v59  }
  0x93   : > { %602 = vperm.xlu0 %5696, %v5991_v60  }
  0x94   : > { %v5996_v61 = vpop.permute.xlu2 %346  ;;  %v5998_v62 = vpop.permute.xlu1 %296 }
  0x95   : > { %8291 = vst [vmem:[#allocation12_spill] sm:$0xff] %v5996_v61  ;;  %v6000_v63 = vpop.permute.xlu0 %291 }
  0x96   : > { %8292 = vst [vmem:[#allocation13_spill] sm:$0xff] %v5998_v62  ;;  %v6060_v62 = vld [vmem:[%s5784_s23 + $0x159] sm:$0xff] }
  0x97   : > { %8293 = vst [vmem:[#allocation14_spill] sm:$0xff] %v6000_v63  ;;  %v6063_v63 = vld [vmem:[%s5784_s23 + $0x151] sm:$0xff] }
  0x98   : > { %8307 = vst [vmem:[#allocation28_spill] sm:$0xff] %v6060_v62 }
  0x99   : > { %8308 = vst [vmem:[#allocation29_spill] sm:$0xff] %v6063_v63 }
  0x9a   : > { %627 = vperm.xlu2 %5698, %v6003_v0   ;;  %622 = vperm.xlu1 %5697, %v6006_v3  }
  0x9b   : > { %617 = vperm.xlu0 %5696, %v6009_v6  }
  0x9c   : > { %v6014_v31 = vpop.permute.xlu2 %361  ;;  %v6016_v36 = vpop.permute.xlu1 %311 }
  0x9d   : > { %8294 = vst [vmem:[#allocation15_spill] sm:$0xff] %v6014_v31  ;;  %v6018_v41 = vpop.permute.xlu0 %306 }
  0x9e   : > { %8295 = vst [vmem:[#allocation16_spill] sm:$0xff] %v6016_v36 }
  0x9f   : > { %8296 = vst [vmem:[#allocation17_spill] sm:$0xff] %v6018_v41 }
  0xa2   : > { %642 = vperm.xlu2 %5698, %v6021_v37   ;;  %637 = vperm.xlu1 %5697, %v6024_v56   ;;  %v753_v37 = vld [vmem:[%s5784_s23 + $0x4a] sm:$0xff] }
  0xa3   : > { %632 = vperm.xlu0 %5696, %v6027_v50  }
  0xa4   : > { %v6032_v31 = vpop.permute.xlu2 %376  ;;  %v6034_v36 = vpop.permute.xlu1 %326 }
  0xa5   : > { %8298 = vst [vmem:[#allocation19_spill] sm:$0xff] %v6032_v31  ;;  %v6036_v49 = vpop.permute.xlu0 %321  ;;  %v6057_v31 = vld [vmem:[%s5784_s23 + $0x169] sm:$0xff] }
  0xa6   : > { %8299 = vst [vmem:[#allocation20_spill] sm:$0xff] %v6034_v36 }
  0xa7   : > { %8300 = vst [vmem:[#allocation21_spill] sm:$0xff] %v6036_v49 }
  0xa8   : > { %8306 = vst [vmem:[#allocation27_spill] sm:$0xff] %v6057_v31 }
  0xaa   : > { %657 = vperm.xlu2 %5698, %v6039_v57   ;;  %652 = vperm.xlu1 %5697, %v6042_v51   ;;  %v6077_v57 = vld [vmem:[%s5784_s23 + $0x171] sm:$0xff] }
  0xab   : > { %647 = vperm.xlu0 %5696, %v6045_v45   ;;  %8312 = vst [vmem:[#allocation33_spill] sm:$0xff] %v6077_v57 }
  0xac   : > { %v6050_v41 = vpop.permute.xlu2 %391  ;;  %v6052_v36 = vpop.permute.xlu1 %341 }
  0xad   : > { %8303 = vst [vmem:[#allocation24_spill] sm:$0xff] %v6050_v41  ;;  %v6054_v49 = vpop.permute.xlu0 %336 }
  0xae   : > { %8304 = vst [vmem:[#allocation25_spill] sm:$0xff] %v6052_v36 }
  0xaf   : > { %8305 = vst [vmem:[#allocation26_spill] sm:$0xff] %v6054_v49  ;;  %v747_v49 = vld [vmem:[%s5784_s23 + $0x2] sm:$0xff] }
  0xb2   : > { %672 = vperm.xlu2 %5698, %v6057_v31   ;;  %667 = vperm.xlu1 %5697, %v6060_v62   ;;  %v750_v62 = vld [vmem:[%s5784_s23 + $0x22] sm:$0xff] }
  0xb3   : > { %662 = vperm.xlu0 %5696, %v6063_v63  }
  0xb4   : > { %v6068_v41 = vpop.permute.xlu2 %406  ;;  %v6070_v36 = vpop.permute.xlu1 %356 }
  0xb5   : > { %8309 = vst [vmem:[#allocation30_spill] sm:$0xff] %v6068_v41  ;;  %v6072_v61 = vpop.permute.xlu0 %351 }
  0xb6   : > { %8310 = vst [vmem:[#allocation31_spill] sm:$0xff] %v6070_v36  ;;  %v751_v36 = vld [vmem:[%s5784_s23 + $0x32] sm:$0xff] }
  0xb7   : > { %8311 = vst [vmem:[#allocation32_spill] sm:$0xff] %v6072_v61  ;;  %v749_v61 = vld [vmem:[%s5784_s23 + $0x1a] sm:$0xff] }
  0xba   : > { %788 = vperm.xlu2 %5698, %v748_v55   ;;  %783 = vperm.xlu1 %5697, %v747_v49  }
  0xbb   : > { %677 = vperm.xlu0 %5696, %v6077_v57  }
  0xbc   : > { %v6080_v31 = vpop.permute.xlu2 %522  ;;  %v6082_v63 = vpop.permute.xlu1 %371 }
  0xbd   : > { %8313 = vst [vmem:[#allocation34_spill] sm:$0xff] %v6080_v31  ;;  %v6084_v41 = vpop.permute.xlu0 %366  ;;  %v754_v31 = vld [vmem:[%s5784_s23 + $0x52] sm:$0xff] }
  0xbe   : > { %8314 = vst [vmem:[#allocation35_spill] sm:$0xff] %v6082_v63  ;;  %v752_v63 = vld [vmem:[%s5784_s23 + $0x3a] sm:$0xff] }
  0xbf   : > { %8315 = vst [vmem:[#allocation36_spill] sm:$0xff] %v6084_v41  ;;  %v757_v41 = vld [vmem:[%s5784_s23 + $0x7a] sm:$0xff] }
  0xc2   : > { %803 = vperm.xlu2 %5698, %v751_v36   ;;  %798 = vperm.xlu1 %5697, %v750_v62  }
  0xc3   : > { %793 = vperm.xlu0 %5696, %v749_v61  }
  0xc4   : > { %v6089_v55 = vpop.permute.xlu2 %537  ;;  %v6091_v49 = vpop.permute.xlu1 %386 }
  0xc5   : > { %8316 = vst [vmem:[#allocation37_spill] sm:$0xff] %v6089_v55  ;;  %v6093_v57 = vpop.permute.xlu0 %381  ;;  %v6106_v55 = vld [vmem:[%s5784_s23 + $0x6a] sm:$0xff] }
  0xc6   : > { %8317 = vst [vmem:[#allocation38_spill] sm:$0xff] %v6091_v49  ;;  %v6109_v49 = vld [vmem:[%s5784_s23 + $0x62] sm:$0xff] }
  0xc7   : > { %8318 = vst [vmem:[#allocation39_spill] sm:$0xff] %v6093_v57  ;;  %v758_v57 = vld [vmem:[%s5784_s23 + $0x82] sm:$0xff] }
  0xc8   : > { %8322 = vst [vmem:[#allocation43_spill] sm:$0xff] %v6106_v55 }
  0xc9   : > { %8323 = vst [vmem:[#allocation44_spill] sm:$0xff] %v6109_v49 }
  0xca   : > { %818 = vperm.xlu2 %5698, %v754_v31   ;;  %813 = vperm.xlu1 %5697, %v753_v37  }
  0xcb   : > { %808 = vperm.xlu0 %5696, %v752_v63  }
  0xcc   : > { %v6098_v36 = vpop.permute.xlu2 %552  ;;  %v6100_v62 = vpop.permute.xlu1 %401 }
  0xcd   : > { %8319 = vst [vmem:[#allocation40_spill] sm:$0xff] %v6098_v36  ;;  %v6102_v61 = vpop.permute.xlu0 %396 }
  0xce   : > { %8320 = vst [vmem:[#allocation41_spill] sm:$0xff] %v6100_v62  ;;  %v760_v62 = vld [vmem:[%s5784_s23 + $0x9a] sm:$0xff] }
  0xcf   : > { %8321 = vst [vmem:[#allocation42_spill] sm:$0xff] %v6102_v61  ;;  %v759_v61 = vld [vmem:[%s5784_s23 + $0x92] sm:$0xff] }
  0xd2   : > { %833 = vperm.xlu2 %5698, %v757_v41   ;;  %828 = vperm.xlu1 %5697, %v6106_v55   ;;  %v761_v55 = vld [vmem:[%s5784_s23 + $0xaa] sm:$0xff] }
  0xd3   : > { %823 = vperm.xlu0 %5696, %v6109_v49  }
  0xd4   : > { %v6113_v37 = vpop.permute.xlu2 %567  ;;  %v6115_v63 = vpop.permute.xlu1 %416 }
  0xd5   : > { %8324 = vst [vmem:[#allocation45_spill] sm:$0xff] %v6113_v37  ;;  %v6117_v31 = vpop.permute.xlu0 %411  ;;  %v6129_v37 = vld [vmem:[%s5784_s23 + $0xc2] sm:$0xff] }
  0xd6   : > { %8325 = vst [vmem:[#allocation46_spill] sm:$0xff] %v6115_v63  ;;  %v762_v63 = vld [vmem:[%s5784_s23 + $0xb2] sm:$0xff] }
  0xd7   : > { %8326 = vst [vmem:[#allocation47_spill] sm:$0xff] %v6117_v31  ;;  %v6141_v31 = vld [vmem:[%s5784_s23 + $0xe2] sm:$0xff] }
  0xd8   : > { %8330 = vst [vmem:[#allocation51_spill] sm:$0xff] %v6129_v37 }
  0xd9   : > { %8334 = vst [vmem:[#allocation55_spill] sm:$0xff] %v6141_v31 }
  0xda   : > { %848 = vperm.xlu2 %5698, %v760_v62   ;;  %843 = vperm.xlu1 %5697, %v759_v61  }
  0xdb   : > { %838 = vperm.xlu0 %5696, %v758_v57  }
  0xdc   : > { %v6122_v41 = vpop.permute.xlu2 %582  ;;  %v6124_v36 = vpop.permute.xlu1 %532 }
  0xdd   : > { %8327 = vst [vmem:[#allocation48_spill] sm:$0xff] %v6122_v41  ;;  %v6126_v49 = vpop.permute.xlu0 %527  ;;  %v6144_v41 = vld [vmem:[%s5784_s23 + $0xda] sm:$0xff] }
  0xde   : > { %8328 = vst [vmem:[#allocation49_spill] sm:$0xff] %v6124_v36  ;;  %v6147_v36 = vld [vmem:[%s5784_s23 + $0xca] sm:$0xff] }
  0xdf   : > { %8329 = vst [vmem:[#allocation50_spill] sm:$0xff] %v6126_v49  ;;  %v768_v49 = vld [vmem:[%s5784_s23 + $0xfa] sm:$0xff] }
  0xe0   : > { %8335 = vst [vmem:[#allocation56_spill] sm:$0xff] %v6144_v41 }
  0xe1   : > { %8336 = vst [vmem:[#allocation57_spill] sm:$0xff] %v6147_v36 }
  0xe2   : > { %863 = vperm.xlu2 %5698, %v6129_v37   ;;  %858 = vperm.xlu1 %5697, %v762_v63  }
  0xe3   : > { %853 = vperm.xlu0 %5696, %v761_v55  }
  0xe4   : > { %v6134_v62 = vpop.permute.xlu2 %597  ;;  %v6136_v57 = vpop.permute.xlu1 %547 }
  0xe5   : > { %8331 = vst [vmem:[#allocation52_spill] sm:$0xff] %v6134_v62  ;;  %v6138_v61 = vpop.permute.xlu0 %542  ;;  %v767_v62 = vld [vmem:[%s5784_s23 + $0xf2] sm:$0xff] }
  0xe6   : > { %8332 = vst [vmem:[#allocation53_spill] sm:$0xff] %v6136_v57 }
  0xe7   : > { %8333 = vst [vmem:[#allocation54_spill] sm:$0xff] %v6138_v61  ;;  %v769_v61 = vld [vmem:[%s5784_s23 + $0x10a] sm:$0xff] }
  0xea   : > { %878 = vperm.xlu2 %5698, %v6141_v31   ;;  %873 = vperm.xlu1 %5697, %v6144_v41  }
  0xeb   : > { %868 = vperm.xlu0 %5696, %v6147_v36   ;;  %v776_v36 = vld [vmem:[%s5784_s23 + $0x15a] sm:$0xff] }
  0xec   : > { %v6152_v55 = vpop.permute.xlu2 %612  ;;  %v6154_v63 = vpop.permute.xlu1 %562 }
  0xed   : > { %8337 = vst [vmem:[#allocation58_spill] sm:$0xff] %v6152_v55  ;;  %v6156_v57 = vpop.permute.xlu0 %557  ;;  %v6168_v55 = vld [vmem:[%s5784_s23 + $0x12a] sm:$0xff] }
  0xee   : > { %8338 = vst [vmem:[#allocation59_spill] sm:$0xff] %v6154_v63  ;;  %v6171_v63 = vld [vmem:[%s5784_s23 + $0x122] sm:$0xff] }
  0xef   : > { %8339 = vst [vmem:[#allocation60_spill] sm:$0xff] %v6156_v57  ;;  %v770_v57 = vld [vmem:[%s5784_s23 + $0x112] sm:$0xff] }
  0xf0   : > { %8343 = vst [vmem:[#allocation64_spill] sm:$0xff] %v6168_v55 }
  0xf1   : > { %8344 = vst [vmem:[#allocation65_spill] sm:$0xff] %v6171_v63 }
  0xf2   : > { %893 = vperm.xlu2 %5698, %v769_v61   ;;  %888 = vperm.xlu1 %5697, %v768_v49  }
  0xf3   : > { %883 = vperm.xlu0 %5696, %v767_v62  }
  0xf4   : > { %v6161_v31 = vpop.permute.xlu2 %627  ;;  %v6163_v41 = vpop.permute.xlu1 %577 }
  0xf5   : > { %8340 = vst [vmem:[#allocation61_spill] sm:$0xff] %v6161_v31  ;;  %v6165_v37 = vpop.permute.xlu0 %572  ;;  %v775_v31 = vld [vmem:[%s5784_s23 + $0x152] sm:$0xff] }
  0xf6   : > { %8341 = vst [vmem:[#allocation62_spill] sm:$0xff] %v6163_v41  ;;  %v6187_v41 = vld [vmem:[%s5784_s23 + $0x13a] sm:$0xff] }
  0xf7   : > { %8342 = vst [vmem:[#allocation63_spill] sm:$0xff] %v6165_v37  ;;  %v6184_v37 = vld [vmem:[%s5784_s23 + $0x142] sm:$0xff] }
  0xfa   : > { %908 = vperm.xlu2 %5698, %v6168_v55   ;;  %903 = vperm.xlu1 %5697, %v6171_v63  }
  0xfb   : > { %898 = vperm.xlu0 %5696, %v770_v57  }
  0xfc   : > { %v6176_v49 = vpop.permute.xlu2 %642  ;;  %v6178_v62 = vpop.permute.xlu1 %592 }
  0xfd   : > { %8345 = vst [vmem:[#allocation66_spill] sm:$0xff] %v6176_v49  ;;  %v6180_v61 = vpop.permute.xlu0 %587  ;;  %v778_v49 = vld [vmem:[%s5784_s23 + $0x172] sm:$0xff] }
  0xfe   : > { %8346 = vst [vmem:[#allocation67_spill] sm:$0xff] %v6178_v62  ;;  %v777_v62 = vld [vmem:[%s5784_s23 + $0x16a] sm:$0xff] }
  0xff   : > { %8347 = vst [vmem:[#allocation68_spill] sm:$0xff] %v6180_v61 }
 0x102   : > { %923 = vperm.xlu2 %5698, %v775_v31   ;;  %918 = vperm.xlu1 %5697, %v6184_v37  }
 0x103   : > { %913 = vperm.xlu0 %5696, %v6187_v41  }
 0x104   : > { %v6191_v55 = vpop.permute.xlu2 %657  ;;  %v6193_v63 = vpop.permute.xlu1 %607 }
 0x105   : > { %8348 = vst [vmem:[#allocation69_spill] sm:$0xff] %v6191_v55  ;;  %v6195_v57 = vpop.permute.xlu0 %602 }
 0x106   : > { %8349 = vst [vmem:[#allocation70_spill] sm:$0xff] %v6193_v63 }
 0x107   : > { %8350 = vst [vmem:[#allocation71_spill] sm:$0xff] %v6195_v57 }
 0x10a   : > { %938 = vperm.xlu2 %5698, %v778_v49   ;;  %933 = vperm.xlu1 %5697, %v777_v62  }
 0x10b   : > { %928 = vperm.xlu0 %5696, %v776_v36  }
 0x10c   : > { %v6200_v61 = vpop.permute.xlu2 %672  ;;  %v6202_v45 = vpop.permute.xlu1 %622 }
 0x10d   : > { %8351 = vst [vmem:[#allocation72_spill] sm:$0xff] %v6200_v61  ;;  %v6204_v31 = vpop.permute.xlu0 %617 }
 0x10e   : > { %8352 = vst [vmem:[#allocation73_spill] sm:$0xff] %v6202_v45  ;;  %v8415_v45 = vld [vmem:[#allocation44_spill] sm:$0xff] }
 0x10f   : > { %8353 = vst [vmem:[#allocation74_spill] sm:$0xff] %v6204_v31  ;;  %v5150_v31 = vld [vmem:[%s5784_s23 + $0x1a] sm:$0xff] }
 0x112   : > { %1055 = vperm.xlu2 %5698, %v5787_v1   ;;  %1050 = vperm.xlu1 %5697, %v5799_v5  }
 0x113   : > { %1045 = vperm.xlu0 %5696, %v5790_v2  }
 0x114   : > { %v6209_v55 = vpop.permute.xlu2 %788  ;;  %v6211_v57 = vpop.permute.xlu1 %637 }
 0x115   : > { %8354 = vst [vmem:[#allocation75_spill] sm:$0xff] %v6209_v55  ;;  %v6213_v63 = vpop.permute.xlu0 %632 }
 0x11a   : > { %1070 = vperm.xlu2 %5698, %v5808_v8   ;;  %1065 = vperm.xlu1 %5697, %v5811_v9  }
 0x11b   : > { %1060 = vperm.xlu0 %5696, %v5796_v4  }
 0x11c   : > { %v6218_v36 = vpop.permute.xlu2 %803  ;;  %v6220_v49 = vpop.permute.xlu1 %652 }
 0x11d   : > { %8355 = vst [vmem:[#allocation76_spill] sm:$0xff] %v6218_v36  ;;  %v6222_v1 = vpop.permute.xlu0 %647 }
 0x11e   : > { %8356 = vst [vmem:[#allocation77_spill] sm:$0xff] %v6220_v49 }
 0x11f   : > { %8357 = vst [vmem:[#allocation78_spill] sm:$0xff] %v6222_v1 }
 0x122   : > { %1085 = vperm.xlu2 %5698, %v5820_v11   ;;  %1080 = vperm.xlu1 %5697, %v5823_v12  }
 0x123   : > { %1075 = vperm.xlu0 %5696, %v5805_v7  }
 0x124   : > { %v6227_v2 = vpop.permute.xlu2 %818  ;;  %v6229_v5 = vpop.permute.xlu1 %667 }
 0x125   : > { %8358 = vst [vmem:[#allocation79_spill] sm:$0xff] %v6229_v5  ;;  %v6231_v8 = vpop.permute.xlu0 %662 }
 0x126   : > { %8359 = vst [vmem:[#allocation80_spill] sm:$0xff] %v6231_v8  ;;  %v8409_v8 = vld [vmem:[#allocation64_spill] sm:$0xff] }
 0x12a   : > { %1100 = vperm.xlu2 %5698, %v5832_v14   ;;  %1095 = vperm.xlu1 %5697, %v5835_v15  }
 0x12b   : > { %1090 = vperm.xlu0 %5696, %v5817_v10  }
 0x12c   : > { %v6236_v4 = vpop.permute.xlu2 %833  ;;  %v6238_v9 = vpop.permute.xlu1 %783 }
 0x12d   : > { %8360 = vst [vmem:[#allocation81_spill] sm:$0xff] %v6236_v4  ;;  %v6240_v11 = vpop.permute.xlu0 %677 }
 0x12e   : > { %8361 = vst [vmem:[#allocation82_spill] sm:$0xff] %v6238_v9  ;;  %v5216_v9 = vld [vmem:[%s5784_s23 + $0x31] sm:$0xff] }
 0x12f   : > { %8362 = vst [vmem:[#allocation83_spill] sm:$0xff] %v6240_v11 }
 0x132   : > { %1115 = vperm.xlu2 %5698, %v5844_v17   ;;  %1110 = vperm.xlu1 %5697, %v5847_v18  }
 0x133   : > { %1105 = vperm.xlu0 %5696, %v5829_v13  }
 0x134   : > { %v6245_v7 = vpop.permute.xlu2 %848  ;;  %v6247_v12 = vpop.permute.xlu1 %798 }
 0x135   : > { %8363 = vst [vmem:[#allocation84_spill] sm:$0xff] %v6245_v7  ;;  %v6249_v14 = vpop.permute.xlu0 %793  ;;  %v8406_v7 = vld [vmem:[#allocation51_spill] sm:$0xff] }
 0x136   : > { %8364 = vst [vmem:[#allocation85_spill] sm:$0xff] %v6247_v12 }
 0x137   : > { %8365 = vst [vmem:[#allocation86_spill] sm:$0xff] %v6249_v14 }
 0x13a   : > { %1130 = vperm.xlu2 %5698, %v5856_v20   ;;  %1125 = vperm.xlu1 %5697, %v5859_v21  }
 0x13b   : > { %1120 = vperm.xlu0 %5696, %v5841_v16  }
 0x13c   : > { %v6254_v10 = vpop.permute.xlu2 %863  ;;  %v6256_v15 = vpop.permute.xlu1 %813 }
 0x13d   : > { %v6258_v17 = vpop.permute.xlu0 %808 }
 0x13e   : > { %8366 = vst [vmem:[#allocation87_spill] sm:$0xff] %v6258_v17  ;;  %v8400_v17 = vld [vmem:[#allocation33_spill] sm:$0xff] }
 0x142   : > { %1145 = vperm.xlu2 %5698, %v5868_v23   ;;  %1140 = vperm.xlu1 %5697, %v5871_v24  }
 0x143   : > { %1135 = vperm.xlu0 %5696, %v5853_v19  }
 0x144   : > { %v6263_v13 = vpop.permute.xlu2 %878  ;;  %v6265_v18 = vpop.permute.xlu1 %828 }
 0x145   : > { %8367 = vst [vmem:[#allocation88_spill] sm:$0xff] %v6263_v13  ;;  %v6267_v20 = vpop.permute.xlu0 %823 }
 0x146   : > { %8368 = vst [vmem:[#allocation89_spill] sm:$0xff] %v6267_v20 }
 0x14a   : > { %1160 = vperm.xlu2 %5698, %v5880_v26   ;;  %1155 = vperm.xlu1 %5697, %v5883_v27  }
 0x14b   : > { %1150 = vperm.xlu0 %5696, %v5865_v22  }
 0x14c   : > { %v6272_v16 = vpop.permute.xlu2 %893  ;;  %v6274_v21 = vpop.permute.xlu1 %843 }
 0x14d   : > { %8369 = vst [vmem:[#allocation90_spill] sm:$0xff] %v6274_v21  ;;  %v6276_v23 = vpop.permute.xlu0 %838  ;;  %v5205_v21 = vld [vmem:[%s5784_s23 + $0x138] sm:$0xff] }
 0x14e   : > { %8370 = vst [vmem:[#allocation91_spill] sm:$0xff] %v6276_v23 }
 0x152   : > { %1175 = vperm.xlu2 %5698, %v5892_v29   ;;  %1170 = vperm.xlu1 %5697, %v5895_v30   ;;  %v5115_v30 = vld [vmem:[%s5784_s23 + $0x188] sm:$0xff] }
 0x153   : > { %1165 = vperm.xlu0 %5696, %v5877_v25   ;;  %v5114_v25 = vld [vmem:[%s5784_s23 + $0x180] sm:$0xff] }
 0x154   : > { %v6281_v19 = vpop.permute.xlu2 %908  ;;  %v6283_v24 = vpop.permute.xlu1 %858 }
 0x155   : > { %8371 = vst [vmem:[#allocation92_spill] sm:$0xff] %v6281_v19  ;;  %v6285_v26 = vpop.permute.xlu0 %853 }
 0x15a   : > { %1190 = vperm.xlu2 %5698, %v5902_v32   ;;  %1185 = vperm.xlu1 %5697, %v5905_v33  }
 0x15b   : > { %1180 = vperm.xlu0 %5696, %v5889_v28  }
 0x15c   : > { %v6290_v22 = vpop.permute.xlu2 %923  ;;  %v6292_v27 = vpop.permute.xlu1 %873 }
 0x15d   : > { %8372 = vst [vmem:[#allocation93_spill] sm:$0xff] %v6290_v22  ;;  %v6294_v29 = vpop.permute.xlu0 %868 }
 0x15e   : > { %8373 = vst [vmem:[#allocation94_spill] sm:$0xff] %v6292_v27 }
 0x162   : > { %1306 = vperm.xlu2 %5698, %v5913_v35   ;;  %1200 = vperm.xlu1 %5697, %v5115_v30  }
 0x163   : > { %1195 = vperm.xlu0 %5696, %v5114_v25  }
 0x164   : > { %v6299_v62 = vpop.permute.xlu2 %938  ;;  %v6301_v11 = vpop.permute.xlu1 %888 }
 0x165   : > { %8374 = vst [vmem:[#allocation95_spill] sm:$0xff] %v6299_v62  ;;  %v6303_v32 = vpop.permute.xlu0 %883  ;;  %v8397_v62 = vld [vmem:[#allocation29_spill] sm:$0xff] }
 0x166   : > { %8375 = vst [vmem:[#allocation96_spill] sm:$0xff] %v6301_v11  ;;  %v8414_v11 = vld [vmem:[#allocation43_spill] sm:$0xff] }
 0x167   : > { %8376 = vst [vmem:[#allocation97_spill] sm:$0xff] %v6303_v32 }
 0x16a   : > { %1321 = vperm.xlu2 %5698, %v5924_v39   ;;  %1316 = vperm.xlu1 %5697, %v5927_v40  }
 0x16b   : > { %1311 = vperm.xlu0 %5696, %v5910_v34  }
 0x16c   : > { %v6308_v28 = vpop.permute.xlu2 %1055  ;;  %v6310_v33 = vpop.permute.xlu1 %903 }
 0x16d   : > { %8377 = vst [vmem:[#allocation98_spill] sm:$0xff] %v6308_v28  ;;  %v6312_v61 = vpop.permute.xlu0 %898 }
 0x16e   : > { %8378 = vst [vmem:[#allocation99_spill] sm:$0xff] %v6310_v33 }
 0x172   : > { %1336 = vperm.xlu2 %5698, %v5938_v43   ;;  %1331 = vperm.xlu1 %5697, %v5941_v44  }
 0x173   : > { %1326 = vperm.xlu0 %5696, %v5921_v38  }
 0x174   : > { %v6317_v35 = vpop.permute.xlu2 %1070  ;;  %v6319_v30 = vpop.permute.xlu1 %918 }
 0x175   : > { %8379 = vst [vmem:[#allocation100_spill] sm:$0xff] %v6317_v35  ;;  %v6321_v39 = vpop.permute.xlu0 %913 }
 0x176   : > { %8380 = vst [vmem:[#allocation101_spill] sm:$0xff] %v6319_v30 }
 0x177   : > { %8381 = vst [vmem:[#allocation102_spill] sm:$0xff] %v6321_v39 }
 0x17a   : > { %1351 = vperm.xlu2 %5698, %v5952_v47   ;;  %1346 = vperm.xlu1 %5697, %v5955_v48  }
 0x17b   : > { %1341 = vperm.xlu0 %5696, %v5935_v42  }
 0x17c   : > { %v6326_v34 = vpop.permute.xlu2 %1085  ;;  %v6328_v40 = vpop.permute.xlu1 %933 }
 0x17d   : > { %8382 = vst [vmem:[#allocation103_spill] sm:$0xff] %v6326_v34  ;;  %v6330_v43 = vpop.permute.xlu0 %928 }
 0x17e   : > { %8383 = vst [vmem:[#allocation104_spill] sm:$0xff] %v6328_v40  ;;  %v8398_v40 = vld [vmem:[#allocation22_spill] sm:$0xff] }
 0x17f   : > { %8384 = vst [vmem:[#allocation105_spill] sm:$0xff] %v6330_v43  ;;  %v5189_v43 = vld [vmem:[%s5784_s23 + $0x78] sm:$0xff] }
 0x182   : > { %1366 = vperm.xlu2 %5698, %v5970_v53   ;;  %1361 = vperm.xlu1 %5697, %v5973_v54  }
 0x183   : > { %1356 = vperm.xlu0 %5696, %v5949_v46  }
 0x184   : > { %v6335_v38 = vpop.permute.xlu2 %1100  ;;  %v6337_v44 = vpop.permute.xlu1 %1050 }
 0x185   : > { %8385 = vst [vmem:[#allocation106_spill] sm:$0xff] %v6335_v38  ;;  %v6339_v47 = vpop.permute.xlu0 %1045  ;;  %v5199_v38 = vld [vmem:[%s5784_s23 + $0xf0] sm:$0xff] }
 0x186   : > { %8386 = vst [vmem:[#allocation107_spill] sm:$0xff] %v6337_v44  ;;  %v6692_v44 = vld [vmem:[%s8257_s2] ss:$0 sm:$0xff] }
 0x187   : > { %8387 = vst [vmem:[#allocation108_spill] sm:$0xff] %v6339_v47 }
 0x18a   : > { %1381 = vperm.xlu2 %5698, %v5988_v59   ;;  %1376 = vperm.xlu1 %5697, %v5991_v60  }
 0x18b   : > { %1371 = vperm.xlu0 %5696, %v5967_v52  }
 0x18c   : > { %v6344_v42 = vpop.permute.xlu2 %1115  ;;  %v6346_v48 = vpop.permute.xlu1 %1065 }
 0x18d   : > { %8388 = vst [vmem:[#allocation109_spill] sm:$0xff] %v6346_v48  ;;  %v6348_v53 = vpop.permute.xlu0 %1060  ;;  %v8401_v48 = vld [vmem:[#allocation27_spill] sm:$0xff] }
 0x18e   : > { %8389 = vst [vmem:[#allocation110_spill] sm:$0xff] %v6348_v53 }
 0x192   : > { %1396 = vperm.xlu2 %5698, %v6006_v3   ;;  %1391 = vperm.xlu1 %5697, %v6009_v6   ;;  %v8393_v6 = vld [vmem:[#allocation18_spill] sm:$0xff] }
 0x193   : > { %1386 = vperm.xlu0 %5696, %v5985_v58   ;;  %v8392_v58 = vld [vmem:[#allocation23_spill] sm:$0xff] }
 0x194   : > { %v6353_v46 = vpop.permute.xlu2 %1130  ;;  %v6355_v54 = vpop.permute.xlu1 %1080 }
 0x195   : > { %v6357_v59 = vpop.permute.xlu0 %1075 }
 0x19a   : > { %1411 = vperm.xlu2 %5698, %v6024_v56   ;;  %1406 = vperm.xlu1 %5697, %v6027_v50  }
 0x19b   : > { %1401 = vperm.xlu0 %5696, %v6003_v0   ;;  %v8396_v0 = vld [vmem:[#allocation28_spill] sm:$0xff] }
 0x19c   : > { %v6362_v52 = vpop.permute.xlu2 %1145  ;;  %v6364_v60 = vpop.permute.xlu1 %1095 }
 0x19d   : > { %8390 = vst [vmem:[#allocation111_spill] sm:$0xff] %v6362_v52  ;;  %v6366_v3 = vpop.permute.xlu0 %1090  ;;  %v8410_v52 = vld [vmem:[#allocation65_spill] sm:$0xff] }
 0x19e   : > { %8391 = vst [vmem:[#allocation112_spill] sm:$0xff] %v6364_v60 }
 0x1a2   : > { %1426 = vperm.xlu2 %5698, %v6042_v51   ;;  %1421 = vperm.xlu1 %5697, %v8392_v58  }
 0x1a3   : > { %1416 = vperm.xlu0 %5696, %v8393_v6   ;;  %v5147_v6 = vld [vmem:[%s5784_s23 + $0x181] sm:$0xff] }
 0x1a4   : > { %v6371_v25 = vpop.permute.xlu2 %1160  ;;  %v6373_v56 = vpop.permute.xlu1 %1110 }
 0x1a5   : > { %8394 = vst [vmem:[#allocation23_spill] sm:$0xff] %v6373_v56  ;;  %v6375_v50 = vpop.permute.xlu0 %1105  ;;  %v8405_v56 = vld [vmem:[#allocation57_spill] sm:$0xff] }
 0x1a6   : > { %8395 = vst [vmem:[#allocation18_spill] sm:$0xff] %v6375_v50  ;;  %v5206_v50 = vld [vmem:[%s5784_s23 + $0x140] sm:$0xff] }
 0x1aa   : > { %1441 = vperm.xlu2 %5698, %v8396_v0   ;;  %1436 = vperm.xlu1 %5697, %v8397_v62  }
 0x1ab   : > { %1431 = vperm.xlu0 %5696, %v8398_v40   ;;  %v5148_v40 = vld [vmem:[%s5784_s23 + $0x189] sm:$0xff] }
 0x1ac   : > { %v6380_v35 = vpop.permute.xlu2 %1175  ;;  %v6382_v51 = vpop.permute.xlu1 %1125 }
 0x1ad   : > { %8399 = vst [vmem:[#allocation28_spill] sm:$0xff] %v6380_v35  ;;  %v6384_v58 = vpop.permute.xlu0 %1120 }
 0x1b2   : > { %1456 = vperm.xlu2 %5698, %v5147_v6   ;;  %1451 = vperm.xlu1 %5697, %v8400_v17  }
 0x1b3   : > { %1446 = vperm.xlu0 %5696, %v8401_v48   ;;  %v5197_v48 = vld [vmem:[%s5784_s23 + $0xd8] sm:$0xff] }
 0x1b4   : > { %v6389_v36 = vpop.permute.xlu2 %1190  ;;  %v6391_v0 = vpop.permute.xlu1 %1140 }
 0x1b5   : > { %8402 = vst [vmem:[#allocation29_spill] sm:$0xff] %v6389_v36  ;;  %v6393_v62 = vpop.permute.xlu0 %1135 }
 0x1b6   : > { %8403 = vst [vmem:[#allocation22_spill] sm:$0xff] %v6391_v0 }
 0x1b7   : > { %8404 = vst [vmem:[#allocation33_spill] sm:$0xff] %v6393_v62 }
 0x1ba   : > { %1642 = vperm.xlu2 %5698, %v8405_v56   ;;  %1637 = vperm.xlu1 %5697, %v8406_v7  }
 0x1bb   : > { %1461 = vperm.xlu0 %5696, %v5148_v40   ;;  %v5198_v40 = vld [vmem:[%s5784_s23 + $0xe0] sm:$0xff] }
 0x1bc   : > { %v6398_v22 = vpop.permute.xlu2 %1306  ;;  %v6400_v6 = vpop.permute.xlu1 %1155 }
 0x1bd   : > { %8407 = vst [vmem:[#allocation27_spill] sm:$0xff] %v6398_v22  ;;  %v6402_v17 = vpop.permute.xlu0 %1150 }
 0x1be   : > { %8408 = vst [vmem:[#allocation57_spill] sm:$0xff] %v6402_v17  ;;  %v5230_v17 = vld [vmem:[%s5784_s23 + $0xd9] sm:$0xff] }
 0x1c2   : > { %1899 = vperm.xlu2 %5698, %v5197_v48   ;;  %1682 = vperm.xlu1 %5697, %v8409_v8  }
 0x1c3   : > { %1677 = vperm.xlu0 %5696, %v8410_v52  }
 0x1c4   : > { %v6407_v32 = vpop.permute.xlu2 %1321  ;;  %v6409_v56 = vpop.permute.xlu1 %1170 }
 0x1c5   : > { %8411 = vst [vmem:[#allocation51_spill] sm:$0xff] %v6407_v32  ;;  %v6411_v7 = vpop.permute.xlu0 %1165  ;;  %v5238_v32 = vld [vmem:[%s5784_s23 + $0x139] sm:$0xff] }
 0x1c6   : > { %8412 = vst [vmem:[#allocation64_spill] sm:$0xff] %v6409_v56  ;;  %v8452_v56 = vld [vmem:[#allocation14_spill] sm:$0xff] }
 0x1c7   : > { %8413 = vst [vmem:[#allocation65_spill] sm:$0xff] %v6411_v7 }
 0x1ca   : > { %1602 = vperm.xlu2 %5698, %v8414_v11   ;;  %1597 = vperm.xlu1 %5697, %v8415_v45  }
 0x1cb   : > { %1904 = vperm.xlu0 %5696, %v5198_v40   ;;  %v5190_v40 = vld [vmem:[%s5784_s23 + $0x80] sm:$0xff] }
 0x1cc   : > { %v6416_v48 = vpop.permute.xlu2 %1336  ;;  %v6418_v8 = vpop.permute.xlu1 %1185 }
 0x1cd   : > { %8416 = vst [vmem:[#allocation43_spill] sm:$0xff] %v6418_v8  ;;  %v6420_v52 = vpop.permute.xlu0 %1180  ;;  %v5231_v8 = vld [vmem:[%s5784_s23 + $0xe1] sm:$0xff] }
 0x1ce   : > { %8417 = vst [vmem:[#allocation44_spill] sm:$0xff] %v6420_v52 }
 0x1d2   : > { %2160 = vperm.xlu2 %5698, %v5230_v17   ;;  %1944 = vperm.xlu1 %5697, %v5206_v50  }
 0x1d3   : > { %1939 = vperm.xlu0 %5696, %v5205_v21   ;;  %v5239_v21 = vld [vmem:[%s5784_s23 + $0x141] sm:$0xff] }
 0x1d4   : > { %v6425_v11 = vpop.permute.xlu2 %1351  ;;  %v6427_v36 = vpop.permute.xlu1 %1200 }
 0x1d5   : > { %8418 = vst [vmem:[#allocation113_spill] sm:$0xff] %v6425_v11  ;;  %v6429_v45 = vpop.permute.xlu0 %1195 }
 0x1d6   : > { %8419 = vst [vmem:[#allocation114_spill] sm:$0xff] %v6427_v36  ;;  %v8424_v36 = vld [vmem:[#allocation56_spill] sm:$0xff] }
 0x1d7   : > { %8420 = vst [vmem:[#allocation115_spill] sm:$0xff] %v6429_v45 }
 0x1da   : > { %1864 = vperm.xlu2 %5698, %v5190_v40   ;;  %1859 = vperm.xlu1 %5697, %v5189_v43   ;;  %v5223_v43 = vld [vmem:[%s5784_s23 + $0x81] sm:$0xff]  ;;  %v8427_v40 = vld [vmem:[#allocation55_spill] sm:$0xff] }
 0x1db   : > { %2165 = vperm.xlu0 %5696, %v5231_v8   ;;  %v5222_v8 = vld [vmem:[%s5784_s23 + $0x79] sm:$0xff] }
 0x1dc   : > { %v6434_v5 = vpop.permute.xlu2 %1366  ;;  %v6436_v17 = vpop.permute.xlu1 %1316 }
 0x1dd   : > { %8421 = vst [vmem:[#allocation116_spill] sm:$0xff] %v6434_v5  ;;  %v6438_v50 = vpop.permute.xlu0 %1311 }
 0x1de   : > { %8422 = vst [vmem:[#allocation117_spill] sm:$0xff] %v6436_v17 }
 0x1df   : > { %8423 = vst [vmem:[#allocation118_spill] sm:$0xff] %v6438_v50  ;;  %v6618_v50 = vld [vmem:[%s5784_s23 + $0x15a] sm:$0xff] }
 0x1e2   : > { %2421 = vperm.xlu2 %5698, %v8424_v36   ;;  %2205 = vperm.xlu1 %5697, %v5239_v21  }
 0x1e3   : > { %2200 = vperm.xlu0 %5696, %v5238_v32   ;;  %v5255_v32 = vld [vmem:[%s5784_s23 + $0x7a] sm:$0xff] }
 0x1e4   : > { %v1382_v45 = vpop.permute.xlu2 %1381  ;;  %v6443_v53 = vpop.permute.xlu1 %1331 }
 0x1e5   : > { %8425 = vst [vmem:[#allocation56_spill] sm:$0xff] %v6443_v53  ;;  %v6445_v12 = vpop.permute.xlu0 %1326 }
 0x1e6   : > { %8426 = vst [vmem:[#allocation119_spill] sm:$0xff] %v6445_v12  ;;  %v5256_v12 = vld [vmem:[%s5784_s23 + $0x82] sm:$0xff] }
 0x1ea   : > { %2125 = vperm.xlu2 %5698, %v5223_v43   ;;  %2120 = vperm.xlu1 %5697, %v5222_v8   ;;  %v5167_v8 = vld [vmem:[%s5784_s23 + $0xe2] sm:$0xff] }
 0x1eb   : > { %2426 = vperm.xlu0 %5696, %v8427_v40   ;;  %v5166_v40 = vld [vmem:[%s5784_s23 + $0xda] sm:$0xff] }
 0x1ec   : > { %v6450_v5 = vpop.permute.xlu2 %1396  ;;  %v6452_v17 = vpop.permute.xlu1 %1346 }
 0x1ed   : > { %8428 = vst [vmem:[#allocation55_spill] sm:$0xff] %v6450_v5  ;;  %v6454_v36 = vpop.permute.xlu0 %1341 }
 0x1ee   : > { %8429 = vst [vmem:[#allocation120_spill] sm:$0xff] %v6452_v17  ;;  %v5184_v17 = vld [vmem:[%s5784_s23 + $0x38] sm:$0xff] }
 0x1f2   : > { %2381 = vperm.xlu2 %5698, %v5255_v32   ;;  %2466 = vperm.xlu1 %5697, %v6184_v37  }
 0x1f3   : > { %2461 = vperm.xlu0 %5696, %v6187_v41  }
 0x1f4   : > { %v6459_v21 = vpop.permute.xlu2 %1411  ;;  %v6461_v53 = vpop.permute.xlu1 %1361 }
 0x1f5   : > { %8430 = vst [vmem:[#allocation121_spill] sm:$0xff] %v6459_v21  ;;  %v6463_v43 = vpop.permute.xlu0 %1356 }
 0x1f6   : > { %8431 = vst [vmem:[#allocation122_spill] sm:$0xff] %v6461_v53 }
 0x1f7   : > { %8432 = vst [vmem:[#allocation123_spill] sm:$0xff] %v6463_v43 }
 0x1fa   : > { %1652 = vperm.xlu2 %5698, %v5167_v8   ;;  %1647 = vperm.xlu1 %5697, %v5166_v40   ;;  %v5200_v8 = vld [vmem:[%s5784_s23 + $0xf8] sm:$0xff]  ;;  %v6487_v40 = vld [vmem:[%s8256_s1 + $0x1] ss:$0 sm:$0xff] }
 0x1fb   : > { %2386 = vperm.xlu0 %5696, %v5256_v12   ;;  %v705_v1 = vmul.f32 %v6487_v40, %v6213_v63 }
 0x1fc   : > { %v6468_v28 = vpop.permute.xlu2 %1426  ;;  %v6470_v14 = vpop.permute.xlu1 %1376 }
 0x1fd   : > { %8433 = vst [vmem:[#allocation124_spill] sm:$0xff] %v6468_v28  ;;  %v6472_v60 = vpop.permute.xlu0 %1371  ;;  %v8451_v28 = vld [vmem:[#allocation40_spill] sm:$0xff] }
 0x1fe   : > { %8434 = vst [vmem:[#allocation125_spill] sm:$0xff] %v6472_v60  ;;  %v6499_v60 = vld [vmem:[%s8256_s1 + $0x2] ss:$0 sm:$0xff] }
 0x202   : > { %1909 = vperm.xlu2 %5698, %v5199_v38   ;;  %1692 = vperm.xlu1 %5697, %v6184_v37   ;;  %v6492_v37 = vld [vmem:[%s8256_s1] ss:$0 sm:$0xff] }
 0x203   : > { %1687 = vperm.xlu0 %5696, %v6187_v41   ;;  %v8436_v41 = vld [vmem:[#allocation52_spill] sm:$0xff]  ;;  %v428_v33 = vmul.f32 %v6492_v37, %v8452_v56 }
 0x204   : > { %v6477_v21 = vpop.permute.xlu2 %1441  ;;  %v6479_v43 = vpop.permute.xlu1 %1391  ;;  %v698_v38 = vmul.f32 %v6487_v40, %v8436_v41  ;;  %v6512_v41 = vld [vmem:[%s8256_s1 + $0x3] ss:$0 sm:$0xff] }
 0x205   : > { %8435 = vst [vmem:[#allocation126_spill] sm:$0xff] %v6477_v21  ;;  %v6481_v53 = vpop.permute.xlu0 %1386  ;;  %v959_v21 = vmul.f32 %v6499_v60, %v6283_v24  ;;  %v5207_v24 = vld [vmem:[%s5784_s23 + $0x150] sm:$0xff]  ;;  %v1220_v0 = vmul.f32 %v6512_v41, %v6344_v42  ;;  %v1212_v56 = vmul.f32 %v6512_v41, %v6357_v59 }
 0x20a   : > { %1612 = vperm.xlu2 %5698, %v5256_v12   ;;  %1607 = vperm.xlu1 %5697, %v5255_v32   ;;  %v8439_v32 = vld [vmem:[#allocation26_spill] sm:$0xff] }
 0x20b   : > { %1914 = vperm.xlu0 %5696, %v5200_v8   ;;  %v437_v23 = vmul.f32 %v6492_v37, %v8439_v32  ;;  %v1221_v8 = vmul.f32 %v6512_v41, %v6384_v58  ;;  %v5232_v32 = vld [vmem:[%s5784_s23 + $0xf1] sm:$0xff] }
 0x20c   : > { %v6501_v4 = vpop.permute.xlu2 %1456  ;;  %v6503_v12 = vpop.permute.xlu1 %1406 }
 0x20d   : > { %8437 = vst [vmem:[#allocation52_spill] sm:$0xff] %v6501_v4  ;;  %v6514_v52 = vpop.permute.xlu0 %1401  ;;  %v730_v30 = vadd.f32 %v698_v38, %v437_v23  ;;  %v6521_v4 = vld [vmem:[%s8256_s1 + $0x4] ss:$0 sm:$0xff]  ;;  %v6530_v23 = vld [vmem:[%s8256_s1 + $0x5] ss:$0 sm:$0xff] }
 0x20e   : > { %8438 = vst [vmem:[#allocation127_spill] sm:$0xff] %v6503_v12  ;;  %v5208_v12 = vld [vmem:[%s5784_s23 + $0x158] sm:$0xff]  ;;  %v1482_v62 = vmul.f32 %v6521_v4, %v1382_v45 }
 0x20f   : > { %8440 = vst [vmem:[#allocation26_spill] sm:$0xff] %v6514_v52  ;;  %v991_v5 = vadd.f32 %v959_v21, %v730_v30  ;;  %v5192_v45 = vld [vmem:[%s5784_s23 + $0x98] sm:$0xff]  ;;  %v5191_v21 = vld [vmem:[%s5784_s23 + $0x90] sm:$0xff] }
 0x210   : > { %v5233_v52 = vld [vmem:[%s5784_s23 + $0xf9] sm:$0xff] }
 0x211   : > { %v1253_v58 = vadd.f32 %v1221_v8, %v991_v5 }
 0x212   : > { %2170 = vperm.xlu2 %5698, %v5232_v32   ;;  %1954 = vperm.xlu1 %5697, %v5208_v12  }
 0x213   : > { %1949 = vperm.xlu0 %5696, %v5207_v24   ;;  %v1514_v35 = vadd.f32 %v1482_v62, %v1253_v58  ;;  %v8276_v62 = vmov 0.0  }
 0x214   : > { %v1643_v38 = vpop.permute.xlu2 %1642  ;;  %v6532_v27 = vpop.permute.xlu1 %1421  ;;  %2670 = vst.msk [vmem:[#allocation2 + $0xc0] sm:$0xff] %vm2644_vm0, %v8276_v62 }
 0x215   : > { %v1743_v39 = vmul.f32 %v6530_v23, %v1643_v38  ;;  %v6535_v49 = vpop.permute.xlu0 %1416  ;;  %2671 = vst.msk [vmem:[#allocation2 + $0xc8] sm:$0xff] %vm2644_vm0, %v8276_v62  ;;  %v5225_v38 = vld [vmem:[%s5784_s23 + $0x99] sm:$0xff] }
 0x216   : > { %2645 = vst.msk [vmem:[#allocation2] sm:$0xff] %vm2644_vm0, %v8276_v62 }
 0x217   : > { %v6537_v30 = vadd.f32 %v1743_v39, %v1514_v35  ;;  %v6555_v35 = vld [vmem:[%s5784_s23 + $0xf2] sm:$0xff]  ;;  %2646 = vst.msk [vmem:[#allocation2 + $0x8] sm:$0xff] %vm2644_vm0, %v8276_v62 }
 0x218   : > { %v5241_v39 = vld [vmem:[%s5784_s23 + $0x159] sm:$0xff]  ;;  %2649 = vst.msk [vmem:[#allocation2 + $0x18] sm:$0xff] %vm2644_vm0, %v8276_v62 }
 0x219   : > { %2650 = vst.msk [vmem:[#allocation2 + $0x20] sm:$0xff] %vm2644_vm0, %v8276_v62 }
 0x21a   : > { %1874 = vperm.xlu2 %5698, %v5192_v45   ;;  %1869 = vperm.xlu1 %5697, %v5191_v21   ;;  %2652 = vst.msk [vmem:[#allocation2 + $0x30] sm:$0xff] %vm2644_vm0, %v8276_v62  ;;  %v5224_v45 = vld [vmem:[%s5784_s23 + $0x91] sm:$0xff]  ;;  %v6587_v21 = vld [vmem:[%s5784_s23 + $0xfa] sm:$0xff] }
 0x21b   : > { %2175 = vperm.xlu0 %5696, %v5233_v52   ;;  %v5240_v52 = vld [vmem:[%s5784_s23 + $0x151] sm:$0xff]  ;;  %2653 = vst.msk [vmem:[#allocation2 + $0x38] sm:$0xff] %vm2644_vm0, %v8276_v62 }
 0x21c   : > { %v6542_v5 = vpop.permute.xlu2 %1899  ;;  %v6544_v12 = vpop.permute.xlu1 %1436  ;;  %2655 = vst.msk [vmem:[#allocation2 + $0x48] sm:$0xff] %vm2644_vm0, %v8276_v62 }
 0x21d   : > { %8441 = vst [vmem:[#allocation128_spill] sm:$0xff] %v6544_v12  ;;  %v6548_v8 = vpop.permute.xlu0 %1431  ;;  %v958_v12 = vmul.f32 %v6499_v60, %v6285_v26 }
 0x21e   : > { %8442 = vst [vmem:[#allocation129_spill] sm:$0xff] %v6548_v8  ;;  %v689_v8 = vmul.f32 %v6487_v40, %v8451_v28  ;;  %v950_v28 = vmul.f32 %v6499_v60, %v6256_v15  ;;  %v706_v15 = vmul.f32 %v6487_v40, %v6211_v57 }
 0x21f   : > { %2656 = vst.msk [vmem:[#allocation2 + $0x50] sm:$0xff] %vm2644_vm0, %v8276_v62 }
 0x220   : > { %2658 = vst.msk [vmem:[#allocation2 + $0x60] sm:$0xff] %vm2644_vm0, %v8276_v62 }
 0x221   : > { %2659 = vst.msk [vmem:[#allocation2 + $0x68] sm:$0xff] %vm2644_vm0, %v8276_v62 }
 0x222   : > { %2431 = vperm.xlu2 %5698, %v6555_v35   ;;  %2215 = vperm.xlu1 %5697, %v5241_v39   ;;  %2661 = vst.msk [vmem:[#allocation2 + $0x78] sm:$0xff] %vm2644_vm0, %v8276_v62  ;;  %v8445_v39 = vld [vmem:[#allocation67_spill] sm:$0xff] }
 0x223   : > { %2210 = vperm.xlu0 %5696, %v5240_v52   ;;  %v697_v52 = vmul.f32 %v6487_v40, %v8445_v39  ;;  %2662 = vst.msk [vmem:[#allocation2 + $0x80] sm:$0xff] %vm2644_vm0, %v8276_v62 }
 0x224   : > { %v6570_v32 = vpop.permute.xlu2 %1602  ;;  %v6572_v24 = vpop.permute.xlu1 %1451  ;;  %2664 = vst.msk [vmem:[#allocation2 + $0x90] sm:$0xff] %vm2644_vm0, %v8276_v62 }
 0x225   : > { %8443 = vst [vmem:[#allocation130_spill] sm:$0xff] %v6572_v24  ;;  %v6576_v58 = vpop.permute.xlu0 %1446 }
 0x226   : > { %8444 = vst [vmem:[#allocation131_spill] sm:$0xff] %v6576_v58  ;;  %v8446_v58 = vld [vmem:[#allocation9_spill] sm:$0xff] }
 0x227   : > { %v436_v24 = vmul.f32 %v6492_v37, %v8446_v58  ;;  %2665 = vst.msk [vmem:[#allocation2 + $0x98] sm:$0xff] %vm2644_vm0, %v8276_v62  ;;  %v1481_v58 = vmul.f32 %v6521_v4, %v6470_v14 }
 0x228   : > { %2667 = vst.msk [vmem:[#allocation2 + $0xa8] sm:$0xff] %vm2644_vm0, %v8276_v62 }
 0x229   : > { %2668 = vst.msk [vmem:[#allocation2 + $0xb0] sm:$0xff] %vm2644_vm0, %v8276_v62 }
 0x22a   : > { %2135 = vperm.xlu2 %5698, %v5225_v38   ;;  %2130 = vperm.xlu1 %5697, %v5224_v45   ;;  %v729_v45 = vadd.f32 %v697_v52, %v436_v24  ;;  %2673 = vst.msk [vmem:[#allocation2 + $0xd8] sm:$0xff] %vm2644_vm0, %v8276_v62  ;;  %v6623_v24 = vld [vmem:[%s5784_s23 + $0x152] sm:$0xff] }
 0x22b   : > { %2436 = vperm.xlu0 %5696, %v6587_v21   ;;  %2674 = vst.msk [vmem:[#allocation2 + $0xe0] sm:$0xff] %vm2644_vm0, %v8276_v62 }
 0x22c   : > { %v2161_v39 = vpop.permute.xlu2 %2160  ;;  %v1638_v38 = vpop.permute.xlu1 %1637  ;;  %v990_v26 = vadd.f32 %v958_v12, %v729_v45  ;;  %2676 = vst.msk [vmem:[#allocation2 + $0xf0] sm:$0xff] %vm2644_vm0, %v8276_v62  ;;  %v6636_v12 = vld [vmem:[%s8256_s1 + $0x6] ss:$0 sm:$0xff] }
 0x22d   : > { %v6608_v13 = vpop.permute.xlu0 %1461  ;;  %v1742_v52 = vmul.f32 %v6530_v23, %v1638_v38  ;;  %2677 = vst.msk [vmem:[#allocation2 + $0xf8] sm:$0xff] %vm2644_vm0, %v8276_v62 }
 0x22e   : > { %8447 = vst [vmem:[#allocation67_spill] sm:$0xff] %v6608_v13  ;;  %v1252_v42 = vadd.f32 %v1220_v0, %v990_v26  ;;  %v2004_v26 = vmul.f32 %v6636_v12, %v6542_v5  ;;  %v6664_v13 = vld [vmem:[%s5784_s23 + $0x92] sm:$0xff]  ;;  %v6674_v5 = vld [vmem:[%s8256_s1 + $0x8] ss:$0 sm:$0xff] }
 0x22f   : > { %2679 = vst.msk [vmem:[#allocation2 + $0x108] sm:$0xff] %vm2644_vm0, %v8276_v62 }
 0x230   : > { %v1513_v14 = vadd.f32 %v1481_v58, %v1252_v42  ;;  %2680 = vst.msk [vmem:[#allocation2 + $0x110] sm:$0xff] %vm2644_vm0, %v8276_v62  ;;  %v6658_v58 = vld [vmem:[%s8256_s1 + $0x7] ss:$0 sm:$0xff]  ;;  %v6661_v42 = vld [vmem:[%s5784_s23 + $0x9a] sm:$0xff] }
 0x231   : > { %2682 = vst.msk [vmem:[#allocation2 + $0x120] sm:$0xff] %vm2644_vm0, %v8276_v62  ;;  %v2265_v22 = vmul.f32 %v6658_v58, %v2161_v39 }
 0x232   : > { %1567 = vperm.xlu2 %5698, %v5150_v31   ;;  %2476 = vperm.xlu1 %5697, %v6618_v50   ;;  %v1774_v38 = vadd.f32 %v1742_v52, %v1513_v14  ;;  %2683 = vst.msk [vmem:[#allocation2 + $0x128] sm:$0xff] %vm2644_vm0, %v8276_v62  ;;  %v5151_v52 = vld [vmem:[%s5784_s23 + $0x22] sm:$0xff] }
 0x233   : > { %2471 = vperm.xlu0 %5696, %v6623_v24   ;;  %2685 = vst.msk [vmem:[#allocation2 + $0x138] sm:$0xff] %vm2644_vm0, %v8276_v62 }
 0x234   : > { %v6641_v31 = vpop.permute.xlu2 %1864  ;;  %v6643_v0 = vpop.permute.xlu1 %1682  ;;  %2686 = vst.msk [vmem:[#allocation2 + $0x140] sm:$0xff] %vm2644_vm0, %v8276_v62  ;;  %v2036_v14 = vadd.f32 %v2004_v26, %v1774_v38 }
 0x235   : > { %v6647_v45 = vpop.permute.xlu0 %1677  ;;  %2688 = vst.msk [vmem:[#allocation2 + $0x150] sm:$0xff] %vm2644_vm0, %v8276_v62 }
 0x236   : > { %2689 = vst.msk [vmem:[#allocation2 + $0x158] sm:$0xff] %vm2644_vm0, %v8276_v62  ;;  %v2297_v47 = vadd.f32 %v2265_v22, %v2036_v14  ;;  %v5644_v22 = vld [vmem:[%s8258_s3 + $0x38] sm:$0xff]  ;;  %v5183_v14 = vld [vmem:[%s5784_s23 + $0x30] sm:$0xff] }
 0x237   : > { %2691 = vst.msk [vmem:[#allocation2 + $0x168] sm:$0xff] %vm2644_vm0, %v8276_v62  ;;  %5674 = vmatpush.bf16.msra.mxu2 %v5644_v22  ;;  %5675 = vmatpush.bf16.msra.mxu3 %v5644_v22 }
 0x238   : > { %2692 = vst.msk [vmem:[#allocation2 + $0x170] sm:$0xff] %vm2644_vm0, %v8276_v62  ;;  %5673 = vmatpush.bf16.msra.mxu1 %v5644_v22  ;;  %2922 = vmatpush.bf16.msra.mxu0 %v5644_v22 }
 0x239   : > { %2694 = vst.msk [vmem:[#allocation2 + $0x180] sm:$0xff] %vm2644_vm0, %v8276_v62 }
 0x23a   : > { %2396 = vperm.xlu2 %5698, %v6661_v42   ;;  %2391 = vperm.xlu1 %5697, %v6664_v13   ;;  %2695 = vst.msk [vmem:[#allocation2 + $0x188] sm:$0xff] %vm2644_vm0, %v8276_v62 }
 0x23b   : > { %1572 = vperm.xlu0 %5696, %v5151_v52   ;;  %2697 = vst.msk [vmem:[#allocation2 + $0x198] sm:$0xff] %vm2644_vm0, %v8276_v62 }
 0x23c   : > { %v2422_v38 = vpop.permute.xlu2 %2421  ;;  %v6687_v26 = vpop.permute.xlu1 %1597  ;;  %2698 = vst.msk [vmem:[#allocation2 + $0x1a0] sm:$0xff] %vm2644_vm0, %v8276_v62 }
 0x23d   : > { %v2526_v55 = vmul.f32 %v6674_v5, %v2422_v38  ;;  %v6697_v39 = vpop.permute.xlu0 %1904 }
 0x23f   : > { %v2558_v52 = vadd.f32 %v2526_v55, %v2297_v47  ;;  %v5643_v55 = vld [vmem:[%s8258_s3 + $0x30] sm:$0xff] }
 0x240   : > { %5677 = vmatpush.bf16.msra.mxu2 %v5643_v55  ;;  %5678 = vmatpush.bf16.msra.mxu3 %v5643_v55 }
 0x241   : > { %v2594_v38 = vadd.f32 %v6692_v44, %v2558_v52  ;;  %5676 = vmatpush.bf16.msra.mxu1 %v5643_v55  ;;  %2923 = vmatpush.bf16.msra.mxu0 %v5643_v55 }
 0x242   : > { %2090 = vperm.xlu2 %5698, %v5216_v9   ;;  %1834 = vperm.xlu1 %5697, %v5184_v17   ;;  %v8448_v9 = vmov 0.0   ;;  %v5642_v17 = vld [vmem:[%s8258_s3 + $0x28] sm:$0xff] }
 0x243   : > { %v2626_v34 = vmax.f32 %v2594_v38, 0.0  ;;  %1829 = vperm.xlu0 %5696, %v5183_v14   ;;  %2672 = vst.msk [vmem:[#allocation2 + $0xd0] sm:$0x3] %vm2647_vm1, %v8448_v9  ;;  %v5217_v14 = vld [vmem:[%s5784_s23 + $0x39] sm:$0xff] }
 0x244   : > { %v6713_v47 = vpop.permute.xlu2 %2125  ;;  %v6715_v62 = vpop.permute.xlu1 %1944  ;;  %2648 = vst.msk [vmem:[#allocation2 + $0x10] sm:$0x3] %vm2647_vm1, %v8448_v9  ;;  %5680 = vmatpush.bf16.msra.mxu2 %v5642_v17  ;;  %5681 = vmatpush.bf16.msra.mxu3 %v5642_v17  ;;  %v5641_v38 = vld [vmem:[%s8258_s3 + $0x20] sm:$0xff] }
 0x245   : > { %2715 = vst.msk [vmem:[#allocation2 + $0xc1] sm:$0xff] %vm2644_vm0, %v2626_v34  ;;  %v6718_v52 = vpop.permute.xlu0 %1939  ;;  %v8449_v34 = vld [vmem:[#allocation70_spill] sm:$0xff]  ;;  %5679 = vmatpush.bf16.msra.mxu1 %v5642_v17  ;;  %2924 = vmatpush.bf16.msra.mxu0 %v5642_v17  ;;  %v1223_v17 = vmul.f32 %v6512_v41, %v6353_v46  ;;  %v1484_v46 = vmul.f32 %v6521_v4, %v6479_v43 }
 0x246   : > { %2651 = vst.msk [vmem:[#allocation2 + $0x28] sm:$0x3] %vm2647_vm1, %v8448_v9  ;;  %v700_v22 = vmul.f32 %v6487_v40, %v8449_v34  ;;  %v961_v34 = vmul.f32 %v6499_v60, %v6294_v29  ;;  %v6765_v29 = vld [vmem:[%s5784_s23 + $0x32] sm:$0xff] }
 0x247   : > { %2654 = vst.msk [vmem:[#allocation2 + $0x40] sm:$0x3] %vm2647_vm1, %v8448_v9 }
 0x248   : > { %2657 = vst.msk [vmem:[#allocation2 + $0x58] sm:$0x3] %vm2647_vm1, %v8448_v9  ;;  %5683 = vmatpush.bf16.msra.mxu2 %v5641_v38  ;;  %5684 = vmatpush.bf16.msra.mxu3 %v5641_v38 }
 0x249   : > { %2660 = vst.msk [vmem:[#allocation2 + $0x70] sm:$0x3] %vm2647_vm1, %v8448_v9  ;;  %5682 = vmatpush.bf16.msra.mxu1 %v5641_v38  ;;  %2925 = vmatpush.bf16.msra.mxu0 %v5641_v38  ;;  %v721_v38 = vadd.f32 %v689_v8, %v428_v33  ;;  %v1473_v8 = vmul.f32 %v6521_v4, %v6416_v48 }
 0x24a   : > { %1662 = vperm.xlu2 %5698, %v6587_v21   ;;  %1657 = vperm.xlu1 %5697, %v6555_v35   ;;  %2663 = vst.msk [vmem:[#allocation2 + $0x88] sm:$0x3] %vm2647_vm1, %v8448_v9  ;;  %v8450_v35 = vld [vmem:[#allocation12_spill] sm:$0xff]  ;;  %v967_v48 = vmul.f32 %v6499_v60, %v6312_v61  ;;  %v966_v61 = vmul.f32 %v6499_v60, %v6272_v16 }
 0x24b   : > { %2095 = vperm.xlu0 %5696, %v5217_v14   ;;  %v439_v14 = vmul.f32 %v6492_v37, %v8450_v35  ;;  %2666 = vst.msk [vmem:[#allocation2 + $0xa0] sm:$0x3] %vm2647_vm1, %v8448_v9  ;;  %v6760_v35 = vld [vmem:[%s5784_s23 + $0x3a] sm:$0xff]  ;;  %v982_v33 = vadd.f32 %v950_v28, %v721_v38  ;;  %v1490_v16 = vmul.f32 %v6521_v4, %v6532_v27 }
 0x24c   : > { %v6743_v55 = vpop.permute.xlu2 %2381  ;;  %v1860_v21 = vpop.permute.xlu1 %1859  ;;  %2669 = vst.msk [vmem:[#allocation2 + $0xb8] sm:$0x3] %vm2647_vm1, %v8448_v9 }
 0x24d   : > { %v2166_v20 = vpop.permute.xlu0 %2165  ;;  %v732_v7 = vadd.f32 %v700_v22, %v439_v14  ;;  %2675 = vst.msk [vmem:[#allocation2 + $0xe8] sm:$0x3] %vm2647_vm1, %v8448_v9  ;;  %v1244_v28 = vadd.f32 %v1212_v56, %v982_v33  ;;  %v2005_v56 = vmul.f32 %v6636_v12, %v6697_v39  ;;  %v1229_v33 = vmul.f32 %v6512_v41, %v6371_v25 }
 0x24e   : > { %2678 = vst.msk [vmem:[#allocation2 + $0x100] sm:$0x3] %vm2647_vm1, %v8448_v9 }
 0x24f   : > { %v993_v22 = vadd.f32 %v961_v34, %v732_v7  ;;  %2681 = vst.msk [vmem:[#allocation2 + $0x118] sm:$0x3] %vm2647_vm1, %v8448_v9 }
 0x250   : > { %2684 = vst.msk [vmem:[#allocation2 + $0x130] sm:$0x3] %vm2647_vm1, %v8448_v9 }
 0x251   : > { %v1255_v14 = vadd.f32 %v1223_v17, %v993_v22  ;;  %2687 = vst.msk [vmem:[#allocation2 + $0x148] sm:$0x3] %vm2647_vm1, %v8448_v9  ;;  %v8453_v17 = vld [vmem:[#allocation13_spill] sm:$0xff]  ;;  %v8454_v22 = vld [vmem:[#allocation19_spill] sm:$0xff] }
 0x252   : > { %1697 = vperm.xlu2 %5698, %v6623_v24   ;;  %2356 = vperm.xlu1 %5697, %v6760_v35   ;;  %2690 = vst.msk [vmem:[#allocation2 + $0x160] sm:$0x3] %vm2647_vm1, %v8448_v9  ;;  %v429_v57 = vmul.f32 %v6492_v37, %v8453_v17  ;;  %v445_v19 = vmul.f32 %v6492_v37, %v8454_v22  ;;  %v8456_v17 = vld [vmem:[#allocation35_spill] sm:$0xff]  ;;  %v8457_v22 = vld [vmem:[#allocation60_spill] sm:$0xff] }
 0x253   : > { %2351 = vperm.xlu0 %5696, %v6765_v29   ;;  %v1516_v59 = vadd.f32 %v1484_v46, %v1255_v14  ;;  %2693 = vst.msk [vmem:[#allocation2 + $0x178] sm:$0x3] %vm2647_vm1, %v8448_v9  ;;  %v1734_v46 = vmul.f32 %v6530_v23, %v6687_v26  ;;  %v5202_v14 = vld [vmem:[%s5784_s23 + $0x110] sm:$0xff]  ;;  %v444_v63 = vmul.f32 %v6492_v37, %v8456_v17 }
 0x254   : > { %v1653_v7 = vpop.permute.xlu2 %1652  ;;  %v2206_v43 = vpop.permute.xlu1 %2205  ;;  %2696 = vst.msk [vmem:[#allocation2 + $0x190] sm:$0x3] %vm2647_vm1, %v8448_v9  ;;  %v690_v11 = vmul.f32 %v6487_v40, %v8457_v22  ;;  %v738_v26 = vadd.f32 %v706_v15, %v445_v19  ;;  %v1228_v17 = vmul.f32 %v6512_v41, %v6400_v6 }
 0x255   : > { %v1745_v24 = vmul.f32 %v6530_v23, %v1653_v7  ;;  %v2201_v34 = vpop.permute.xlu0 %2200  ;;  %v5201_v7 = vld [vmem:[%s5784_s23 + $0x108] sm:$0xff]  ;;  %2699 = vst.msk [vmem:[#allocation2 + $0x1a8] sm:$0x3] %vm2647_vm1, %v8448_v9  ;;  %v737_v9 = vadd.f32 %v705_v1, %v444_v63  ;;  %v2037_v1 = vadd.f32 %v2005_v56, %v6537_v30  ;;  %v951_v63 = vmul.f32 %v6499_v60, %v6227_v2 }
 0x256   : > { %v999_v22 = vadd.f32 %v967_v48, %v738_v26  ;;  %v722_v19 = vadd.f32 %v690_v11, %v429_v57  ;;  %v1750_v11 = vmul.f32 %v6530_v23, %v6647_v45  ;;  %v2012_v56 = vmul.f32 %v6636_v12, %v6718_v52 }
 0x257   : > { %v6807_v38 = vadd.f32 %v1745_v24, %v1516_v59  ;;  %v1505_v59 = vadd.f32 %v1473_v8, %v1244_v28  ;;  %v1996_v24 = vmul.f32 %v6636_v12, %v1860_v21  ;;  %v998_v25 = vadd.f32 %v966_v61, %v737_v9 }
 0x258   : > { %v1489_v21 = vmul.f32 %v6521_v4, %v6535_v49  ;;  %v1261_v15 = vadd.f32 %v1229_v33, %v999_v22  ;;  %v1751_v8 = vmul.f32 %v6530_v23, %v6643_v0  ;;  %v5209_v0 = vld [vmem:[%s5784_s23 + $0x168] sm:$0xff]  ;;  %v2274_v33 = vmul.f32 %v6658_v58, %v2206_v43 }
 0x259   : > { %8455 = vst [vmem:[#allocation9_spill] sm:$0xff] %v6807_v38  ;;  %v2266_v38 = vmul.f32 %v6658_v58, %v2166_v20  ;;  %v1766_v39 = vadd.f32 %v1734_v46, %v1505_v59  ;;  %v2013_v46 = vmul.f32 %v6636_v12, %v6715_v62  ;;  %v983_v52 = vadd.f32 %v951_v63, %v722_v19 }
 0x25a   : > { %1924 = vperm.xlu2 %5698, %v5202_v14   ;;  %1919 = vperm.xlu1 %5697, %v5201_v7   ;;  %v1522_v30 = vadd.f32 %v1490_v16, %v1261_v15  ;;  %v2518_v14 = vmul.f32 %v6674_v5, %v6743_v55  ;;  %v2273_v55 = vmul.f32 %v6658_v58, %v2201_v34  ;;  %v5234_v15 = vld [vmem:[%s5784_s23 + $0x109] sm:$0xff] }
 0x25b   : > { %1702 = vperm.xlu0 %5696, %v6618_v50   ;;  %v2028_v48 = vadd.f32 %v1996_v24, %v1766_v39  ;;  %v1260_v50 = vadd.f32 %v1228_v17, %v998_v25  ;;  %v2298_v57 = vadd.f32 %v2266_v38, %v2037_v1  ;;  %v1213_v38 = vmul.f32 %v6512_v41, %v6355_v54 }
 0x25c   : > { %v6833_v6 = vpop.permute.xlu2 %1909  ;;  %v2121_v20 = vpop.permute.xlu1 %2120  ;;  %v1783_v26 = vadd.f32 %v1751_v8, %v1522_v30  ;;  %v1474_v54 = vmul.f32 %v6521_v4, %v6454_v36 }
 0x25d   : > { %v2257_v27 = vmul.f32 %v6658_v58, %v2121_v20  ;;  %v2427_v28 = vpop.permute.xlu0 %2426  ;;  %v1521_v61 = vadd.f32 %v1489_v21, %v1260_v50  ;;  %v1245_v21 = vadd.f32 %v1213_v38, %v983_v52  ;;  %v5235_v20 = vld [vmem:[%s5784_s23 + $0x111] sm:$0xff] }
 0x25e   : > { %v2527_v49 = vmul.f32 %v6674_v5, %v2427_v28  ;;  %v2045_v2 = vadd.f32 %v2013_v46, %v1783_v26  ;;  %v5210_v28 = vld [vmem:[%s5784_s23 + $0x170] sm:$0xff]  ;;  %v8459_v46 = vld [vmem:[#allocation25_spill] sm:$0xff] }
 0x25f   : > { %v2289_v7 = vadd.f32 %v2257_v27, %v2028_v48  ;;  %v1782_v59 = vadd.f32 %v1750_v11, %v1521_v61  ;;  %v1506_v8 = vadd.f32 %v1474_v54, %v1245_v21  ;;  %v1997_v48 = vmul.f32 %v6636_v12, %v6641_v31  ;;  %v8458_v50 = vld [vmem:[#allocation71_spill] sm:$0xff]  ;;  %v2805_v26 = vld [vmem:[#allocation2 + $0xc1] sm:$0xff] }
 0x260   : > { %v2559_v45 = vadd.f32 %v2527_v49, %v2298_v57  ;;  %v2306_v16 = vadd.f32 %v2274_v33, %v2045_v2  ;;  %v699_v11 = vmul.f32 %v6487_v40, %v8458_v50  ;;  %v2258_v49 = vmul.f32 %v6658_v58, %v6713_v47  ;;  %v5242_v2 = vld [vmem:[%s5784_s23 + $0x169] sm:$0xff] }
 0x261   : > { %v2550_v62 = vadd.f32 %v2518_v14, %v2289_v7  ;;  %v2044_v43 = vadd.f32 %v2012_v56, %v1782_v59  ;;  %v438_v14 = vmul.f32 %v6492_v37, %v8459_v46  ;;  %v960_v31 = vmul.f32 %v6499_v60, %v6254_v10  ;;  %v6918_v46 = vld [vmem:[%s5784_s23 + $0x16a] sm:$0xff] }
 0x262   : > { %v2595_v24 = vadd.f32 %v6692_v44, %v2559_v45  ;;  %1959 = vperm.xlu2 %5698, %v5209_v0   ;;  %1622 = vperm.xlu1 %5697, %v6661_v42   ;;  %v1222_v47 = vmul.f32 %v6512_v41, %v6382_v51  ;;  %v5193_v51 = vld [vmem:[%s5784_s23 + $0xa8] sm:$0xff] }
 0x263   : > { %v2586_v9 = vadd.f32 %v6692_v44, %v2550_v62  ;;  %1617 = vperm.xlu0 %5696, %v6664_v13   ;;  %v1735_v13 = vmul.f32 %v6530_v23, %v6570_v32  ;;  %v2305_v19 = vadd.f32 %v2273_v55, %v2044_v43  ;;  %v731_v45 = vadd.f32 %v699_v11, %v438_v14  ;;  %v5227_v14 = vld [vmem:[%s5784_s23 + $0xb1] sm:$0xff] }
 0x264   : > { %v2627_v17 = vmax.f32 %v2595_v24, 0.0  ;;  %v6860_v22 = vpop.permute.xlu2 %1612  ;;  %v2467_v34 = vpop.permute.xlu1 %2466  ;;  %v1483_v24 = vmul.f32 %v6521_v4, %v6481_v53 }
 0x265   : > { %v2618_v39 = vmax.f32 %v2586_v9, 0.0  ;;  %v2535_v42 = vmul.f32 %v6674_v5, %v2467_v34  ;;  %v2462_v25 = vpop.permute.xlu0 %2461  ;;  %v1767_v57 = vadd.f32 %v1735_v13, %v1506_v8  ;;  %v992_v55 = vadd.f32 %v960_v31, %v731_v45  ;;  %v5194_v9 = vld [vmem:[%s5784_s23 + $0xb0] sm:$0xff] }
 0x266   : > { %2716 = vst.msk [vmem:[#allocation2 + $0xc9] sm:$0xff] %vm2644_vm0, %v2627_v17  ;;  %v2534_v36 = vmul.f32 %v6674_v5, %v2462_v25  ;;  %v5226_v31 = vld [vmem:[%s5784_s23 + $0xa9] sm:$0xff] }
 0x267   : > { %2707 = vst.msk [vmem:[#allocation2 + $0x61] sm:$0xff] %vm2644_vm0, %v2618_v39  ;;  %v2567_v1 = vadd.f32 %v2535_v42, %v2306_v16  ;;  %v2029_v0 = vadd.f32 %v1997_v48, %v1767_v57  ;;  %v1254_v54 = vadd.f32 %v1222_v47, %v992_v55 }
 0x268   : > { %v2566_v27 = vadd.f32 %v2534_v36, %v2305_v19  ;;  %v2006_v36 = vmul.f32 %v6636_v12, %v6833_v6 }
 0x269   : > { %v2603_v32 = vadd.f32 %v6692_v44, %v2567_v1  ;;  %v2290_v62 = vadd.f32 %v2258_v49, %v2029_v0  ;;  %v1515_v34 = vadd.f32 %v1483_v24, %v1254_v54  ;;  %v6904_v1 = vld [vmem:[%s5784_s23 + $0x112] sm:$0xff]  ;;  %v8462_v24 = vld [vmem:[#allocation113_spill] sm:$0xff] }
 0x26a   : > { %v2602_v30 = vadd.f32 %v6692_v44, %v2566_v27  ;;  %2185 = vperm.xlu2 %5698, %v5235_v20   ;;  %2180 = vperm.xlu1 %5697, %v5234_v15   ;;  %v6907_v20 = vld [vmem:[%s5784_s23 + $0x10a] sm:$0xff] }
 0x26b   : > { %v2635_v7 = vmax.f32 %v2603_v32, 0.0  ;;  %1964 = vperm.xlu0 %5696, %v5210_v28   ;;  %v5243_v15 = vld [vmem:[%s5784_s23 + $0x171] sm:$0xff] }
 0x26c   : > { %v2634_v63 = vmax.f32 %v2602_v30, 0.0  ;;  %v2171_v61 = vpop.permute.xlu2 %2170  ;;  %v1648_v56 = vpop.permute.xlu1 %1647 }
 0x26d   : > { %2724 = vst.msk [vmem:[#allocation2 + $0x129] sm:$0xff] %vm2644_vm0, %v2635_v7  ;;  %v2387_v38 = vpop.permute.xlu0 %2386  ;;  %v2806_v33 = vld [vmem:[#allocation2 + $0xc9] sm:$0xff]  ;;  %v1744_v43 = vmul.f32 %v6530_v23, %v1648_v56  ;;  %v2267_v48 = vmul.f32 %v6658_v58, %v2171_v61  ;;  %v8460_v56 = vld [vmem:[#allocation45_spill] sm:$0xff] }
 0x26e   : > { %2723 = vst.msk [vmem:[#allocation2 + $0x121] sm:$0xff] %vm2644_vm0, %v2634_v63  ;;  %v2519_v10 = vmul.f32 %v6674_v5, %v2387_v38  ;;  %v2829_v59 = vpack.c.bf16 %v2806_v33, %v2805_v26  ;;  %v2797_v32 = vld [vmem:[#allocation2 + $0x61] sm:$0xff]  ;;  %v692_v45 = vmul.f32 %v6487_v40, %v8460_v56  ;;  %v953_v33 = vmul.f32 %v6499_v60, %v6265_v18  ;;  %v5186_v56 = vld [vmem:[%s5784_s23 + $0x50] sm:$0xff] }
 0x26f   : > { %v1776_v25 = vadd.f32 %v1744_v43, %v1515_v34  ;;  %v8461_v38 = vld [vmem:[#allocation17_spill] sm:$0xff]  ;;  %v5185_v43 = vld [vmem:[%s5784_s23 + $0x48] sm:$0xff] }
 0x270   : > { %v2551_v52 = vadd.f32 %v2519_v10, %v2290_v62  ;;  %5314 = vmatmul.msk.bf16.vlgmr.msra.gmra.mxu2 %vm2644_vm0, %v2829_v59  ;;  %v431_v26 = vmul.f32 %v6492_v37, %v8461_v38  ;;  %v6937_v62 = vld [vmem:[%s5784_s23 + $0x172] sm:$0xff]  ;;  %v1215_v59 = vmul.f32 %v6512_v41, %v6366_v3 }
 0x271   : > { %v2038_v8 = vadd.f32 %v2006_v36, %v1776_v25  ;;  %v8469_v38 = vld [vmem:[#allocation64_spill] sm:$0xff] }
 0x272   : > { %v2587_v17 = vadd.f32 %v6692_v44, %v2551_v52  ;;  %2220 = vperm.xlu2 %5698, %v5242_v2   ;;  %1884 = vperm.xlu1 %5697, %v5194_v9   ;;  %v724_v10 = vadd.f32 %v692_v45, %v431_v26  ;;  %v1476_v2 = vmul.f32 %v6521_v4, %v8462_v24 }
 0x273   : > { %1879 = vperm.xlu0 %5696, %v5193_v51   ;;  %v2299_v28 = vadd.f32 %v2267_v48, %v2038_v8  ;;  %v1737_v51 = vmul.f32 %v6530_v23, %v6860_v22  ;;  %v8464_v8 = vld [vmem:[#allocation66_spill] sm:$0xff]  ;;  %v1231_v26 = vmul.f32 %v6512_v41, %v8469_v38 }
 0x274   : > { %v2619_v16 = vmax.f32 %v2587_v17, 0.0  ;;  %v1875_v53 = vpop.permute.xlu2 %1874  ;;  %v6896_v39 = vpop.permute.xlu1 %1692  ;;  %v2814_v42 = vld [vmem:[#allocation2 + $0x129] sm:$0xff]  ;;  %v985_v55 = vadd.f32 %v953_v33, %v724_v10  ;;  %v707_v48 = vmul.f32 %v6487_v40, %v8464_v8 }
 0x275   : > { %v6898_v21 = vpop.permute.xlu0 %1687  ;;  %v2813_v13 = vld [vmem:[#allocation2 + $0x121] sm:$0xff]  ;;  %v6958_v17 = vld [vmem:[%s5784_s23 + $0xaa] sm:$0xff] }
 0x276   : > { %2708 = vst.msk [vmem:[#allocation2 + $0x69] sm:$0xff] %vm2644_vm0, %v2619_v16  ;;  %v2833_v19 = vpack.c.bf16 %v2814_v42, %v2813_v13  ;;  %v1247_v52 = vadd.f32 %v1215_v59, %v985_v55  ;;  %v8470_v59 = vld [vmem:[#allocation65_spill] sm:$0xff] }
 0x277   : > { %v1230_v55 = vmul.f32 %v6512_v41, %v8470_v59 }
 0x278   : > { %5318 = vmatmul.msk.bf16.vlgmr.msra.gmra.mxu3 %vm2644_vm0, %v2833_v19  ;;  %v1508_v3 = vadd.f32 %v1476_v2, %v1247_v52  ;;  %v8471_v52 = vld [vmem:[#allocation129_spill] sm:$0xff] }
 0x27a   : > { %2446 = vperm.xlu2 %5698, %v6904_v1   ;;  %2441 = vperm.xlu1 %5697, %v6907_v20   ;;  %v1769_v34 = vadd.f32 %v1737_v51, %v1508_v3  ;;  %v1492_v51 = vmul.f32 %v6521_v4, %v8471_v52  ;;  %v2789_v52 = vld [vmem:[#allocation2 + $0x1] sm:$0xff] }
 0x27b   : > { %2225 = vperm.xlu0 %5696, %v5243_v15  }
 0x27c   : > { %v2432_v27 = vpop.permute.xlu2 %2431  ;;  %v6914_v6 = vpop.permute.xlu1 %1607 }
 0x27d   : > { %v2528_v50 = vmul.f32 %v6674_v5, %v2432_v27  ;;  %v1915_v11 = vpop.permute.xlu0 %1914  ;;  %v2798_v57 = vld [vmem:[#allocation2 + $0x69] sm:$0xff] }
 0x27e   : > { %v2825_v49 = vpack.c.bf16 %v2798_v57, %v2797_v32  ;;  %v8465_v27 = vld [vmem:[#allocation38_spill] sm:$0xff] }
 0x27f   : > { %v2560_v30 = vadd.f32 %v2528_v50, %v2299_v28  ;;  %v447_v28 = vmul.f32 %v6492_v37, %v8465_v27  ;;  %v8466_v50 = vld [vmem:[#allocation92_spill] sm:$0xff] }
 0x280   : > { %5310 = vmatmul.msk.bf16.vlgmr.msra.gmra.mxu1 %vm2644_vm0, %v2825_v49  ;;  %v969_v32 = vmul.f32 %v6499_v60, %v8466_v50  ;;  %v5219_v49 = vld [vmem:[%s5784_s23 + $0x51] sm:$0xff]  ;;  %v8475_v50 = vld [vmem:[#allocation5_spill] sm:$0xff] }
 0x281   : > { %v2596_v7 = vadd.f32 %v6692_v44, %v2560_v30  ;;  %v5218_v30 = vld [vmem:[%s5784_s23 + $0x49] sm:$0xff] }
 0x282   : > { %2481 = vperm.xlu2 %5698, %v6918_v46   ;;  %2145 = vperm.xlu1 %5697, %v5227_v14   ;;  %v8467_v14 = vld [vmem:[#allocation39_spill] sm:$0xff] }
 0x283   : > { %v2628_v0 = vmax.f32 %v2596_v7, 0.0  ;;  %2140 = vperm.xlu0 %5696, %v5226_v31   ;;  %v446_v31 = vmul.f32 %v6492_v37, %v8467_v14  ;;  %v8468_v7 = vld [vmem:[#allocation99_spill] sm:$0xff] }
 0x284   : > { %v2136_v63 = vpop.permute.xlu2 %2135  ;;  %v6925_v61 = vpop.permute.xlu1 %1954 }
 0x285   : > { %2717 = vst.msk [vmem:[#allocation2 + $0xd9] sm:$0xff] %vm2644_vm0, %v2628_v0  ;;  %v6930_v47 = vpop.permute.xlu0 %1949  ;;  %v2260_v16 = vmul.f32 %v6658_v58, %v2136_v63  ;;  %v968_v0 = vmul.f32 %v6499_v60, %v8468_v7  ;;  %v2007_v63 = vmul.f32 %v6636_v12, %v1915_v11  ;;  %v739_v10 = vadd.f32 %v707_v48, %v446_v31 }
 0x286   : > { %v1752_v48 = vmul.f32 %v6530_v23, %v6898_v21  ;;  %v2014_v31 = vmul.f32 %v6636_v12, %v6930_v47 }
 0x287   : > { %v1000_v3 = vadd.f32 %v968_v0, %v739_v10  ;;  %v8477_v0 = vld [vmem:[#allocation103_spill] sm:$0xff] }
 0x289   : > { %v1262_v8 = vadd.f32 %v1230_v55, %v1000_v3  ;;  %v1736_v55 = vmul.f32 %v6530_v23, %v6914_v6 }
 0x28a   : > { %1582 = vperm.xlu2 %5698, %v6760_v35   ;;  %1577 = vperm.xlu1 %5697, %v6765_v29   ;;  %v1999_v35 = vmul.f32 %v6636_v12, %v1875_v53  ;;  %v6955_v29 = vld [vmem:[%s5784_s23 + $0xb2] sm:$0xff]  ;;  %v8463_v53 = vld [vmem:[#allocation78_spill] sm:$0xff] }
 0x28b   : > { %2486 = vperm.xlu0 %5696, %v6937_v62   ;;  %v708_v13 = vmul.f32 %v6487_v40, %v8463_v53  ;;  %v8474_v53 = vld [vmem:[#allocation59_spill] sm:$0xff] }
 0x28c   : > { %v6946_v18 = vpop.permute.xlu2 %1567  ;;  %v6948_v9 = vpop.permute.xlu1 %1869  ;;  %v2031_v42 = vadd.f32 %v1999_v35, %v1769_v34  ;;  %v8472_v35 = vld [vmem:[#allocation124_spill] sm:$0xff]  ;;  %v8473_v34 = vld [vmem:[#allocation9_spill] sm:$0xff] }
 0x28d   : > { %v2176_v54 = vpop.permute.xlu0 %2175  ;;  %v740_v45 = vadd.f32 %v708_v13, %v447_v28 }
 0x28e   : > { %v2292_v19 = vadd.f32 %v2260_v16, %v2031_v42  ;;  %v2268_v24 = vmul.f32 %v6658_v58, %v2176_v54  ;;  %v2039_v16 = vadd.f32 %v2007_v63, %v8473_v34  ;;  %v691_v54 = vmul.f32 %v6487_v40, %v8474_v53 }
 0x28f   : > { %v1001_v2 = vadd.f32 %v969_v32, %v740_v45  ;;  %v430_v32 = vmul.f32 %v6492_v37, %v8475_v50  ;;  %v1214_v63 = vmul.f32 %v6512_v41, %v8477_v0 }
 0x290   : > { %v2300_v27 = vadd.f32 %v2268_v24, %v2039_v16  ;;  %v7032_v16 = vld [vmem:[%s5784_s23 + $0x52] sm:$0xff] }
 0x291   : > { %v1263_v13 = vadd.f32 %v1231_v26, %v1001_v2  ;;  %v723_v7 = vadd.f32 %v691_v54, %v430_v32  ;;  %v8478_v26 = vld [vmem:[#allocation120_spill] sm:$0xff]  ;;  %v5204_v32 = vld [vmem:[%s5784_s23 + $0x128] sm:$0xff] }
 0x292   : > { %1839 = vperm.xlu2 %5698, %v5185_v43   ;;  %2406 = vperm.xlu1 %5697, %v6955_v29   ;;  %v1491_v43 = vmul.f32 %v6521_v4, %v8472_v35  ;;  %v1475_v47 = vmul.f32 %v6521_v4, %v8478_v26  ;;  %v1998_v35 = vmul.f32 %v6636_v12, %v6948_v9  ;;  %v8482_v26 = vld [vmem:[#allocation82_spill] sm:$0xff] }
 0x293   : > { %2401 = vperm.xlu0 %5696, %v6958_v17  }
 0x294   : > { %v2397_v22 = vpop.permute.xlu2 %2396  ;;  %v2216_v25 = vpop.permute.xlu1 %2215  ;;  %v1523_v14 = vadd.f32 %v1491_v43, %v1262_v8 }
 0x295   : > { %v2521_v36 = vmul.f32 %v6674_v5, %v2397_v22  ;;  %v2211_v15 = vpop.permute.xlu0 %2210  ;;  %v2276_v37 = vmul.f32 %v6658_v58, %v2216_v25 }
 0x296   : > { %v1784_v45 = vadd.f32 %v1752_v48, %v1523_v14  ;;  %v8479_v14 = vld [vmem:[#allocation34_spill] sm:$0xff] }
 0x297   : > { %v2553_v57 = vadd.f32 %v2521_v36, %v2292_v19  ;;  %v1753_v19 = vmul.f32 %v6530_v23, %v6896_v39  ;;  %v2015_v39 = vmul.f32 %v6636_v12, %v6925_v61 }
 0x298   : > { %v2046_v41 = vadd.f32 %v2014_v31, %v1784_v45  ;;  %v7066_v45 = vld [vmem:[%s8256_s1] ss:$0 sm:$0xff] }
 0x299   : > { %v2589_v33 = vadd.f32 %v6692_v44, %v2553_v57  ;;  %v8476_v57 = vld [vmem:[#allocation89_spill] sm:$0xff] }
 0x29a   : > { %2105 = vperm.xlu2 %5698, %v5219_v49   ;;  %2100 = vperm.xlu1 %5697, %v5218_v30   ;;  %v952_v40 = vmul.f32 %v6499_v60, %v8476_v57  ;;  %v1524_v49 = vadd.f32 %v1492_v51, %v1263_v13  ;;  %v7008_v30 = vld [vmem:[%s5784_s23 + $0x4a] sm:$0xff]  ;;  %v2275_v60 = vmul.f32 %v6658_v58, %v2211_v15  ;;  %v5203_v57 = vld [vmem:[%s5784_s23 + $0x120] sm:$0xff] }
 0x29b   : > { %v2621_v11 = vmax.f32 %v2589_v33, 0.0  ;;  %1844 = vperm.xlu0 %5696, %v5186_v56   ;;  %v2790_v51 = vld [vmem:[#allocation2 + $0x9] sm:$0xff] }
 0x29c   : > { %v6991_v42 = vpop.permute.xlu2 %2090  ;;  %v2131_v22 = vpop.permute.xlu1 %2130  ;;  %v1785_v56 = vadd.f32 %v1753_v19, %v1524_v49  ;;  %v984_v61 = vadd.f32 %v952_v40, %v723_v7  ;;  %v2307_v4 = vadd.f32 %v2275_v60, %v2046_v41  ;;  %v8481_v60 = vld [vmem:[#allocation8_spill] sm:$0xff]  ;;  %v8483_v41 = vld [vmem:[#allocation11_spill] sm:$0xff] }
 0x29d   : > { %2710 = vst.msk [vmem:[#allocation2 + $0x81] sm:$0xff] %vm2644_vm0, %v2621_v11  ;;  %v2437_v36 = vpop.permute.xlu0 %2436  ;;  %v2821_v11 = vpack.c.bf16 %v2790_v51, %v2789_v52  ;;  %v2259_v6 = vmul.f32 %v6658_v58, %v2131_v22  ;;  %v8485_v52 = vld [vmem:[#allocation108_spill] sm:$0xff] }
 0x29e   : > { %v2529_v28 = vmul.f32 %v6674_v5, %v2437_v36  ;;  %v2047_v33 = vadd.f32 %v2015_v39, %v1785_v56  ;;  %v1246_v15 = vadd.f32 %v1214_v63, %v984_v61  ;;  %v7054_v39 = vld [vmem:[%s8256_s1 + $0x1] ss:$0 sm:$0xff]  ;;  %v8480_v63 = vld [vmem:[#allocation50_spill] sm:$0xff]  ;;  %v7073_v61 = vld [vmem:[%s8256_s1 + $0x2] ss:$0 sm:$0xff] }
 0x29f   : > { %5306 = vmatmul.msk.bf16.vlgmr.msra.gmra.mxu0 %vm2644_vm0, %v2821_v11  ;;  %v683_v31 = vmul.f32 %v7054_v39, %v8479_v14 }
 0x2a0   : > { %v2561_v21 = vadd.f32 %v2529_v28, %v2300_v27  ;;  %v2308_v24 = vadd.f32 %v2276_v37, %v2047_v33  ;;  %v1507_v3 = vadd.f32 %v1475_v47, %v1246_v15  ;;  %v2807_v28 = vld [vmem:[#allocation2 + $0xd9] sm:$0xff]  ;;  %v944_v47 = vmul.f32 %v7073_v61, %v8482_v26 }
 0x2a2   : > { %v2597_v38 = vadd.f32 %v6692_v44, %v2561_v21  ;;  %2361 = vperm.xlu2 %5698, %v7008_v30   ;;  %1672 = vperm.xlu1 %5697, %v6904_v1   ;;  %v1768_v23 = vadd.f32 %v1736_v55, %v1507_v3  ;;  %v5212_v55 = vld [vmem:[%s5784_s23 + $0x188] sm:$0xff] }
 0x2a3   : > { %1667 = vperm.xlu0 %5696, %v6907_v20  }
 0x2a4   : > { %v2629_v10 = vmax.f32 %v2597_v38, 0.0  ;;  %v7022_v59 = vpop.permute.xlu2 %1662  ;;  %v2477_v25 = vpop.permute.xlu1 %2476  ;;  %v2030_v13 = vadd.f32 %v1998_v35, %v1768_v23  ;;  %v422_v38 = vmul.f32 %v7066_v45, %v8481_v60  ;;  %v7096_v35 = vld [vmem:[%s8256_s1 + $0x4] ss:$0 sm:$0xff] }
 0x2a5   : > { %v2537_v1 = vmul.f32 %v6674_v5, %v2477_v25  ;;  %v2472_v2 = vpop.permute.xlu0 %2471  ;;  %v8484_v25 = vld [vmem:[#allocation75_spill] sm:$0xff] }
 0x2a6   : > { %2718 = vst.msk [vmem:[#allocation2 + $0xe1] sm:$0xff] %vm2644_vm0, %v2629_v10  ;;  %v2536_v20 = vmul.f32 %v6674_v5, %v2472_v2  ;;  %v2291_v48 = vadd.f32 %v2259_v6, %v2030_v13  ;;  %v423_v10 = vmul.f32 %v7066_v45, %v8483_v41  ;;  %v945_v15 = vmul.f32 %v7073_v61, %v8484_v25  ;;  %v7086_v2 = vld [vmem:[%s8256_s1 + $0x3] ss:$0 sm:$0xff]  ;;  %v8488_v6 = vld [vmem:[#allocation118_spill] sm:$0xff]  ;;  %v7106_v13 = vld [vmem:[%s8256_s1 + $0x5] ss:$0 sm:$0xff] }
 0x2a7   : > { %v2569_v43 = vadd.f32 %v2537_v1, %v2308_v24  ;;  %v5211_v24 = vld [vmem:[%s5784_s23 + $0x180] sm:$0xff]  ;;  %v715_v1 = vadd.f32 %v683_v31, %v422_v38  ;;  %v1206_v51 = vmul.f32 %v7086_v2, %v8485_v52  ;;  %v5196_v52 = vld [vmem:[%s5784_s23 + $0xc8] sm:$0xff] }
 0x2a8   : > { %v2568_v34 = vadd.f32 %v2536_v20, %v2307_v4  ;;  %v8486_v20 = vld [vmem:[#allocation107_spill] sm:$0xff]  ;;  %v5236_v31 = vld [vmem:[%s5784_s23 + $0x121] sm:$0xff] }
 0x2a9   : > { %v2605_v53 = vadd.f32 %v6692_v44, %v2569_v43  ;;  %v1207_v11 = vmul.f32 %v7086_v2, %v8486_v20  ;;  %v976_v3 = vadd.f32 %v944_v47, %v715_v1  ;;  %v8487_v43 = vld [vmem:[#allocation27_spill] sm:$0xff] }
 0x2aa   : > { %v2604_v54 = vadd.f32 %v6692_v44, %v2568_v34  ;;  %1712 = vperm.xlu2 %5698, %v6937_v62   ;;  %1707 = vperm.xlu1 %5697, %v6918_v46   ;;  %v1467_v34 = vmul.f32 %v7096_v35, %v8487_v43  ;;  %v8493_v43 = vld [vmem:[#allocation26_spill] sm:$0xff] }
 0x2ab   : > { %v2637_v9 = vmax.f32 %v2605_v53, 0.0  ;;  %2366 = vperm.xlu0 %5696, %v7032_v16   ;;  %v1468_v53 = vmul.f32 %v7096_v35, %v8488_v6 }
 0x2ac   : > { %v2636_v19 = vmax.f32 %v2604_v54, 0.0  ;;  %v7041_v36 = vpop.permute.xlu2 %1697  ;;  %v2392_v8 = vpop.permute.xlu1 %2391  ;;  %v1238_v54 = vadd.f32 %v1206_v51, %v976_v3 }
 0x2ad   : > { %2726 = vst.msk [vmem:[#allocation2 + $0x141] sm:$0xff] %vm2644_vm0, %v2637_v9  ;;  %v2520_v22 = vmul.f32 %v6674_v5, %v2392_v8  ;;  %v1573_v27 = vpop.permute.xlu0 %1572  ;;  %v2808_v62 = vld [vmem:[#allocation2 + $0xe1] sm:$0xff]  ;;  %v1728_v9 = vmul.f32 %v7106_v13, %v6946_v18 }
 0x2ae   : > { %2725 = vst.msk [vmem:[#allocation2 + $0x139] sm:$0xff] %vm2644_vm0, %v2636_v19  ;;  %v2830_v46 = vpack.c.bf16 %v2808_v62, %v2807_v28  ;;  %v5195_v18 = vld [vmem:[%s5784_s23 + $0xc0] sm:$0xff] }
 0x2af   : > { %v2552_v50 = vadd.f32 %v2520_v22, %v2291_v48  ;;  %v2800_v22 = vld [vmem:[#allocation2 + $0x81] sm:$0xff] }
 0x2b0   : > { %5315 = vmatmul.msk.bf16.gmra.mxu2 %vm2644_vm0, %v2830_v46 }
 0x2b1   : > { %v2588_v40 = vadd.f32 %v6692_v44, %v2552_v50  ;;  %v1499_v50 = vadd.f32 %v1467_v34, %v1238_v54  ;;  %v1486_v34 = vmul.f32 %v7096_v35, %v8493_v43 }
 0x2b2   : > { %1627 = vperm.xlu2 %5698, %v6958_v17   ;;  %1934 = vperm.xlu1 %5697, %v5204_v32   ;;  %v684_v17 = vmul.f32 %v7054_v39, %v8480_v63 }
 0x2b3   : > { %v2620_v49 = vmax.f32 %v2588_v40, 0.0  ;;  %1929 = vperm.xlu0 %5696, %v5203_v57   ;;  %v1760_v14 = vadd.f32 %v1728_v9, %v1499_v50  ;;  %v8494_v9 = vld [vmem:[#allocation77_spill] sm:$0xff] }
 0x2b4   : > { %v7058_v21 = vpop.permute.xlu2 %1924  ;;  %v1835_v7 = vpop.permute.xlu1 %1834  ;;  %v2816_v0 = vld [vmem:[#allocation2 + $0x141] sm:$0xff]  ;;  %v716_v4 = vadd.f32 %v684_v17, %v423_v10  ;;  %v8490_v10 = vld [vmem:[#allocation31_spill] sm:$0xff] }
 0x2b5   : > { %2709 = vst.msk [vmem:[#allocation2 + $0x79] sm:$0xff] %vm2644_vm0, %v2620_v49  ;;  %v1830_v56 = vpop.permute.xlu0 %1829  ;;  %v2815_v37 = vld [vmem:[#allocation2 + $0x139] sm:$0xff]  ;;  %v1991_v40 = vmul.f32 %v6636_v12, %v1835_v7  ;;  %v5237_v49 = vld [vmem:[%s5784_s23 + $0x129] sm:$0xff]  ;;  %v441_v25 = vmul.f32 %v7066_v45, %v8490_v10 }
 0x2b6   : > { %v2834_v33 = vpack.c.bf16 %v2816_v0, %v2815_v37  ;;  %v977_v23 = vadd.f32 %v945_v15, %v716_v4  ;;  %v1990_v32 = vmul.f32 %v6636_v12, %v1830_v56  ;;  %v2251_v12 = vmul.f32 %v6658_v58, %v6991_v42  ;;  %v8489_v37 = vld [vmem:[#allocation74_spill] sm:$0xff]  ;;  %v8491_v15 = vld [vmem:[#allocation88_spill] sm:$0xff] }
 0x2b7   : > { %v702_v60 = vmul.f32 %v7054_v39, %v8489_v37  ;;  %v5244_v42 = vld [vmem:[%s5784_s23 + $0x181] sm:$0xff] }
 0x2b8   : > { %5319 = vmatmul.msk.bf16.gmra.mxu3 %vm2644_vm0, %v2834_v33  ;;  %v1239_v28 = vadd.f32 %v1207_v11, %v977_v23  ;;  %v2022_v17 = vadd.f32 %v1990_v32, %v1760_v14  ;;  %v8492_v4 = vld [vmem:[#allocation22_spill] sm:$0xff] }
 0x2b9   : > { %v734_v51 = vadd.f32 %v702_v60, %v441_v25  ;;  %v1225_v20 = vmul.f32 %v7086_v2, %v8492_v4 }
 0x2ba   : > { %1974 = vperm.xlu2 %5698, %v5212_v55   ;;  %1969 = vperm.xlu1 %5697, %v5211_v24   ;;  %v1500_v57 = vadd.f32 %v1468_v53, %v1239_v28  ;;  %v2283_v33 = vadd.f32 %v2251_v12, %v2022_v17  ;;  %v963_v55 = vmul.f32 %v7073_v61, %v8491_v15  ;;  %v7170_v17 = vld [vmem:[%s8256_s1 + $0x7] ss:$0 sm:$0xff] }
 0x2bb   : > { %1632 = vperm.xlu0 %5696, %v6955_v29   ;;  %v1729_v29 = vmul.f32 %v7106_v13, %v1573_v27 }
 0x2bc   : > { %v7110_v19 = vpop.permute.xlu2 %1959  ;;  %v7112_v8 = vpop.permute.xlu1 %1657  ;;  %v2799_v48 = vld [vmem:[#allocation2 + $0x79] sm:$0xff] }
 0x2bd   : > { %v2096_v62 = vpop.permute.xlu0 %2095  ;;  %v2826_v46 = vpack.c.bf16 %v2800_v22, %v2799_v48  ;;  %v1761_v0 = vadd.f32 %v1729_v29, %v1500_v57  ;;  %v709_v48 = vmul.f32 %v7054_v39, %v8494_v9  ;;  %v8495_v29 = vld [vmem:[#allocation24_spill] sm:$0xff]  ;;  %v7158_v57 = vld [vmem:[%s8256_s1 + $0x6] ss:$0 sm:$0xff] }
 0x2be   : > { %v2252_v63 = vmul.f32 %v6658_v58, %v2096_v62  ;;  %v5245_v58 = vld [vmem:[%s5784_s23 + $0x189] sm:$0xff]  ;;  %v448_v62 = vmul.f32 %v7066_v45, %v8495_v29 }
 0x2bf   : > { %5311 = vmatmul.msk.bf16.gmra.mxu1 %vm2644_vm0, %v2826_v46  ;;  %v2023_v27 = vadd.f32 %v1991_v40, %v1761_v0  ;;  %v8496_v46 = vld [vmem:[#allocation102_spill] sm:$0xff] }
 0x2c0   : > { %v970_v50 = vmul.f32 %v7073_v61, %v8496_v46  ;;  %v5228_v40 = vld [vmem:[%s5784_s23 + $0xc1] sm:$0xff]  ;;  %v741_v14 = vadd.f32 %v709_v48, %v448_v62  ;;  %v8500_v48 = vld [vmem:[#allocation32_spill] sm:$0xff] }
 0x2c1   : > { %v2284_v38 = vadd.f32 %v2252_v63, %v2023_v27  ;;  %v5261_v46 = vld [vmem:[%s5784_s23 + $0xc2] sm:$0xff] }
 0x2c2   : > { %1889 = vperm.xlu2 %5698, %v5195_v18   ;;  %2195 = vperm.xlu1 %5697, %v5237_v49   ;;  %v5270_v18 = vld [vmem:[%s5784_s23 + $0x12a] sm:$0xff]  ;;  %v5269_v49 = vld [vmem:[%s5784_s23 + $0x122] sm:$0xff]  ;;  %v1002_v12 = vadd.f32 %v970_v50, %v741_v14 }
 0x2c3   : > { %2190 = vperm.xlu0 %5696, %v5236_v31   ;;  %v8497_v31 = vld [vmem:[#allocation28_spill] sm:$0xff] }
 0x2c4   : > { %v2186_v7 = vpop.permute.xlu2 %2185  ;;  %v2357_v56 = vpop.permute.xlu1 %2356  ;;  %v1232_v0 = vmul.f32 %v7086_v2, %v8497_v31 }
 0x2c5   : > { %v2513_v26 = vmul.f32 %v6674_v5, %v2357_v56  ;;  %v2352_v47 = vpop.permute.xlu0 %2351  ;;  %v2270_v27 = vmul.f32 %v7170_v17, %v2186_v7  ;;  %v8498_v56 = vld [vmem:[#allocation128_spill] sm:$0xff] }
 0x2c6   : > { %v2512_v41 = vmul.f32 %v6674_v5, %v2352_v47  ;;  %v995_v5 = vadd.f32 %v963_v55, %v734_v51  ;;  %v1264_v47 = vadd.f32 %v1232_v0, %v1002_v12  ;;  %v1746_v12 = vmul.f32 %v7106_v13, %v7112_v8 }
 0x2c7   : > { %v2545_v24 = vadd.f32 %v2513_v26, %v2284_v38 }
 0x2c8   : > { %v2544_v1 = vadd.f32 %v2512_v41, %v2283_v33  ;;  %v1257_v22 = vadd.f32 %v1225_v20, %v995_v5  ;;  %v1754_v33 = vmul.f32 %v7106_v13, %v7041_v36  ;;  %v7182_v41 = vld [vmem:[%s8256_s1 + $0x8] ss:$0 sm:$0xff]  ;;  %v7204_v20 = vld [vmem:[%s8257_s2] ss:$0 sm:$0xff] }
 0x2c9   : > { %v2581_v11 = vadd.f32 %v6692_v44, %v2545_v24  ;;  %v7195_v36 = vld [vmem:[%s5784_s23 + $0x182] sm:$0xff] }
 0x2ca   : > { %v2580_v3 = vadd.f32 %v6692_v44, %v2544_v1  ;;  %2235 = vperm.xlu2 %5698, %v5245_v58   ;;  %2230 = vperm.xlu1 %5697, %v5244_v42   ;;  %v1747_v44 = vmul.f32 %v7106_v13, %v7022_v59  ;;  %v1518_v32 = vadd.f32 %v1486_v34, %v1257_v22  ;;  %v7192_v1 = vld [vmem:[%s5784_s23 + $0x18a] sm:$0xff] }
 0x2cb   : > { %v2613_v23 = vmax.f32 %v2581_v11, 0.0  ;;  %1894 = vperm.xlu0 %5696, %v5196_v52   ;;  %v2009_v59 = vmul.f32 %v7158_v57, %v7058_v21  ;;  %v1493_v21 = vmul.f32 %v7096_v35, %v8498_v56  ;;  %v2016_v58 = vmul.f32 %v7158_v57, %v7110_v19  ;;  %v5229_v52 = vld [vmem:[%s5784_s23 + $0xc9] sm:$0xff] }
 0x2cc   : > { %v2612_v6 = vmax.f32 %v2580_v3, 0.0  ;;  %v2221_v53 = vpop.permute.xlu2 %2220  ;;  %v7141_v54 = vpop.permute.xlu1 %1919  ;;  %v1779_v63 = vadd.f32 %v1747_v44, %v1518_v32  ;;  %v8499_v34 = vld [vmem:[#allocation58_spill] sm:$0xff]  ;;  %v440_v22 = vmul.f32 %v7066_v45, %v8500_v48  ;;  %v8502_v32 = vld [vmem:[#allocation33_spill] sm:$0xff] }
 0x2cd   : > { %2702 = vst.msk [vmem:[#allocation2 + $0x21] sm:$0xff] %vm2644_vm0, %v2613_v23  ;;  %v7148_v28 = vpop.permute.xlu0 %1702  ;;  %v1525_v24 = vadd.f32 %v1493_v21, %v1264_v47  ;;  %v2277_v4 = vmul.f32 %v7170_v17, %v2221_v53  ;;  %v701_v23 = vmul.f32 %v7054_v39, %v8499_v34  ;;  %v8501_v44 = vld [vmem:[#allocation94_spill] sm:$0xff]  ;;  %v2008_v21 = vmul.f32 %v7158_v57, %v7141_v54 }
 0x2ce   : > { %2701 = vst.msk [vmem:[#allocation2 + $0x19] sm:$0xff] %vm2644_vm0, %v2612_v6  ;;  %v2041_v37 = vadd.f32 %v2009_v59, %v1779_v63  ;;  %v962_v29 = vmul.f32 %v7073_v61, %v8501_v44  ;;  %v1224_v59 = vmul.f32 %v7086_v2, %v8502_v32  ;;  %v8510_v32 = vld [vmem:[#allocation63_spill] sm:$0xff] }
 0x2cf   : > { %v1786_v51 = vadd.f32 %v1754_v33, %v1525_v24  ;;  %v733_v50 = vadd.f32 %v701_v23, %v440_v22  ;;  %v8504_v24 = vld [vmem:[#allocation69_spill] sm:$0xff]  ;;  %v8507_v23 = vld [vmem:[#allocation44_spill] sm:$0xff]  ;;  %v8508_v22 = vld [vmem:[#allocation126_spill] sm:$0xff] }
 0x2d0   : > { %v2302_v7 = vadd.f32 %v2270_v27, %v2041_v37  ;;  %v5188_v37 = vld [vmem:[%s5784_s23 + $0x68] sm:$0xff]  ;;  %v1494_v44 = vmul.f32 %v7096_v35, %v8508_v22 }
 0x2d1   : > { %v2048_v19 = vadd.f32 %v2016_v58, %v1786_v51  ;;  %v710_v58 = vmul.f32 %v7054_v39, %v8504_v24  ;;  %v5221_v51 = vld [vmem:[%s5784_s23 + $0x69] sm:$0xff] }
 0x2d2   : > { %2150 = vperm.xlu2 %5698, %v5228_v40   ;;  %2456 = vperm.xlu1 %5697, %v5270_v18   ;;  %v994_v18 = vadd.f32 %v962_v29, %v733_v50 }
 0x2d3   : > { %2451 = vperm.xlu0 %5696, %v5269_v49   ;;  %v2309_v6 = vadd.f32 %v2277_v4, %v2048_v19  ;;  %v8503_v49 = vld [vmem:[#allocation55_spill] sm:$0xff]  ;;  %v8505_v4 = vld [vmem:[#allocation42_spill] sm:$0xff]  ;;  %v8506_v19 = vld [vmem:[#allocation101_spill] sm:$0xff] }
 0x2d4   : > { %v2447_v60 = vpop.permute.xlu2 %2446  ;;  %v7175_v38 = vpop.permute.xlu1 %1622  ;;  %v2792_v26 = vld [vmem:[#allocation2 + $0x21] sm:$0xff]  ;;  %v1485_v14 = vmul.f32 %v7096_v35, %v8503_v49  ;;  %v1256_v27 = vadd.f32 %v1224_v59, %v994_v18  ;;  %v693_v59 = vmul.f32 %v7054_v39, %v8510_v32  ;;  %v1755_v49 = vmul.f32 %v7106_v13, %v7148_v28  ;;  %v8520_v32 = vld [vmem:[#allocation7_spill] sm:$0xff] }
 0x2d5   : > { %v2531_v10 = vmul.f32 %v7182_v41, %v2447_v60  ;;  %v7185_v25 = vpop.permute.xlu0 %1617  ;;  %v2791_v15 = vld [vmem:[#allocation2 + $0x19] sm:$0xff]  ;;  %v8515_v28 = vld [vmem:[#allocation106_spill] sm:$0xff] }
 0x2d6   : > { %v7187_v55 = vpack.c.bf16 %v2792_v26, %v2791_v15  ;;  %v5187_v60 = vld [vmem:[%s5784_s23 + $0x60] sm:$0xff] }
 0x2d7   : > { %v2563_v42 = vadd.f32 %v2531_v10, %v2302_v7 }
 0x2d8   : > { %5307 = vmatmul.msk.bf16.gmra.mxu0 %vm2644_vm0, %v7187_v55 }
 0x2d9   : > { %v2599_v11 = vadd.f32 %v7204_v20, %v2563_v42 }
 0x2da   : > { %2496 = vperm.xlu2 %5698, %v7192_v1   ;;  %2491 = vperm.xlu1 %5697, %v7195_v36  }
 0x2db   : > { %v2631_v3 = vmax.f32 %v2599_v11, 0.0  ;;  %2155 = vperm.xlu0 %5696, %v5229_v52   ;;  %v5253_v52 = vld [vmem:[%s5784_s23 + $0x62] sm:$0xff]  ;;  %v449_v11 = vmul.f32 %v7066_v45, %v8505_v4 }
 0x2dc   : > { %v2482_v5 = vpop.permute.xlu2 %2481  ;;  %v2181_v43 = vpop.permute.xlu1 %2180 }
 0x2dd   : > { %2720 = vst.msk [vmem:[#allocation2 + $0xf9] sm:$0xff] %vm2644_vm0, %v2631_v3  ;;  %v2538_v53 = vmul.f32 %v7182_v41, %v2482_v5  ;;  %v7213_v9 = vpop.permute.xlu0 %1964  ;;  %v2269_v47 = vmul.f32 %v7170_v17, %v2181_v43  ;;  %v971_v3 = vmul.f32 %v7073_v61, %v8506_v19  ;;  %v5220_v5 = vld [vmem:[%s5784_s23 + $0x61] sm:$0xff]  ;;  %v742_v34 = vadd.f32 %v710_v58, %v449_v11  ;;  %v8518_v11 = vld [vmem:[#allocation123_spill] sm:$0xff] }
 0x2de   : > { %v1477_v19 = vmul.f32 %v7096_v35, %v8518_v11 }
 0x2df   : > { %v2570_v62 = vadd.f32 %v2538_v53, %v2309_v6  ;;  %v1233_v6 = vmul.f32 %v7086_v2, %v8507_v23  ;;  %v1003_v48 = vadd.f32 %v971_v3, %v742_v34  ;;  %v8519_v23 = vld [vmem:[#allocation49_spill] sm:$0xff] }
 0x2e1   : > { %v2606_v40 = vadd.f32 %v7204_v20, %v2570_v62  ;;  %v1265_v18 = vadd.f32 %v1233_v6, %v1003_v48  ;;  %v1739_v6 = vmul.f32 %v7106_v13, %v7175_v38 }
 0x2e2   : > { %2411 = vperm.xlu2 %5698, %v5261_v46   ;;  %1592 = vperm.xlu1 %5697, %v7032_v16   ;;  %v1517_v16 = vadd.f32 %v1485_v14, %v1256_v27  ;;  %v8509_v46 = vld [vmem:[#allocation62_spill] sm:$0xff]  ;;  %v8512_v27 = vld [vmem:[#allocation16_spill] sm:$0xff] }
 0x2e3   : > { %v2638_v31 = vmax.f32 %v2606_v40, 0.0  ;;  %1587 = vperm.xlu0 %5696, %v7008_v30   ;;  %v5262_v30 = vld [vmem:[%s5784_s23 + $0xca] sm:$0xff]  ;;  %v694_v50 = vmul.f32 %v7054_v39, %v8509_v46 }
 0x2e4   : > { %v7227_v0 = vpop.permute.xlu2 %1582  ;;  %v7229_v63 = vpop.permute.xlu1 %1884  ;;  %v1778_v26 = vadd.f32 %v1746_v12, %v1517_v16  ;;  %v8511_v14 = vld [vmem:[#allocation6_spill] sm:$0xff]  ;;  %v432_v12 = vmul.f32 %v7066_v45, %v8512_v27  ;;  %v8513_v16 = vld [vmem:[#allocation91_spill] sm:$0xff]  ;;  %v5214_v27 = vld [vmem:[%s5784_s23 + $0x1a0] sm:$0xff] }
 0x2e5   : > { %2727 = vst.msk [vmem:[#allocation2 + $0x151] sm:$0xff] %vm2644_vm0, %v2638_v31  ;;  %v7234_v56 = vpop.permute.xlu0 %1879  ;;  %v433_v31 = vmul.f32 %v7066_v45, %v8511_v14  ;;  %v2001_v38 = vmul.f32 %v7158_v57, %v7229_v63 }
 0x2e6   : > { %v2040_v8 = vadd.f32 %v2008_v21, %v1778_v26  ;;  %v955_v21 = vmul.f32 %v7073_v61, %v8513_v16  ;;  %v2017_v26 = vmul.f32 %v7158_v57, %v7213_v9 }
 0x2e8   : > { %v2301_v10 = vadd.f32 %v2269_v47, %v2040_v8  ;;  %v5254_v47 = vld [vmem:[%s5784_s23 + $0x6a] sm:$0xff]  ;;  %v726_v8 = vadd.f32 %v694_v50, %v433_v31  ;;  %v5246_v31 = vld [vmem:[%s5784_s23 + $0x199] sm:$0xff] }
 0x2ea   : > { %1854 = vperm.xlu2 %5698, %v5188_v37   ;;  %1849 = vperm.xlu1 %5697, %v5187_v60   ;;  %v8514_v37 = vld [vmem:[#allocation81_spill] sm:$0xff] }
 0x2eb   : > { %2416 = vperm.xlu0 %5696, %v5262_v30   ;;  %v954_v60 = vmul.f32 %v7073_v61, %v8514_v37  ;;  %v1526_v30 = vadd.f32 %v1494_v44, %v1265_v18  ;;  %v1738_v44 = vmul.f32 %v7106_v13, %v7185_v25  ;;  %v8521_v18 = vld [vmem:[#allocation86_spill] sm:$0xff]  ;;  %v2000_v25 = vmul.f32 %v7158_v57, %v7234_v56 }
 0x2ec   : > { %v7242_v33 = vpop.permute.xlu2 %1839  ;;  %v2442_v7 = vpop.permute.xlu1 %2441 }
 0x2ed   : > { %v2530_v15 = vmul.f32 %v7182_v41, %v2442_v7  ;;  %v2226_v54 = vpop.permute.xlu0 %2225  ;;  %v725_v7 = vadd.f32 %v693_v59, %v432_v12  ;;  %v1787_v58 = vadd.f32 %v1755_v49, %v1526_v30  ;;  %v424_v59 = vmul.f32 %v7066_v45, %v8520_v32 }
 0x2ee   : > { %v946_v49 = vmul.f32 %v7073_v61, %v8521_v18 }
 0x2ef   : > { %v2562_v42 = vadd.f32 %v2530_v15, %v2301_v10  ;;  %v1217_v10 = vmul.f32 %v7086_v2, %v8515_v28  ;;  %v8516_v15 = vld [vmem:[#allocation112_spill] sm:$0xff]  ;;  %v986_v4 = vadd.f32 %v954_v60, %v725_v7  ;;  %v2049_v3 = vadd.f32 %v2017_v26, %v1787_v58  ;;  %v8522_v60 = vld [vmem:[#allocation98_spill] sm:$0xff] }
 0x2f0   : > { %v1216_v24 = vmul.f32 %v7086_v2, %v8516_v15  ;;  %v1208_v30 = vmul.f32 %v7086_v2, %v8522_v60 }
 0x2f1   : > { %v2598_v43 = vadd.f32 %v7204_v20, %v2562_v42  ;;  %v2278_v42 = vmul.f32 %v7170_v17, %v2226_v54  ;;  %v2810_v54 = vld [vmem:[#allocation2 + $0xf9] sm:$0xff] }
 0x2f2   : > { %2371 = vperm.xlu2 %5698, %v5253_v52   ;;  %2115 = vperm.xlu1 %5697, %v5221_v51   ;;  %v987_v52 = vadd.f32 %v955_v21, %v726_v8  ;;  %v8517_v51 = vld [vmem:[#allocation122_spill] sm:$0xff]  ;;  %v1248_v22 = vadd.f32 %v1216_v24, %v986_v4  ;;  %v5213_v21 = vld [vmem:[%s5784_s23 + $0x198] sm:$0xff] }
 0x2f3   : > { %v2630_v53 = vmax.f32 %v2598_v43, 0.0  ;;  %2110 = vperm.xlu0 %5696, %v5220_v5   ;;  %v1478_v9 = vmul.f32 %v7096_v35, %v8517_v51  ;;  %v2310_v46 = vadd.f32 %v2278_v42, %v2049_v3 }
 0x2f4   : > { %v7259_v29 = vpop.permute.xlu2 %2105  ;;  %v2146_v62 = vpop.permute.xlu1 %2145  ;;  %v1509_v12 = vadd.f32 %v1477_v19, %v1248_v22 }
 0x2f5   : > { %2719 = vst.msk [vmem:[#allocation2 + $0xf1] sm:$0xff] %vm2644_vm0, %v2630_v53  ;;  %v2141_v40 = vpop.permute.xlu0 %2140 }
 0x2f6   : > { %v1770_v8 = vadd.f32 %v1738_v44, %v1509_v12  ;;  %v2261_v63 = vmul.f32 %v7170_v17, %v2141_v40  ;;  %v8524_v44 = vld [vmem:[#allocation37_spill] sm:$0xff] }
 0x2f7   : > { %v8526_v12 = vld [vmem:[#allocation85_spill] sm:$0xff] }
 0x2f8   : > { %v2032_v24 = vadd.f32 %v2000_v25, %v1770_v8  ;;  %v947_v25 = vmul.f32 %v7073_v61, %v8526_v12 }
 0x2fa   : > { %1722 = vperm.xlu2 %5698, %v7192_v1   ;;  %1717 = vperm.xlu1 %5697, %v7195_v36   ;;  %v685_v1 = vmul.f32 %v7054_v39, %v8519_v23  ;;  %v1249_v36 = vadd.f32 %v1217_v10, %v987_v52  ;;  %v8523_v10 = vld [vmem:[#allocation117_spill] sm:$0xff]  ;;  %v2293_v11 = vadd.f32 %v2261_v63, %v2032_v24  ;;  %v8528_v63 = vld [vmem:[#allocation51_spill] sm:$0xff] }
 0x2fb   : > { %2376 = vperm.xlu0 %5696, %v5254_v47   ;;  %v2262_v47 = vmul.f32 %v7170_v17, %v2146_v62  ;;  %v1469_v56 = vmul.f32 %v7096_v35, %v8523_v10  ;;  %v5279_v23 = vld [vmem:[%s5784_s23 + $0x19a] sm:$0xff] }
 0x2fc   : > { %v7290_v5 = vpop.permute.xlu2 %2361  ;;  %v1578_v43 = vpop.permute.xlu1 %1577  ;;  %v2809_v34 = vld [vmem:[#allocation2 + $0xf1] sm:$0xff]  ;;  %v1510_v14 = vadd.f32 %v1478_v9, %v1249_v36  ;;  %v717_v37 = vadd.f32 %v685_v1, %v424_v59  ;;  %v5247_v36 = vld [vmem:[%s5784_s23 + $0x1a1] sm:$0xff] }
 0x2fd   : > { %v2487_v53 = vpop.permute.xlu0 %2486  ;;  %v2831_v48 = vpack.c.bf16 %v2810_v54, %v2809_v34  ;;  %v1730_v51 = vmul.f32 %v7106_v13, %v1578_v43  ;;  %v5280_v54 = vld [vmem:[%s5784_s23 + $0x1a2] sm:$0xff]  ;;  %v1992_v43 = vmul.f32 %v7158_v57, %v7242_v33 }
 0x2fe   : > { %v2539_v50 = vmul.f32 %v7182_v41, %v2487_v53  ;;  %v1771_v26 = vadd.f32 %v1739_v6, %v1510_v14  ;;  %v978_v28 = vadd.f32 %v946_v49, %v717_v37 }
 0x2ff   : > { %5316 = vmatmul.msk.bf16.gmra.mxu2 %vm2644_vm0, %v2831_v48 }
 0x300   : > { %v2571_v16 = vadd.f32 %v2539_v50, %v2310_v46  ;;  %v2033_v15 = vadd.f32 %v2001_v38, %v1771_v26  ;;  %v1240_v52 = vadd.f32 %v1208_v30, %v978_v28  ;;  %v686_v46 = vmul.f32 %v7054_v39, %v8524_v44  ;;  %v2817_v38 = vld [vmem:[#allocation2 + $0x151] sm:$0xff]  ;;  %v8527_v30 = vld [vmem:[#allocation110_spill] sm:$0xff] }
 0x301   : > { %v1209_v26 = vmul.f32 %v7086_v2, %v8527_v30 }
 0x302   : > { %v2607_v7 = vadd.f32 %v7204_v20, %v2571_v16  ;;  %2240 = vperm.xlu2 %5698, %v5246_v31   ;;  %1984 = vperm.xlu1 %5697, %v5214_v27   ;;  %v2294_v40 = vadd.f32 %v2262_v47, %v2033_v15  ;;  %v1501_v3 = vadd.f32 %v1469_v56, %v1240_v52  ;;  %v8525_v27 = vld [vmem:[#allocation10_spill] sm:$0xff] }
 0x303   : > { %1979 = vperm.xlu0 %5696, %v5213_v21   ;;  %v425_v33 = vmul.f32 %v7066_v45, %v8525_v27  ;;  %v2514_v21 = vmul.f32 %v7182_v41, %v7290_v5  ;;  %v1731_v56 = vmul.f32 %v7106_v13, %v7227_v0 }
 0x304   : > { %v2639_v58 = vmax.f32 %v2607_v7, 0.0  ;;  %v7318_v42 = vpop.permute.xlu2 %1712  ;;  %v2407_v62 = vpop.permute.xlu1 %2406  ;;  %v1762_v6 = vadd.f32 %v1730_v51, %v1501_v3  ;;  %v1470_v7 = vmul.f32 %v7096_v35, %v8528_v63 }
 0x305   : > { %v2523_v9 = vmul.f32 %v7182_v41, %v2407_v62  ;;  %v2402_v4 = vpop.permute.xlu0 %2401  ;;  %v718_v60 = vadd.f32 %v686_v46, %v425_v33  ;;  %v8534_v33 = vld [vmem:[#allocation48_spill] sm:$0xff] }
 0x306   : > { %2728 = vst.msk [vmem:[#allocation2 + $0x159] sm:$0xff] %vm2644_vm0, %v2639_v58  ;;  %v2522_v19 = vmul.f32 %v7182_v41, %v2402_v4  ;;  %v2024_v18 = vadd.f32 %v1992_v43, %v1762_v6  ;;  %v8529_v43 = vld [vmem:[#allocation79_spill] sm:$0xff]  ;;  %v695_v12 = vmul.f32 %v7054_v39, %v8534_v33 }
 0x307   : > { %v2555_v34 = vadd.f32 %v2523_v9, %v2294_v40  ;;  %v979_v8 = vadd.f32 %v947_v25, %v718_v60 }
 0x308   : > { %v2554_v1 = vadd.f32 %v2522_v19, %v2293_v11  ;;  %v2254_v11 = vmul.f32 %v7170_v17, %v7259_v29  ;;  %v8530_v29 = vld [vmem:[#allocation30_spill] sm:$0xff] }
 0x309   : > { %v2591_v53 = vadd.f32 %v7204_v20, %v2555_v34  ;;  %v1241_v10 = vadd.f32 %v1209_v26, %v979_v8  ;;  %v451_v46 = vmul.f32 %v7066_v45, %v8530_v29 }
 0x30a   : > { %v2590_v48 = vadd.f32 %v7204_v20, %v2554_v1  ;;  %2506 = vperm.xlu2 %5698, %v5280_v54   ;;  %2501 = vperm.xlu1 %5697, %v5279_v23  }
 0x30b   : > { %v2623_v22 = vmax.f32 %v2591_v53, 0.0  ;;  %2245 = vperm.xlu0 %5696, %v5247_v36   ;;  %v1502_v40 = vadd.f32 %v1470_v7, %v1241_v10  ;;  %v5648_v7 = vld [vmem:[%s8258_s3 + $0x58] sm:$0xff]  ;;  %v8536_v10 = vld [vmem:[#allocation90_spill] sm:$0xff] }
 0x30c   : > { %v2622_v50 = vmax.f32 %v2590_v48, 0.0  ;;  %v7333_v32 = vpop.permute.xlu2 %1627  ;;  %v2101_v59 = vpop.permute.xlu1 %2100  ;;  %3301 = vmatpush.bf16.msrb.mxu2 %v5648_v7  ;;  %v8545_v7 = vld [vmem:[#allocation57_spill] sm:$0xff] }
 0x30d   : > { %2712 = vst.msk [vmem:[#allocation2 + $0x99] sm:$0xff] %vm2644_vm0, %v2623_v22  ;;  %v2253_v49 = vmul.f32 %v7170_v17, %v2101_v59  ;;  %v1845_v14 = vpop.permute.xlu0 %1844  ;;  %v2818_v31 = vld [vmem:[#allocation2 + $0x159] sm:$0xff]  ;;  %v1763_v4 = vadd.f32 %v1731_v56, %v1502_v40  ;;  %v712_v22 = vmul.f32 %v7054_v39, %v8529_v43  ;;  %v956_v56 = vmul.f32 %v7073_v61, %v8536_v10  ;;  %v8537_v40 = vld [vmem:[#allocation18_spill] sm:$0xff] }
 0x30e   : > { %2711 = vst.msk [vmem:[#allocation2 + $0x91] sm:$0xff] %vm2644_vm0, %v2622_v50  ;;  %v2835_v16 = vpack.c.bf16 %v2818_v31, %v2817_v38  ;;  %v1993_v51 = vmul.f32 %v7158_v57, %v1845_v14  ;;  %v8531_v50 = vld [vmem:[#allocation105_spill] sm:$0xff]  ;;  %v8533_v31 = vld [vmem:[#allocation130_spill] sm:$0xff] }
 0x30f   : > { %v2285_v37 = vadd.f32 %v2253_v49, %v2024_v18  ;;  %v973_v59 = vmul.f32 %v7073_v61, %v8531_v50  ;;  %v744_v18 = vadd.f32 %v712_v22, %v451_v46  ;;  %v8532_v49 = vld [vmem:[#allocation29_spill] sm:$0xff]  ;;  %v1496_v27 = vmul.f32 %v7096_v35, %v8533_v31  ;;  %v5656_v50 = vld [vmem:[%s8258_s3 + $0x98] sm:$0xff] }
 0x310   : > { %5320 = vmatmul.msk.bf16.gmra.mxu3 %vm2644_vm0, %v2835_v16  ;;  %v2025_v0 = vadd.f32 %v1993_v51, %v1763_v4  ;;  %v1235_v14 = vmul.f32 %v7086_v2, %v8532_v49  ;;  %v1218_v51 = vmul.f32 %v7086_v2, %v8537_v40  ;;  %v1740_v22 = vmul.f32 %v7106_v13, %v7333_v32  ;;  %v8541_v49 = vld [vmem:[#allocation73_spill] sm:$0xff] }
 0x311   : > { %v2546_v47 = vadd.f32 %v2514_v21, %v2285_v37  ;;  %v1005_v38 = vadd.f32 %v973_v59, %v744_v18  ;;  %v1757_v37 = vmul.f32 %v7106_v13, %v7318_v42  ;;  %v5640_v42 = vld [vmem:[%s8258_s3 + $0x18] sm:$0xff]  ;;  %3801 = vmatpush.bf16.msrb.mxu0 %v5656_v50 }
 0x312   : > { %v2286_v54 = vadd.f32 %v2254_v11, %v2025_v0  ;;  %3083 = vmatpush.bf16.msrb.mxu1 %v5640_v42  ;;  %v8540_v59 = vld [vmem:[#allocation36_spill] sm:$0xff] }
 0x313   : > { %v2582_v28 = vadd.f32 %v7204_v20, %v2546_v47  ;;  %v1267_v21 = vadd.f32 %v1235_v14, %v1005_v38  ;;  %v8535_v47 = vld [vmem:[#allocation21_spill] sm:$0xff]  ;;  %v443_v18 = vmul.f32 %v7066_v45, %v8540_v59  ;;  %v703_v14 = vmul.f32 %v7054_v39, %v8541_v49  ;;  %v8542_v38 = vld [vmem:[#allocation96_spill] sm:$0xff] }
 0x314   : > { %v1975_v15 = vpop.permute.xlu2 %1974  ;;  %v7352_v5 = vpop.permute.xlu1 %1672  ;;  %v2802_v24 = vld [vmem:[#allocation2 + $0x99] sm:$0xff]  ;;  %v434_v8 = vmul.f32 %v7066_v45, %v8535_v47  ;;  %v965_v31 = vmul.f32 %v7073_v61, %v8542_v38  ;;  %v5647_v47 = vld [vmem:[%s8258_s3 + $0x50] sm:$0xff] }
 0x315   : > { %v2614_v58 = vmax.f32 %v2582_v28, 0.0  ;;  %v7354_v62 = vpop.permute.xlu0 %1667  ;;  %v2801_v52 = vld [vmem:[#allocation2 + $0x91] sm:$0xff]  ;;  %3302 = vmatpush.bf16.msrb.mxu2 %v5647_v47  ;;  %v8550_v59 = vld [vmem:[#allocation41_spill] sm:$0xff] }
 0x316   : > { %v7357_v9 = vpack.c.bf16 %v2802_v24, %v2801_v52  ;;  %v5652_v28 = vld [vmem:[%s8258_s3 + $0x78] sm:$0xff]  ;;  %v1528_v24 = vadd.f32 %v1496_v27, %v1267_v21  ;;  %v727_v52 = vadd.f32 %v695_v12, %v434_v8  ;;  %v8543_v12 = vld [vmem:[#allocation15_spill] sm:$0xff]  ;;  %v8551_v49 = vld [vmem:[#allocation93_spill] sm:$0xff] }
 0x317   : > { %2703 = vst.msk [vmem:[#allocation2 + $0x31] sm:$0xff] %vm2644_vm0, %v2614_v58  ;;  %v2019_v58 = vmul.f32 %v7158_v57, %v1975_v15  ;;  %3551 = vmatpush.bf16.msrb.mxu3 %v5652_v28  ;;  %v442_v21 = vmul.f32 %v7066_v45, %v8543_v12  ;;  %v5651_v8 = vld [vmem:[%s8258_s3 + $0x70] sm:$0xff]  ;;  %v1227_v28 = vmul.f32 %v7086_v2, %v8545_v7 }
 0x318   : > { %5312 = vmatmul.msk.bf16.gmra.mxu1 %vm2644_vm0, %v7357_v9  ;;  %v1789_v4 = vadd.f32 %v1757_v37, %v1528_v24  ;;  %v988_v11 = vadd.f32 %v956_v56, %v727_v52 }
 0x319   : > { %v735_v24 = vadd.f32 %v703_v14, %v442_v21  ;;  %v972_v14 = vmul.f32 %v7073_v61, %v8551_v49  ;;  %v8552_v21 = vld [vmem:[#allocation43_spill] sm:$0xff] }
 0x31a   : > { %v1250_v43 = vadd.f32 %v1218_v51, %v988_v11  ;;  %v8547_v51 = vld [vmem:[#allocation121_spill] sm:$0xff] }
 0x31b   : > { %3552 = vmatpush.bf16.msrb.mxu3 %v5651_v8 }
 0x31c   : > { %v1890_v19 = vpop.permute.xlu2 %1889  ;;  %v7364_v3 = vpop.permute.xlu1 %1707 }
 0x31d   : > { %v2367_v34 = vpop.permute.xlu0 %2366  ;;  %v2002_v32 = vmul.f32 %v7158_v57, %v1890_v19  ;;  %v5639_v19 = vld [vmem:[%s8258_s3 + $0x10] sm:$0xff] }
 0x31e   : > { %v2515_v23 = vmul.f32 %v7182_v41, %v2367_v34  ;;  %v2793_v30 = vld [vmem:[#allocation2 + $0x31] sm:$0xff]  ;;  %3084 = vmatpush.bf16.msrb.mxu1 %v5639_v19 }
 0x31f   : > { %v8538_v34 = vld [vmem:[#allocation116_spill] sm:$0xff] }
 0x320   : > { %v2547_v1 = vadd.f32 %v2515_v23, %v2286_v54  ;;  %v1479_v54 = vmul.f32 %v7096_v35, %v8538_v34  ;;  %v2051_v23 = vadd.f32 %v2019_v58, %v1789_v4  ;;  %v8546_v58 = vld [vmem:[#allocation111_spill] sm:$0xff]  ;;  %v1488_v4 = vmul.f32 %v7096_v35, %v8547_v51  ;;  %v8548_v34 = vld [vmem:[#allocation80_spill] sm:$0xff] }
 0x321   : > { %v1226_v52 = vmul.f32 %v7086_v2, %v8546_v58 }
 0x322   : > { %v2583_v36 = vadd.f32 %v7204_v20, %v2547_v1  ;;  %v8539_v1 = vld [vmem:[#allocation61_spill] sm:$0xff]  ;;  %v1511_v27 = vadd.f32 %v1479_v54, %v1250_v43  ;;  %v711_v54 = vmul.f32 %v7054_v39, %v8548_v34 }
 0x323   : > { %v704_v15 = vmul.f32 %v7054_v39, %v8539_v1 }
 0x324   : > { %v2615_v6 = vmax.f32 %v2583_v36, 0.0  ;;  %v2236_v53 = vpop.permute.xlu2 %2235  ;;  %v7368_v48 = vpop.permute.xlu1 %1934  ;;  %v1772_v42 = vadd.f32 %v1740_v22, %v1511_v27  ;;  %v1749_v22 = vmul.f32 %v7106_v13, %v7352_v5 }
 0x325   : > { %v7372_v44 = vpop.permute.xlu0 %1929  ;;  %v2280_v0 = vmul.f32 %v7170_v17, %v2236_v53  ;;  %v736_v37 = vadd.f32 %v704_v15, %v443_v18  ;;  %v450_v18 = vmul.f32 %v7066_v45, %v8550_v59  ;;  %v2011_v5 = vmul.f32 %v7158_v57, %v7368_v48 }
 0x326   : > { %2704 = vst.msk [vmem:[#allocation2 + $0x39] sm:$0xff] %vm2644_vm0, %v2615_v6 }
 0x327   : > { %v2312_v29 = vadd.f32 %v2280_v0, %v2051_v23  ;;  %v997_v40 = vadd.f32 %v965_v31, %v736_v37  ;;  %v2034_v0 = vadd.f32 %v2002_v32, %v1772_v42  ;;  %v1748_v31 = vmul.f32 %v7106_v13, %v7354_v62 }
 0x328   : > { %v743_v12 = vadd.f32 %v711_v54, %v450_v18  ;;  %v1234_v37 = vmul.f32 %v7086_v2, %v8552_v21  ;;  %v5638_v21 = vld [vmem:[%s8258_s3 + $0x8] sm:$0xff] }
 0x329   : > { %v1259_v43 = vadd.f32 %v1227_v28, %v997_v40  ;;  %v8553_v28 = vld [vmem:[#allocation131_spill] sm:$0xff]  ;;  %3085 = vmatpush.bf16.msrb.mxu1 %v5638_v21 }
 0x32a   : > { %v1004_v48 = vadd.f32 %v972_v14, %v743_v12  ;;  %v1495_v42 = vmul.f32 %v7096_v35, %v8553_v28 }
 0x32b   : > { %v1520_v27 = vadd.f32 %v1488_v4, %v1259_v43 }
 0x32c   : > { %v2151_v25 = vpop.permute.xlu2 %2150  ;;  %v7385_v16 = vpop.permute.xlu1 %1969 }
 0x32d   : > { %v7389_v60 = vpop.permute.xlu0 %1632  ;;  %v2794_v26 = vld [vmem:[#allocation2 + $0x39] sm:$0xff]  ;;  %v2263_v10 = vmul.f32 %v7170_v17, %v2151_v25  ;;  %v8549_v25 = vld [vmem:[#allocation127_spill] sm:$0xff]  ;;  %v1781_v47 = vadd.f32 %v1749_v22, %v1520_v27  ;;  %v2018_v54 = vmul.f32 %v7158_v57, %v7385_v16 }
 0x32e   : > { %v7393_v63 = vpack.c.bf16 %v2794_v26, %v2793_v30  ;;  %v8544_v30 = vld [vmem:[#allocation97_spill] sm:$0xff]  ;;  %v1487_v1 = vmul.f32 %v7096_v35, %v8549_v25 }
 0x32f   : > { %v964_v26 = vmul.f32 %v7073_v61, %v8544_v30  ;;  %v5649_v16 = vld [vmem:[%s8258_s3 + $0x60] sm:$0xff] }
 0x330   : > { %5308 = vmatmul.msk.bf16.gmra.mxu0 %vm2644_vm0, %v7393_v63 }
 0x331   : > { %v996_v23 = vadd.f32 %v964_v26, %v735_v24  ;;  %v2010_v26 = vmul.f32 %v7158_v57, %v7372_v44  ;;  %v5645_v24 = vld [vmem:[%s8258_s3 + $0x40] sm:$0xff]  ;;  %v1266_v44 = vadd.f32 %v1234_v37, %v1004_v48 }
 0x332   : > { %v8558_v48 = vld [vmem:[#allocation125_spill] sm:$0xff] }
 0x333   : > { %v1258_v38 = vadd.f32 %v1226_v52, %v996_v23  ;;  %v1527_v34 = vadd.f32 %v1495_v42, %v1266_v44  ;;  %v1741_v44 = vmul.f32 %v7106_v13, %v7389_v60  ;;  %v5637_v60 = vld [vmem:[%s8258_s3] sm:$0xff] }
 0x334   : > { %v2497_v36 = vpop.permute.xlu2 %2496  ;;  %v2196_v6 = vpop.permute.xlu1 %2195  ;;  %3086 = vmatpush.bf16.msrb.mxu1 %v5637_v60 }
 0x335   : > { %v2541_v46 = vmul.f32 %v7182_v41, %v2497_v36  ;;  %v2191_v53 = vpop.permute.xlu0 %2190  ;;  %v1519_v30 = vadd.f32 %v1487_v1, %v1258_v38  ;;  %v2272_v62 = vmul.f32 %v7170_v17, %v2196_v6  ;;  %v1756_v6 = vmul.f32 %v7106_v13, %v7364_v3  ;;  %v5650_v3 = vld [vmem:[%s8258_s3 + $0x68] sm:$0xff] }
 0x336   : > { %v2271_v7 = vmul.f32 %v7170_v17, %v2191_v53  ;;  %3553 = vmatpush.bf16.msrb.mxu3 %v5650_v3  ;;  %v8562_v3 = vld [vmem:[#allocation53_spill] sm:$0xff] }
 0x337   : > { %v2573_v33 = vadd.f32 %v2541_v46, %v2312_v29  ;;  %v2295_v29 = vadd.f32 %v2263_v10, %v2034_v0  ;;  %v1780_v19 = vadd.f32 %v1748_v31, %v1519_v30  ;;  %v2043_v10 = vadd.f32 %v2011_v5, %v1781_v47  ;;  %v8555_v5 = vld [vmem:[#allocation20_spill] sm:$0xff] }
 0x338   : > { %v1788_v1 = vadd.f32 %v1756_v6, %v1527_v34  ;;  %v8559_v6 = vld [vmem:[#allocation54_spill] sm:$0xff] }
 0x339   : > { %v2609_v56 = vadd.f32 %v7204_v20, %v2573_v33  ;;  %v5646_v33 = vld [vmem:[%s8258_s3 + $0x48] sm:$0xff]  ;;  %v2042_v58 = vadd.f32 %v2010_v26, %v1780_v19  ;;  %v2304_v40 = vadd.f32 %v2272_v62, %v2043_v10  ;;  %v8557_v26 = vld [vmem:[#allocation23_spill] sm:$0xff]  ;;  %v1480_v19 = vmul.f32 %v7096_v35, %v8558_v48 }
 0x33a   : > { %3303 = vmatpush.bf16.msrb.mxu2 %v5646_v33  ;;  %3554 = vmatpush.bf16.msrb.mxu3 %v5649_v16  ;;  %v8556_v33 = vld [vmem:[#allocation84_spill] sm:$0xff]  ;;  %v1219_v47 = vmul.f32 %v7086_v2, %v8557_v26  ;;  %v3168_v26 = vld [vmem:[#allocation2 + $0x2] sm:$0xff] }
 0x33b   : > { %v2641_v11 = vmax.f32 %v2609_v56, 0.0  ;;  %v2303_v4 = vadd.f32 %v2271_v7, %v2042_v58  ;;  %v957_v12 = vmul.f32 %v7073_v61, %v8556_v33  ;;  %v8564_v16 = vld [vmem:[#allocation4_spill] sm:$0xff] }
 0x33c   : > { %v2412_v15 = vpop.permute.xlu2 %2411  ;;  %v2231_v36 = vpop.permute.xlu1 %2230  ;;  %v8567_v33 = vld [vmem:[#allocation100_spill] sm:$0xff] }
 0x33d   : > { %2730 = vst.msk [vmem:[#allocation2 + $0x171] sm:$0xff] %vm2644_vm0, %v2641_v11  ;;  %v2524_v46 = vmul.f32 %v7182_v41, %v2412_v15  ;;  %v7458_v50 = vpop.permute.xlu0 %1894  ;;  %v5655_v11 = vld [vmem:[%s8258_s3 + $0x90] sm:$0xff]  ;;  %v2279_v15 = vmul.f32 %v7170_v17, %v2231_v36  ;;  %v8554_v36 = vld [vmem:[#allocation68_spill] sm:$0xff] }
 0x33e   : > { %3304 = vmatpush.bf16.msrb.mxu2 %v5645_v24  ;;  %3802 = vmatpush.bf16.msrb.mxu0 %v5655_v11  ;;  %v696_v31 = vmul.f32 %v7054_v39, %v8554_v36  ;;  %v8561_v11 = vld [vmem:[#allocation76_spill] sm:$0xff] }
 0x33f   : > { %v2556_v32 = vadd.f32 %v2524_v46, %v2295_v29  ;;  %v2050_v29 = vadd.f32 %v2018_v54, %v1788_v1  ;;  %v948_v34 = vmul.f32 %v7073_v61, %v8561_v11  ;;  %v8563_v1 = vld [vmem:[#allocation109_spill] sm:$0xff] }
 0x341   : > { %v2592_v8 = vadd.f32 %v7204_v20, %v2556_v32  ;;  %v2311_v49 = vadd.f32 %v2279_v15, %v2050_v29  ;;  %v435_v32 = vmul.f32 %v7066_v45, %v8555_v5  ;;  %v1210_v15 = vmul.f32 %v7086_v2, %v8563_v1  ;;  %v5720_v1 = vld [vmem:[%s8256_s1 + $0x1] ss:$0 sm:$0xff] }
 0x343   : > { %v2624_v56 = vmax.f32 %v2592_v8, 0.0  ;;  %v728_v30 = vadd.f32 %v696_v31, %v435_v32  ;;  %v8566_v31 = vld [vmem:[#allocation119_spill] sm:$0xff] }
 0x344   : > { %v2457_v52 = vpop.permute.xlu1 %2456  ;;  %v7519_v42 = vpop.permute.xlu2 %1854 }
 0x345   : > { %2713 = vst.msk [vmem:[#allocation2 + $0xa9] sm:$0xff] %vm2644_vm0, %v2624_v56  ;;  %v2533_v53 = vmul.f32 %v7182_v41, %v2457_v52  ;;  %v2452_v51 = vpop.permute.xlu0 %2451  ;;  %v989_v8 = vadd.f32 %v957_v12, %v728_v30  ;;  %v5654_v52 = vld [vmem:[%s8258_s3 + $0x88] sm:$0xff]  ;;  %v1211_v12 = vmul.f32 %v7086_v2, %v8567_v33 }
 0x346   : > { %v2532_v0 = vmul.f32 %v7182_v41, %v2452_v51  ;;  %v2003_v51 = vmul.f32 %v7158_v57, %v7458_v50  ;;  %3803 = vmatpush.bf16.msrb.mxu0 %v5654_v52  ;;  %v688_v50 = vmul.f32 %v7054_v39, %v8562_v3 }
 0x347   : > { %v2565_v23 = vadd.f32 %v2533_v53, %v2304_v40  ;;  %v1251_v24 = vadd.f32 %v1219_v47, %v989_v8  ;;  %v687_v40 = vmul.f32 %v7054_v39, %v8559_v6  ;;  %v1471_v39 = vmul.f32 %v7096_v35, %v8566_v31  ;;  %v3169_v47 = vld [vmem:[#allocation2 + $0xa] sm:$0xff] }
 0x348   : > { %v2564_v25 = vadd.f32 %v2532_v0, %v2303_v4  ;;  %v8560_v4 = vld [vmem:[#allocation3_spill] sm:$0xff]  ;;  %v3200_v6 = vpack.c.bf16 %v3169_v47, %v3168_v26  ;;  %v5672_v26 = vld [vmem:[%s8258_s3 + $0x118] sm:$0xff] }
 0x349   : > { %v2601_v43 = vadd.f32 %v7204_v20, %v2565_v23  ;;  %v1512_v53 = vadd.f32 %v1480_v19, %v1251_v24  ;;  %v426_v0 = vmul.f32 %v7066_v45, %v8560_v4 }
 0x34a   : > { %v2600_v22 = vadd.f32 %v7204_v20, %v2564_v25 }
 0x34b   : > { %v2633_v46 = vmax.f32 %v2601_v43, 0.0  ;;  %v1773_v54 = vadd.f32 %v1741_v44, %v1512_v53  ;;  %v719_v25 = vadd.f32 %v687_v40, %v426_v0  ;;  %v5668_v0 = vld [vmem:[%s8258_s3 + $0xf8] sm:$0xff] }
 0x34c   : > { %v2632_v59 = vmax.f32 %v2600_v22, 0.0  ;;  %v2492_v18 = vpop.permute.xlu1 %2491  ;;  %v2372_v21 = vpop.permute.xlu2 %2371  ;;  %4552 = vmatpush.bf16.msra.mxu3 %v5668_v0 }
 0x34d   : > { %2722 = vst.msk [vmem:[#allocation2 + $0x111] sm:$0xff] %vm2644_vm0, %v2633_v46  ;;  %v2540_v14 = vmul.f32 %v7182_v41, %v2492_v18  ;;  %v2156_v38 = vpop.permute.xlu0 %2155  ;;  %v2035_v43 = vadd.f32 %v2003_v51, %v1773_v54  ;;  %v2820_v46 = vld [vmem:[#allocation2 + $0x171] sm:$0xff]  ;;  %v980_v36 = vadd.f32 %v948_v34, %v719_v25  ;;  %v1995_v54 = vmul.f32 %v7158_v57, %v7519_v42  ;;  %v3419_v25 = vld [vmem:[#allocation2 + $0x20] sm:$0xff] }
 0x34e   : > { %2721 = vst.msk [vmem:[#allocation2 + $0x109] sm:$0xff] %vm2644_vm0, %v2632_v59  ;;  %v2264_v23 = vmul.f32 %v7170_v17, %v2156_v38  ;;  %v427_v59 = vmul.f32 %v7066_v45, %v8564_v16  ;;  %v8565_v18 = vld [vmem:[#allocation87_spill] sm:$0xff]  ;;  %v5660_v34 = vld [vmem:[%s8258_s3 + $0xb8] sm:$0xff] }
 0x34f   : > { %v2572_v27 = vadd.f32 %v2540_v14, %v2311_v49  ;;  %v949_v49 = vmul.f32 %v7073_v61, %v8565_v18  ;;  %v1242_v45 = vadd.f32 %v1210_v15, %v980_v36  ;;  %v8569_v15 = vld [vmem:[#allocation72_spill] sm:$0xff]  ;;  %4051 = vmatpush.bf16.msra.mxu1 %v5660_v34  ;;  %v8570_v42 = vld [vmem:[#allocation47_spill] sm:$0xff] }
 0x350   : > { %v720_v32 = vadd.f32 %v688_v50, %v427_v59  ;;  %v3418_v50 = vld [vmem:[#allocation2 + $0x18] sm:$0xff]  ;;  %v5722_v59 = vld [vmem:[%s8256_s1 + $0x2] ss:$0 sm:$0xff] }
 0x351   : > { %v2608_v37 = vadd.f32 %v7204_v20, %v2572_v27  ;;  %v2296_v27 = vadd.f32 %v2264_v23, %v2035_v43  ;;  %v1503_v48 = vadd.f32 %v1471_v39, %v1242_v45  ;;  %v713_v43 = vmul.f32 %v5720_v1, %v8569_v15  ;;  %v8571_v18 = vld [vmem:[#allocation104_spill] sm:$0xff] }
 0x352   : > { %v981_v30 = vadd.f32 %v949_v49, %v720_v32  ;;  %v974_v49 = vmul.f32 %v5722_v59, %v8571_v18  ;;  %v7597_v31 = vpack.c.bf16 %v3419_v25, %v3418_v50 }
 0x353   : > { %v2640_v62 = vmax.f32 %v2608_v37, 0.0 }
 0x354   : > { %v1593_v7 = vpop.permute.xlu1 %1592  ;;  %v2812_v28 = vld [vmem:[#allocation2 + $0x111] sm:$0xff]  ;;  %v7576_v11 = vpop.permute.xlu2 %1722 }
 0x355   : > { %2729 = vst.msk [vmem:[#allocation2 + $0x169] sm:$0xff] %vm2644_vm0, %v2640_v62  ;;  %v1588_v10 = vpop.permute.xlu0 %1587  ;;  %v2811_v56 = vld [vmem:[#allocation2 + $0x109] sm:$0xff]  ;;  %v8568_v62 = vld [vmem:[#allocation56_spill] sm:$0xff]  ;;  %v1733_v2 = vmul.f32 %v7106_v13, %v1593_v7 }
 0x356   : > { %v7524_v58 = vpack.c.bf16 %v2812_v28, %v2811_v56  ;;  %v1732_v37 = vmul.f32 %v7106_v13, %v1588_v10  ;;  %v1472_v8 = vmul.f32 %v7096_v35, %v8568_v62  ;;  %v1243_v56 = vadd.f32 %v1211_v12, %v981_v30  ;;  %v5653_v13 = vld [vmem:[%s8258_s3 + $0x80] sm:$0xff]  ;;  %v5664_v7 = vld [vmem:[%s8258_s3 + $0xd8] sm:$0xff] }
 0x357   : > { %v2516_v35 = vmul.f32 %v7182_v41, %v2372_v21  ;;  %3804 = vmatpush.bf16.msrb.mxu0 %v5653_v13  ;;  %4302 = vmatpush.bf16.msra.mxu2 %v5664_v7  ;;  %v5723_v12 = vld [vmem:[%s8256_s1 + $0x3] ss:$0 sm:$0xff]  ;;  %v8572_v21 = vld [vmem:[#allocation115_spill] sm:$0xff]  ;;  %v5724_v62 = vld [vmem:[%s8256_s1 + $0x4] ss:$0 sm:$0xff] }
 0x358   : > { %5317 = vmatmul.msk.bf16.gmra.mxu2 %vm2644_vm0, %v7524_v58  ;;  %v1764_v24 = vadd.f32 %v1732_v37, %v1503_v48  ;;  %v1504_v40 = vadd.f32 %v1472_v8, %v1243_v56  ;;  %v1236_v45 = vmul.f32 %v5723_v12, %v8572_v21  ;;  %v8573_v37 = vld [vmem:[#allocation83_spill] sm:$0xff]  ;;  %v8574_v8 = vld [vmem:[#allocation52_spill] sm:$0xff] }
 0x359   : > { %v1497_v48 = vmul.f32 %v5724_v62, %v8574_v8  ;;  %v8576_v56 = vld [vmem:[#allocation95_spill] sm:$0xff] }
 0x35a   : > { %v1765_v60 = vadd.f32 %v1733_v2, %v1504_v40  ;;  %v975_v2 = vmul.f32 %v5722_v59, %v8576_v56  ;;  %v3170_v40 = vld [vmem:[#allocation2 + $0x1a] sm:$0xff] }
 0x35b   : > { %4802 = vmatpush.bf16.msra.mxu0 %v5672_v26 }
 0x35c   : > { %v1850_v22 = vpop.permute.xlu1 %1849  ;;  %v2819_v29 = vld [vmem:[#allocation2 + $0x169] sm:$0xff] }
 0x35d   : > { %v2417_v14 = vpop.permute.xlu0 %2416  ;;  %v2836_v38 = vpack.c.bf16 %v2820_v46, %v2819_v29  ;;  %v1994_v19 = vmul.f32 %v7158_v57, %v1850_v22  ;;  %v2027_v22 = vadd.f32 %v1995_v54, %v1765_v60  ;;  %v8578_v54 = vld [vmem:[#allocation67_spill] sm:$0xff] }
 0x35e   : > { %v2525_v5 = vmul.f32 %v7182_v41, %v2417_v14 }
 0x35f   : > { %5321 = vmatmul.msk.bf16.gmra.mxu3 %vm2644_vm0, %v2836_v38  ;;  %v2026_v53 = vadd.f32 %v1994_v19, %v1764_v24  ;;  %v2803_v38 = vld [vmem:[#allocation2 + $0xa9] sm:$0xff] }
 0x360   : > { %v2557_v61 = vadd.f32 %v2525_v5, %v2296_v27  ;;  %v8575_v19 = vld [vmem:[#allocation46_spill] sm:$0xff] }
 0x362   : > { %v2593_v28 = vadd.f32 %v7204_v20, %v2557_v61  ;;  %v714_v61 = vmul.f32 %v5720_v1, %v8573_v37 }
 0x364   : > { %v2625_v44 = vmax.f32 %v2593_v28, 0.0  ;;  %v2116_v52 = vpop.permute.xlu1 %2115 }
 0x365   : > { %v2111_v10 = vpop.permute.xlu0 %2110  ;;  %v2256_v23 = vmul.f32 %v7170_v17, %v2116_v52  ;;  %v2241_v52 = vpop.permute.xlu2 %2240 }
 0x366   : > { %2714 = vst.msk [vmem:[#allocation2 + $0xb1] sm:$0xff] %vm2644_vm0, %v2625_v44  ;;  %v2255_v51 = vmul.f32 %v7170_v17, %v2111_v10  ;;  %v5721_v17 = vld [vmem:[%s8256_s1] ss:$0 sm:$0xff] }
 0x367   : > { %v452_v16 = vmul.f32 %v5721_v17, %v8570_v42  ;;  %v2288_v39 = vadd.f32 %v2256_v23, %v2027_v22  ;;  %v453_v28 = vmul.f32 %v5721_v17, %v8575_v19  ;;  %v1498_v23 = vmul.f32 %v5724_v62, %v8578_v54  ;;  %v2733_v22 = vld [vmem:[#allocation2] sm:$0xff]  ;;  %v7698_v54 = vpop.f32.mrf.mxu3 }
 0x368   : > { %v2287_v4 = vadd.f32 %v2255_v51, %v2026_v53  ;;  %5378 = vmatmul.msk.bf16.vlgmr.msrb.gmra.mxu2 %vm2644_vm0, %v3200_v6  ;;  %v5725_v6 = vld [vmem:[%s8256_s1 + $0x5] ss:$0 sm:$0xff]  ;;  %v5726_v17 = vld [vmem:[%s8256_s1 + $0x6] ss:$0 sm:$0xff]  ;;  %v3173_v19 = vld [vmem:[#allocation2 + $0x3a] sm:$0xff] }
 0x369   : > { %v745_v33 = vadd.f32 %v713_v43, %v452_v16  ;;  %v3171_v53 = vld [vmem:[#allocation2 + $0x22] sm:$0xff]  ;;  %v746_v51 = vadd.f32 %v714_v61, %v453_v28  ;;  %v1759_v15 = vmul.f32 %v5725_v6, %v7576_v11  ;;  %v3421_v16 = vld [vmem:[#allocation2 + $0x38] sm:$0xff]  ;;  %v5729_v28 = vld [vmem:[%s8257_s2] ss:$0 sm:$0xff] }
 0x36a   : > { %v2548_v3 = vadd.f32 %v2516_v35, %v2287_v4  ;;  %v8577_v35 = vld [vmem:[#allocation114_spill] sm:$0xff]  ;;  %v7629_v50 = vpack.c.bf16 %v3171_v53, %v3170_v40 }
 0x36b   : > { %v1006_v47 = vadd.f32 %v974_v49, %v745_v33  ;;  %v1237_v60 = vmul.f32 %v5723_v12, %v8577_v35  ;;  %v1007_v34 = vadd.f32 %v975_v2, %v746_v51  ;;  %v3425_v53 = vld [vmem:[#allocation2 + $0x68] sm:$0xff]  ;;  %v3424_v51 = vld [vmem:[#allocation2 + $0x60] sm:$0xff] }
 0x36c   : > { %v2584_v29 = vadd.f32 %v7204_v20, %v2548_v3  ;;  %v1718_v46 = vpop.permute.xlu1 %1717  ;;  %v7675_v35 = vpack.c.bf16 %v3425_v53, %v3424_v51  ;;  %v3432_v51 = vld [vmem:[#allocation2 + $0xc0] sm:$0xff] }
 0x36d   : > { %v2377_v14 = vpop.permute.xlu0 %2376  ;;  %v2804_v36 = vld [vmem:[#allocation2 + $0xb1] sm:$0xff]  ;;  %v1268_v44 = vadd.f32 %v1236_v45, %v1006_v47  ;;  %v1758_v10 = vmul.f32 %v5725_v6, %v1718_v46  ;;  %v1269_v1 = vadd.f32 %v1237_v60, %v1007_v34  ;;  %v3427_v34 = vld [vmem:[#allocation2 + $0x80] sm:$0xff] }
 0x36e   : > { %v2616_v27 = vmax.f32 %v2584_v29, 0.0  ;;  %v2517_v5 = vmul.f32 %v7182_v41, %v2377_v14  ;;  %v7600_v32 = vpack.c.bf16 %v2804_v36, %v2803_v38  ;;  %v2734_v29 = vld [vmem:[#allocation2 + $0x8] sm:$0xff]  ;;  %v3420_v14 = vld [vmem:[#allocation2 + $0x30] sm:$0xff]  ;;  %v2507_v38 = vpop.permute.xlu2 %2506 }
 0x36f   : > { %5418 = vmatmul.msk.bf16.vlgmr.msrb.gmra.mxu3 %vm2644_vm0, %v7597_v31  ;;  %v1529_v7 = vadd.f32 %v1497_v48, %v1268_v44  ;;  %v1530_v46 = vadd.f32 %v1498_v23, %v1269_v1  ;;  %v2765_v49 = vpack.c.bf16 %v2734_v29, %v2733_v22  ;;  %v7641_v12 = vpack.c.bf16 %v3421_v16, %v3420_v14  ;;  %v3172_v48 = vld [vmem:[#allocation2 + $0x32] sm:$0xff]  ;;  %v3177_v60 = vld [vmem:[#allocation2 + $0x6a] sm:$0xff]  ;;  %v3178_v1 = vld [vmem:[#allocation2 + $0x7a] sm:$0xff]  ;;  %v7715_v29 = vpop.f32.mrf.mxu1 }
 0x370   : > { %2705 = vst.msk [vmem:[#allocation2 + $0x49] sm:$0xff] %vm2644_vm0, %v2616_v27  ;;  %v2549_v30 = vadd.f32 %v2517_v5, %v2288_v39  ;;  %5313 = vmatmul.msk.bf16.gmra.mxu1 %vm2644_vm0, %v7600_v32  ;;  %v3675_v16 = vld [vmem:[#allocation2 + $0x69] sm:$0xff] }
 0x371   : > { %v1790_v25 = vadd.f32 %v1758_v10, %v1529_v7  ;;  %v1791_v18 = vadd.f32 %v1759_v15, %v1530_v46  ;;  %v5667_v7 = vld [vmem:[%s8258_s3 + $0xf0] sm:$0xff]  ;;  %v3179_v15 = vld [vmem:[#allocation2 + $0x82] sm:$0xff] }
 0x372   : > { %v2585_v24 = vadd.f32 %v7204_v20, %v2549_v30  ;;  %v5728_v30 = vld [vmem:[%s8256_s1 + $0x8] ss:$0 sm:$0xff]  ;;  %4553 = vmatpush.bf16.msra.mxu3 %v5667_v7  ;;  %v3205_v22 = vpack.c.bf16 %v3179_v15, %v3178_v1 }
 0x373   : > { %v2543_v26 = vmul.f32 %v5728_v30, %v2507_v38  ;;  %v3180_v38 = vld [vmem:[#allocation2 + $0x92] sm:$0xff]  ;;  %v3430_v30 = vld [vmem:[#allocation2 + $0xa8] sm:$0xff] }
 0x374   : > { %v2617_v4 = vmax.f32 %v2585_v24, 0.0  ;;  %v1985_v13 = vpop.permute.xlu1 %1984  ;;  %v7658_v24 = vpack.c.bf16 %v3173_v19, %v3172_v48  ;;  %v5662_v1 = vld [vmem:[%s8258_s3 + $0xc8] sm:$0xff] }
 0x375   : > { %v1980_v0 = vpop.permute.xlu0 %1979  ;;  %v2021_v42 = vmul.f32 %v5726_v17, %v1985_v13  ;;  %v3428_v17 = vld [vmem:[#allocation2 + $0x90] sm:$0xff]  ;;  %v5658_v15 = vld [vmem:[%s8258_s3 + $0xa8] sm:$0xff] }
 0x376   : > { %2706 = vst.msk [vmem:[#allocation2 + $0x51] sm:$0xff] %vm2644_vm0, %v2617_v4  ;;  %v2020_v3 = vmul.f32 %v7158_v57, %v1980_v0  ;;  %v5727_v57 = vld [vmem:[%s8256_s1 + $0x7] ss:$0 sm:$0xff]  ;;  %v7686_v4 = vpop.f32.mrf.mxu2  ;;  %v3426_v0 = vld [vmem:[#allocation2 + $0x78] sm:$0xff] }
 0x377   : > { %v2281_v59 = vmul.f32 %v5727_v57, %v2241_v52  ;;  %v2795_v5 = vld [vmem:[#allocation2 + $0x49] sm:$0xff]  ;;  %v2053_v21 = vadd.f32 %v2021_v42, %v1791_v18  ;;  %v7700_v23 = vpack.c.bf16 %v3427_v34, %v3426_v0  ;;  %v3429_v42 = vld [vmem:[#allocation2 + $0x98] sm:$0xff] }
 0x378   : > { %5379 = vmatmul.msk.bf16.gmra.mxu2 %vm2644_vm0, %v7629_v50  ;;  %v2052_v43 = vadd.f32 %v2020_v3, %v1790_v25  ;;  %v3422_v44 = vld [vmem:[#allocation2 + $0x48] sm:$0xff]  ;;  %v5671_v25 = vld [vmem:[%s8258_s3 + $0x110] sm:$0xff] }
 0x379   : > { %4803 = vmatpush.bf16.msra.mxu0 %v5671_v25  ;;  %v3185_v0 = vld [vmem:[#allocation2 + $0xca] sm:$0xff] }
 0x37a   : > { %v2313_v36 = vadd.f32 %v2281_v59, %v2052_v43  ;;  %v7713_v43 = vpop.f32.mrf.mxu3  ;;  %v3674_v59 = vld [vmem:[#allocation2 + $0x61] sm:$0xff] }
 0x37b   : > { %8579 = vst [vmem:[#allocation70_spill] sm:$0xff] %v7713_v43 }
 0x37c   : > { %v2502_v11 = vpop.permute.xlu1 %2501 }
 0x37d   : > { %v2542_v39 = vmul.f32 %v7182_v41, %v2502_v11  ;;  %v2246_v27 = vpop.permute.xlu0 %2245  ;;  %v2796_v33 = vld [vmem:[#allocation2 + $0x51] sm:$0xff]  ;;  %v7724_v11 = vpack.c.bf16 %v3675_v16, %v3674_v59 }
 0x37e   : > { %v2282_v45 = vmul.f32 %v5727_v57, %v2246_v27  ;;  %v7643_v37 = vpack.c.bf16 %v2796_v33, %v2795_v5  ;;  %v3174_v6 = vld [vmem:[#allocation2 + $0x4a] sm:$0xff]  ;;  %v3175_v10 = vld [vmem:[#allocation2 + $0x52] sm:$0xff]  ;;  %v7702_v3 = vpop.f32.mrf.mxu2  ;;  %v7720_v57 = vpack.c.bf16 %v3429_v42, %v3428_v17  ;;  %v3435_v17 = vld [vmem:[#allocation2 + $0xe0] sm:$0xff] }
 0x37f   : > { %v2574_v61 = vadd.f32 %v2542_v39, %v2313_v36  ;;  %5419 = vmatmul.msk.bf16.gmra.mxu3 %vm2644_vm0, %v7641_v12  ;;  %v7671_v40 = vpack.c.bf16 %v3175_v10, %v3174_v6  ;;  %v3181_v36 = vld [vmem:[#allocation2 + $0x9a] sm:$0xff]  ;;  %v7736_v39 = vpop.f32.mrf.mxu0  ;;  %v3433_v6 = vld [vmem:[#allocation2 + $0xc8] sm:$0xff] }
 0x380   : > { %v2314_v47 = vadd.f32 %v2282_v45, %v2053_v21  ;;  %5309 = vmatmul.msk.bf16.gmra.mxu0 %vm2644_vm0, %v7643_v37  ;;  %5338 = vmatmul.msk.bf16.vlgmr.msrb.gmra.mxu1 %vm2644_vm0, %v2765_v49  ;;  %v7732_v49 = vpop.f32.mrf.mxu1  ;;  %v3206_v27 = vpack.c.bf16 %v3181_v36, %v3180_v38  ;;  %v3431_v45 = vld [vmem:[#allocation2 + $0xb0] sm:$0xff]  ;;  %v3434_v59 = vld [vmem:[#allocation2 + $0xd8] sm:$0xff] }
 0x381   : > { %v2610_v41 = vadd.f32 %v7204_v20, %v2574_v61  ;;  %v3423_v20 = vld [vmem:[#allocation2 + $0x50] sm:$0xff]  ;;  %v3676_v61 = vld [vmem:[#allocation2 + $0x79] sm:$0xff]  ;;  %v7804_v36 = vpack.c.bf16 %v3435_v17, %v3434_v59 }
 0x382   : > { %v2575_v62 = vadd.f32 %v2543_v26, %v2314_v47  ;;  %v7663_v52 = vpack.c.bf16 %v3423_v20, %v3422_v44  ;;  %v7722_v18 = vpop.f32.mrf.mxu3  ;;  %v7745_v26 = vpack.c.bf16 %v3431_v45, %v3430_v30  ;;  %v3677_v47 = vld [vmem:[#allocation2 + $0x81] sm:$0xff] }
 0x383   : > { %v2642_v8 = vmax.f32 %v2610_v41, 0.0  ;;  %8580 = vst [vmem:[#allocation12_spill] sm:$0xff] %v7722_v18  ;;  %v7747_v41 = vpack.c.bf16 %v3677_v47, %v3676_v61  ;;  %v3186_v30 = vld [vmem:[#allocation2 + $0xda] sm:$0xff]  ;;  %v3187_v47 = vld [vmem:[#allocation2 + $0xe2] sm:$0xff] }
 0x384   : > { %v2611_v56 = vadd.f32 %v5729_v28, %v2575_v62  ;;  %v3182_v28 = vld [vmem:[#allocation2 + $0xaa] sm:$0xff]  ;;  %8587 = vst [vmem:[#allocation71_spill] sm:$0xff] %v7804_v36  ;;  %v3684_v18 = vld [vmem:[#allocation2 + $0xd9] sm:$0xff] }
 0x385   : > { %2731 = vst.msk [vmem:[#allocation2 + $0x181] sm:$0xff] %vm2644_vm0, %v2642_v8 }
 0x386   : > { %v2643_v2 = vmax.f32 %v2611_v56, 0.0  ;;  %v7717_v46 = vpop.f32.mrf.mxu2  ;;  %v3183_v56 = vld [vmem:[#allocation2 + $0xb2] sm:$0xff] }
 0x387   : > { %v7749_v62 = vpop.f32.mrf.mxu0 }
 0x388   : > { %2732 = vst.msk [vmem:[#allocation2 + $0x189] sm:$0xff] %vm2644_vm0, %v2643_v2  ;;  %5380 = vmatmul.msk.bf16.gmra.mxu2 %vm2644_vm0, %v7658_v24  ;;  %v7741_v33 = vpop.f32.mrf.mxu1  ;;  %v3207_v2 = vpack.c.bf16 %v3183_v56, %v3182_v28 }
 0x38a   : > { %v7738_v5 = vpop.f32.mrf.mxu3 }
 0x38b   : > { %8581 = vst [vmem:[#allocation40_spill] sm:$0xff] %v7738_v5  ;;  %v3685_v5 = vld [vmem:[#allocation2 + $0xe1] sm:$0xff] }
 0x38e   : > { %v7734_v14 = vpop.f32.mrf.mxu2 }
 0x38f   : > { %5420 = vmatmul.msk.bf16.gmra.mxu3 %vm2644_vm0, %v7663_v52  ;;  %v7764_v20 = vpop.f32.mrf.mxu0 }
 0x390   : > { %5339 = vmatmul.msk.bf16.gmra.mxu1 %vm2644_vm0, %v7597_v31  ;;  %5458 = vmatmul.msk.bf16.vlgmr.msrb.gmra.mxu0 %vm2644_vm0, %v7187_v55  ;;  %v5663_v55 = vld [vmem:[%s8258_s3 + $0xd0] sm:$0xff]  ;;  %v3176_v31 = vld [vmem:[#allocation2 + $0x62] sm:$0xff]  ;;  %v7759_v48 = vpop.f32.mrf.mxu1 }
 0x391   : > { %4303 = vmatpush.bf16.msra.mxu2 %v5663_v55  ;;  %v7688_v13 = vpack.c.bf16 %v3177_v60, %v3176_v31  ;;  %v7772_v55 = vpack.c.bf16 %v3433_v6, %v3432_v51  ;;  %v3436_v51 = vld [vmem:[#allocation2 + $0xf0] sm:$0xff] }
 0x393   : > { %v7753_v8 = vpop.f32.mrf.mxu3  ;;  %8584 = vst [vmem:[#allocation19_spill] sm:$0xff] %v7772_v55 }
 0x394   : > { %8582 = vst [vmem:[#allocation14_spill] sm:$0xff] %v7753_v8 }
 0x395   : > { %4304 = vmatpush.bf16.msra.mxu2 %v5662_v1 }
 0x396   : > { %v7743_v21 = vpop.f32.mrf.mxu2 }
 0x397   : > { %v7782_v60 = vpop.f32.mrf.mxu0 }
 0x398   : > { %5381 = vmatmul.msk.bf16.gmra.mxu2 %vm2644_vm0, %v7671_v40  ;;  %v7768_v10 = vpop.f32.mrf.mxu1 }
 0x39b   : > { %v7766_v44 = vpop.f32.mrf.mxu3 }
 0x39c   : > { %8583 = vst [vmem:[#allocation13_spill] sm:$0xff] %v7766_v44 }
 0x39e   : > { %v7761_v19 = vpop.f32.mrf.mxu2 }
 0x39f   : > { %5421 = vmatmul.msk.bf16.gmra.mxu3 %vm2644_vm0, %v7675_v35 }
 0x3a0   : > { %5340 = vmatmul.msk.bf16.gmra.mxu1 %vm2644_vm0, %v7641_v12  ;;  %5459 = vmatmul.msk.bf16.gmra.mxu0 %vm2644_vm0, %v7393_v63  ;;  %v5659_v63 = vld [vmem:[%s8258_s3 + $0xb0] sm:$0xff]  ;;  %v7786_v34 = vpop.f32.mrf.mxu1 }
 0x3a1   : > { %4052 = vmatpush.bf16.msra.mxu1 %v5659_v63  ;;  %v3184_v63 = vld [vmem:[#allocation2 + $0xc2] sm:$0xff] }
 0x3a2   : > { %v3208_v25 = vpack.c.bf16 %v3185_v0, %v3184_v63  ;;  %v3437_v63 = vld [vmem:[#allocation2 + $0xf8] sm:$0xff]  ;;  %v3683_v0 = vld [vmem:[#allocation2 + $0xc9] sm:$0xff] }
 0x3a5   : > { %4053 = vmatpush.bf16.msra.mxu1 %v5658_v15  ;;  %v3682_v15 = vld [vmem:[#allocation2 + $0xc1] sm:$0xff] }
 0x3a6   : > { %v7825_v59 = vpack.c.bf16 %v3683_v0, %v3682_v15 }
 0x3a8   : > { %5382 = vmatmul.msk.bf16.gmra.mxu2 %vm2644_vm0, %v7688_v13  ;;  %8588 = vst [vmem:[#allocation25_spill] sm:$0xff] %v7825_v59 }
 0x3ad   : > { %v7800_v42 = vpop.f32.mrf.mxu0 }
 0x3af   : > { %5422 = vmatmul.msk.bf16.gmra.mxu3 %vm2644_vm0, %v7700_v23 }
 0x3b0   : > { %5341 = vmatmul.msk.bf16.gmra.mxu1 %vm2644_vm0, %v7663_v52  ;;  %5460 = vmatmul.msk.bf16.gmra.mxu0 %vm2644_vm0, %v7643_v37 }
 0x3b5   : > { %v7815_v28 = vpop.f32.mrf.mxu0 }
 0x3b8   : > { %5383 = vmatmul.msk.bf16.gmra.mxu2 %vm2644_vm0, %v3205_v22 }
 0x3bf   : > { %5423 = vmatmul.msk.bf16.gmra.mxu3 %vm2644_vm0, %v7720_v57 }
 0x3c0   : > { %5342 = vmatmul.msk.bf16.gmra.mxu1 %vm2644_vm0, %v7675_v35  ;;  %5461 = vmatmul.msk.bf16.gmra.mxu0 %vm2644_vm0, %v7724_v11 }
 0x3c8   : > { %5384 = vmatmul.msk.bf16.gmra.mxu2 %vm2644_vm0, %v3206_v27  ;;  %v5670_v27 = vld [vmem:[%s8258_s3 + $0x108] sm:$0xff] }
 0x3c9   : > { %4804 = vmatpush.bf16.msra.mxu0 %v5670_v27 }
 0x3cf   : > { %5424 = vmatmul.msk.bf16.gmra.mxu3 %vm2644_vm0, %v7745_v26 }
 0x3d0   : > { %5343 = vmatmul.msk.bf16.gmra.mxu1 %vm2644_vm0, %v7700_v23  ;;  %5462 = vmatmul.msk.bf16.gmra.mxu0 %vm2644_vm0, %v7747_v41 }
 0x3d8   : > { %5385 = vmatmul.msk.bf16.gmra.mxu2 %vm2644_vm0, %v3207_v2  ;;  %v3209_v2 = vpack.c.bf16 %v3187_v47, %v3186_v30 }
 0x3db   : > { %v7770_v53 = vpop.f32.mrf.mxu2 }
 0x3df   : > { %5425 = vmatmul.msk.bf16.gmra.mxu3 %vm2644_vm0, %v7772_v55 }
 0x3e0   : > { %5344 = vmatmul.msk.bf16.gmra.mxu1 %vm2644_vm0, %v7720_v57  ;;  %5463 = vmatmul.msk.bf16.gmra.mxu0 %vm2644_vm0, %v7357_v9  ;;  %v5666_v9 = vld [vmem:[%s8258_s3 + $0xe8] sm:$0xff] }
 0x3e1   : > { %4554 = vmatpush.bf16.msra.mxu3 %v5666_v9  ;;  %v7822_v9 = vpack.c.bf16 %v3437_v63, %v3436_v51  ;;  %v3188_v51 = vld [vmem:[#allocation2 + $0xf2] sm:$0xff] }
 0x3e2   : > { %v7780_v31 = vpop.f32.mrf.mxu3 }
 0x3e3   : > { %8585 = vst [vmem:[#allocation35_spill] sm:$0xff] %v7780_v31  ;;  %v7784_v7 = vpop.f32.mrf.mxu2  ;;  %v3439_v31 = vld [vmem:[#allocation2 + $0x110] sm:$0xff] }
 0x3e8   : > { %5386 = vmatmul.msk.bf16.gmra.mxu2 %vm2644_vm0, %v3208_v25 }
 0x3ea   : > { %v7798_v22 = vpop.f32.mrf.mxu3 }
 0x3eb   : > { %8586 = vst [vmem:[#allocation60_spill] sm:$0xff] %v7798_v22  ;;  %v3306_v16 = vpop.f32.mrf.mxu2 }
 0x3ed   : > { %v7802_v38 = vpop.f32.mrf.mxu1 }
 0x3ef   : > { %5426 = vmatmul.msk.bf16.gmra.mxu3 %vm2644_vm0, %v7804_v36 }
 0x3f0   : > { %5345 = vmatmul.msk.bf16.gmra.mxu1 %vm2644_vm0, %v7745_v26  ;;  %5464 = vmatmul.msk.bf16.gmra.mxu0 %vm2644_vm0, %v7600_v32 }
 0x3f2   : > { %v3556_v45 = vpop.f32.mrf.mxu3 }
 0x3f3   : > { %v3308_v61 = vpop.f32.mrf.mxu2 }
 0x3f5   : > { %v7817_v56 = vpop.f32.mrf.mxu1 }
 0x3f8   : > { %5387 = vmatmul.msk.bf16.gmra.mxu2 %vm2644_vm0, %v3209_v2 }
 0x3fa   : > { %v3558_v6 = vpop.f32.mrf.mxu3 }
 0x3fb   : > { %v3311_v32 = vpop.f32.mrf.mxu2 }
 0x3fd   : > { %v7820_v25 = vpop.f32.mrf.mxu0  ;;  %v3088_v1 = vpop.f32.mrf.mxu1 }
 0x3fe   : > { %v3089_v17 = vadd.f32 %v3088_v1, %v7736_v39  ;;  %v3189_v39 = vld [vmem:[#allocation2 + $0xfa] sm:$0xff] }
 0x3ff   : > { %5427 = vmatmul.msk.bf16.gmra.mxu3 %vm2644_vm0, %v7822_v9  ;;  %v3210_v1 = vpack.c.bf16 %v3189_v39, %v3188_v51  ;;  %v3190_v51 = vld [vmem:[#allocation2 + $0x10a] sm:$0xff]  ;;  %v3191_v39 = vld [vmem:[#allocation2 + $0x112] sm:$0xff] }
 0x400   : > { %v3386_v27 = vadd.f32 %v3306_v16, %v3089_v17  ;;  %5346 = vmatmul.msk.bf16.gmra.mxu1 %vm2644_vm0, %v7772_v55  ;;  %5465 = vmatmul.msk.bf16.gmra.mxu0 %vm2644_vm0, %v7825_v59  ;;  %v3438_v17 = vld [vmem:[#allocation2 + $0x108] sm:$0xff] }
 0x402   : > { %v3561_v30 = vpop.f32.mrf.mxu3  ;;  %v3636_v47 = vadd.f32 %v3556_v45, %v3386_v27  ;;  %v7837_v27 = vpack.c.bf16 %v3439_v31, %v3438_v17 }
 0x403   : > { %v3313_v2 = vpop.f32.mrf.mxu2 }
 0x405   : > { %v7833_v63 = vpop.f32.mrf.mxu0  ;;  %v3090_v22 = vpop.f32.mrf.mxu1 }
 0x406   : > { %v3091_v0 = vadd.f32 %v3090_v22, %v7749_v62  ;;  %v7842_v62 = vpack.c.bf16 %v3685_v5, %v3684_v18 }
 0x408   : > { %v3387_v15 = vadd.f32 %v3308_v61, %v3091_v0  ;;  %5388 = vmatmul.msk.bf16.gmra.mxu2 %vm2644_vm0, %v3210_v1  ;;  %8590 = vst [vmem:[#allocation17_spill] sm:$0xff] %v7842_v62  ;;  %v3441_v1 = vld [vmem:[#allocation2 + $0x128] sm:$0xff] }
 0x40a   : > { %v3563_v16 = vpop.f32.mrf.mxu3  ;;  %v3637_v44 = vadd.f32 %v3558_v6, %v3387_v15 }
 0x40b   : > { %v3316_v8 = vpop.f32.mrf.mxu2 }
 0x40d   : > { %v3093_v59 = vpop.f32.mrf.mxu1  ;;  %v3806_v45 = vpop.f32.mrf.mxu0 }
 0x40e   : > { %v3094_v55 = vadd.f32 %v3093_v59, %v7764_v20  ;;  %v7840_v43 = vadd.f32 %v3806_v45, %v3636_v47  ;;  %v3211_v47 = vpack.c.bf16 %v3191_v39, %v3190_v51  ;;  %v3686_v45 = vld [vmem:[#allocation2 + $0xf1] sm:$0xff] }
 0x40f   : > { %5428 = vmatmul.msk.bf16.gmra.mxu3 %vm2644_vm0, %v7837_v27 }
 0x410   : > { %8589 = vst [vmem:[#allocation45_spill] sm:$0xff] %v7840_v43  ;;  %v3388_v22 = vadd.f32 %v3311_v32, %v3094_v55  ;;  %5347 = vmatmul.msk.bf16.gmra.mxu1 %vm2644_vm0, %v7804_v36  ;;  %5466 = vmatmul.msk.bf16.gmra.mxu0 %vm2644_vm0, %v7842_v62  ;;  %v3440_v32 = vld [vmem:[#allocation2 + $0x120] sm:$0xff] }
 0x411   : > { %v7854_v43 = vpack.c.bf16 %v3441_v1, %v3440_v32  ;;  %v3687_v62 = vld [vmem:[#allocation2 + $0xf9] sm:$0xff] }
 0x412   : > { %v3566_v61 = vpop.f32.mrf.mxu3  ;;  %v3638_v31 = vadd.f32 %v3561_v30, %v3388_v22  ;;  %v3443_v1 = vld [vmem:[#allocation2 + $0x140] sm:$0xff] }
 0x413   : > { %v3318_v6 = vpop.f32.mrf.mxu2 }
 0x415   : > { %v3095_v20 = vpop.f32.mrf.mxu1  ;;  %v3808_v59 = vpop.f32.mrf.mxu0 }
 0x416   : > { %v3096_v18 = vadd.f32 %v3095_v20, %v7782_v60  ;;  %v7851_v5 = vadd.f32 %v3808_v59, %v3637_v44  ;;  %v7859_v44 = vpack.c.bf16 %v3687_v62, %v3686_v45  ;;  %v3192_v20 = vld [vmem:[#allocation2 + $0x122] sm:$0xff]  ;;  %v3193_v59 = vld [vmem:[#allocation2 + $0x12a] sm:$0xff] }
 0x418   : > { %v3389_v0 = vadd.f32 %v3313_v2, %v3096_v18  ;;  %5389 = vmatmul.msk.bf16.gmra.mxu2 %vm2644_vm0, %v3211_v47  ;;  %v3212_v47 = vpack.c.bf16 %v3193_v59, %v3192_v20 }
 0x41a   : > { %v3568_v55 = vpop.f32.mrf.mxu3  ;;  %v3639_v15 = vadd.f32 %v3563_v16, %v3389_v0 }
 0x41b   : > { %v3321_v17 = vpop.f32.mrf.mxu2 }
 0x41d   : > { %v3098_v30 = vpop.f32.mrf.mxu1  ;;  %v3811_v22 = vpop.f32.mrf.mxu0 }
 0x41e   : > { %v3099_v36 = vadd.f32 %v3098_v30, %v7800_v42  ;;  %v7857_v60 = vadd.f32 %v3811_v22, %v3638_v31 }
 0x41f   : > { %5429 = vmatmul.msk.bf16.gmra.mxu3 %vm2644_vm0, %v7854_v43 }
 0x420   : > { %v3390_v2 = vadd.f32 %v3316_v8, %v3099_v36  ;;  %5348 = vmatmul.msk.bf16.gmra.mxu1 %vm2644_vm0, %v7822_v9  ;;  %5467 = vmatmul.msk.bf16.gmra.mxu0 %vm2644_vm0, %v7859_v44  ;;  %v5661_v8 = vld [vmem:[%s8258_s3 + $0xc0] sm:$0xff] }
 0x421   : > { %v5665_v36 = vld [vmem:[%s8258_s3 + $0xe0] sm:$0xff]  ;;  %4305 = vmatpush.bf16.msra.mxu2 %v5661_v8 }
 0x422   : > { %v3571_v16 = vpop.f32.mrf.mxu3  ;;  %v3640_v51 = vadd.f32 %v3566_v61, %v3390_v2  ;;  %v5657_v61 = vld [vmem:[%s8258_s3 + $0xa0] sm:$0xff]  ;;  %4555 = vmatpush.bf16.msra.mxu3 %v5665_v36 }
 0x423   : > { %v3323_v39 = vpop.f32.mrf.mxu2  ;;  %4054 = vmatpush.bf16.msra.mxu1 %v5657_v61 }
 0x425   : > { %v3100_v42 = vpop.f32.mrf.mxu1  ;;  %v3813_v31 = vpop.f32.mrf.mxu0 }
 0x426   : > { %v3101_v62 = vadd.f32 %v3100_v42, %v7815_v28  ;;  %v7868_v18 = vadd.f32 %v3813_v31, %v3639_v15  ;;  %v3442_v28 = vld [vmem:[#allocation2 + $0x138] sm:$0xff] }
 0x427   : > { %v7880_v22 = vpack.c.bf16 %v3443_v1, %v3442_v28  ;;  %v3445_v28 = vld [vmem:[#allocation2 + $0x158] sm:$0xff] }
 0x428   : > { %8591 = vst [vmem:[#allocation113_spill] sm:$0xff] %v7868_v18  ;;  %v3391_v0 = vadd.f32 %v3318_v6, %v3101_v62  ;;  %5390 = vmatmul.msk.bf16.gmra.mxu2 %vm2644_vm0, %v3212_v47  ;;  %v3195_v62 = vld [vmem:[#allocation2 + $0x142] sm:$0xff] }
 0x42a   : > { %v3573_v32 = vpop.f32.mrf.mxu3  ;;  %v3641_v15 = vadd.f32 %v3568_v55, %v3391_v0  ;;  %v5669_v55 = vld [vmem:[%s8258_s3 + $0x100] sm:$0xff] }
 0x42b   : > { %v3326_v6 = vpop.f32.mrf.mxu2  ;;  %4805 = vmatpush.bf16.msra.mxu0 %v5669_v55 }
 0x42d   : > { %v3103_v45 = vpop.f32.mrf.mxu1  ;;  %v3816_v30 = vpop.f32.mrf.mxu0 }
 0x42e   : > { %v3104_v2 = vadd.f32 %v3103_v45, %v7820_v25  ;;  %v7883_v20 = vadd.f32 %v3816_v30, %v3640_v51  ;;  %v3194_v51 = vld [vmem:[#allocation2 + $0x13a] sm:$0xff] }
 0x42f   : > { %5430 = vmatmul.msk.bf16.gmra.mxu3 %vm2644_vm0, %v7880_v22  ;;  %v3213_v36 = vpack.c.bf16 %v3195_v62, %v3194_v51  ;;  %v3690_v30 = vld [vmem:[#allocation2 + $0x121] sm:$0xff] }
 0x430   : > { %8592 = vst [vmem:[#allocation78_spill] sm:$0xff] %v7883_v20  ;;  %v3392_v59 = vadd.f32 %v3321_v17, %v3104_v2  ;;  %5349 = vmatmul.msk.bf16.gmra.mxu1 %vm2644_vm0, %v7837_v27  ;;  %5468 = vmatmul.msk.bf16.gmra.mxu0 %vm2644_vm0, %v7524_v58  ;;  %v3444_v2 = vld [vmem:[#allocation2 + $0x150] sm:$0xff] }
 0x431   : > { %v7898_v20 = vpack.c.bf16 %v3445_v28, %v3444_v2 }
 0x432   : > { %v3576_v42 = vpop.f32.mrf.mxu3  ;;  %v3642_v31 = vadd.f32 %v3571_v16, %v3392_v59  ;;  %v3691_v16 = vld [vmem:[#allocation2 + $0x129] sm:$0xff] }
 0x433   : > { %v3328_v25 = vpop.f32.mrf.mxu2 }
 0x435   : > { %v3105_v47 = vpop.f32.mrf.mxu1  ;;  %v3818_v0 = vpop.f32.mrf.mxu0 }
 0x436   : > { %v3106_v17 = vadd.f32 %v3105_v47, %v7833_v63  ;;  %v7895_v8 = vadd.f32 %v3818_v0, %v3641_v15  ;;  %v7903_v15 = vpack.c.bf16 %v3691_v16, %v3690_v30  ;;  %v3196_v47 = vld [vmem:[#allocation2 + $0x152] sm:$0xff]  ;;  %v3197_v0 = vld [vmem:[#allocation2 + $0x15a] sm:$0xff] }
 0x437   : > { %v3447_v30 = vld [vmem:[#allocation2 + $0x170] sm:$0xff] }
 0x438   : > { %8593 = vst [vmem:[#allocation66_spill] sm:$0xff] %v7895_v8  ;;  %v3393_v61 = vadd.f32 %v3323_v39, %v3106_v17  ;;  %5391 = vmatmul.msk.bf16.gmra.mxu2 %vm2644_vm0, %v3213_v36 }
 0x43a   : > { %v3578_v58 = vpop.f32.mrf.mxu3  ;;  %v3643_v1 = vadd.f32 %v3573_v32, %v3393_v61  ;;  %v3214_v61 = vpack.c.bf16 %v3197_v0, %v3196_v47 }
 0x43b   : > { %v3331_v45 = vpop.f32.mrf.mxu2 }
 0x43d   : > { %v3108_v59 = vpop.f32.mrf.mxu1  ;;  %v3821_v55 = vpop.f32.mrf.mxu0 }
 0x43e   : > { %v3109_v18 = vadd.f32 %v3108_v59, %v7715_v29  ;;  %v7901_v63 = vadd.f32 %v3821_v55, %v3642_v31  ;;  %v3692_v59 = vld [vmem:[#allocation2 + $0x139] sm:$0xff] }
 0x43f   : > { %5431 = vmatmul.msk.bf16.gmra.mxu3 %vm2644_vm0, %v7898_v20 }
 0x440   : > { %8594 = vst [vmem:[#allocation38_spill] sm:$0xff] %v7901_v63  ;;  %v3394_v39 = vadd.f32 %v3326_v6, %v3109_v18  ;;  %5350 = vmatmul.msk.bf16.gmra.mxu1 %vm2644_vm0, %v7854_v43  ;;  %5469 = vmatmul.msk.bf16.gmra.mxu0 %vm2644_vm0, %v7903_v15  ;;  %v3446_v6 = vld [vmem:[#allocation2 + $0x168] sm:$0xff] }
 0x441   : > { %v7915_v63 = vpack.c.bf16 %v3447_v30, %v3446_v6 }
 0x442   : > { %v3581_v32 = vpop.f32.mrf.mxu3  ;;  %v3644_v51 = vadd.f32 %v3576_v42, %v3394_v39  ;;  %v3693_v42 = vld [vmem:[#allocation2 + $0x141] sm:$0xff] }
 0x443   : > { %v3333_v62 = vpop.f32.mrf.mxu2 }
 0x445   : > { %v3110_v29 = vpop.f32.mrf.mxu1  ;;  %v3823_v31 = vpop.f32.mrf.mxu0 }
 0x446   : > { %v3111_v17 = vadd.f32 %v3110_v29, %v7732_v49  ;;  %v7912_v36 = vadd.f32 %v3823_v31, %v3643_v1  ;;  %v7920_v1 = vpack.c.bf16 %v3693_v42, %v3692_v59  ;;  %v3198_v29 = vld [vmem:[#allocation2 + $0x16a] sm:$0xff]  ;;  %v3695_v42 = vld [vmem:[#allocation2 + $0x159] sm:$0xff] }
 0x448   : > { %8595 = vst [vmem:[#allocation92_spill] sm:$0xff] %v7912_v36  ;;  %v3395_v28 = vadd.f32 %v3328_v25, %v3111_v17  ;;  %5392 = vmatmul.msk.bf16.gmra.mxu2 %vm2644_vm0, %v3214_v61 }
 0x44a   : > { %v3583_v18 = vpop.f32.mrf.mxu3  ;;  %v3645_v16 = vadd.f32 %v3578_v58, %v3395_v28 }
 0x44b   : > { %v3336_v2 = vpop.f32.mrf.mxu2 }
 0x44d   : > { %v3113_v55 = vpop.f32.mrf.mxu1  ;;  %v3826_v39 = vpop.f32.mrf.mxu0 }
 0x44e   : > { %v3114_v8 = vadd.f32 %v3113_v55, %v7741_v33  ;;  %v7918_v49 = vadd.f32 %v3826_v39, %v3644_v51  ;;  %v3199_v51 = vld [vmem:[#allocation2 + $0x172] sm:$0xff]  ;;  %v3448_v55 = vld [vmem:[#allocation2 + $0x180] sm:$0xff] }
 0x44f   : > { %5432 = vmatmul.msk.bf16.gmra.mxu3 %vm2644_vm0, %v7915_v63  ;;  %v3215_v28 = vpack.c.bf16 %v3199_v51, %v3198_v29 }
 0x450   : > { %8596 = vst [vmem:[#allocation39_spill] sm:$0xff] %v7918_v49  ;;  %v3396_v25 = vadd.f32 %v3331_v45, %v3114_v8  ;;  %5351 = vmatmul.msk.bf16.gmra.mxu1 %vm2644_vm0, %v7880_v22  ;;  %5470 = vmatmul.msk.bf16.gmra.mxu0 %vm2644_vm0, %v7920_v1  ;;  %v3449_v45 = vld [vmem:[#allocation2 + $0x188] sm:$0xff]  ;;  %v3694_v49 = vld [vmem:[#allocation2 + $0x151] sm:$0xff] }
 0x452   : > { %v3586_v58 = vpop.f32.mrf.mxu3  ;;  %v3646_v47 = vadd.f32 %v3581_v32, %v3396_v25  ;;  %v7932_v25 = vpack.c.bf16 %v3449_v45, %v3448_v55  ;;  %v4419_v45 = vld [vmem:[#allocation2 + $0x31] sm:$0xff] }
 0x453   : > { %v3338_v0 = vpop.f32.mrf.mxu2 }
 0x455   : > { %v3115_v31 = vpop.f32.mrf.mxu1  ;;  %v3828_v33 = vpop.f32.mrf.mxu0 }
 0x456   : > { %v3116_v17 = vadd.f32 %v3115_v31, %v7759_v48  ;;  %v7929_v61 = vadd.f32 %v3828_v33, %v3645_v16  ;;  %v7937_v16 = vpack.c.bf16 %v3695_v42, %v3694_v49 }
 0x458   : > { %v3397_v6 = vadd.f32 %v3333_v62, %v3116_v17  ;;  %5393 = vmatmul.msk.bf16.gmra.mxu2 %vm2644_vm0, %v3215_v28 }
 0x45a   : > { %v3588_v8 = vpop.f32.mrf.mxu3  ;;  %v3647_v30 = vadd.f32 %v3583_v18, %v3397_v6  ;;  %v3696_v6 = vld [vmem:[#allocation2 + $0x169] sm:$0xff] }
 0x45b   : > { %v3341_v59 = vpop.f32.mrf.mxu2 }
 0x45d   : > { %v3118_v32 = vpop.f32.mrf.mxu1  ;;  %v3831_v39 = vpop.f32.mrf.mxu0 }
 0x45e   : > { %v3119_v36 = vadd.f32 %v3118_v32, %v7768_v10  ;;  %v7935_v48 = vadd.f32 %v3831_v39, %v3646_v47 }
 0x45f   : > { %5433 = vmatmul.msk.bf16.gmra.mxu3 %vm2644_vm0, %v7932_v25 }
 0x460   : > { %v3398_v62 = vadd.f32 %v3336_v2, %v3119_v36  ;;  %5352 = vmatmul.msk.bf16.gmra.mxu1 %vm2644_vm0, %v7898_v20  ;;  %5471 = vmatmul.msk.bf16.gmra.mxu0 %vm2644_vm0, %v7937_v16  ;;  %v4420_v2 = vld [vmem:[#allocation2 + $0x39] sm:$0xff] }
 0x461   : > { %v4451_v32 = vpack.c.bf16 %v4420_v2, %v4419_v45 }
 0x462   : > { %v3591_v18 = vpop.f32.mrf.mxu3  ;;  %v3648_v29 = vadd.f32 %v3586_v58, %v3398_v62  ;;  %v3697_v58 = vld [vmem:[#allocation2 + $0x171] sm:$0xff] }
 0x463   : > { %v3343_v31 = vpop.f32.mrf.mxu2 }
 0x465   : > { %v3120_v33 = vpop.f32.mrf.mxu1  ;;  %v3833_v51 = vpop.f32.mrf.mxu0 }
 0x466   : > { %v3121_v10 = vadd.f32 %v3120_v33, %v7786_v34  ;;  %v7946_v47 = vadd.f32 %v3833_v51, %v3647_v30  ;;  %v7953_v34 = vpack.c.bf16 %v3697_v58, %v3696_v6  ;;  %v3699_v6 = vld [vmem:[#allocation2 + $0x189] sm:$0xff] }
 0x468   : > { %v3399_v49 = vadd.f32 %v3338_v0, %v3121_v10  ;;  %5538 = vmatmul.msk.bf16.vlgmr.msra.gmra.mxu2 %vm2644_vm0, %v7641_v12 }
 0x46a   : > { %v3593_v36 = vpop.f32.mrf.mxu3  ;;  %v3649_v17 = vadd.f32 %v3588_v8, %v3399_v49 }
 0x46b   : > { %v3346_v28 = vpop.f32.mrf.mxu2 }
 0x46d   : > { %v3123_v42 = vpop.f32.mrf.mxu1  ;;  %v3836_v55 = vpop.f32.mrf.mxu0 }
 0x46e   : > { %v3124_v39 = vadd.f32 %v3123_v42, %v7802_v38  ;;  %v7951_v62 = vadd.f32 %v3836_v55, %v3648_v29  ;;  %v3698_v55 = vld [vmem:[#allocation2 + $0x181] sm:$0xff] }
 0x46f   : > { %5578 = vmatmul.msk.bf16.vlgmr.msra.gmra.mxu3 %vm2644_vm0, %v4451_v32  ;;  %v7968_v32 = vpack.c.bf16 %v3699_v6, %v3698_v55 }
 0x470   : > { %v3400_v0 = vadd.f32 %v3341_v59, %v3124_v39  ;;  %5353 = vmatmul.msk.bf16.gmra.mxu1 %vm2644_vm0, %v7915_v63  ;;  %5472 = vmatmul.msk.bf16.gmra.mxu0 %vm2644_vm0, %v7953_v34 }
 0x472   : > { %v3596_v12 = vpop.f32.mrf.mxu3  ;;  %v3650_v8 = vadd.f32 %v3591_v18, %v3400_v0 }
 0x473   : > { %v3348_v30 = vpop.f32.mrf.mxu2 }
 0x475   : > { %v3125_v33 = vpop.f32.mrf.mxu1  ;;  %v3838_v51 = vpop.f32.mrf.mxu0 }
 0x476   : > { %v3126_v38 = vadd.f32 %v3125_v33, %v7817_v56  ;;  %v7961_v29 = vadd.f32 %v3838_v51, %v3649_v17 }
 0x478   : > { %v3401_v10 = vadd.f32 %v3343_v31, %v3126_v38  ;;  %5539 = vmatmul.msk.bf16.gmra.mxu2 %vm2644_vm0, %v7663_v52 }
 0x47a   : > { %v3598_v59 = vpop.f32.mrf.mxu3  ;;  %v3651_v49 = vadd.f32 %v3593_v36, %v3401_v10 }
 0x47b   : > { %v3351_v2 = vpop.f32.mrf.mxu2 }
 0x47d   : > { %v3128_v45 = vpop.f32.mrf.mxu1  ;;  %v3841_v42 = vpop.f32.mrf.mxu0 }
 0x47e   : > { %v3129_v18 = vadd.f32 %v3128_v45, %v7686_v4  ;;  %v7966_v58 = vadd.f32 %v3841_v42, %v3650_v8 }
 0x47f   : > { %5579 = vmatmul.msk.bf16.gmra.mxu3 %vm2644_vm0, %v7643_v37 }
 0x480   : > { %v3402_v56 = vadd.f32 %v3346_v28, %v3129_v18  ;;  %5473 = vmatmul.msk.bf16.gmra.mxu0 %vm2644_vm0, %v7968_v32  ;;  %5498 = vmatmul.msk.bf16.vlgmr.msra.gmra.mxu1 %vm2644_vm0, %v7629_v50 }
 0x482   : > { %v3601_v52 = vpop.f32.mrf.mxu3  ;;  %v3652_v31 = vadd.f32 %v3596_v12, %v3402_v56 }
 0x483   : > { %v3353_v36 = vpop.f32.mrf.mxu2 }
 0x485   : > { %v3130_v17 = vpop.f32.mrf.mxu1  ;;  %v3843_v39 = vpop.f32.mrf.mxu0 }
 0x486   : > { %v3131_v4 = vadd.f32 %v3130_v17, %v7702_v3  ;;  %v7977_v0 = vadd.f32 %v3843_v39, %v3651_v49 }
 0x488   : > { %v3403_v8 = vadd.f32 %v3348_v30, %v3131_v4  ;;  %5540 = vmatmul.msk.bf16.gmra.mxu2 %vm2644_vm0, %v7675_v35 }
 0x48a   : > { %v3603_v37 = vpop.f32.mrf.mxu3  ;;  %v3653_v28 = vadd.f32 %v3598_v59, %v3403_v8  ;;  %v4427_v8 = vld [vmem:[#allocation2 + $0x91] sm:$0xff] }
 0x48b   : > { %v3356_v33 = vpop.f32.mrf.mxu2 }
 0x48d   : > { %v3133_v51 = vpop.f32.mrf.mxu1  ;;  %v3846_v38 = vpop.f32.mrf.mxu0 }
 0x48e   : > { %v3134_v50 = vadd.f32 %v3133_v51, %v7717_v46  ;;  %v7982_v10 = vadd.f32 %v3846_v38, %v3652_v31 }
 0x48f   : > { %5580 = vmatmul.msk.bf16.gmra.mxu3 %vm2644_vm0, %v7724_v11 }
 0x490   : > { %v3404_v12 = vadd.f32 %v3351_v2, %v3134_v50  ;;  %5499 = vmatmul.msk.bf16.gmra.mxu1 %vm2644_vm0, %v7658_v24  ;;  %5618 = vmatmul.msk.bf16.vlgmr.msra.gmra.mxu0 %vm2644_vm0, %v7658_v24 }
 0x492   : > { %v3606_v35 = vpop.f32.mrf.mxu3  ;;  %v3654_v3 = vadd.f32 %v3601_v52, %v3404_v12 }
 0x493   : > { %v3358_v30 = vpop.f32.mrf.mxu2 }
 0x495   : > { %v3135_v59 = vpop.f32.mrf.mxu1  ;;  %v3848_v49 = vpop.f32.mrf.mxu0 }
 0x496   : > { %v3136_v6 = vadd.f32 %v3135_v59, %v7734_v14  ;;  %v7991_v46 = vadd.f32 %v3848_v49, %v3653_v28 }
 0x498   : > { %v3405_v45 = vadd.f32 %v3353_v36, %v3136_v6  ;;  %5541 = vmatmul.msk.bf16.gmra.mxu2 %vm2644_vm0, %v7700_v23 }
 0x49a   : > { %v3608_v11 = vpop.f32.mrf.mxu3  ;;  %v3655_v2 = vadd.f32 %v3603_v37, %v3405_v45  ;;  %v4428_v37 = vld [vmem:[#allocation2 + $0x99] sm:$0xff] }
 0x49b   : > { %v3361_v42 = vpop.f32.mrf.mxu2  ;;  %v4455_v38 = vpack.c.bf16 %v4428_v37, %v4427_v8  ;;  %v8597_v8 = vld [vmem:[#allocation70_spill] sm:$0xff] }
 0x49d   : > { %v3138_v55 = vpop.f32.mrf.mxu1  ;;  %v3851_v18 = vpop.f32.mrf.mxu0 }
 0x49e   : > { %v3139_v24 = vadd.f32 %v3138_v55, %v7743_v21  ;;  %v7996_v56 = vadd.f32 %v3851_v18, %v3654_v3  ;;  %v3926_v55 = vld [vmem:[#allocation2 + $0x7a] sm:$0xff]  ;;  %v4429_v18 = vld [vmem:[#allocation2 + $0xa9] sm:$0xff] }
 0x49f   : > { %5581 = vmatmul.msk.bf16.gmra.mxu3 %vm2644_vm0, %v7747_v41 }
 0x4a0   : > { %v3406_v52 = vadd.f32 %v3356_v33, %v3139_v24  ;;  %5500 = vmatmul.msk.bf16.gmra.mxu1 %vm2644_vm0, %v7671_v40  ;;  %5619 = vmatmul.msk.bf16.gmra.mxu0 %vm2644_vm0, %v7671_v40 }
 0x4a2   : > { %v3611_v23 = vpop.f32.mrf.mxu3  ;;  %v3656_v14 = vadd.f32 %v3606_v35, %v3406_v52  ;;  %v3927_v52 = vld [vmem:[#allocation2 + $0x82] sm:$0xff] }
 0x4a3   : > { %v3363_v31 = vpop.f32.mrf.mxu2 }
 0x4a5   : > { %v3140_v36 = vpop.f32.mrf.mxu1  ;;  %v3853_v17 = vpop.f32.mrf.mxu0 }
 0x4a6   : > { %v3141_v39 = vadd.f32 %v3140_v36, %v7761_v19  ;;  %v8005_v21 = vadd.f32 %v3853_v17, %v3655_v2 }
 0x4a8   : > { %v3407_v4 = vadd.f32 %v3358_v30, %v3141_v39  ;;  %5542 = vmatmul.msk.bf16.gmra.mxu2 %vm2644_vm0, %v7720_v57 }
 0x4aa   : > { %v3613_v41 = vpop.f32.mrf.mxu3  ;;  %v3657_v28 = vadd.f32 %v3608_v11, %v3407_v4  ;;  %v4430_v11 = vld [vmem:[#allocation2 + $0xb1] sm:$0xff] }
 0x4ab   : > { %v3366_v33 = vpop.f32.mrf.mxu2 }
 0x4ad   : > { %v3143_v51 = vpop.f32.mrf.mxu1  ;;  %v3856_v40 = vpop.f32.mrf.mxu0 }
 0x4ae   : > { %v3144_v50 = vadd.f32 %v3143_v51, %v7770_v53  ;;  %v8010_v12 = vadd.f32 %v3856_v40, %v3656_v14  ;;  %v8598_v51 = vld [vmem:[#allocation19_spill] sm:$0xff] }
 0x4af   : > { %5582 = vmatmul.msk.bf16.gmra.mxu3 %vm2644_vm0, %v4455_v38 }
 0x4b0   : > { %v3408_v19 = vadd.f32 %v3361_v42, %v3144_v50  ;;  %5501 = vmatmul.msk.bf16.gmra.mxu1 %vm2644_vm0, %v7688_v13  ;;  %5620 = vmatmul.msk.bf16.gmra.mxu0 %vm2644_vm0, %v7688_v13  ;;  %v3928_v50 = vld [vmem:[#allocation2 + $0x92] sm:$0xff] }
 0x4b2   : > { %v3616_v57 = vpop.f32.mrf.mxu3  ;;  %v3658_v35 = vadd.f32 %v3611_v23, %v3408_v19  ;;  %v4456_v23 = vpack.c.bf16 %v4430_v11, %v4429_v18  ;;  %v3929_v19 = vld [vmem:[#allocation2 + $0x9a] sm:$0xff] }
 0x4b3   : > { %v3368_v3 = vpop.f32.mrf.mxu2  ;;  %v8600_v11 = vld [vmem:[#allocation25_spill] sm:$0xff] }
 0x4b5   : > { %v3145_v30 = vpop.f32.mrf.mxu1  ;;  %v3858_v59 = vpop.f32.mrf.mxu0 }
 0x4b6   : > { %v3146_v49 = vadd.f32 %v3145_v30, %v7784_v7  ;;  %v8018_v6 = vadd.f32 %v3858_v59, %v3657_v28  ;;  %v3954_v7 = vpack.c.bf16 %v3927_v52, %v3926_v55  ;;  %v8599_v59 = vld [vmem:[#allocation12_spill] sm:$0xff] }
 0x4b8   : > { %v3409_v53 = vadd.f32 %v3363_v31, %v3146_v49  ;;  %5543 = vmatmul.msk.bf16.gmra.mxu2 %vm2644_vm0, %v7745_v26 }
 0x4ba   : > { %v3618_v45 = vpop.f32.mrf.mxu3  ;;  %v3659_v2 = vadd.f32 %v3613_v41, %v3409_v53  ;;  %v3955_v53 = vpack.c.bf16 %v3929_v19, %v3928_v50  ;;  %v8604_v19 = vld [vmem:[#allocation17_spill] sm:$0xff] }
 0x4bb   : > { %v3371_v42 = vpop.f32.mrf.mxu2 }
 0x4bd   : > { %v3148_v13 = vpop.f32.mrf.mxu1  ;;  %v3861_v24 = vpop.f32.mrf.mxu0 }
 0x4be   : > { %v3149_v14 = vadd.f32 %v3148_v13, %v7698_v54  ;;  %v8023_v36 = vadd.f32 %v3861_v24, %v3658_v35  ;;  %v8601_v24 = vld [vmem:[#allocation40_spill] sm:$0xff] }
 0x4bf   : > { %5583 = vmatmul.msk.bf16.gmra.mxu3 %vm2644_vm0, %v4456_v23 }
 0x4c0   : > { %v3410_v31 = vadd.f32 %v3366_v33, %v3149_v14  ;;  %5502 = vmatmul.msk.bf16.gmra.mxu1 %vm2644_vm0, %v3954_v7  ;;  %5621 = vmatmul.msk.bf16.gmra.mxu0 %vm2644_vm0, %v3954_v7  ;;  %v8602_v7 = vld [vmem:[#allocation71_spill] sm:$0xff] }
 0x4c2   : > { %v3621_v26 = vpop.f32.mrf.mxu3  ;;  %v3660_v17 = vadd.f32 %v3616_v57, %v3410_v31 }
 0x4c3   : > { %v3373_v39 = vpop.f32.mrf.mxu2 }
 0x4c5   : > { %v3150_v4 = vpop.f32.mrf.mxu1  ;;  %v3863_v41 = vpop.f32.mrf.mxu0 }
 0x4c6   : > { %v3151_v37 = vadd.f32 %v3150_v4, %v8597_v8  ;;  %v8029_v28 = vadd.f32 %v3863_v41, %v3659_v2  ;;  %v3930_v4 = vld [vmem:[#allocation2 + $0xaa] sm:$0xff]  ;;  %v3931_v41 = vld [vmem:[#allocation2 + $0xb2] sm:$0xff] }
 0x4c7   : > { %v3956_v50 = vpack.c.bf16 %v3931_v41, %v3930_v4 }
 0x4c8   : > { %v3411_v54 = vadd.f32 %v3368_v3, %v3151_v37  ;;  %5544 = vmatmul.msk.bf16.gmra.mxu2 %vm2644_vm0, %v8598_v51 }
 0x4ca   : > { %v3623_v40 = vpop.f32.mrf.mxu3  ;;  %v3661_v38 = vadd.f32 %v3618_v45, %v3411_v54  ;;  %v8603_v54 = vld [vmem:[#allocation14_spill] sm:$0xff] }
 0x4cb   : > { %v3376_v33 = vpop.f32.mrf.mxu2 }
 0x4cd   : > { %v3153_v35 = vpop.f32.mrf.mxu1  ;;  %v3866_v30 = vpop.f32.mrf.mxu0 }
 0x4ce   : > { %v3154_v57 = vadd.f32 %v3153_v35, %v8599_v59  ;;  %v8034_v49 = vadd.f32 %v3866_v30, %v3660_v17 }
 0x4cf   : > { %5584 = vmatmul.msk.bf16.gmra.mxu3 %vm2644_vm0, %v8600_v11 }
 0x4d0   : > { %v3412_v2 = vadd.f32 %v3371_v42, %v3154_v57  ;;  %5503 = vmatmul.msk.bf16.gmra.mxu1 %vm2644_vm0, %v3955_v53  ;;  %5622 = vmatmul.msk.bf16.gmra.mxu0 %vm2644_vm0, %v3955_v53  ;;  %v8605_v57 = vld [vmem:[#allocation13_spill] sm:$0xff] }
 0x4d2   : > { %v3626_v3 = vpop.f32.mrf.mxu3  ;;  %v3662_v45 = vadd.f32 %v3621_v26, %v3412_v2 }
 0x4d3   : > { %v3378_v55 = vpop.f32.mrf.mxu2 }
 0x4d5   : > { %v3155_v18 = vpop.f32.mrf.mxu1  ;;  %v3868_v13 = vpop.f32.mrf.mxu0 }
 0x4d6   : > { %v3156_v52 = vadd.f32 %v3155_v18, %v8601_v24  ;;  %v8041_v23 = vadd.f32 %v3868_v13, %v3661_v38  ;;  %v3932_v13 = vld [vmem:[#allocation2 + $0xc2] sm:$0xff]  ;;  %v3933_v24 = vld [vmem:[#allocation2 + $0xca] sm:$0xff] }
 0x4d7   : > { %v3957_v41 = vpack.c.bf16 %v3933_v24, %v3932_v13 }
 0x4d8   : > { %v3413_v14 = vadd.f32 %v3373_v39, %v3156_v52  ;;  %5545 = vmatmul.msk.bf16.gmra.mxu2 %vm2644_vm0, %v8602_v7  ;;  %v8606_v7 = vld [vmem:[#allocation35_spill] sm:$0xff] }
 0x4da   : > { %v3628_v31 = vpop.f32.mrf.mxu3  ;;  %v3663_v17 = vadd.f32 %v3623_v40, %v3413_v14 }
 0x4db   : > { %v3381_v42 = vpop.f32.mrf.mxu2 }
 0x4dd   : > { %v3158_v8 = vpop.f32.mrf.mxu1  ;;  %v3871_v37 = vpop.f32.mrf.mxu0 }
 0x4de   : > { %v3159_v26 = vadd.f32 %v3158_v8, %v8603_v54  ;;  %v8046_v51 = vadd.f32 %v3871_v37, %v3662_v45  ;;  %v8607_v54 = vld [vmem:[#allocation60_spill] sm:$0xff] }
 0x4df   : > { %5585 = vmatmul.msk.bf16.gmra.mxu3 %vm2644_vm0, %v8604_v19 }
 0x4e0   : > { %v3414_v38 = vadd.f32 %v3376_v33, %v3159_v26  ;;  %5504 = vmatmul.msk.bf16.gmra.mxu1 %vm2644_vm0, %v3956_v50  ;;  %5623 = vmatmul.msk.bf16.gmra.mxu0 %vm2644_vm0, %v3956_v50 }
 0x4e2   : > { %v3631_v39 = vpop.f32.mrf.mxu3  ;;  %v3664_v40 = vadd.f32 %v3626_v3, %v3414_v38 }
 0x4e3   : > { %v3383_v35 = vpop.f32.mrf.mxu2 }
 0x4e5   : > { %v3160_v30 = vpop.f32.mrf.mxu1  ;;  %v3873_v59 = vpop.f32.mrf.mxu0 }
 0x4e6   : > { %v3161_v53 = vadd.f32 %v3160_v30, %v8605_v57  ;;  %v8053_v11 = vadd.f32 %v3873_v59, %v3663_v17  ;;  %v3934_v59 = vld [vmem:[#allocation2 + $0xda] sm:$0xff]  ;;  %v3935_v57 = vld [vmem:[#allocation2 + $0xe2] sm:$0xff] }
 0x4e7   : > { %v3958_v24 = vpack.c.bf16 %v3935_v57, %v3934_v59 }
 0x4e8   : > { %v3415_v2 = vadd.f32 %v3378_v55, %v3161_v53  ;;  %5546 = vmatmul.msk.bf16.gmra.mxu2 %vm2644_vm0, %v7822_v9 }
 0x4ea   : > { %v3633_v45 = vpop.f32.mrf.mxu3  ;;  %v3665_v18 = vadd.f32 %v3628_v31, %v3415_v2 }
 0x4eb   : > { %v4307_v33 = vpop.f32.mrf.mxu2 }
 0x4ed   : > { %v3163_v52 = vpop.f32.mrf.mxu1  ;;  %v3876_v14 = vpop.f32.mrf.mxu0 }
 0x4ee   : > { %v3164_v3 = vadd.f32 %v3163_v52, %v8606_v7  ;;  %v8058_v4 = vadd.f32 %v3876_v14, %v3664_v40 }
 0x4ef   : > { %5586 = vmatmul.msk.bf16.gmra.mxu3 %vm2644_vm0, %v7859_v44  ;;  %v4437_v44 = vld [vmem:[#allocation2 + $0x109] sm:$0xff] }
 0x4f0   : > { %v3416_v17 = vadd.f32 %v3381_v42, %v3164_v3  ;;  %5505 = vmatmul.msk.bf16.gmra.mxu1 %vm2644_vm0, %v3957_v41  ;;  %5624 = vmatmul.msk.bf16.gmra.mxu0 %vm2644_vm0, %v3957_v41  ;;  %v4438_v42 = vld [vmem:[#allocation2 + $0x111] sm:$0xff] }
 0x4f1   : > { %v4460_v2 = vpack.c.bf16 %v4438_v42, %v4437_v44  ;;  %v3937_v44 = vld [vmem:[#allocation2 + $0xfa] sm:$0xff] }
 0x4f2   : > { %v4557_v9 = vpop.f32.mrf.mxu3  ;;  %v3666_v55 = vadd.f32 %v3631_v39, %v3416_v17 }
 0x4f3   : > { %v4309_v31 = vpop.f32.mrf.mxu2 }
 0x4f5   : > { %v3165_v8 = vpop.f32.mrf.mxu1  ;;  %v3878_v37 = vpop.f32.mrf.mxu0 }
 0x4f6   : > { %v3166_v26 = vadd.f32 %v3165_v8, %v8607_v54  ;;  %v8065_v50 = vadd.f32 %v3878_v37, %v3665_v18  ;;  %v8608_v18 = vld [vmem:[#allocation45_spill] sm:$0xff] }
 0x4f7   : > { %v8083_v54 = vld [vmem:[%s8259_s4] ss:$0 sm:$0xff] }
 0x4f8   : > { %v3417_v19 = vadd.f32 %v3383_v35, %v3166_v26  ;;  %5547 = vmatmul.msk.bf16.gmra.mxu2 %vm2644_vm0, %v7837_v27 }
 0x4fa   : > { %v4559_v38 = vpop.f32.mrf.mxu3  ;;  %v3667_v40 = vadd.f32 %v3633_v45, %v3417_v19 }
 0x4fb   : > { %v4312_v30 = vpop.f32.mrf.mxu2 }
 0x4fd   : > { %v3881_v53 = vpop.f32.mrf.mxu0  ;;  %v4056_v39 = vpop.f32.mrf.mxu1 }
 0x4fe   : > { %v8069_v13 = vadd.f32 %v3881_v53, %v3666_v55  ;;  %v4136_v45 = vadd.f32 %v4056_v39, %v8608_v18  ;;  %v3936_v55 = vld [vmem:[#allocation2 + $0xf2] sm:$0xff] }
 0x4ff   : > { %5587 = vmatmul.msk.bf16.gmra.mxu3 %vm2644_vm0, %v4460_v2 }
 0x500   : > { %5506 = vmatmul.msk.bf16.gmra.mxu1 %vm2644_vm0, %v3958_v24  ;;  %5625 = vmatmul.msk.bf16.gmra.mxu0 %vm2644_vm0, %v3958_v24  ;;  %v4387_v3 = vadd.f32 %v4307_v33, %v4136_v45  ;;  %v3959_v33 = vpack.c.bf16 %v3937_v44, %v3936_v55  ;;  %v8609_v55 = vld [vmem:[#allocation113_spill] sm:$0xff] }
 0x502   : > { %v4562_v27 = vpop.f32.mrf.mxu3  ;;  %v4637_v37 = vadd.f32 %v4557_v9, %v4387_v3  ;;  %v3939_v3 = vld [vmem:[#allocation2 + $0x112] sm:$0xff] }
 0x503   : > { %v4314_v35 = vpop.f32.mrf.mxu2 }
 0x505   : > { %v3883_v52 = vpop.f32.mrf.mxu0  ;;  %v4058_v14 = vpop.f32.mrf.mxu1 }
 0x506   : > { %v8075_v7 = vadd.f32 %v3883_v52, %v3667_v40  ;;  %v4137_v8 = vadd.f32 %v4058_v14, %v7851_v5  ;;  %v3938_v14 = vld [vmem:[#allocation2 + $0x10a] sm:$0xff] }
 0x508   : > { %5548 = vmatmul.msk.bf16.gmra.mxu2 %vm2644_vm0, %v7854_v43  ;;  %v4388_v43 = vadd.f32 %v4309_v31, %v4137_v8 }
 0x50a   : > { %v4564_v41 = vpop.f32.mrf.mxu3 }
 0x50b   : > { %v4317_v17 = vpop.f32.mrf.mxu2 }
 0x50d   : > { %v4061_v26 = vpop.f32.mrf.mxu1  ;;  %v4807_v19 = vpop.f32.mrf.mxu0 }
 0x50e   : > { %v4887_v42 = vadd.f32 %v4807_v19, %v4637_v37  ;;  %v4138_v57 = vadd.f32 %v4061_v26, %v7857_v60 }
 0x50f   : > { %5588 = vmatmul.msk.bf16.gmra.mxu3 %vm2644_vm0, %v7903_v15  ;;  %v4638_v15 = vadd.f32 %v4559_v38, %v4388_v43  ;;  %v8610_v43 = vld [vmem:[#allocation78_spill] sm:$0xff] }
 0x510   : > { %v4923_v40 = vadd.f32 %v8083_v54, %v4887_v42  ;;  %5507 = vmatmul.msk.bf16.gmra.mxu1 %vm2644_vm0, %v3959_v33  ;;  %5626 = vmatmul.msk.bf16.gmra.mxu0 %vm2644_vm0, %v3959_v33  ;;  %v4389_v2 = vadd.f32 %v4312_v30, %v4138_v57  ;;  %v3960_v30 = vpack.c.bf16 %v3939_v3, %v3938_v14 }
 0x512   : > { %v4955_v5 = vmax.f32 %v4923_v40, 0.0  ;;  %v4567_v9 = vpop.f32.mrf.mxu3  ;;  %v4639_v60 = vadd.f32 %v4562_v27, %v4389_v2  ;;  %v3940_v2 = vld [vmem:[#allocation2 + $0x122] sm:$0xff] }
 0x513   : > { %v4319_v59 = vpop.f32.mrf.mxu2 }
 0x514   : > { %4987 = vst.msk [vmem:[%s8094_s25] sm:$0xff] %vm2644_vm0, %v4955_v5 }
 0x515   : > { %v4063_v31 = vpop.f32.mrf.mxu1  ;;  %v4809_v53 = vpop.f32.mrf.mxu0 }
 0x516   : > { %v4888_v39 = vadd.f32 %v4809_v53, %v4638_v15  ;;  %v4139_v8 = vadd.f32 %v4063_v31, %v8609_v55 }
 0x518   : > { %v4924_v24 = vadd.f32 %v8083_v54, %v4888_v39  ;;  %5549 = vmatmul.msk.bf16.gmra.mxu2 %vm2644_vm0, %v7880_v22  ;;  %v4390_v19 = vadd.f32 %v4314_v35, %v4139_v8 }
 0x51a   : > { %v4956_v18 = vmax.f32 %v4924_v24, 0.0  ;;  %v4569_v45 = vpop.f32.mrf.mxu3  ;;  %v4640_v40 = vadd.f32 %v4564_v41, %v4390_v19  ;;  %v3941_v24 = vld [vmem:[#allocation2 + $0x12a] sm:$0xff] }
 0x51b   : > { %v4322_v52 = vpop.f32.mrf.mxu2 }
 0x51c   : > { %4988 = vst.msk [vmem:[%s8094_s25 + $0x8] sm:$0xff] %vm2644_vm0, %v4956_v18  ;;  %v8611_v18 = vld [vmem:[#allocation66_spill] sm:$0xff] }
 0x51d   : > { %v4066_v38 = vpop.f32.mrf.mxu1  ;;  %v4812_v37 = vpop.f32.mrf.mxu0 }
 0x51e   : > { %v4889_v26 = vadd.f32 %v4812_v37, %v4639_v60  ;;  %v4140_v27 = vadd.f32 %v4066_v38, %v8610_v43 }
 0x51f   : > { %5589 = vmatmul.msk.bf16.gmra.mxu3 %vm2644_vm0, %v7920_v1 }
 0x520   : > { %v4925_v22 = vadd.f32 %v8083_v54, %v4889_v26  ;;  %5508 = vmatmul.msk.bf16.gmra.mxu1 %vm2644_vm0, %v3960_v30  ;;  %5627 = vmatmul.msk.bf16.gmra.mxu0 %vm2644_vm0, %v3960_v30  ;;  %v4391_v1 = vadd.f32 %v4317_v17, %v4140_v27  ;;  %v3961_v17 = vpack.c.bf16 %v3941_v24, %v3940_v2  ;;  %v8612_v30 = vld [vmem:[#allocation38_spill] sm:$0xff] }
 0x522   : > { %v4957_v44 = vmax.f32 %v4925_v22, 0.0  ;;  %v4572_v42 = vpop.f32.mrf.mxu3  ;;  %v4641_v41 = vadd.f32 %v4567_v9, %v4391_v1  ;;  %v8613_v1 = vld [vmem:[#allocation92_spill] sm:$0xff] }
 0x523   : > { %v4324_v33 = vpop.f32.mrf.mxu2 }
 0x524   : > { %4989 = vst.msk [vmem:[%s8094_s25 + $0x10] sm:$0xff] %vm2644_vm0, %v4957_v44 }
 0x525   : > { %v4068_v5 = vpop.f32.mrf.mxu1  ;;  %v4814_v57 = vpop.f32.mrf.mxu0 }
 0x526   : > { %v4890_v15 = vadd.f32 %v4814_v57, %v4640_v40  ;;  %v4141_v14 = vadd.f32 %v4068_v5, %v8611_v18  ;;  %v3942_v57 = vld [vmem:[#allocation2 + $0x13a] sm:$0xff] }
 0x528   : > { %v4926_v35 = vadd.f32 %v8083_v54, %v4890_v15  ;;  %5550 = vmatmul.msk.bf16.gmra.mxu2 %vm2644_vm0, %v7898_v20  ;;  %v4392_v60 = vadd.f32 %v4319_v59, %v4141_v14  ;;  %v3943_v15 = vld [vmem:[#allocation2 + $0x142] sm:$0xff] }
 0x52a   : > { %v4958_v31 = vmax.f32 %v4926_v35, 0.0  ;;  %v4574_v53 = vpop.f32.mrf.mxu3  ;;  %v4642_v19 = vadd.f32 %v4569_v45, %v4392_v60 }
 0x52b   : > { %v4327_v39 = vpop.f32.mrf.mxu2 }
 0x52c   : > { %4990 = vst.msk [vmem:[%s8094_s25 + $0x18] sm:$0xff] %vm2644_vm0, %v4958_v31 }
 0x52d   : > { %v4071_v3 = vpop.f32.mrf.mxu1  ;;  %v4817_v55 = vpop.f32.mrf.mxu0 }
 0x52e   : > { %v4891_v8 = vadd.f32 %v4817_v55, %v4641_v41  ;;  %v4142_v9 = vadd.f32 %v4071_v3, %v8612_v30  ;;  %v8614_v55 = vld [vmem:[#allocation39_spill] sm:$0xff] }
 0x52f   : > { %5590 = vmatmul.msk.bf16.gmra.mxu3 %vm2644_vm0, %v7937_v16 }
 0x530   : > { %v4927_v20 = vadd.f32 %v8083_v54, %v4891_v8  ;;  %5509 = vmatmul.msk.bf16.gmra.mxu1 %vm2644_vm0, %v3961_v17  ;;  %5628 = vmatmul.msk.bf16.gmra.mxu0 %vm2644_vm0, %v3961_v17  ;;  %v4393_v16 = vadd.f32 %v4322_v52, %v4142_v9  ;;  %v3962_v52 = vpack.c.bf16 %v3943_v15, %v3942_v57  ;;  %v4199_v57 = vld [vmem:[#allocation2 + $0x198] sm:$0xff] }
 0x532   : > { %v4959_v38 = vmax.f32 %v4927_v20, 0.0  ;;  %v4577_v37 = vpop.f32.mrf.mxu3  ;;  %v4643_v45 = vadd.f32 %v4572_v42, %v4393_v16 }
 0x533   : > { %v4329_v26 = vpop.f32.mrf.mxu2 }
 0x534   : > { %4991 = vst.msk [vmem:[%s8094_s25 + $0x20] sm:$0xff] %vm2644_vm0, %v4959_v38 }
 0x535   : > { %v4073_v22 = vpop.f32.mrf.mxu1  ;;  %v4819_v44 = vpop.f32.mrf.mxu0 }
 0x536   : > { %v4892_v43 = vadd.f32 %v4819_v44, %v4642_v19  ;;  %v4143_v35 = vadd.f32 %v4073_v22, %v8613_v1  ;;  %v3944_v19 = vld [vmem:[#allocation2 + $0x152] sm:$0xff]  ;;  %v3945_v22 = vld [vmem:[#allocation2 + $0x15a] sm:$0xff] }
 0x538   : > { %v4928_v59 = vadd.f32 %v8083_v54, %v4892_v43  ;;  %5551 = vmatmul.msk.bf16.gmra.mxu2 %vm2644_vm0, %v7915_v63  ;;  %v4394_v18 = vadd.f32 %v4324_v33, %v4143_v35 }
 0x53a   : > { %v4960_v27 = vmax.f32 %v4928_v59, 0.0  ;;  %v4579_v40 = vpop.f32.mrf.mxu3  ;;  %v4644_v8 = vadd.f32 %v4574_v53, %v4394_v18  ;;  %v4449_v18 = vld [vmem:[#allocation2 + $0x199] sm:$0xff] }
 0x53b   : > { %v4332_v5 = vpop.f32.mrf.mxu2 }
 0x53c   : > { %4992 = vst.msk [vmem:[%s8094_s25 + $0x28] sm:$0xff] %vm2644_vm0, %v4960_v27 }
 0x53d   : > { %v4076_v31 = vpop.f32.mrf.mxu1  ;;  %v4822_v2 = vpop.f32.mrf.mxu0 }
 0x53e   : > { %v4893_v24 = vadd.f32 %v4822_v2, %v4643_v45  ;;  %v4144_v42 = vadd.f32 %v4076_v31, %v8614_v55 }
 0x53f   : > { %5591 = vmatmul.msk.bf16.gmra.mxu3 %vm2644_vm0, %v7953_v34 }
 0x540   : > { %v4929_v63 = vadd.f32 %v8083_v54, %v4893_v24  ;;  %5510 = vmatmul.msk.bf16.gmra.mxu1 %vm2644_vm0, %v3962_v52  ;;  %5629 = vmatmul.msk.bf16.gmra.mxu0 %vm2644_vm0, %v3962_v52  ;;  %v4395_v34 = vadd.f32 %v4327_v39, %v4144_v42  ;;  %v3963_v39 = vpack.c.bf16 %v3945_v22, %v3944_v19 }
 0x542   : > { %v4961_v14 = vmax.f32 %v4929_v63, 0.0  ;;  %v4582_v41 = vpop.f32.mrf.mxu3  ;;  %v4645_v43 = vadd.f32 %v4577_v37, %v4395_v34  ;;  %v4450_v63 = vld [vmem:[#allocation2 + $0x1a1] sm:$0xff] }
 0x543   : > { %v4334_v3 = vpop.f32.mrf.mxu2 }
 0x544   : > { %4993 = vst.msk [vmem:[%s8094_s25 + $0x30] sm:$0xff] %vm2644_vm0, %v4961_v14 }
 0x545   : > { %v4078_v17 = vpop.f32.mrf.mxu1  ;;  %v4824_v60 = vpop.f32.mrf.mxu0 }
 0x546   : > { %v4894_v20 = vadd.f32 %v4824_v60, %v4644_v8  ;;  %v4145_v44 = vadd.f32 %v4078_v17, %v7929_v61  ;;  %v4200_v61 = vld [vmem:[#allocation2 + $0x1a0] sm:$0xff]  ;;  %v3946_v8 = vld [vmem:[#allocation2 + $0x16a] sm:$0xff] }
 0x547   : > { %v4216_v31 = vpack.c.bf16 %v4200_v61, %v4199_v57  ;;  %v3948_v61 = vld [vmem:[#allocation2 + $0x182] sm:$0xff] }
 0x548   : > { %v4930_v33 = vadd.f32 %v8083_v54, %v4894_v20  ;;  %5552 = vmatmul.msk.bf16.gmra.mxu2 %vm2644_vm0, %v7932_v25  ;;  %v4396_v27 = vadd.f32 %v4329_v26, %v4145_v44 }
 0x54a   : > { %v4962_v38 = vmax.f32 %v4930_v33, 0.0  ;;  %v4584_v30 = vpop.f32.mrf.mxu3  ;;  %v4646_v45 = vadd.f32 %v4579_v40, %v4396_v27 }
 0x54b   : > { %v4337_v9 = vpop.f32.mrf.mxu2 }
 0x54c   : > { %4994 = vst.msk [vmem:[%s8094_s25 + $0x38] sm:$0xff] %vm2644_vm0, %v4962_v38 }
 0x54d   : > { %v4081_v53 = vpop.f32.mrf.mxu1  ;;  %v4827_v16 = vpop.f32.mrf.mxu0 }
 0x54e   : > { %v4895_v59 = vadd.f32 %v4827_v16, %v4645_v43  ;;  %v4146_v35 = vadd.f32 %v4081_v53, %v7935_v48  ;;  %v4466_v48 = vpack.c.bf16 %v4450_v63, %v4449_v18 }
 0x54f   : > { %5592 = vmatmul.msk.bf16.gmra.mxu3 %vm2644_vm0, %v7968_v32 }
 0x550   : > { %v4931_v25 = vadd.f32 %v8083_v54, %v4895_v59  ;;  %5511 = vmatmul.msk.bf16.gmra.mxu1 %vm2644_vm0, %v3963_v39  ;;  %5630 = vmatmul.msk.bf16.gmra.mxu0 %vm2644_vm0, %v3963_v39  ;;  %v4397_v24 = vadd.f32 %v4332_v5, %v4146_v35  ;;  %v3947_v5 = vld [vmem:[#allocation2 + $0x172] sm:$0xff] }
 0x551   : > { %v3964_v33 = vpack.c.bf16 %v3947_v5, %v3946_v8 }
 0x552   : > { %v4963_v15 = vmax.f32 %v4931_v25, 0.0  ;;  %v4587_v1 = vpop.f32.mrf.mxu3  ;;  %v4647_v40 = vadd.f32 %v4582_v41, %v4397_v24 }
 0x553   : > { %v4339_v37 = vpop.f32.mrf.mxu2 }
 0x554   : > { %4995 = vst.msk [vmem:[%s8094_s25 + $0x40] sm:$0xff] %vm2644_vm0, %v4963_v15  ;;  %v3949_v15 = vld [vmem:[#allocation2 + $0x18a] sm:$0xff] }
 0x555   : > { %v4083_v32 = vpop.f32.mrf.mxu1  ;;  %v4829_v26 = vpop.f32.mrf.mxu0 }
 0x556   : > { %v4896_v2 = vadd.f32 %v4829_v26, %v4646_v45  ;;  %v4147_v17 = vadd.f32 %v4083_v32, %v7946_v47  ;;  %v3965_v32 = vpack.c.bf16 %v3949_v15, %v3948_v61 }
 0x558   : > { %v4932_v52 = vadd.f32 %v8083_v54, %v4896_v2  ;;  %5553 = vmatmul.msk.bf16.gmra.mxu2 %vm2644_vm0, %v4216_v31  ;;  %v4398_v38 = vadd.f32 %v4334_v3, %v4147_v17  ;;  %v4700_v17 = vld [vmem:[#allocation2 + $0x1a2] sm:$0xff] }
 0x55a   : > { %v4964_v14 = vmax.f32 %v4932_v52, 0.0  ;;  %v4589_v55 = vpop.f32.mrf.mxu3  ;;  %v4648_v43 = vadd.f32 %v4584_v30, %v4398_v38 }
 0x55b   : > { %v4342_v42 = vpop.f32.mrf.mxu2 }
 0x55c   : > { %4996 = vst.msk [vmem:[%s8094_s25 + $0x48] sm:$0xff] %vm2644_vm0, %v4964_v14 }
 0x55d   : > { %v4086_v60 = vpop.f32.mrf.mxu1  ;;  %v4832_v20 = vpop.f32.mrf.mxu0 }
 0x55e   : > { %v4897_v34 = vadd.f32 %v4832_v20, %v4647_v40  ;;  %v4148_v41 = vadd.f32 %v4086_v60, %v7951_v62 }
 0x55f   : > { %5593 = vmatmul.msk.bf16.gmra.mxu3 %vm2644_vm0, %v4466_v48  ;;  %v4699_v48 = vld [vmem:[#allocation2 + $0x19a] sm:$0xff] }
 0x560   : > { %v4933_v19 = vadd.f32 %v8083_v54, %v4897_v34  ;;  %5512 = vmatmul.msk.bf16.gmra.mxu1 %vm2644_vm0, %v3964_v33  ;;  %5631 = vmatmul.msk.bf16.gmra.mxu0 %vm2644_vm0, %v3964_v33  ;;  %v4399_v39 = vadd.f32 %v4337_v9, %v4148_v41  ;;  %v4716_v34 = vpack.c.bf16 %v4700_v17, %v4699_v48 }
 0x562   : > { %v4965_v22 = vmax.f32 %v4933_v19, 0.0  ;;  %v4592_v47 = vpop.f32.mrf.mxu3  ;;  %v4649_v62 = vadd.f32 %v4587_v1, %v4399_v39 }
 0x563   : > { %v4344_v44 = vpop.f32.mrf.mxu2 }
 0x564   : > { %4997 = vst.msk [vmem:[%s8094_s25 + $0x50] sm:$0xff] %vm2644_vm0, %v4965_v22 }
 0x565   : > { %v4088_v53 = vpop.f32.mrf.mxu1  ;;  %v4834_v16 = vpop.f32.mrf.mxu0 }
 0x566   : > { %v4898_v59 = vadd.f32 %v4834_v16, %v4648_v43  ;;  %v4149_v35 = vadd.f32 %v4088_v53, %v7961_v29 }
 0x568   : > { %v4934_v3 = vadd.f32 %v8083_v54, %v4898_v59  ;;  %v4400_v26 = vadd.f32 %v4339_v37, %v4149_v35 }
 0x56a   : > { %v4966_v27 = vmax.f32 %v4934_v3, 0.0  ;;  %v4594_v25 = vpop.f32.mrf.mxu3  ;;  %v4650_v1 = vadd.f32 %v4589_v55, %v4400_v26 }
 0x56b   : > { %v4347_v57 = vpop.f32.mrf.mxu2 }
 0x56c   : > { %4998 = vst.msk [vmem:[%s8094_s25 + $0x58] sm:$0xff] %vm2644_vm0, %v4966_v27 }
 0x56d   : > { %v4091_v45 = vpop.f32.mrf.mxu1  ;;  %v4837_v31 = vpop.f32.mrf.mxu0 }
 0x56e   : > { %v4899_v30 = vadd.f32 %v4837_v31, %v4649_v62  ;;  %v4150_v29 = vadd.f32 %v4091_v45, %v7966_v58 }
 0x570   : > { %v4935_v9 = vadd.f32 %v8083_v54, %v4899_v30  ;;  %5513 = vmatmul.msk.bf16.gmra.mxu1 %vm2644_vm0, %v3965_v32  ;;  %5632 = vmatmul.msk.bf16.gmra.mxu0 %vm2644_vm0, %v3965_v32  ;;  %v4401_v8 = vadd.f32 %v4342_v42, %v4150_v29 }
 0x572   : > { %v4967_v2 = vmax.f32 %v4935_v9, 0.0  ;;  %v4597_v24 = vpop.f32.mrf.mxu3  ;;  %v4651_v58 = vadd.f32 %v4592_v47, %v4401_v8 }
 0x573   : > { %v4349_v52 = vpop.f32.mrf.mxu2 }
 0x574   : > { %4999 = vst.msk [vmem:[%s8094_s25 + $0x60] sm:$0xff] %vm2644_vm0, %v4967_v2 }
 0x575   : > { %v4093_v18 = vpop.f32.mrf.mxu1  ;;  %v4839_v63 = vpop.f32.mrf.mxu0 }
 0x576   : > { %v4900_v14 = vadd.f32 %v4839_v63, %v4650_v1  ;;  %v4151_v20 = vadd.f32 %v4093_v18, %v7977_v0 }
 0x578   : > { %v4936_v37 = vadd.f32 %v8083_v54, %v4900_v14  ;;  %v4402_v19 = vadd.f32 %v4344_v44, %v4151_v20 }
 0x57a   : > { %v4968_v40 = vmax.f32 %v4936_v37, 0.0  ;;  %v4599_v60 = vpop.f32.mrf.mxu3  ;;  %v4652_v0 = vadd.f32 %v4594_v25, %v4402_v19 }
 0x57b   : > { %v4352_v5 = vpop.f32.mrf.mxu2 }
 0x57c   : > { %5000 = vst.msk [vmem:[%s8094_s25 + $0x68] sm:$0xff] %vm2644_vm0, %v4968_v40 }
 0x57d   : > { %v4096_v33 = vpop.f32.mrf.mxu1  ;;  %v4842_v55 = vpop.f32.mrf.mxu0 }
 0x57e   : > { %v4901_v38 = vadd.f32 %v4842_v55, %v4651_v58  ;;  %v4152_v43 = vadd.f32 %v4096_v33, %v7982_v10 }
 0x580   : > { %v4937_v42 = vadd.f32 %v8083_v54, %v4901_v38  ;;  %5633 = vmatmul.msk.bf16.gmra.mxu0 %vm2644_vm0, %v4716_v34  ;;  %v4403_v39 = vadd.f32 %v4347_v57, %v4152_v43 }
 0x582   : > { %v4969_v22 = vmax.f32 %v4937_v42, 0.0  ;;  %v4602_v41 = vpop.f32.mrf.mxu3  ;;  %v4653_v15 = vadd.f32 %v4597_v24, %v4403_v39 }
 0x583   : > { %v4354_v47 = vpop.f32.mrf.mxu2 }
 0x584   : > { %5001 = vst.msk [vmem:[%s8094_s25 + $0x70] sm:$0xff] %vm2644_vm0, %v4969_v22 }
 0x585   : > { %v4098_v53 = vpop.f32.mrf.mxu1  ;;  %v4844_v16 = vpop.f32.mrf.mxu0 }
 0x586   : > { %v4902_v59 = vadd.f32 %v4844_v16, %v4652_v0  ;;  %v4153_v61 = vadd.f32 %v4098_v53, %v7991_v46 }
 0x588   : > { %v4938_v44 = vadd.f32 %v8083_v54, %v4902_v59  ;;  %v4404_v45 = vadd.f32 %v4349_v52, %v4153_v61 }
 0x58a   : > { %v4970_v3 = vmax.f32 %v4938_v44, 0.0  ;;  %v4604_v27 = vpop.f32.mrf.mxu3  ;;  %v4654_v26 = vadd.f32 %v4599_v60, %v4404_v45 }
 0x58b   : > { %v4357_v25 = vpop.f32.mrf.mxu2 }
 0x58c   : > { %5002 = vst.msk [vmem:[%s8094_s25 + $0x78] sm:$0xff] %vm2644_vm0, %v4970_v3 }
 0x58d   : > { %v4101_v35 = vpop.f32.mrf.mxu1  ;;  %v4847_v10 = vpop.f32.mrf.mxu0 }
 0x58e   : > { %v4903_v62 = vadd.f32 %v4847_v10, %v4653_v15  ;;  %v4154_v57 = vadd.f32 %v4101_v35, %v7996_v56 }
 0x590   : > { %v4939_v31 = vadd.f32 %v8083_v54, %v4903_v62  ;;  %v4405_v29 = vadd.f32 %v4352_v5, %v4154_v57 }
 0x592   : > { %v4971_v30 = vmax.f32 %v4939_v31, 0.0  ;;  %v4607_v32 = vpop.f32.mrf.mxu3  ;;  %v4655_v63 = vadd.f32 %v4602_v41, %v4405_v29 }
 0x593   : > { %v4359_v1 = vpop.f32.mrf.mxu2 }
 0x594   : > { %5003 = vst.msk [vmem:[%s8094_s25 + $0x80] sm:$0xff] %vm2644_vm0, %v4971_v30 }
 0x595   : > { %v4103_v9 = vpop.f32.mrf.mxu1  ;;  %v4849_v46 = vpop.f32.mrf.mxu0 }
 0x596   : > { %v4904_v2 = vadd.f32 %v4849_v46, %v4654_v26  ;;  %v4155_v18 = vadd.f32 %v4103_v9, %v8005_v21 }
 0x598   : > { %v4940_v24 = vadd.f32 %v8083_v54, %v4904_v2  ;;  %v4406_v48 = vadd.f32 %v4354_v47, %v4155_v18 }
 0x59a   : > { %v4972_v52 = vmax.f32 %v4940_v24, 0.0  ;;  %v4609_v8 = vpop.f32.mrf.mxu3  ;;  %v4656_v5 = vadd.f32 %v4604_v27, %v4406_v48 }
 0x59b   : > { %v4362_v60 = vpop.f32.mrf.mxu2 }
 0x59c   : > { %5004 = vst.msk [vmem:[%s8094_s25 + $0x88] sm:$0xff] %vm2644_vm0, %v4972_v52 }
 0x59d   : > { %v4106_v14 = vpop.f32.mrf.mxu1  ;;  %v4852_v56 = vpop.f32.mrf.mxu0 }
 0x59e   : > { %v4905_v37 = vadd.f32 %v4852_v56, %v4655_v63  ;;  %v4156_v20 = vadd.f32 %v4106_v14, %v8010_v12 }
 0x5a0   : > { %v4941_v17 = vadd.f32 %v8083_v54, %v4905_v37  ;;  %v4407_v33 = vadd.f32 %v4357_v25, %v4156_v20 }
 0x5a2   : > { %v4973_v40 = vmax.f32 %v4941_v17, 0.0  ;;  %v4612_v55 = vpop.f32.mrf.mxu3  ;;  %v4657_v22 = vadd.f32 %v4607_v32, %v4407_v33 }
 0x5a3   : > { %v4364_v12 = vpop.f32.mrf.mxu2 }
 0x5a4   : > { %5005 = vst.msk [vmem:[%s8094_s25 + $0x90] sm:$0xff] %vm2644_vm0, %v4973_v40 }
 0x5a5   : > { %v4108_v58 = vpop.f32.mrf.mxu1  ;;  %v4854_v21 = vpop.f32.mrf.mxu0 }
 0x5a6   : > { %v4906_v34 = vadd.f32 %v4854_v21, %v4656_v5  ;;  %v4157_v42 = vadd.f32 %v4108_v58, %v8018_v6 }
 0x5a8   : > { %v4942_v38 = vadd.f32 %v8083_v54, %v4906_v34  ;;  %v4408_v53 = vadd.f32 %v4359_v1, %v4157_v42 }
 0x5aa   : > { %v4974_v19 = vmax.f32 %v4942_v38, 0.0  ;;  %v4614_v47 = vpop.f32.mrf.mxu3  ;;  %v4658_v44 = vadd.f32 %v4609_v8, %v4408_v53 }
 0x5ab   : > { %v4367_v61 = vpop.f32.mrf.mxu2 }
 0x5ac   : > { %5006 = vst.msk [vmem:[%s8094_s25 + $0x98] sm:$0xff] %vm2644_vm0, %v4974_v19 }
 0x5ad   : > { %v4111_v41 = vpop.f32.mrf.mxu1  ;;  %v4857_v43 = vpop.f32.mrf.mxu0 }
 0x5ae   : > { %v4907_v0 = vadd.f32 %v4857_v43, %v4657_v22  ;;  %v4158_v39 = vadd.f32 %v4111_v41, %v8023_v36 }
 0x5b0   : > { %v4943_v16 = vadd.f32 %v8083_v54, %v4907_v0  ;;  %v4409_v15 = vadd.f32 %v4362_v60, %v4158_v39 }
 0x5b2   : > { %v4975_v59 = vmax.f32 %v4943_v16, 0.0  ;;  %v4617_v62 = vpop.f32.mrf.mxu3  ;;  %v4659_v25 = vadd.f32 %v4612_v55, %v4409_v15 }
 0x5b3   : > { %v4369_v26 = vpop.f32.mrf.mxu2 }
 0x5b4   : > { %5007 = vst.msk [vmem:[%s8094_s25 + $0xa0] sm:$0xff] %vm2644_vm0, %v4975_v59 }
 0x5b5   : > { %v4113_v3 = vpop.f32.mrf.mxu1  ;;  %v4859_v6 = vpop.f32.mrf.mxu0 }
 0x5b6   : > { %v4908_v27 = vadd.f32 %v4859_v6, %v4658_v44  ;;  %v4159_v45 = vadd.f32 %v4113_v3, %v8029_v28 }
 0x5b8   : > { %v4944_v35 = vadd.f32 %v8083_v54, %v4908_v27  ;;  %v4410_v57 = vadd.f32 %v4364_v12, %v4159_v45 }
 0x5ba   : > { %v4976_v10 = vmax.f32 %v4944_v35, 0.0  ;;  %v4660_v2 = vadd.f32 %v4614_v47, %v4410_v57  ;;  %v4619_v28 = vpop.f32.mrf.mxu3 }
 0x5bb   : > { %v4372_v14 = vpop.f32.mrf.mxu2 }
 0x5bc   : > { %5008 = vst.msk [vmem:[%s8094_s25 + $0xa8] sm:$0xff] %vm2644_vm0, %v4976_v10 }
 0x5bd   : > { %v4116_v31 = vpop.f32.mrf.mxu1  ;;  %v4862_v36 = vpop.f32.mrf.mxu0 }
 0x5be   : > { %v4909_v30 = vadd.f32 %v4862_v36, %v4659_v25  ;;  %v4160_v46 = vadd.f32 %v4116_v31, %v8034_v49 }
 0x5c0   : > { %v4945_v32 = vadd.f32 %v8083_v54, %v4909_v30  ;;  %v4411_v52 = vadd.f32 %v4367_v61, %v4160_v46 }
 0x5c2   : > { %v4977_v9 = vmax.f32 %v4945_v32, 0.0  ;;  %v4661_v8 = vadd.f32 %v4617_v62, %v4411_v52  ;;  %v4622_v17 = vpop.f32.mrf.mxu3 }
 0x5c3   : > { %v4374_v33 = vpop.f32.mrf.mxu2 }
 0x5c4   : > { %5009 = vst.msk [vmem:[%s8094_s25 + $0xb0] sm:$0xff] %vm2644_vm0, %v4977_v9 }
 0x5c5   : > { %v4118_v29 = vpop.f32.mrf.mxu1  ;;  %v4864_v24 = vpop.f32.mrf.mxu0 }
 0x5c6   : > { %v4910_v1 = vadd.f32 %v4864_v24, %v4660_v2  ;;  %v4161_v56 = vadd.f32 %v4118_v29, %v8041_v23 }
 0x5c8   : > { %v4946_v18 = vadd.f32 %v8083_v54, %v4910_v1  ;;  %v4412_v40 = vadd.f32 %v4369_v26, %v4161_v56 }
 0x5ca   : > { %v4978_v63 = vmax.f32 %v4946_v18, 0.0  ;;  %v4662_v58 = vadd.f32 %v4619_v28, %v4412_v40  ;;  %v4624_v19 = vpop.f32.mrf.mxu3 }
 0x5cb   : > { %v4377_v16 = vpop.f32.mrf.mxu2 }
 0x5cc   : > { %5010 = vst.msk [vmem:[%s8094_s25 + $0xb8] sm:$0xff] %vm2644_vm0, %v4978_v63 }
 0x5cd   : > { %v4121_v37 = vpop.f32.mrf.mxu1  ;;  %v4867_v49 = vpop.f32.mrf.mxu0 }
 0x5ce   : > { %v4911_v48 = vadd.f32 %v4867_v49, %v4661_v8  ;;  %v4162_v5 = vadd.f32 %v4121_v37, %v8046_v51 }
 0x5d0   : > { %v4947_v60 = vadd.f32 %v8083_v54, %v4911_v48  ;;  %v4413_v55 = vadd.f32 %v4372_v14, %v4162_v5 }
 0x5d2   : > { %v4979_v20 = vmax.f32 %v4947_v60, 0.0  ;;  %v4663_v41 = vadd.f32 %v4622_v17, %v4413_v55  ;;  %v4627_v59 = vpop.f32.mrf.mxu3 }
 0x5d3   : > { %v4379_v35 = vpop.f32.mrf.mxu2 }
 0x5d4   : > { %5011 = vst.msk [vmem:[%s8094_s25 + $0xc0] sm:$0xff] %vm2644_vm0, %v4979_v20 }
 0x5d5   : > { %v4123_v21 = vpop.f32.mrf.mxu1  ;;  %v4869_v34 = vpop.f32.mrf.mxu0 }
 0x5d6   : > { %v4912_v23 = vadd.f32 %v4869_v34, %v4662_v58  ;;  %v4163_v22 = vadd.f32 %v4123_v21, %v8053_v11 }
 0x5d8   : > { %v4948_v38 = vadd.f32 %v8083_v54, %v4912_v23  ;;  %v4414_v0 = vadd.f32 %v4374_v33, %v4163_v22 }
 0x5da   : > { %v4980_v42 = vmax.f32 %v4948_v38, 0.0  ;;  %v4664_v44 = vadd.f32 %v4624_v19, %v4414_v0 }
 0x5db   : > { %v4382_v32 = vpop.f32.mrf.mxu2 }
 0x5dc   : > { %5012 = vst.msk [vmem:[%s8094_s25 + $0xc8] sm:$0xff] %vm2644_vm0, %v4980_v42 }
 0x5dd   : > { %v4126_v43 = vpop.f32.mrf.mxu1  ;;  %v4872_v51 = vpop.f32.mrf.mxu0 }
 0x5de   : > { %v4913_v12 = vadd.f32 %v4872_v51, %v4663_v41  ;;  %v4164_v39 = vadd.f32 %v4126_v43, %v8058_v4  ;;  %v4629_v4 = vpop.f32.mrf.mxu3 }
 0x5e0   : > { %v4949_v53 = vadd.f32 %v8083_v54, %v4913_v12  ;;  %v4415_v27 = vadd.f32 %v4377_v16, %v4164_v39 }
 0x5e2   : > { %v4981_v47 = vmax.f32 %v4949_v53, 0.0  ;;  %v4665_v62 = vadd.f32 %v4627_v59, %v4415_v27 }
 0x5e3   : > { %v4384_v63 = vpop.f32.mrf.mxu2 }
 0x5e4   : > { %5013 = vst.msk [vmem:[%s8094_s25 + $0xd0] sm:$0xff] %vm2644_vm0, %v4981_v47 }
 0x5e5   : > { %v4128_v3 = vpop.f32.mrf.mxu1  ;;  %v4874_v11 = vpop.f32.mrf.mxu0 }
 0x5e6   : > { %v4914_v6 = vadd.f32 %v4874_v11, %v4664_v44  ;;  %v4165_v10 = vadd.f32 %v4128_v3, %v8065_v50  ;;  %v4632_v2 = vpop.f32.mrf.mxu3 }
 0x5e8   : > { %v4950_v61 = vadd.f32 %v8083_v54, %v4914_v6  ;;  %v4416_v36 = vadd.f32 %v4379_v35, %v4165_v10 }
 0x5ea   : > { %v4982_v15 = vmax.f32 %v4950_v61, 0.0  ;;  %v4666_v9 = vadd.f32 %v4629_v4, %v4416_v36 }
 0x5ec   : > { %5014 = vst.msk [vmem:[%s8094_s25 + $0xd8] sm:$0xff] %vm2644_vm0, %v4982_v15 }
 0x5ed   : > { %v4877_v45 = vpop.f32.mrf.mxu0  ;;  %v4131_v31 = vpop.f32.mrf.mxu1 }
 0x5ee   : > { %v4915_v25 = vadd.f32 %v4877_v45, %v4665_v62  ;;  %v4166_v26 = vadd.f32 %v4131_v31, %v8069_v13  ;;  %v4634_v37 = vpop.f32.mrf.mxu3 }
 0x5f0   : > { %v4951_v30 = vadd.f32 %v8083_v54, %v4915_v25  ;;  %v4417_v29 = vadd.f32 %v4382_v32, %v4166_v26 }
 0x5f2   : > { %v4983_v57 = vmax.f32 %v4951_v30, 0.0  ;;  %v4667_v52 = vadd.f32 %v4632_v2, %v4417_v29 }
 0x5f4   : > { %5015 = vst.msk [vmem:[%s8094_s25 + $0xe0] sm:$0xff] %vm2644_vm0, %v4983_v57 }
 0x5f5   : > { %v4879_v46 = vpop.f32.mrf.mxu0  ;;  %v4133_v28 = vpop.f32.mrf.mxu1 }
 0x5f6   : > { %v4916_v50 = vadd.f32 %v4879_v46, %v4666_v9  ;;  %v4167_v18 = vadd.f32 %v4133_v28, %v8075_v7 }
 0x5f8   : > { %v4952_v24 = vadd.f32 %v8083_v54, %v4916_v50  ;;  %v4418_v56 = vadd.f32 %v4384_v63, %v4167_v18 }
 0x5fa   : > { %v4984_v1 = vmax.f32 %v4952_v24, 0.0  ;;  %v4668_v48 = vadd.f32 %v4634_v37, %v4418_v56 }
 0x5fc   : > { %5016 = vst.msk [vmem:[%s8094_s25 + $0xe8] sm:$0xff] %vm2644_vm0, %v4984_v1 }
 0x5fd   : > { %v4882_v13 = vpop.f32.mrf.mxu0 }
 0x5fe   : > { %v4917_v14 = vadd.f32 %v4882_v13, %v4667_v52 }
 0x600   : > { %v4953_v8 = vadd.f32 %v8083_v54, %v4917_v14 }
 0x602   : > { %v4985_v49 = vmax.f32 %v4953_v8, 0.0 }
 0x604   : > { %5017 = vst.msk [vmem:[%s8094_s25 + $0xf0] sm:$0xff] %vm2644_vm0, %v4985_v49 }
 0x605   : > { %v4884_v17 = vpop.f32.mrf.mxu0 }
 0x606   : > { %v4918_v40 = vadd.f32 %v4884_v17, %v4668_v48 }
 0x608   : > { %v4954_v60 = vadd.f32 %v8083_v54, %v4918_v40 }
 0x60a   : > { %v4986_v20 = vmax.f32 %v4954_v60, 0.0 }
 0x60c   : > { %5018 = vst.msk [vmem:[%s8094_s25 + $0xf8] sm:$0xff] %vm2644_vm0, %v4986_v20 }
 0x60d PF: > { %s15_s18 = sadd.s32 1, %s5736_s18  }
 0x60e   : > { %p12_p4 = scmp.ge.s32.totalorder %s15_s18, 4  }
 0x610   :  { %14 = sbr.rel (!%p12_p4) target bundleno = 1 (0x1), region = 90 }

</bundles_post_ra>
